<compile_context>
chip_gen: v7x
topology: tpu7x:2x2x1
jax: 0.10.0
libtpu: 0.0.40
codegen_flags: <defaults>
</compile_context>

<pallas_src>
import functools

import jax
import jax.numpy as jnp
from jax.experimental import pallas as pl
from jax.experimental.pallas import tpu as pltpu


_COMPUTE_DTYPE = jnp.bfloat16      # MXU inputs + stored activations
_VMEM = pl.BlockSpec(memory_space=pltpu.MemorySpace.VMEM)


def _round_up(x, m):
    return (x + m - 1) // m * m


@functools.lru_cache(maxsize=None)
def _tpu_caps():
    """Generation-dependent tiling / scoped-VMEM sizing."""
    vmem = 64 << 20
    try:
        vmem = int(pltpu.get_tpu_info().vmem_capacity_bytes)
    except Exception:
        pass
    if vmem >= (96 << 20):                       # v5e / v6e: 128 MiB VMEM
        return {'row_cap': 1024, 'vmem_limit': 100 << 20}
    return {'row_cap': 512, 'vmem_limit': 48 << 20}   # v7x: 64 MiB VMEM


def _choose_row_tile(m, cap):
    """Pick a row-tile size <= cap; returns (tile, padded_row_count)."""
    if m <= cap:
        return m, m                       # full dim -> exempt from (8,128) rule
    t = cap
    while t >= 8:
        if m % t == 0:
            return t, m
        t //= 2
    return cap, _round_up(m, cap)         # pad rows, slice result afterwards


def _choose_k_tile(k_pad, cap=1024):
    """Largest multiple-of-128 tile <= cap that divides k_pad (k_pad % 128 == 0)."""
    if k_pad <= cap:
        return k_pad
    best = 128
    t = 256
    while t <= cap:
        if k_pad % t == 0:
            best = t
        t += 128
    return best


# ----------------------------- Pallas kernels -------------------------------

def _mm_affine_kernel(x_ref, w_ref, scale_ref, bias_ref, o_ref, acc_ref, *, relu):
    # out = act(sum_k x @ w * scale + bias); K is the innermost grid axis.
    @pl.when(pl.program_id(2) == 0)
    def _init():
        acc_ref[...] = jnp.zeros_like(acc_ref)

    acc_ref[...] += jnp.dot(x_ref[...], w_ref[...],
                            preferred_element_type=jnp.float32)

    @pl.when(pl.program_id(2) == pl.num_programs(2) - 1)
    def _finalize():
        out = acc_ref[...] * scale_ref[...] + bias_ref[...]
        if relu:
            out = jnp.maximum(out, 0.0)
        o_ref[...] = out.astype(o_ref.dtype)


def _mm_affine_skip_kernel(x_ref, w_ref, scale_ref, bias_ref, skip_ref,
                           o_ref, acc_ref):
    # out = relu( relu(sum_k x @ w * scale + bias) + skip )
    # (second_conv of the reference block has its own ReLU before the add)
    @pl.when(pl.program_id(2) == 0)
    def _init():
        acc_ref[...] = jnp.zeros_like(acc_ref)

    acc_ref[...] += jnp.dot(x_ref[...], w_ref[...],
                            preferred_element_type=jnp.float32)

    @pl.when(pl.program_id(2) == pl.num_programs(2) - 1)
    def _finalize():
        out = jnp.maximum(acc_ref[...] * scale_ref[...] + bias_ref[...], 0.0)
        out = jnp.maximum(out + skip_ref[...].astype(jnp.float32), 0.0)
        o_ref[...] = out.astype(o_ref.dtype)


def _pool_fc_kernel(x_ref, w_ref, b_ref, o_ref):
    # x: (N, H*W, C) -> global average pool (f32) -> (N, C) @ (C, Ncls_pad) + b
    pooled = jnp.mean(x_ref[...].astype(jnp.float32), axis=1)
    acc = jnp.dot(pooled.astype(_COMPUTE_DTYPE), w_ref[...],
                  preferred_element_type=jnp.float32)
    o_ref[...] = acc + b_ref[...]


# ------------------------ tiled matmul wrapper -------------------------------

def _tiled_matmul(kernel, x, w, row_vecs, skip, out_dtype):
    """out[M,N] = epilogue(sum_k x[M,K] @ w[K,N]), grid = (M, N, K) tiles.

    x/w are bf16 MXU inputs, row_vecs are (1, N) f32 epilogue vectors, skip
    (optional) is an (M, N) bf16 residual.  K is padded to a multiple of 128,
    tiled last ("arbitrary") and accumulated in an f32 VMEM scratch; the
    epilogue runs only at the final K step.
    """
    caps = _tpu_caps()
    M, K = x.shape
    N = w.shape[1]

    k_pad = _round_up(K, 128)
    if k_pad != K:
        x = jnp.pad(x, ((0, 0), (0, k_pad - K)))
        w = jnp.pad(w, ((0, k_pad - K), (0, 0)))
    tk = _choose_k_tile(k_pad, cap=1024)

    tm, m_pad = _choose_row_tile(M, cap=caps['row_cap'])
    if m_pad != M:
        x = jnp.pad(x, ((0, m_pad - M), (0, 0)))
        if skip is not None:
            skip = jnp.pad(skip, ((0, m_pad - M), (0, 0)))

    # Split Co only when the (i, j) grid would otherwise have a single tile,
    # so both v7x TensorCores get work at small batch; large-M layers keep
    # tn = N to avoid re-reading the patch matrix once per j step.
    tn = 256 if (m_pad // tm == 1 and N >= 512 and N % 256 == 0) else N

    grid = (m_pad // tm, N // tn, k_pad // tk)
    in_specs = [pl.BlockSpec((tm, tk), lambda i, j, k: (i, k)),
                pl.BlockSpec((tk, tn), lambda i, j, k: (k, j))]
    args = [x, w]
    for v in row_vecs:
        in_specs.append(pl.BlockSpec((1, tn), lambda i, j, k: (0, j)))
        args.append(v)
    if skip is not None:
        in_specs.append(pl.BlockSpec((tm, tn), lambda i, j, k: (i, j)))
        args.append(skip)

    out = pl.pallas_call(
        kernel,
        out_shape=jax.ShapeDtypeStruct((m_pad, N), out_dtype),
        grid=grid,
        in_specs=in_specs,
        out_specs=pl.BlockSpec((tm, tn), lambda i, j, k: (i, j)),
        scratch_shapes=[pltpu.VMEM((tm, tn), jnp.float32)],
        compiler_params=pltpu.CompilerParams(
            dimension_semantics=("parallel", "parallel", "arbitrary"),
            vmem_limit_bytes=caps['vmem_limit']),
    )(*args)
    return out[:M] if m_pad != M else out


# ------------------------------ JAX glue ------------------------------------

def _im2col(x, kh, kw, stride, pad):
    """x: NHWC (bf16) -> (N*Ho*Wo, kh*kw*C) patch matrix (glue only)."""
    n, h, w, c = x.shape
    xp = jnp.pad(x, ((0, 0), (pad, pad), (pad, pad), (0, 0)))
    ho = (h + 2 * pad - kh) // stride + 1
    wo = (w + 2 * pad - kw) // stride + 1
    cols = []
    for i in range(kh):
        for j in range(kw):
            cols.append(jax.lax.slice(
                xp, (0, i, j, 0),
                (n, i + stride * (ho - 1) + 1, j + stride * (wo - 1) + 1, c),
                (1, stride, stride, 1)))            # (N, Ho, Wo, C)
    patches = jnp.stack(cols, axis=3)               # (N, Ho, Wo, KH*KW, C)
    return patches.reshape(n * ho * wo, kh * kw * c), ho, wo


def conv_bn_act(x, w_oihw, b, gamma, beta, mean, var, *, stride, pad,
                eps=1e-5, relu=True, skip=None):
    """Conv2d + BatchNorm2d(eval) + ReLU (+ optional residual add + ReLU).

    Activations in/out are bf16; BN folded into an f32 (scale, bias) epilogue.
    """
    n, _, _, ci = x.shape
    co, _, kh, kw = w_oihw.shape
    patches, ho, wo = _im2col(x, kh, kw, stride, pad)
    patches = patches.astype(_COMPUTE_DTYPE)
    w2 = jnp.transpose(w_oihw, (2, 3, 1, 0)).reshape(kh * kw * ci, co)
    w2 = w2.astype(_COMPUTE_DTYPE)

    inv = gamma / jnp.sqrt(var + eps)
    scale = inv.reshape(1, co).astype(jnp.float32)
    bias = (beta + inv * (b - mean)).reshape(1, co).astype(jnp.float32)

    if skip is None:
        kern = functools.partial(_mm_affine_kernel, relu=relu)
        out = _tiled_matmul(kern, patches, w2, (scale, bias), None,
                            _COMPUTE_DTYPE)
    else:
        skip_flat = skip.reshape(n * ho * wo, co).astype(_COMPUTE_DTYPE)
        out = _tiled_matmul(_mm_affine_skip_kernel, patches, w2, (scale, bias),
                            skip_flat, _COMPUTE_DTYPE)
    return out.reshape(n, ho, wo, co)


def maxpool_3x3_s2_p1(x):
    # TODO(synk): intentionally left to XLA as a fused maximum-tree over
    # strided slices (single pass, no 9x HBM window stack) per perf guidance;
    # an in-kernel streaming version needs strided VMEM reads.
    n, h, w, c = x.shape
    neg = float(jnp.finfo(x.dtype).min)
    xp = jnp.pad(x, ((0, 0), (1, 1), (1, 1), (0, 0)), constant_values=neg)
    ho = (h + 2 - 3) // 2 + 1
    wo = (w + 2 - 3) // 2 + 1
    out = None
    for i in range(3):
        for j in range(3):
            win = jax.lax.slice(
                xp, (0, i, j, 0),
                (n, i + 2 * (ho - 1) + 1, j + 2 * (wo - 1) + 1, c),
                (1, 2, 2, 1))
            out = win if out is None else jnp.maximum(out, win)
    return out


def avgpool_fc(x, w, b):
    """AdaptiveAvgPool2d(1) + flatten + Linear fused in one Pallas kernel.

    x: (N, H, W, C) bf16; w: (num_classes, C); b: (num_classes,).
    Logits are computed into a lane-dense 128-padded block and sliced.
    """
    n, h, wsp, c = x.shape
    xr = x.reshape(n, h * wsp, c)
    nc = w.shape[0]
    ncp = _round_up(nc, 128)
    wt = jnp.pad(jnp.transpose(w), ((0, 0), (0, ncp - nc))).astype(_COMPUTE_DTYPE)
    bias = jnp.pad(b, (0, ncp - nc)).reshape(1, ncp).astype(jnp.float32)

    out = pl.pallas_call(
        _pool_fc_kernel,
        out_shape=jax.ShapeDtypeStruct((n, ncp), jnp.float32),
        in_specs=[_VMEM, _VMEM, _VMEM],
        out_specs=_VMEM,
        compiler_params=pltpu.CompilerParams(
            vmem_limit_bytes=_tpu_caps()['vmem_limit']),
    )(xr, wt, bias)
    return out[:, :nc]


# ------------------------------- network ------------------------------------

def resnet_block(x, blk):
    if blk['downsampling']:
        # Reference module's skip_conv is Conv+BN+ReLU (3x3, stride 2, pad 1).
        skip = conv_bn_act(x, blk['skip_w'], blk['skip_b'], *blk['skip_bn'],
                           stride=2, pad=1)
        stride = 2
    else:
        skip = x
        stride = 1
    h = conv_bn_act(x, blk['w1'], blk['b1'], *blk['bn1'], stride=stride, pad=1)
    h = conv_bn_act(h, blk['w2'], blk['b2'], *blk['bn2'], stride=1, pad=1,
                    skip=skip)
    return h


def resnet_forward(x_nchw, params):
    x = jnp.transpose(x_nchw, (0, 2, 3, 1)).astype(_COMPUTE_DTYPE)  # NCHW->NHWC
    # front: conv(7x7, s2, p3) + BN + ReLU -> maxpool(3, s2, p1)
    pf = params['front']
    x = conv_bn_act(x, pf['w'], pf['b'], *pf['bn'], stride=2, pad=3)
    x = maxpool_3x3_s2_p1(x)
    # middle (layer1..layer4, 2 blocks each)
    for layer in params['middle']:
        for blk in layer:
            x = resnet_block(x, blk)
    # back: adaptive avg pool to 1x1, flatten, fc(512 -> num_classes)
    pfc = params['fc']
    logits = avgpool_fc(x, pfc['w'], pfc['b'])
    return logits                                        # (N, num_classes) f32


# --------------------------- parameter init ---------------------------------

def init_params(key, num_classes=10):
    keys = iter(jax.random.split(key, 32))

    def conv_w(co, ci, kh, kw):
        return jax.random.normal(next(keys), (co, ci, kh, kw), jnp.float32) * 0.05

    def bn(c):  # (gamma, beta, running_mean, running_var) — PyTorch defaults
        return (jnp.ones((c,), jnp.float32), jnp.zeros((c,), jnp.float32),
                jnp.zeros((c,), jnp.float32), jnp.ones((c,), jnp.float32))

    params = {'front': dict(w=conv_w(64, 3, 7, 7),
                            b=jnp.zeros((64,), jnp.float32), bn=bn(64))}

    middle = []
    for cin, cout, down in [(64, 64, False), (64, 128, True),
                            (128, 256, True), (256, 512, True)]:
        blk1 = dict(downsampling=down,
                    w1=conv_w(cout, cin, 3, 3), b1=jnp.zeros((cout,), jnp.float32),
                    bn1=bn(cout),
                    w2=conv_w(cout, cout, 3, 3), b2=jnp.zeros((cout,), jnp.float32),
                    bn2=bn(cout))
        if down:
            blk1['skip_w'] = conv_w(cout, cin, 3, 3)
            blk1['skip_b'] = jnp.zeros((cout,), jnp.float32)
            blk1['skip_bn'] = bn(cout)
        blk2 = dict(downsampling=False,
                    w1=conv_w(cout, cout, 3, 3), b1=jnp.zeros((cout,), jnp.float32),
                    bn1=bn(cout),
                    w2=conv_w(cout, cout, 3, 3), b2=jnp.zeros((cout,), jnp.float32),
                    bn2=bn(cout))
        middle.append([blk1, blk2])
    params['middle'] = middle

    params['fc'] = dict(
        w=jax.random.normal(next(keys), (num_classes, 512), jnp.float32) * 0.05,
        b=jnp.zeros((num_classes,), jnp.float32))
    return params


# ------------------------------- main ----------------------------------------

if __name__ == "__main__":
    key = jax.random.PRNGKey(0)
    pkey, xkey = jax.random.split(key)
    params = init_params(pkey)

    # small input consistent with the module: NCHW, 3 channels (first conv is 3->64)
    x = jax.random.normal(xkey, (2, 3, 32, 32), jnp.float32)

    fwd = jax.jit(lambda inp: resnet_forward(inp, params))
    out = fwd(x)
    jax.block_until_ready(out)

    assert out.shape == (2, 10) and out.dtype == jnp.float32
    print("KERNEL_OK")
</pallas_src>

<mosaic_0001>
module attributes {stable_mosaic.version = 11 : i64} {
  func.func @_mm_affine_kernel(%arg0: i32, %arg1: i32, %arg2: i32, %arg3: memref<512x256xbf16, #tpu.memory_space<vmem>>, %arg4: memref<256x64xbf16, #tpu.memory_space<vmem>>, %arg5: memref<1x64xf32, #tpu.memory_space<vmem>>, %arg6: memref<1x64xf32, #tpu.memory_space<vmem>>, %arg7: memref<512x64xbf16, #tpu.memory_space<vmem>>, %arg8: memref<512x64xf32, #tpu.memory_space<vmem>>) attributes {dimension_semantics = [#tpu.dimension_semantics<parallel>, #tpu.dimension_semantics<parallel>, #tpu.dimension_semantics<arbitrary>], iteration_bounds = array<i64: 1, 1, 1>, scalar_prefetch = 0 : i64, scratch_operands = 1 : i64, tpu.core_type = #tpu.core_type<tc>, window_params = [{transform_indices = @transform_0, window_bounds = array<i64: 512, 256>}, {transform_indices = @transform_1, window_bounds = array<i64: 256, 64>}, {transform_indices = @transform_2, window_bounds = array<i64: 1, 64>}, {transform_indices = @transform_3, window_bounds = array<i64: 1, 64>}, {transform_indices = @transform_4, window_bounds = array<i64: 512, 64>}]} {
    %c0_i32 = arith.constant 0 : i32
    %0 = arith.cmpi eq, %arg2, %c0_i32 : i32
    %1 = arith.extui %0 : i1 to i32
    %c0_i32_0 = arith.constant 0 : i32
    %2 = arith.cmpi ne, %1, %c0_i32_0 : i32
    scf.if %2 {
      %cst_10 = arith.constant 0.000000e+00 : f32
      %12 = vector.broadcast %cst_10 : f32 to vector<512x64xf32>
      %c0_11 = arith.constant 0 : index
      %c0_12 = arith.constant 0 : index
      %13 = vector.load %arg8[%c0_11, %c0_12] : memref<512x64xf32, #tpu.memory_space<vmem>>, vector<512x64xf32>
      tpu.vector_store %arg8[%c0_11, %c0_12], %12 {strides = array<i32>} : memref<512x64xf32, #tpu.memory_space<vmem>>, vector<512x64xf32>,
    } else {
    }
    %c0 = arith.constant 0 : index
    %c0_1 = arith.constant 0 : index
    %3 = vector.load %arg8[%c0, %c0_1] : memref<512x64xf32, #tpu.memory_space<vmem>>, vector<512x64xf32>
    %c0_2 = arith.constant 0 : index
    %c0_3 = arith.constant 0 : index
    %4 = vector.load %arg3[%c0_2, %c0_3] : memref<512x256xbf16, #tpu.memory_space<vmem>>, vector<512x256xbf16>
    %c0_4 = arith.constant 0 : index
    %c0_5 = arith.constant 0 : index
    %5 = vector.load %arg4[%c0_4, %c0_5] : memref<256x64xbf16, #tpu.memory_space<vmem>>, vector<256x64xbf16>
    %cst = arith.constant dense<0.000000e+00> : vector<512x64xf32>
    %6 = tpu.matmul %4, %5, %cst {dimension_numbers = #tpu.dot_dimension_numbers<[1], [0], [0], [1], [0, 0, 1, 1], [], []>} : vector<512x256xbf16>, vector<256x64xbf16>, vector<512x64xf32> -> vector<512x64xf32>
    %7 = arith.addf %3, %6 : vector<512x64xf32>
    %c0_6 = arith.constant 0 : index
    %c0_7 = arith.constant 0 : index
    %8 = vector.load %arg8[%c0_6, %c0_7] : memref<512x64xf32, #tpu.memory_space<vmem>>, vector<512x64xf32>
    tpu.vector_store %arg8[%c0_6, %c0_7], %7 {strides = array<i32>} : memref<512x64xf32, #tpu.memory_space<vmem>>, vector<512x64xf32>,
    %c0_i32_8 = arith.constant 0 : i32
    %9 = arith.cmpi eq, %arg2, %c0_i32_8 : i32
    %10 = arith.extui %9 : i1 to i32
    %c0_i32_9 = arith.constant 0 : i32
    %11 = arith.cmpi ne, %10, %c0_i32_9 : i32
    scf.if %11 {
      %c0_10 = arith.constant 0 : index
      %c0_11 = arith.constant 0 : index
      %12 = vector.load %arg8[%c0_10, %c0_11] : memref<512x64xf32, #tpu.memory_space<vmem>>, vector<512x64xf32>
      %c0_12 = arith.constant 0 : index
      %c0_13 = arith.constant 0 : index
      %13 = vector.load %arg5[%c0_12, %c0_13] : memref<1x64xf32, #tpu.memory_space<vmem>>, vector<1x64xf32>
      %14 = vector.broadcast %13 : vector<1x64xf32> to vector<512x64xf32>
      %15 = arith.mulf %12, %14 : vector<512x64xf32>
      %c0_14 = arith.constant 0 : index
      %c0_15 = arith.constant 0 : index
      %16 = vector.load %arg6[%c0_14, %c0_15] : memref<1x64xf32, #tpu.memory_space<vmem>>, vector<1x64xf32>
      %17 = vector.broadcast %16 : vector<1x64xf32> to vector<512x64xf32>
      %18 = arith.addf %15, %17 : vector<512x64xf32>
      %cst_16 = arith.constant 0.000000e+00 : f32
      %19 = vector.broadcast %cst_16 : f32 to vector<512x64xf32>
      %20 = arith.maximumf %18, %19 : vector<512x64xf32>
      %21 = arith.truncf %20 : vector<512x64xf32> to vector<512x64xbf16>
      %c0_17 = arith.constant 0 : index
      %c0_18 = arith.constant 0 : index
      %22 = vector.load %arg7[%c0_17, %c0_18] : memref<512x64xbf16, #tpu.memory_space<vmem>>, vector<512x64xbf16>
      tpu.vector_store %arg7[%c0_17, %c0_18], %21 {strides = array<i32>} : memref<512x64xbf16, #tpu.memory_space<vmem>>, vector<512x64xbf16>,
    } else {
    }
    return
  }
  func.func @transform_0(%arg0: i32, %arg1: i32, %arg2: i32) -> (i32, i32) {
    %c0_i32 = arith.constant 0 : i32
    return %arg0, %arg2 : i32, i32
  }
  func.func @transform_1(%arg0: i32, %arg1: i32, %arg2: i32) -> (i32, i32) {
    %c0_i32 = arith.constant 0 : i32
    return %arg2, %arg1 : i32, i32
  }
  func.func @transform_2(%arg0: i32, %arg1: i32, %arg2: i32) -> (i32, i32) {
    %c0_i32 = arith.constant 0 : i32
    %c0_i32_0 = arith.constant 0 : i32
    return %c0_i32, %arg1 : i32, i32
  }
  func.func @transform_3(%arg0: i32, %arg1: i32, %arg2: i32) -> (i32, i32) {
    %c0_i32 = arith.constant 0 : i32
    %c0_i32_0 = arith.constant 0 : i32
    return %c0_i32, %arg1 : i32, i32
  }
  func.func @transform_4(%arg0: i32, %arg1: i32, %arg2: i32) -> (i32, i32) {
    %c0_i32 = arith.constant 0 : i32
    return %arg0, %arg1 : i32, i32
  }
}

module attributes {stable_mosaic.version = 11 : i64} {
  func.func @_mm_affine_kernel(%arg0: i32, %arg1: i32, %arg2: i32, %arg3: memref<128x640xbf16, #tpu.memory_space<vmem>>, %arg4: memref<640x64xbf16, #tpu.memory_space<vmem>>, %arg5: memref<1x64xf32, #tpu.memory_space<vmem>>, %arg6: memref<1x64xf32, #tpu.memory_space<vmem>>, %arg7: memref<128x64xbf16, #tpu.memory_space<vmem>>, %arg8: memref<128x64xf32, #tpu.memory_space<vmem>>) attributes {dimension_semantics = [#tpu.dimension_semantics<parallel>, #tpu.dimension_semantics<parallel>, #tpu.dimension_semantics<arbitrary>], iteration_bounds = array<i64: 1, 1, 1>, scalar_prefetch = 0 : i64, scratch_operands = 1 : i64, tpu.core_type = #tpu.core_type<tc>, window_params = [{transform_indices = @transform_0, window_bounds = array<i64: 128, 640>}, {transform_indices = @transform_1, window_bounds = array<i64: 640, 64>}, {transform_indices = @transform_2, window_bounds = array<i64: 1, 64>}, {transform_indices = @transform_3, window_bounds = array<i64: 1, 64>}, {transform_indices = @transform_4, window_bounds = array<i64: 128, 64>}]} {
    %c0_i32 = arith.constant 0 : i32
    %0 = arith.cmpi eq, %arg2, %c0_i32 : i32
    %1 = arith.extui %0 : i1 to i32
    %c0_i32_0 = arith.constant 0 : i32
    %2 = arith.cmpi ne, %1, %c0_i32_0 : i32
    scf.if %2 {
      %cst_10 = arith.constant 0.000000e+00 : f32
      %12 = vector.broadcast %cst_10 : f32 to vector<128x64xf32>
      %c0_11 = arith.constant 0 : index
      %c0_12 = arith.constant 0 : index
      %13 = vector.load %arg8[%c0_11, %c0_12] : memref<128x64xf32, #tpu.memory_space<vmem>>, vector<128x64xf32>
      tpu.vector_store %arg8[%c0_11, %c0_12], %12 {strides = array<i32>} : memref<128x64xf32, #tpu.memory_space<vmem>>, vector<128x64xf32>,
    } else {
    }
    %c0 = arith.constant 0 : index
    %c0_1 = arith.constant 0 : index
    %3 = vector.load %arg8[%c0, %c0_1] : memref<128x64xf32, #tpu.memory_space<vmem>>, vector<128x64xf32>
    %c0_2 = arith.constant 0 : index
    %c0_3 = arith.constant 0 : index
    %4 = vector.load %arg3[%c0_2, %c0_3] : memref<128x640xbf16, #tpu.memory_space<vmem>>, vector<128x640xbf16>
    %c0_4 = arith.constant 0 : index
    %c0_5 = arith.constant 0 : index
    %5 = vector.load %arg4[%c0_4, %c0_5] : memref<640x64xbf16, #tpu.memory_space<vmem>>, vector<640x64xbf16>
    %cst = arith.constant dense<0.000000e+00> : vector<128x64xf32>
    %6 = tpu.matmul %4, %5, %cst {dimension_numbers = #tpu.dot_dimension_numbers<[1], [0], [0], [1], [0, 0, 1, 1], [], []>} : vector<128x640xbf16>, vector<640x64xbf16>, vector<128x64xf32> -> vector<128x64xf32>
    %7 = arith.addf %3, %6 : vector<128x64xf32>
    %c0_6 = arith.constant 0 : index
    %c0_7 = arith.constant 0 : index
    %8 = vector.load %arg8[%c0_6, %c0_7] : memref<128x64xf32, #tpu.memory_space<vmem>>, vector<128x64xf32>
    tpu.vector_store %arg8[%c0_6, %c0_7], %7 {strides = array<i32>} : memref<128x64xf32, #tpu.memory_space<vmem>>, vector<128x64xf32>,
    %c0_i32_8 = arith.constant 0 : i32
    %9 = arith.cmpi eq, %arg2, %c0_i32_8 : i32
    %10 = arith.extui %9 : i1 to i32
    %c0_i32_9 = arith.constant 0 : i32
    %11 = arith.cmpi ne, %10, %c0_i32_9 : i32
    scf.if %11 {
      %c0_10 = arith.constant 0 : index
      %c0_11 = arith.constant 0 : index
      %12 = vector.load %arg8[%c0_10, %c0_11] : memref<128x64xf32, #tpu.memory_space<vmem>>, vector<128x64xf32>
      %c0_12 = arith.constant 0 : index
      %c0_13 = arith.constant 0 : index
      %13 = vector.load %arg5[%c0_12, %c0_13] : memref<1x64xf32, #tpu.memory_space<vmem>>, vector<1x64xf32>
      %14 = vector.broadcast %13 : vector<1x64xf32> to vector<128x64xf32>
      %15 = arith.mulf %12, %14 : vector<128x64xf32>
      %c0_14 = arith.constant 0 : index
      %c0_15 = arith.constant 0 : index
      %16 = vector.load %arg6[%c0_14, %c0_15] : memref<1x64xf32, #tpu.memory_space<vmem>>, vector<1x64xf32>
      %17 = vector.broadcast %16 : vector<1x64xf32> to vector<128x64xf32>
      %18 = arith.addf %15, %17 : vector<128x64xf32>
      %cst_16 = arith.constant 0.000000e+00 : f32
      %19 = vector.broadcast %cst_16 : f32 to vector<128x64xf32>
      %20 = arith.maximumf %18, %19 : vector<128x64xf32>
      %21 = arith.truncf %20 : vector<128x64xf32> to vector<128x64xbf16>
      %c0_17 = arith.constant 0 : index
      %c0_18 = arith.constant 0 : index
      %22 = vector.load %arg7[%c0_17, %c0_18] : memref<128x64xbf16, #tpu.memory_space<vmem>>, vector<128x64xbf16>
      tpu.vector_store %arg7[%c0_17, %c0_18], %21 {strides = array<i32>} : memref<128x64xbf16, #tpu.memory_space<vmem>>, vector<128x64xbf16>,
    } else {
    }
    return
  }
  func.func @transform_0(%arg0: i32, %arg1: i32, %arg2: i32) -> (i32, i32) {
    %c0_i32 = arith.constant 0 : i32
    return %arg0, %arg2 : i32, i32
  }
  func.func @transform_1(%arg0: i32, %arg1: i32, %arg2: i32) -> (i32, i32) {
    %c0_i32 = arith.constant 0 : i32
    return %arg2, %arg1 : i32, i32
  }
  func.func @transform_2(%arg0: i32, %arg1: i32, %arg2: i32) -> (i32, i32) {
    %c0_i32 = arith.constant 0 : i32
    %c0_i32_0 = arith.constant 0 : i32
    return %c0_i32, %arg1 : i32, i32
  }
  func.func @transform_3(%arg0: i32, %arg1: i32, %arg2: i32) -> (i32, i32) {
    %c0_i32 = arith.constant 0 : i32
    %c0_i32_0 = arith.constant 0 : i32
    return %c0_i32, %arg1 : i32, i32
  }
  func.func @transform_4(%arg0: i32, %arg1: i32, %arg2: i32) -> (i32, i32) {
    %c0_i32 = arith.constant 0 : i32
    return %arg0, %arg1 : i32, i32
  }
}

module attributes {stable_mosaic.version = 11 : i64} {
  func.func @_mm_affine_skip_kernel(%arg0: i32, %arg1: i32, %arg2: i32, %arg3: memref<128x640xbf16, #tpu.memory_space<vmem>>, %arg4: memref<640x64xbf16, #tpu.memory_space<vmem>>, %arg5: memref<1x64xf32, #tpu.memory_space<vmem>>, %arg6: memref<1x64xf32, #tpu.memory_space<vmem>>, %arg7: memref<128x64xbf16, #tpu.memory_space<vmem>>, %arg8: memref<128x64xbf16, #tpu.memory_space<vmem>>, %arg9: memref<128x64xf32, #tpu.memory_space<vmem>>) attributes {dimension_semantics = [#tpu.dimension_semantics<parallel>, #tpu.dimension_semantics<parallel>, #tpu.dimension_semantics<arbitrary>], iteration_bounds = array<i64: 1, 1, 1>, scalar_prefetch = 0 : i64, scratch_operands = 1 : i64, tpu.core_type = #tpu.core_type<tc>, window_params = [{transform_indices = @transform_0, window_bounds = array<i64: 128, 640>}, {transform_indices = @transform_1, window_bounds = array<i64: 640, 64>}, {transform_indices = @transform_2, window_bounds = array<i64: 1, 64>}, {transform_indices = @transform_3, window_bounds = array<i64: 1, 64>}, {transform_indices = @transform_4, window_bounds = array<i64: 128, 64>}, {transform_indices = @transform_5, window_bounds = array<i64: 128, 64>}]} {
    %c0_i32 = arith.constant 0 : i32
    %0 = arith.cmpi eq, %arg2, %c0_i32 : i32
    %1 = arith.extui %0 : i1 to i32
    %c0_i32_0 = arith.constant 0 : i32
    %2 = arith.cmpi ne, %1, %c0_i32_0 : i32
    scf.if %2 {
      %cst_10 = arith.constant 0.000000e+00 : f32
      %12 = vector.broadcast %cst_10 : f32 to vector<128x64xf32>
      %c0_11 = arith.constant 0 : index
      %c0_12 = arith.constant 0 : index
      %13 = vector.load %arg9[%c0_11, %c0_12] : memref<128x64xf32, #tpu.memory_space<vmem>>, vector<128x64xf32>
      tpu.vector_store %arg9[%c0_11, %c0_12], %12 {strides = array<i32>} : memref<128x64xf32, #tpu.memory_space<vmem>>, vector<128x64xf32>,
    } else {
    }
    %c0 = arith.constant 0 : index
    %c0_1 = arith.constant 0 : index
    %3 = vector.load %arg9[%c0, %c0_1] : memref<128x64xf32, #tpu.memory_space<vmem>>, vector<128x64xf32>
    %c0_2 = arith.constant 0 : index
    %c0_3 = arith.constant 0 : index
    %4 = vector.load %arg3[%c0_2, %c0_3] : memref<128x640xbf16, #tpu.memory_space<vmem>>, vector<128x640xbf16>
    %c0_4 = arith.constant 0 : index
    %c0_5 = arith.constant 0 : index
    %5 = vector.load %arg4[%c0_4, %c0_5] : memref<640x64xbf16, #tpu.memory_space<vmem>>, vector<640x64xbf16>
    %cst = arith.constant dense<0.000000e+00> : vector<128x64xf32>
    %6 = tpu.matmul %4, %5, %cst {dimension_numbers = #tpu.dot_dimension_numbers<[1], [0], [0], [1], [0, 0, 1, 1], [], []>} : vector<128x640xbf16>, vector<640x64xbf16>, vector<128x64xf32> -> vector<128x64xf32>
    %7 = arith.addf %3, %6 : vector<128x64xf32>
    %c0_6 = arith.constant 0 : index
    %c0_7 = arith.constant 0 : index
    %8 = vector.load %arg9[%c0_6, %c0_7] : memref<128x64xf32, #tpu.memory_space<vmem>>, vector<128x64xf32>
    tpu.vector_store %arg9[%c0_6, %c0_7], %7 {strides = array<i32>} : memref<128x64xf32, #tpu.memory_space<vmem>>, vector<128x64xf32>,
    %c0_i32_8 = arith.constant 0 : i32
    %9 = arith.cmpi eq, %arg2, %c0_i32_8 : i32
    %10 = arith.extui %9 : i1 to i32
    %c0_i32_9 = arith.constant 0 : i32
    %11 = arith.cmpi ne, %10, %c0_i32_9 : i32
    scf.if %11 {
      %c0_10 = arith.constant 0 : index
      %c0_11 = arith.constant 0 : index
      %12 = vector.load %arg9[%c0_10, %c0_11] : memref<128x64xf32, #tpu.memory_space<vmem>>, vector<128x64xf32>
      %c0_12 = arith.constant 0 : index
      %c0_13 = arith.constant 0 : index
      %13 = vector.load %arg5[%c0_12, %c0_13] : memref<1x64xf32, #tpu.memory_space<vmem>>, vector<1x64xf32>
      %14 = vector.broadcast %13 : vector<1x64xf32> to vector<128x64xf32>
      %15 = arith.mulf %12, %14 : vector<128x64xf32>
      %c0_14 = arith.constant 0 : index
      %c0_15 = arith.constant 0 : index
      %16 = vector.load %arg6[%c0_14, %c0_15] : memref<1x64xf32, #tpu.memory_space<vmem>>, vector<1x64xf32>
      %17 = vector.broadcast %16 : vector<1x64xf32> to vector<128x64xf32>
      %18 = arith.addf %15, %17 : vector<128x64xf32>
      %cst_16 = arith.constant 0.000000e+00 : f32
      %19 = vector.broadcast %cst_16 : f32 to vector<128x64xf32>
      %20 = arith.maximumf %18, %19 : vector<128x64xf32>
      %c0_17 = arith.constant 0 : index
      %c0_18 = arith.constant 0 : index
      %21 = vector.load %arg7[%c0_17, %c0_18] : memref<128x64xbf16, #tpu.memory_space<vmem>>, vector<128x64xbf16>
      %22 = arith.extf %21 : vector<128x64xbf16> to vector<128x64xf32>
      %23 = arith.addf %20, %22 : vector<128x64xf32>
      %cst_19 = arith.constant 0.000000e+00 : f32
      %24 = vector.broadcast %cst_19 : f32 to vector<128x64xf32>
      %25 = arith.maximumf %23, %24 : vector<128x64xf32>
      %26 = arith.truncf %25 : vector<128x64xf32> to vector<128x64xbf16>
      %c0_20 = arith.constant 0 : index
      %c0_21 = arith.constant 0 : index
      %27 = vector.load %arg8[%c0_20, %c0_21] : memref<128x64xbf16, #tpu.memory_space<vmem>>, vector<128x64xbf16>
      tpu.vector_store %arg8[%c0_20, %c0_21], %26 {strides = array<i32>} : memref<128x64xbf16, #tpu.memory_space<vmem>>, vector<128x64xbf16>,
    } else {
    }
    return
  }
  func.func @transform_0(%arg0: i32, %arg1: i32, %arg2: i32) -> (i32, i32) {
    %c0_i32 = arith.constant 0 : i32
    return %arg0, %arg2 : i32, i32
  }
  func.func @transform_1(%arg0: i32, %arg1: i32, %arg2: i32) -> (i32, i32) {
    %c0_i32 = arith.constant 0 : i32
    return %arg2, %arg1 : i32, i32
  }
  func.func @transform_2(%arg0: i32, %arg1: i32, %arg2: i32) -> (i32, i32) {
    %c0_i32 = arith.constant 0 : i32
    %c0_i32_0 = arith.constant 0 : i32
    return %c0_i32, %arg1 : i32, i32
  }
  func.func @transform_3(%arg0: i32, %arg1: i32, %arg2: i32) -> (i32, i32) {
    %c0_i32 = arith.constant 0 : i32
    %c0_i32_0 = arith.constant 0 : i32
    return %c0_i32, %arg1 : i32, i32
  }
  func.func @transform_4(%arg0: i32, %arg1: i32, %arg2: i32) -> (i32, i32) {
    %c0_i32 = arith.constant 0 : i32
    return %arg0, %arg1 : i32, i32
  }
  func.func @transform_5(%arg0: i32, %arg1: i32, %arg2: i32) -> (i32, i32) {
    %c0_i32 = arith.constant 0 : i32
    return %arg0, %arg1 : i32, i32
  }
}

module attributes {stable_mosaic.version = 11 : i64} {
  func.func @_mm_affine_kernel(%arg0: i32, %arg1: i32, %arg2: i32, %arg3: memref<32x640xbf16, #tpu.memory_space<vmem>>, %arg4: memref<640x128xbf16, #tpu.memory_space<vmem>>, %arg5: memref<1x128xf32, #tpu.memory_space<vmem>>, %arg6: memref<1x128xf32, #tpu.memory_space<vmem>>, %arg7: memref<32x128xbf16, #tpu.memory_space<vmem>>, %arg8: memref<32x128xf32, #tpu.memory_space<vmem>>) attributes {dimension_semantics = [#tpu.dimension_semantics<parallel>, #tpu.dimension_semantics<parallel>, #tpu.dimension_semantics<arbitrary>], iteration_bounds = array<i64: 1, 1, 1>, scalar_prefetch = 0 : i64, scratch_operands = 1 : i64, tpu.core_type = #tpu.core_type<tc>, window_params = [{transform_indices = @transform_0, window_bounds = array<i64: 32, 640>}, {transform_indices = @transform_1, window_bounds = array<i64: 640, 128>}, {transform_indices = @transform_2, window_bounds = array<i64: 1, 128>}, {transform_indices = @transform_3, window_bounds = array<i64: 1, 128>}, {transform_indices = @transform_4, window_bounds = array<i64: 32, 128>}]} {
    %c0_i32 = arith.constant 0 : i32
    %0 = arith.cmpi eq, %arg2, %c0_i32 : i32
    %1 = arith.extui %0 : i1 to i32
    %c0_i32_0 = arith.constant 0 : i32
    %2 = arith.cmpi ne, %1, %c0_i32_0 : i32
    scf.if %2 {
      %cst_10 = arith.constant 0.000000e+00 : f32
      %12 = vector.broadcast %cst_10 : f32 to vector<32x128xf32>
      %c0_11 = arith.constant 0 : index
      %c0_12 = arith.constant 0 : index
      %13 = vector.load %arg8[%c0_11, %c0_12] : memref<32x128xf32, #tpu.memory_space<vmem>>, vector<32x128xf32>
      tpu.vector_store %arg8[%c0_11, %c0_12], %12 {strides = array<i32>} : memref<32x128xf32, #tpu.memory_space<vmem>>, vector<32x128xf32>,
    } else {
    }
    %c0 = arith.constant 0 : index
    %c0_1 = arith.constant 0 : index
    %3 = vector.load %arg8[%c0, %c0_1] : memref<32x128xf32, #tpu.memory_space<vmem>>, vector<32x128xf32>
    %c0_2 = arith.constant 0 : index
    %c0_3 = arith.constant 0 : index
    %4 = vector.load %arg3[%c0_2, %c0_3] : memref<32x640xbf16, #tpu.memory_space<vmem>>, vector<32x640xbf16>
    %c0_4 = arith.constant 0 : index
    %c0_5 = arith.constant 0 : index
    %5 = vector.load %arg4[%c0_4, %c0_5] : memref<640x128xbf16, #tpu.memory_space<vmem>>, vector<640x128xbf16>
    %cst = arith.constant dense<0.000000e+00> : vector<32x128xf32>
    %6 = tpu.matmul %4, %5, %cst {dimension_numbers = #tpu.dot_dimension_numbers<[1], [0], [0], [1], [0, 0, 1, 1], [], []>} : vector<32x640xbf16>, vector<640x128xbf16>, vector<32x128xf32> -> vector<32x128xf32>
    %7 = arith.addf %3, %6 : vector<32x128xf32>
    %c0_6 = arith.constant 0 : index
    %c0_7 = arith.constant 0 : index
    %8 = vector.load %arg8[%c0_6, %c0_7] : memref<32x128xf32, #tpu.memory_space<vmem>>, vector<32x128xf32>
    tpu.vector_store %arg8[%c0_6, %c0_7], %7 {strides = array<i32>} : memref<32x128xf32, #tpu.memory_space<vmem>>, vector<32x128xf32>,
    %c0_i32_8 = arith.constant 0 : i32
    %9 = arith.cmpi eq, %arg2, %c0_i32_8 : i32
    %10 = arith.extui %9 : i1 to i32
    %c0_i32_9 = arith.constant 0 : i32
    %11 = arith.cmpi ne, %10, %c0_i32_9 : i32
    scf.if %11 {
      %c0_10 = arith.constant 0 : index
      %c0_11 = arith.constant 0 : index
      %12 = vector.load %arg8[%c0_10, %c0_11] : memref<32x128xf32, #tpu.memory_space<vmem>>, vector<32x128xf32>
      %c0_12 = arith.constant 0 : index
      %c0_13 = arith.constant 0 : index
      %13 = vector.load %arg5[%c0_12, %c0_13] : memref<1x128xf32, #tpu.memory_space<vmem>>, vector<1x128xf32>
      %14 = vector.broadcast %13 : vector<1x128xf32> to vector<32x128xf32>
      %15 = arith.mulf %12, %14 : vector<32x128xf32>
      %c0_14 = arith.constant 0 : index
      %c0_15 = arith.constant 0 : index
      %16 = vector.load %arg6[%c0_14, %c0_15] : memref<1x128xf32, #tpu.memory_space<vmem>>, vector<1x128xf32>
      %17 = vector.broadcast %16 : vector<1x128xf32> to vector<32x128xf32>
      %18 = arith.addf %15, %17 : vector<32x128xf32>
      %cst_16 = arith.constant 0.000000e+00 : f32
      %19 = vector.broadcast %cst_16 : f32 to vector<32x128xf32>
      %20 = arith.maximumf %18, %19 : vector<32x128xf32>
      %21 = arith.truncf %20 : vector<32x128xf32> to vector<32x128xbf16>
      %c0_17 = arith.constant 0 : index
      %c0_18 = arith.constant 0 : index
      %22 = vector.load %arg7[%c0_17, %c0_18] : memref<32x128xbf16, #tpu.memory_space<vmem>>, vector<32x128xbf16>
      tpu.vector_store %arg7[%c0_17, %c0_18], %21 {strides = array<i32>} : memref<32x128xbf16, #tpu.memory_space<vmem>>, vector<32x128xbf16>,
    } else {
    }
    return
  }
  func.func @transform_0(%arg0: i32, %arg1: i32, %arg2: i32) -> (i32, i32) {
    %c0_i32 = arith.constant 0 : i32
    return %arg0, %arg2 : i32, i32
  }
  func.func @transform_1(%arg0: i32, %arg1: i32, %arg2: i32) -> (i32, i32) {
    %c0_i32 = arith.constant 0 : i32
    return %arg2, %arg1 : i32, i32
  }
  func.func @transform_2(%arg0: i32, %arg1: i32, %arg2: i32) -> (i32, i32) {
    %c0_i32 = arith.constant 0 : i32
    %c0_i32_0 = arith.constant 0 : i32
    return %c0_i32, %arg1 : i32, i32
  }
  func.func @transform_3(%arg0: i32, %arg1: i32, %arg2: i32) -> (i32, i32) {
    %c0_i32 = arith.constant 0 : i32
    %c0_i32_0 = arith.constant 0 : i32
    return %c0_i32, %arg1 : i32, i32
  }
  func.func @transform_4(%arg0: i32, %arg1: i32, %arg2: i32) -> (i32, i32) {
    %c0_i32 = arith.constant 0 : i32
    return %arg0, %arg1 : i32, i32
  }
}

module attributes {stable_mosaic.version = 11 : i64} {
  func.func @_mm_affine_skip_kernel(%arg0: i32, %arg1: i32, %arg2: i32, %arg3: memref<32x384xbf16, #tpu.memory_space<vmem>>, %arg4: memref<384x128xbf16, #tpu.memory_space<vmem>>, %arg5: memref<1x128xf32, #tpu.memory_space<vmem>>, %arg6: memref<1x128xf32, #tpu.memory_space<vmem>>, %arg7: memref<32x128xbf16, #tpu.memory_space<vmem>>, %arg8: memref<32x128xbf16, #tpu.memory_space<vmem>>, %arg9: memref<32x128xf32, #tpu.memory_space<vmem>>) attributes {dimension_semantics = [#tpu.dimension_semantics<parallel>, #tpu.dimension_semantics<parallel>, #tpu.dimension_semantics<arbitrary>], iteration_bounds = array<i64: 1, 1, 3>, scalar_prefetch = 0 : i64, scratch_operands = 1 : i64, tpu.core_type = #tpu.core_type<tc>, window_params = [{transform_indices = @transform_0, window_bounds = array<i64: 32, 384>}, {transform_indices = @transform_1, window_bounds = array<i64: 384, 128>}, {transform_indices = @transform_2, window_bounds = array<i64: 1, 128>}, {transform_indices = @transform_3, window_bounds = array<i64: 1, 128>}, {transform_indices = @transform_4, window_bounds = array<i64: 32, 128>}, {transform_indices = @transform_5, window_bounds = array<i64: 32, 128>}]} {
    %c0_i32 = arith.constant 0 : i32
    %0 = arith.cmpi eq, %arg2, %c0_i32 : i32
    %1 = arith.extui %0 : i1 to i32
    %c0_i32_0 = arith.constant 0 : i32
    %2 = arith.cmpi ne, %1, %c0_i32_0 : i32
    scf.if %2 {
      %cst_9 = arith.constant 0.000000e+00 : f32
      %12 = vector.broadcast %cst_9 : f32 to vector<32x128xf32>
      %c0_10 = arith.constant 0 : index
      %c0_11 = arith.constant 0 : index
      %13 = vector.load %arg9[%c0_10, %c0_11] : memref<32x128xf32, #tpu.memory_space<vmem>>, vector<32x128xf32>
      tpu.vector_store %arg9[%c0_10, %c0_11], %12 {strides = array<i32>} : memref<32x128xf32, #tpu.memory_space<vmem>>, vector<32x128xf32>,
    } else {
    }
    %c0 = arith.constant 0 : index
    %c0_1 = arith.constant 0 : index
    %3 = vector.load %arg9[%c0, %c0_1] : memref<32x128xf32, #tpu.memory_space<vmem>>, vector<32x128xf32>
    %c0_2 = arith.constant 0 : index
    %c0_3 = arith.constant 0 : index
    %4 = vector.load %arg3[%c0_2, %c0_3] : memref<32x384xbf16, #tpu.memory_space<vmem>>, vector<32x384xbf16>
    %c0_4 = arith.constant 0 : index
    %c0_5 = arith.constant 0 : index
    %5 = vector.load %arg4[%c0_4, %c0_5] : memref<384x128xbf16, #tpu.memory_space<vmem>>, vector<384x128xbf16>
    %cst = arith.constant dense<0.000000e+00> : vector<32x128xf32>
    %6 = tpu.matmul %4, %5, %cst {dimension_numbers = #tpu.dot_dimension_numbers<[1], [0], [0], [1], [0, 0, 1, 1], [], []>} : vector<32x384xbf16>, vector<384x128xbf16>, vector<32x128xf32> -> vector<32x128xf32>
    %7 = arith.addf %3, %6 : vector<32x128xf32>
    %c0_6 = arith.constant 0 : index
    %c0_7 = arith.constant 0 : index
    %8 = vector.load %arg9[%c0_6, %c0_7] : memref<32x128xf32, #tpu.memory_space<vmem>>, vector<32x128xf32>
    tpu.vector_store %arg9[%c0_6, %c0_7], %7 {strides = array<i32>} : memref<32x128xf32, #tpu.memory_space<vmem>>, vector<32x128xf32>,
    %c2_i32 = arith.constant 2 : i32
    %9 = arith.cmpi eq, %arg2, %c2_i32 : i32
    %10 = arith.extui %9 : i1 to i32
    %c0_i32_8 = arith.constant 0 : i32
    %11 = arith.cmpi ne, %10, %c0_i32_8 : i32
    scf.if %11 {
      %c0_9 = arith.constant 0 : index
      %c0_10 = arith.constant 0 : index
      %12 = vector.load %arg9[%c0_9, %c0_10] : memref<32x128xf32, #tpu.memory_space<vmem>>, vector<32x128xf32>
      %c0_11 = arith.constant 0 : index
      %c0_12 = arith.constant 0 : index
      %13 = vector.load %arg5[%c0_11, %c0_12] : memref<1x128xf32, #tpu.memory_space<vmem>>, vector<1x128xf32>
      %14 = vector.broadcast %13 : vector<1x128xf32> to vector<32x128xf32>
      %15 = arith.mulf %12, %14 : vector<32x128xf32>
      %c0_13 = arith.constant 0 : index
      %c0_14 = arith.constant 0 : index
      %16 = vector.load %arg6[%c0_13, %c0_14] : memref<1x128xf32, #tpu.memory_space<vmem>>, vector<1x128xf32>
      %17 = vector.broadcast %16 : vector<1x128xf32> to vector<32x128xf32>
      %18 = arith.addf %15, %17 : vector<32x128xf32>
      %cst_15 = arith.constant 0.000000e+00 : f32
      %19 = vector.broadcast %cst_15 : f32 to vector<32x128xf32>
      %20 = arith.maximumf %18, %19 : vector<32x128xf32>
      %c0_16 = arith.constant 0 : index
      %c0_17 = arith.constant 0 : index
      %21 = vector.load %arg7[%c0_16, %c0_17] : memref<32x128xbf16, #tpu.memory_space<vmem>>, vector<32x128xbf16>
      %22 = arith.extf %21 : vector<32x128xbf16> to vector<32x128xf32>
      %23 = arith.addf %20, %22 : vector<32x128xf32>
      %cst_18 = arith.constant 0.000000e+00 : f32
      %24 = vector.broadcast %cst_18 : f32 to vector<32x128xf32>
      %25 = arith.maximumf %23, %24 : vector<32x128xf32>
      %26 = arith.truncf %25 : vector<32x128xf32> to vector<32x128xbf16>
      %c0_19 = arith.constant 0 : index
      %c0_20 = arith.constant 0 : index
      %27 = vector.load %arg8[%c0_19, %c0_20] : memref<32x128xbf16, #tpu.memory_space<vmem>>, vector<32x128xbf16>
      tpu.vector_store %arg8[%c0_19, %c0_20], %26 {strides = array<i32>} : memref<32x128xbf16, #tpu.memory_space<vmem>>, vector<32x128xbf16>,
    } else {
    }
    return
  }
  func.func @transform_0(%arg0: i32, %arg1: i32, %arg2: i32) -> (i32, i32) {
    %c0_i32 = arith.constant 0 : i32
    return %arg0, %arg2 : i32, i32
  }
  func.func @transform_1(%arg0: i32, %arg1: i32, %arg2: i32) -> (i32, i32) {
    %c0_i32 = arith.constant 0 : i32
    return %arg2, %arg1 : i32, i32
  }
  func.func @transform_2(%arg0: i32, %arg1: i32, %arg2: i32) -> (i32, i32) {
    %c0_i32 = arith.constant 0 : i32
    %c0_i32_0 = arith.constant 0 : i32
    return %c0_i32, %arg1 : i32, i32
  }
  func.func @transform_3(%arg0: i32, %arg1: i32, %arg2: i32) -> (i32, i32) {
    %c0_i32 = arith.constant 0 : i32
    %c0_i32_0 = arith.constant 0 : i32
    return %c0_i32, %arg1 : i32, i32
  }
  func.func @transform_4(%arg0: i32, %arg1: i32, %arg2: i32) -> (i32, i32) {
    %c0_i32 = arith.constant 0 : i32
    return %arg0, %arg1 : i32, i32
  }
  func.func @transform_5(%arg0: i32, %arg1: i32, %arg2: i32) -> (i32, i32) {
    %c0_i32 = arith.constant 0 : i32
    return %arg0, %arg1 : i32, i32
  }
}

module attributes {stable_mosaic.version = 11 : i64} {
  func.func @_mm_affine_kernel(%arg0: i32, %arg1: i32, %arg2: i32, %arg3: memref<32x384xbf16, #tpu.memory_space<vmem>>, %arg4: memref<384x128xbf16, #tpu.memory_space<vmem>>, %arg5: memref<1x128xf32, #tpu.memory_space<vmem>>, %arg6: memref<1x128xf32, #tpu.memory_space<vmem>>, %arg7: memref<32x128xbf16, #tpu.memory_space<vmem>>, %arg8: memref<32x128xf32, #tpu.memory_space<vmem>>) attributes {dimension_semantics = [#tpu.dimension_semantics<parallel>, #tpu.dimension_semantics<parallel>, #tpu.dimension_semantics<arbitrary>], iteration_bounds = array<i64: 1, 1, 3>, scalar_prefetch = 0 : i64, scratch_operands = 1 : i64, tpu.core_type = #tpu.core_type<tc>, window_params = [{transform_indices = @transform_0, window_bounds = array<i64: 32, 384>}, {transform_indices = @transform_1, window_bounds = array<i64: 384, 128>}, {transform_indices = @transform_2, window_bounds = array<i64: 1, 128>}, {transform_indices = @transform_3, window_bounds = array<i64: 1, 128>}, {transform_indices = @transform_4, window_bounds = array<i64: 32, 128>}]} {
    %c0_i32 = arith.constant 0 : i32
    %0 = arith.cmpi eq, %arg2, %c0_i32 : i32
    %1 = arith.extui %0 : i1 to i32
    %c0_i32_0 = arith.constant 0 : i32
    %2 = arith.cmpi ne, %1, %c0_i32_0 : i32
    scf.if %2 {
      %cst_9 = arith.constant 0.000000e+00 : f32
      %12 = vector.broadcast %cst_9 : f32 to vector<32x128xf32>
      %c0_10 = arith.constant 0 : index
      %c0_11 = arith.constant 0 : index
      %13 = vector.load %arg8[%c0_10, %c0_11] : memref<32x128xf32, #tpu.memory_space<vmem>>, vector<32x128xf32>
      tpu.vector_store %arg8[%c0_10, %c0_11], %12 {strides = array<i32>} : memref<32x128xf32, #tpu.memory_space<vmem>>, vector<32x128xf32>,
    } else {
    }
    %c0 = arith.constant 0 : index
    %c0_1 = arith.constant 0 : index
    %3 = vector.load %arg8[%c0, %c0_1] : memref<32x128xf32, #tpu.memory_space<vmem>>, vector<32x128xf32>
    %c0_2 = arith.constant 0 : index
    %c0_3 = arith.constant 0 : index
    %4 = vector.load %arg3[%c0_2, %c0_3] : memref<32x384xbf16, #tpu.memory_space<vmem>>, vector<32x384xbf16>
    %c0_4 = arith.constant 0 : index
    %c0_5 = arith.constant 0 : index
    %5 = vector.load %arg4[%c0_4, %c0_5] : memref<384x128xbf16, #tpu.memory_space<vmem>>, vector<384x128xbf16>
    %cst = arith.constant dense<0.000000e+00> : vector<32x128xf32>
    %6 = tpu.matmul %4, %5, %cst {dimension_numbers = #tpu.dot_dimension_numbers<[1], [0], [0], [1], [0, 0, 1, 1], [], []>} : vector<32x384xbf16>, vector<384x128xbf16>, vector<32x128xf32> -> vector<32x128xf32>
    %7 = arith.addf %3, %6 : vector<32x128xf32>
    %c0_6 = arith.constant 0 : index
    %c0_7 = arith.constant 0 : index
    %8 = vector.load %arg8[%c0_6, %c0_7] : memref<32x128xf32, #tpu.memory_space<vmem>>, vector<32x128xf32>
    tpu.vector_store %arg8[%c0_6, %c0_7], %7 {strides = array<i32>} : memref<32x128xf32, #tpu.memory_space<vmem>>, vector<32x128xf32>,
    %c2_i32 = arith.constant 2 : i32
    %9 = arith.cmpi eq, %arg2, %c2_i32 : i32
    %10 = arith.extui %9 : i1 to i32
    %c0_i32_8 = arith.constant 0 : i32
    %11 = arith.cmpi ne, %10, %c0_i32_8 : i32
    scf.if %11 {
      %c0_9 = arith.constant 0 : index
      %c0_10 = arith.constant 0 : index
      %12 = vector.load %arg8[%c0_9, %c0_10] : memref<32x128xf32, #tpu.memory_space<vmem>>, vector<32x128xf32>
      %c0_11 = arith.constant 0 : index
      %c0_12 = arith.constant 0 : index
      %13 = vector.load %arg5[%c0_11, %c0_12] : memref<1x128xf32, #tpu.memory_space<vmem>>, vector<1x128xf32>
      %14 = vector.broadcast %13 : vector<1x128xf32> to vector<32x128xf32>
      %15 = arith.mulf %12, %14 : vector<32x128xf32>
      %c0_13 = arith.constant 0 : index
      %c0_14 = arith.constant 0 : index
      %16 = vector.load %arg6[%c0_13, %c0_14] : memref<1x128xf32, #tpu.memory_space<vmem>>, vector<1x128xf32>
      %17 = vector.broadcast %16 : vector<1x128xf32> to vector<32x128xf32>
      %18 = arith.addf %15, %17 : vector<32x128xf32>
      %cst_15 = arith.constant 0.000000e+00 : f32
      %19 = vector.broadcast %cst_15 : f32 to vector<32x128xf32>
      %20 = arith.maximumf %18, %19 : vector<32x128xf32>
      %21 = arith.truncf %20 : vector<32x128xf32> to vector<32x128xbf16>
      %c0_16 = arith.constant 0 : index
      %c0_17 = arith.constant 0 : index
      %22 = vector.load %arg7[%c0_16, %c0_17] : memref<32x128xbf16, #tpu.memory_space<vmem>>, vector<32x128xbf16>
      tpu.vector_store %arg7[%c0_16, %c0_17], %21 {strides = array<i32>} : memref<32x128xbf16, #tpu.memory_space<vmem>>, vector<32x128xbf16>,
    } else {
    }
    return
  }
  func.func @transform_0(%arg0: i32, %arg1: i32, %arg2: i32) -> (i32, i32) {
    %c0_i32 = arith.constant 0 : i32
    return %arg0, %arg2 : i32, i32
  }
  func.func @transform_1(%arg0: i32, %arg1: i32, %arg2: i32) -> (i32, i32) {
    %c0_i32 = arith.constant 0 : i32
    return %arg2, %arg1 : i32, i32
  }
  func.func @transform_2(%arg0: i32, %arg1: i32, %arg2: i32) -> (i32, i32) {
    %c0_i32 = arith.constant 0 : i32
    %c0_i32_0 = arith.constant 0 : i32
    return %c0_i32, %arg1 : i32, i32
  }
  func.func @transform_3(%arg0: i32, %arg1: i32, %arg2: i32) -> (i32, i32) {
    %c0_i32 = arith.constant 0 : i32
    %c0_i32_0 = arith.constant 0 : i32
    return %c0_i32, %arg1 : i32, i32
  }
  func.func @transform_4(%arg0: i32, %arg1: i32, %arg2: i32) -> (i32, i32) {
    %c0_i32 = arith.constant 0 : i32
    return %arg0, %arg1 : i32, i32
  }
}

module attributes {stable_mosaic.version = 11 : i64} {
  func.func @_mm_affine_kernel(%arg0: i32, %arg1: i32, %arg2: i32, %arg3: memref<8x384xbf16, #tpu.memory_space<vmem>>, %arg4: memref<384x256xbf16, #tpu.memory_space<vmem>>, %arg5: memref<1x256xf32, #tpu.memory_space<vmem>>, %arg6: memref<1x256xf32, #tpu.memory_space<vmem>>, %arg7: memref<8x256xbf16, #tpu.memory_space<vmem>>, %arg8: memref<8x256xf32, #tpu.memory_space<vmem>>) attributes {dimension_semantics = [#tpu.dimension_semantics<parallel>, #tpu.dimension_semantics<parallel>, #tpu.dimension_semantics<arbitrary>], iteration_bounds = array<i64: 1, 1, 3>, scalar_prefetch = 0 : i64, scratch_operands = 1 : i64, tpu.core_type = #tpu.core_type<tc>, window_params = [{transform_indices = @transform_0, window_bounds = array<i64: 8, 384>}, {transform_indices = @transform_1, window_bounds = array<i64: 384, 256>}, {transform_indices = @transform_2, window_bounds = array<i64: 1, 256>}, {transform_indices = @transform_3, window_bounds = array<i64: 1, 256>}, {transform_indices = @transform_4, window_bounds = array<i64: 8, 256>}]} {
    %c0_i32 = arith.constant 0 : i32
    %0 = arith.cmpi eq, %arg2, %c0_i32 : i32
    %1 = arith.extui %0 : i1 to i32
    %c0_i32_0 = arith.constant 0 : i32
    %2 = arith.cmpi ne, %1, %c0_i32_0 : i32
    scf.if %2 {
      %cst_9 = arith.constant 0.000000e+00 : f32
      %12 = vector.broadcast %cst_9 : f32 to vector<8x256xf32>
      %c0_10 = arith.constant 0 : index
      %c0_11 = arith.constant 0 : index
      %13 = vector.load %arg8[%c0_10, %c0_11] : memref<8x256xf32, #tpu.memory_space<vmem>>, vector<8x256xf32>
      tpu.vector_store %arg8[%c0_10, %c0_11], %12 {strides = array<i32>} : memref<8x256xf32, #tpu.memory_space<vmem>>, vector<8x256xf32>,
    } else {
    }
    %c0 = arith.constant 0 : index
    %c0_1 = arith.constant 0 : index
    %3 = vector.load %arg8[%c0, %c0_1] : memref<8x256xf32, #tpu.memory_space<vmem>>, vector<8x256xf32>
    %c0_2 = arith.constant 0 : index
    %c0_3 = arith.constant 0 : index
    %4 = vector.load %arg3[%c0_2, %c0_3] : memref<8x384xbf16, #tpu.memory_space<vmem>>, vector<8x384xbf16>
    %c0_4 = arith.constant 0 : index
    %c0_5 = arith.constant 0 : index
    %5 = vector.load %arg4[%c0_4, %c0_5] : memref<384x256xbf16, #tpu.memory_space<vmem>>, vector<384x256xbf16>
    %cst = arith.constant dense<0.000000e+00> : vector<8x256xf32>
    %6 = tpu.matmul %4, %5, %cst {dimension_numbers = #tpu.dot_dimension_numbers<[1], [0], [0], [1], [0, 0, 1, 1], [], []>} : vector<8x384xbf16>, vector<384x256xbf16>, vector<8x256xf32> -> vector<8x256xf32>
    %7 = arith.addf %3, %6 : vector<8x256xf32>
    %c0_6 = arith.constant 0 : index
    %c0_7 = arith.constant 0 : index
    %8 = vector.load %arg8[%c0_6, %c0_7] : memref<8x256xf32, #tpu.memory_space<vmem>>, vector<8x256xf32>
    tpu.vector_store %arg8[%c0_6, %c0_7], %7 {strides = array<i32>} : memref<8x256xf32, #tpu.memory_space<vmem>>, vector<8x256xf32>,
    %c2_i32 = arith.constant 2 : i32
    %9 = arith.cmpi eq, %arg2, %c2_i32 : i32
    %10 = arith.extui %9 : i1 to i32
    %c0_i32_8 = arith.constant 0 : i32
    %11 = arith.cmpi ne, %10, %c0_i32_8 : i32
    scf.if %11 {
      %c0_9 = arith.constant 0 : index
      %c0_10 = arith.constant 0 : index
      %12 = vector.load %arg8[%c0_9, %c0_10] : memref<8x256xf32, #tpu.memory_space<vmem>>, vector<8x256xf32>
      %c0_11 = arith.constant 0 : index
      %c0_12 = arith.constant 0 : index
      %13 = vector.load %arg5[%c0_11, %c0_12] : memref<1x256xf32, #tpu.memory_space<vmem>>, vector<1x256xf32>
      %14 = vector.broadcast %13 : vector<1x256xf32> to vector<8x256xf32>
      %15 = arith.mulf %12, %14 : vector<8x256xf32>
      %c0_13 = arith.constant 0 : index
      %c0_14 = arith.constant 0 : index
      %16 = vector.load %arg6[%c0_13, %c0_14] : memref<1x256xf32, #tpu.memory_space<vmem>>, vector<1x256xf32>
      %17 = vector.broadcast %16 : vector<1x256xf32> to vector<8x256xf32>
      %18 = arith.addf %15, %17 : vector<8x256xf32>
      %cst_15 = arith.constant 0.000000e+00 : f32
      %19 = vector.broadcast %cst_15 : f32 to vector<8x256xf32>
      %20 = arith.maximumf %18, %19 : vector<8x256xf32>
      %21 = arith.truncf %20 : vector<8x256xf32> to vector<8x256xbf16>
      %c0_16 = arith.constant 0 : index
      %c0_17 = arith.constant 0 : index
      %22 = vector.load %arg7[%c0_16, %c0_17] : memref<8x256xbf16, #tpu.memory_space<vmem>>, vector<8x256xbf16>
      tpu.vector_store %arg7[%c0_16, %c0_17], %21 {strides = array<i32>} : memref<8x256xbf16, #tpu.memory_space<vmem>>, vector<8x256xbf16>,
    } else {
    }
    return
  }
  func.func @transform_0(%arg0: i32, %arg1: i32, %arg2: i32) -> (i32, i32) {
    %c0_i32 = arith.constant 0 : i32
    return %arg0, %arg2 : i32, i32
  }
  func.func @transform_1(%arg0: i32, %arg1: i32, %arg2: i32) -> (i32, i32) {
    %c0_i32 = arith.constant 0 : i32
    return %arg2, %arg1 : i32, i32
  }
  func.func @transform_2(%arg0: i32, %arg1: i32, %arg2: i32) -> (i32, i32) {
    %c0_i32 = arith.constant 0 : i32
    %c0_i32_0 = arith.constant 0 : i32
    return %c0_i32, %arg1 : i32, i32
  }
  func.func @transform_3(%arg0: i32, %arg1: i32, %arg2: i32) -> (i32, i32) {
    %c0_i32 = arith.constant 0 : i32
    %c0_i32_0 = arith.constant 0 : i32
    return %c0_i32, %arg1 : i32, i32
  }
  func.func @transform_4(%arg0: i32, %arg1: i32, %arg2: i32) -> (i32, i32) {
    %c0_i32 = arith.constant 0 : i32
    return %arg0, %arg1 : i32, i32
  }
}

module attributes {stable_mosaic.version = 11 : i64} {
  func.func @_mm_affine_skip_kernel(%arg0: i32, %arg1: i32, %arg2: i32, %arg3: memref<8x768xbf16, #tpu.memory_space<vmem>>, %arg4: memref<768x256xbf16, #tpu.memory_space<vmem>>, %arg5: memref<1x256xf32, #tpu.memory_space<vmem>>, %arg6: memref<1x256xf32, #tpu.memory_space<vmem>>, %arg7: memref<8x256xbf16, #tpu.memory_space<vmem>>, %arg8: memref<8x256xbf16, #tpu.memory_space<vmem>>, %arg9: memref<8x256xf32, #tpu.memory_space<vmem>>) attributes {dimension_semantics = [#tpu.dimension_semantics<parallel>, #tpu.dimension_semantics<parallel>, #tpu.dimension_semantics<arbitrary>], iteration_bounds = array<i64: 1, 1, 3>, scalar_prefetch = 0 : i64, scratch_operands = 1 : i64, tpu.core_type = #tpu.core_type<tc>, window_params = [{transform_indices = @transform_0, window_bounds = array<i64: 8, 768>}, {transform_indices = @transform_1, window_bounds = array<i64: 768, 256>}, {transform_indices = @transform_2, window_bounds = array<i64: 1, 256>}, {transform_indices = @transform_3, window_bounds = array<i64: 1, 256>}, {transform_indices = @transform_4, window_bounds = array<i64: 8, 256>}, {transform_indices = @transform_5, window_bounds = array<i64: 8, 256>}]} {
    %c0_i32 = arith.constant 0 : i32
    %0 = arith.cmpi eq, %arg2, %c0_i32 : i32
    %1 = arith.extui %0 : i1 to i32
    %c0_i32_0 = arith.constant 0 : i32
    %2 = arith.cmpi ne, %1, %c0_i32_0 : i32
    scf.if %2 {
      %cst_9 = arith.constant 0.000000e+00 : f32
      %12 = vector.broadcast %cst_9 : f32 to vector<8x256xf32>
      %c0_10 = arith.constant 0 : index
      %c0_11 = arith.constant 0 : index
      %13 = vector.load %arg9[%c0_10, %c0_11] : memref<8x256xf32, #tpu.memory_space<vmem>>, vector<8x256xf32>
      tpu.vector_store %arg9[%c0_10, %c0_11], %12 {strides = array<i32>} : memref<8x256xf32, #tpu.memory_space<vmem>>, vector<8x256xf32>,
    } else {
    }
    %c0 = arith.constant 0 : index
    %c0_1 = arith.constant 0 : index
    %3 = vector.load %arg9[%c0, %c0_1] : memref<8x256xf32, #tpu.memory_space<vmem>>, vector<8x256xf32>
    %c0_2 = arith.constant 0 : index
    %c0_3 = arith.constant 0 : index
    %4 = vector.load %arg3[%c0_2, %c0_3] : memref<8x768xbf16, #tpu.memory_space<vmem>>, vector<8x768xbf16>
    %c0_4 = arith.constant 0 : index
    %c0_5 = arith.constant 0 : index
    %5 = vector.load %arg4[%c0_4, %c0_5] : memref<768x256xbf16, #tpu.memory_space<vmem>>, vector<768x256xbf16>
    %cst = arith.constant dense<0.000000e+00> : vector<8x256xf32>
    %6 = tpu.matmul %4, %5, %cst {dimension_numbers = #tpu.dot_dimension_numbers<[1], [0], [0], [1], [0, 0, 1, 1], [], []>} : vector<8x768xbf16>, vector<768x256xbf16>, vector<8x256xf32> -> vector<8x256xf32>
    %7 = arith.addf %3, %6 : vector<8x256xf32>
    %c0_6 = arith.constant 0 : index
    %c0_7 = arith.constant 0 : index
    %8 = vector.load %arg9[%c0_6, %c0_7] : memref<8x256xf32, #tpu.memory_space<vmem>>, vector<8x256xf32>
    tpu.vector_store %arg9[%c0_6, %c0_7], %7 {strides = array<i32>} : memref<8x256xf32, #tpu.memory_space<vmem>>, vector<8x256xf32>,
    %c2_i32 = arith.constant 2 : i32
    %9 = arith.cmpi eq, %arg2, %c2_i32 : i32
    %10 = arith.extui %9 : i1 to i32
    %c0_i32_8 = arith.constant 0 : i32
    %11 = arith.cmpi ne, %10, %c0_i32_8 : i32
    scf.if %11 {
      %c0_9 = arith.constant 0 : index
      %c0_10 = arith.constant 0 : index
      %12 = vector.load %arg9[%c0_9, %c0_10] : memref<8x256xf32, #tpu.memory_space<vmem>>, vector<8x256xf32>
      %c0_11 = arith.constant 0 : index
      %c0_12 = arith.constant 0 : index
      %13 = vector.load %arg5[%c0_11, %c0_12] : memref<1x256xf32, #tpu.memory_space<vmem>>, vector<1x256xf32>
      %14 = vector.broadcast %13 : vector<1x256xf32> to vector<8x256xf32>
      %15 = arith.mulf %12, %14 : vector<8x256xf32>
      %c0_13 = arith.constant 0 : index
      %c0_14 = arith.constant 0 : index
      %16 = vector.load %arg6[%c0_13, %c0_14] : memref<1x256xf32, #tpu.memory_space<vmem>>, vector<1x256xf32>
      %17 = vector.broadcast %16 : vector<1x256xf32> to vector<8x256xf32>
      %18 = arith.addf %15, %17 : vector<8x256xf32>
      %cst_15 = arith.constant 0.000000e+00 : f32
      %19 = vector.broadcast %cst_15 : f32 to vector<8x256xf32>
      %20 = arith.maximumf %18, %19 : vector<8x256xf32>
      %c0_16 = arith.constant 0 : index
      %c0_17 = arith.constant 0 : index
      %21 = vector.load %arg7[%c0_16, %c0_17] : memref<8x256xbf16, #tpu.memory_space<vmem>>, vector<8x256xbf16>
      %22 = arith.extf %21 : vector<8x256xbf16> to vector<8x256xf32>
      %23 = arith.addf %20, %22 : vector<8x256xf32>
      %cst_18 = arith.constant 0.000000e+00 : f32
      %24 = vector.broadcast %cst_18 : f32 to vector<8x256xf32>
      %25 = arith.maximumf %23, %24 : vector<8x256xf32>
      %26 = arith.truncf %25 : vector<8x256xf32> to vector<8x256xbf16>
      %c0_19 = arith.constant 0 : index
      %c0_20 = arith.constant 0 : index
      %27 = vector.load %arg8[%c0_19, %c0_20] : memref<8x256xbf16, #tpu.memory_space<vmem>>, vector<8x256xbf16>
      tpu.vector_store %arg8[%c0_19, %c0_20], %26 {strides = array<i32>} : memref<8x256xbf16, #tpu.memory_space<vmem>>, vector<8x256xbf16>,
    } else {
    }
    return
  }
  func.func @transform_0(%arg0: i32, %arg1: i32, %arg2: i32) -> (i32, i32) {
    %c0_i32 = arith.constant 0 : i32
    return %arg0, %arg2 : i32, i32
  }
  func.func @transform_1(%arg0: i32, %arg1: i32, %arg2: i32) -> (i32, i32) {
    %c0_i32 = arith.constant 0 : i32
    return %arg2, %arg1 : i32, i32
  }
  func.func @transform_2(%arg0: i32, %arg1: i32, %arg2: i32) -> (i32, i32) {
    %c0_i32 = arith.constant 0 : i32
    %c0_i32_0 = arith.constant 0 : i32
    return %c0_i32, %arg1 : i32, i32
  }
  func.func @transform_3(%arg0: i32, %arg1: i32, %arg2: i32) -> (i32, i32) {
    %c0_i32 = arith.constant 0 : i32
    %c0_i32_0 = arith.constant 0 : i32
    return %c0_i32, %arg1 : i32, i32
  }
  func.func @transform_4(%arg0: i32, %arg1: i32, %arg2: i32) -> (i32, i32) {
    %c0_i32 = arith.constant 0 : i32
    return %arg0, %arg1 : i32, i32
  }
  func.func @transform_5(%arg0: i32, %arg1: i32, %arg2: i32) -> (i32, i32) {
    %c0_i32 = arith.constant 0 : i32
    return %arg0, %arg1 : i32, i32
  }
}

module attributes {stable_mosaic.version = 11 : i64} {
  func.func @_mm_affine_kernel(%arg0: i32, %arg1: i32, %arg2: i32, %arg3: memref<8x768xbf16, #tpu.memory_space<vmem>>, %arg4: memref<768x256xbf16, #tpu.memory_space<vmem>>, %arg5: memref<1x256xf32, #tpu.memory_space<vmem>>, %arg6: memref<1x256xf32, #tpu.memory_space<vmem>>, %arg7: memref<8x256xbf16, #tpu.memory_space<vmem>>, %arg8: memref<8x256xf32, #tpu.memory_space<vmem>>) attributes {dimension_semantics = [#tpu.dimension_semantics<parallel>, #tpu.dimension_semantics<parallel>, #tpu.dimension_semantics<arbitrary>], iteration_bounds = array<i64: 1, 1, 3>, scalar_prefetch = 0 : i64, scratch_operands = 1 : i64, tpu.core_type = #tpu.core_type<tc>, window_params = [{transform_indices = @transform_0, window_bounds = array<i64: 8, 768>}, {transform_indices = @transform_1, window_bounds = array<i64: 768, 256>}, {transform_indices = @transform_2, window_bounds = array<i64: 1, 256>}, {transform_indices = @transform_3, window_bounds = array<i64: 1, 256>}, {transform_indices = @transform_4, window_bounds = array<i64: 8, 256>}]} {
    %c0_i32 = arith.constant 0 : i32
    %0 = arith.cmpi eq, %arg2, %c0_i32 : i32
    %1 = arith.extui %0 : i1 to i32
    %c0_i32_0 = arith.constant 0 : i32
    %2 = arith.cmpi ne, %1, %c0_i32_0 : i32
    scf.if %2 {
      %cst_9 = arith.constant 0.000000e+00 : f32
      %12 = vector.broadcast %cst_9 : f32 to vector<8x256xf32>
      %c0_10 = arith.constant 0 : index
      %c0_11 = arith.constant 0 : index
      %13 = vector.load %arg8[%c0_10, %c0_11] : memref<8x256xf32, #tpu.memory_space<vmem>>, vector<8x256xf32>
      tpu.vector_store %arg8[%c0_10, %c0_11], %12 {strides = array<i32>} : memref<8x256xf32, #tpu.memory_space<vmem>>, vector<8x256xf32>,
    } else {
    }
    %c0 = arith.constant 0 : index
    %c0_1 = arith.constant 0 : index
    %3 = vector.load %arg8[%c0, %c0_1] : memref<8x256xf32, #tpu.memory_space<vmem>>, vector<8x256xf32>
    %c0_2 = arith.constant 0 : index
    %c0_3 = arith.constant 0 : index
    %4 = vector.load %arg3[%c0_2, %c0_3] : memref<8x768xbf16, #tpu.memory_space<vmem>>, vector<8x768xbf16>
    %c0_4 = arith.constant 0 : index
    %c0_5 = arith.constant 0 : index
    %5 = vector.load %arg4[%c0_4, %c0_5] : memref<768x256xbf16, #tpu.memory_space<vmem>>, vector<768x256xbf16>
    %cst = arith.constant dense<0.000000e+00> : vector<8x256xf32>
    %6 = tpu.matmul %4, %5, %cst {dimension_numbers = #tpu.dot_dimension_numbers<[1], [0], [0], [1], [0, 0, 1, 1], [], []>} : vector<8x768xbf16>, vector<768x256xbf16>, vector<8x256xf32> -> vector<8x256xf32>
    %7 = arith.addf %3, %6 : vector<8x256xf32>
    %c0_6 = arith.constant 0 : index
    %c0_7 = arith.constant 0 : index
    %8 = vector.load %arg8[%c0_6, %c0_7] : memref<8x256xf32, #tpu.memory_space<vmem>>, vector<8x256xf32>
    tpu.vector_store %arg8[%c0_6, %c0_7], %7 {strides = array<i32>} : memref<8x256xf32, #tpu.memory_space<vmem>>, vector<8x256xf32>,
    %c2_i32 = arith.constant 2 : i32
    %9 = arith.cmpi eq, %arg2, %c2_i32 : i32
    %10 = arith.extui %9 : i1 to i32
    %c0_i32_8 = arith.constant 0 : i32
    %11 = arith.cmpi ne, %10, %c0_i32_8 : i32
    scf.if %11 {
      %c0_9 = arith.constant 0 : index
      %c0_10 = arith.constant 0 : index
      %12 = vector.load %arg8[%c0_9, %c0_10] : memref<8x256xf32, #tpu.memory_space<vmem>>, vector<8x256xf32>
      %c0_11 = arith.constant 0 : index
      %c0_12 = arith.constant 0 : index
      %13 = vector.load %arg5[%c0_11, %c0_12] : memref<1x256xf32, #tpu.memory_space<vmem>>, vector<1x256xf32>
      %14 = vector.broadcast %13 : vector<1x256xf32> to vector<8x256xf32>
      %15 = arith.mulf %12, %14 : vector<8x256xf32>
      %c0_13 = arith.constant 0 : index
      %c0_14 = arith.constant 0 : index
      %16 = vector.load %arg6[%c0_13, %c0_14] : memref<1x256xf32, #tpu.memory_space<vmem>>, vector<1x256xf32>
      %17 = vector.broadcast %16 : vector<1x256xf32> to vector<8x256xf32>
      %18 = arith.addf %15, %17 : vector<8x256xf32>
      %cst_15 = arith.constant 0.000000e+00 : f32
      %19 = vector.broadcast %cst_15 : f32 to vector<8x256xf32>
      %20 = arith.maximumf %18, %19 : vector<8x256xf32>
      %21 = arith.truncf %20 : vector<8x256xf32> to vector<8x256xbf16>
      %c0_16 = arith.constant 0 : index
      %c0_17 = arith.constant 0 : index
      %22 = vector.load %arg7[%c0_16, %c0_17] : memref<8x256xbf16, #tpu.memory_space<vmem>>, vector<8x256xbf16>
      tpu.vector_store %arg7[%c0_16, %c0_17], %21 {strides = array<i32>} : memref<8x256xbf16, #tpu.memory_space<vmem>>, vector<8x256xbf16>,
    } else {
    }
    return
  }
  func.func @transform_0(%arg0: i32, %arg1: i32, %arg2: i32) -> (i32, i32) {
    %c0_i32 = arith.constant 0 : i32
    return %arg0, %arg2 : i32, i32
  }
  func.func @transform_1(%arg0: i32, %arg1: i32, %arg2: i32) -> (i32, i32) {
    %c0_i32 = arith.constant 0 : i32
    return %arg2, %arg1 : i32, i32
  }
  func.func @transform_2(%arg0: i32, %arg1: i32, %arg2: i32) -> (i32, i32) {
    %c0_i32 = arith.constant 0 : i32
    %c0_i32_0 = arith.constant 0 : i32
    return %c0_i32, %arg1 : i32, i32
  }
  func.func @transform_3(%arg0: i32, %arg1: i32, %arg2: i32) -> (i32, i32) {
    %c0_i32 = arith.constant 0 : i32
    %c0_i32_0 = arith.constant 0 : i32
    return %c0_i32, %arg1 : i32, i32
  }
  func.func @transform_4(%arg0: i32, %arg1: i32, %arg2: i32) -> (i32, i32) {
    %c0_i32 = arith.constant 0 : i32
    return %arg0, %arg1 : i32, i32
  }
}

module attributes {stable_mosaic.version = 11 : i64} {
  func.func @_mm_affine_kernel(%arg0: i32, %arg1: i32, %arg2: i32, %arg3: memref<2x768xbf16, #tpu.memory_space<vmem>>, %arg4: memref<768x256xbf16, #tpu.memory_space<vmem>>, %arg5: memref<1x256xf32, #tpu.memory_space<vmem>>, %arg6: memref<1x256xf32, #tpu.memory_space<vmem>>, %arg7: memref<2x256xbf16, #tpu.memory_space<vmem>>, %arg8: memref<2x256xf32, #tpu.memory_space<vmem>>) attributes {dimension_semantics = [#tpu.dimension_semantics<parallel>, #tpu.dimension_semantics<parallel>, #tpu.dimension_semantics<arbitrary>], iteration_bounds = array<i64: 1, 2, 3>, scalar_prefetch = 0 : i64, scratch_operands = 1 : i64, tpu.core_type = #tpu.core_type<tc>, window_params = [{transform_indices = @transform_0, window_bounds = array<i64: 2, 768>}, {transform_indices = @transform_1, window_bounds = array<i64: 768, 256>}, {transform_indices = @transform_2, window_bounds = array<i64: 1, 256>}, {transform_indices = @transform_3, window_bounds = array<i64: 1, 256>}, {transform_indices = @transform_4, window_bounds = array<i64: 2, 256>}]} {
    %c0_i32 = arith.constant 0 : i32
    %0 = arith.cmpi eq, %arg2, %c0_i32 : i32
    %1 = arith.extui %0 : i1 to i32
    %c0_i32_0 = arith.constant 0 : i32
    %2 = arith.cmpi ne, %1, %c0_i32_0 : i32
    scf.if %2 {
      %cst_9 = arith.constant 0.000000e+00 : f32
      %12 = vector.broadcast %cst_9 : f32 to vector<2x256xf32>
      %c0_10 = arith.constant 0 : index
      %c0_11 = arith.constant 0 : index
      %13 = vector.load %arg8[%c0_10, %c0_11] : memref<2x256xf32, #tpu.memory_space<vmem>>, vector<2x256xf32>
      tpu.vector_store %arg8[%c0_10, %c0_11], %12 {strides = array<i32>} : memref<2x256xf32, #tpu.memory_space<vmem>>, vector<2x256xf32>,
    } else {
    }
    %c0 = arith.constant 0 : index
    %c0_1 = arith.constant 0 : index
    %3 = vector.load %arg8[%c0, %c0_1] : memref<2x256xf32, #tpu.memory_space<vmem>>, vector<2x256xf32>
    %c0_2 = arith.constant 0 : index
    %c0_3 = arith.constant 0 : index
    %4 = vector.load %arg3[%c0_2, %c0_3] : memref<2x768xbf16, #tpu.memory_space<vmem>>, vector<2x768xbf16>
    %c0_4 = arith.constant 0 : index
    %c0_5 = arith.constant 0 : index
    %5 = vector.load %arg4[%c0_4, %c0_5] : memref<768x256xbf16, #tpu.memory_space<vmem>>, vector<768x256xbf16>
    %cst = arith.constant dense<0.000000e+00> : vector<2x256xf32>
    %6 = tpu.matmul %4, %5, %cst {dimension_numbers = #tpu.dot_dimension_numbers<[1], [0], [0], [1], [0, 0, 1, 1], [], []>} : vector<2x768xbf16>, vector<768x256xbf16>, vector<2x256xf32> -> vector<2x256xf32>
    %7 = arith.addf %3, %6 : vector<2x256xf32>
    %c0_6 = arith.constant 0 : index
    %c0_7 = arith.constant 0 : index
    %8 = vector.load %arg8[%c0_6, %c0_7] : memref<2x256xf32, #tpu.memory_space<vmem>>, vector<2x256xf32>
    tpu.vector_store %arg8[%c0_6, %c0_7], %7 {strides = array<i32>} : memref<2x256xf32, #tpu.memory_space<vmem>>, vector<2x256xf32>,
    %c2_i32 = arith.constant 2 : i32
    %9 = arith.cmpi eq, %arg2, %c2_i32 : i32
    %10 = arith.extui %9 : i1 to i32
    %c0_i32_8 = arith.constant 0 : i32
    %11 = arith.cmpi ne, %10, %c0_i32_8 : i32
    scf.if %11 {
      %c0_9 = arith.constant 0 : index
      %c0_10 = arith.constant 0 : index
      %12 = vector.load %arg8[%c0_9, %c0_10] : memref<2x256xf32, #tpu.memory_space<vmem>>, vector<2x256xf32>
      %c0_11 = arith.constant 0 : index
      %c0_12 = arith.constant 0 : index
      %13 = vector.load %arg5[%c0_11, %c0_12] : memref<1x256xf32, #tpu.memory_space<vmem>>, vector<1x256xf32>
      %14 = vector.broadcast %13 : vector<1x256xf32> to vector<2x256xf32>
      %15 = arith.mulf %12, %14 : vector<2x256xf32>
      %c0_13 = arith.constant 0 : index
      %c0_14 = arith.constant 0 : index
      %16 = vector.load %arg6[%c0_13, %c0_14] : memref<1x256xf32, #tpu.memory_space<vmem>>, vector<1x256xf32>
      %17 = vector.broadcast %16 : vector<1x256xf32> to vector<2x256xf32>
      %18 = arith.addf %15, %17 : vector<2x256xf32>
      %cst_15 = arith.constant 0.000000e+00 : f32
      %19 = vector.broadcast %cst_15 : f32 to vector<2x256xf32>
      %20 = arith.maximumf %18, %19 : vector<2x256xf32>
      %21 = arith.truncf %20 : vector<2x256xf32> to vector<2x256xbf16>
      %c0_16 = arith.constant 0 : index
      %c0_17 = arith.constant 0 : index
      %22 = vector.load %arg7[%c0_16, %c0_17] : memref<2x256xbf16, #tpu.memory_space<vmem>>, vector<2x256xbf16>
      tpu.vector_store %arg7[%c0_16, %c0_17], %21 {strides = array<i32>} : memref<2x256xbf16, #tpu.memory_space<vmem>>, vector<2x256xbf16>,
    } else {
    }
    return
  }
  func.func @transform_0(%arg0: i32, %arg1: i32, %arg2: i32) -> (i32, i32) {
    %c0_i32 = arith.constant 0 : i32
    return %arg0, %arg2 : i32, i32
  }
  func.func @transform_1(%arg0: i32, %arg1: i32, %arg2: i32) -> (i32, i32) {
    %c0_i32 = arith.constant 0 : i32
    return %arg2, %arg1 : i32, i32
  }
  func.func @transform_2(%arg0: i32, %arg1: i32, %arg2: i32) -> (i32, i32) {
    %c0_i32 = arith.constant 0 : i32
    %c0_i32_0 = arith.constant 0 : i32
    return %c0_i32, %arg1 : i32, i32
  }
  func.func @transform_3(%arg0: i32, %arg1: i32, %arg2: i32) -> (i32, i32) {
    %c0_i32 = arith.constant 0 : i32
    %c0_i32_0 = arith.constant 0 : i32
    return %c0_i32, %arg1 : i32, i32
  }
  func.func @transform_4(%arg0: i32, %arg1: i32, %arg2: i32) -> (i32, i32) {
    %c0_i32 = arith.constant 0 : i32
    return %arg0, %arg1 : i32, i32
  }
}

module attributes {stable_mosaic.version = 11 : i64} {
  func.func @_mm_affine_kernel(%arg0: i32, %arg1: i32, %arg2: i32, %arg3: memref<2x768xbf16, #tpu.memory_space<vmem>>, %arg4: memref<768x256xbf16, #tpu.memory_space<vmem>>, %arg5: memref<1x256xf32, #tpu.memory_space<vmem>>, %arg6: memref<1x256xf32, #tpu.memory_space<vmem>>, %arg7: memref<2x256xbf16, #tpu.memory_space<vmem>>, %arg8: memref<2x256xf32, #tpu.memory_space<vmem>>) attributes {dimension_semantics = [#tpu.dimension_semantics<parallel>, #tpu.dimension_semantics<parallel>, #tpu.dimension_semantics<arbitrary>], iteration_bounds = array<i64: 1, 2, 3>, scalar_prefetch = 0 : i64, scratch_operands = 1 : i64, tpu.core_type = #tpu.core_type<tc>, window_params = [{transform_indices = @transform_0, window_bounds = array<i64: 2, 768>}, {transform_indices = @transform_1, window_bounds = array<i64: 768, 256>}, {transform_indices = @transform_2, window_bounds = array<i64: 1, 256>}, {transform_indices = @transform_3, window_bounds = array<i64: 1, 256>}, {transform_indices = @transform_4, window_bounds = array<i64: 2, 256>}]} {
    %c0_i32 = arith.constant 0 : i32
    %0 = arith.cmpi eq, %arg2, %c0_i32 : i32
    %1 = arith.extui %0 : i1 to i32
    %c0_i32_0 = arith.constant 0 : i32
    %2 = arith.cmpi ne, %1, %c0_i32_0 : i32
    scf.if %2 {
      %cst_9 = arith.constant 0.000000e+00 : f32
      %12 = vector.broadcast %cst_9 : f32 to vector<2x256xf32>
      %c0_10 = arith.constant 0 : index
      %c0_11 = arith.constant 0 : index
      %13 = vector.load %arg8[%c0_10, %c0_11] : memref<2x256xf32, #tpu.memory_space<vmem>>, vector<2x256xf32>
      tpu.vector_store %arg8[%c0_10, %c0_11], %12 {strides = array<i32>} : memref<2x256xf32, #tpu.memory_space<vmem>>, vector<2x256xf32>,
    } else {
    }
    %c0 = arith.constant 0 : index
    %c0_1 = arith.constant 0 : index
    %3 = vector.load %arg8[%c0, %c0_1] : memref<2x256xf32, #tpu.memory_space<vmem>>, vector<2x256xf32>
    %c0_2 = arith.constant 0 : index
    %c0_3 = arith.constant 0 : index
    %4 = vector.load %arg3[%c0_2, %c0_3] : memref<2x768xbf16, #tpu.memory_space<vmem>>, vector<2x768xbf16>
    %c0_4 = arith.constant 0 : index
    %c0_5 = arith.constant 0 : index
    %5 = vector.load %arg4[%c0_4, %c0_5] : memref<768x256xbf16, #tpu.memory_space<vmem>>, vector<768x256xbf16>
    %cst = arith.constant dense<0.000000e+00> : vector<2x256xf32>
    %6 = tpu.matmul %4, %5, %cst {dimension_numbers = #tpu.dot_dimension_numbers<[1], [0], [0], [1], [0, 0, 1, 1], [], []>} : vector<2x768xbf16>, vector<768x256xbf16>, vector<2x256xf32> -> vector<2x256xf32>
    %7 = arith.addf %3, %6 : vector<2x256xf32>
    %c0_6 = arith.constant 0 : index
    %c0_7 = arith.constant 0 : index
    %8 = vector.load %arg8[%c0_6, %c0_7] : memref<2x256xf32, #tpu.memory_space<vmem>>, vector<2x256xf32>
    tpu.vector_store %arg8[%c0_6, %c0_7], %7 {strides = array<i32>} : memref<2x256xf32, #tpu.memory_space<vmem>>, vector<2x256xf32>,
    %c2_i32 = arith.constant 2 : i32
    %9 = arith.cmpi eq, %arg2, %c2_i32 : i32
    %10 = arith.extui %9 : i1 to i32
    %c0_i32_8 = arith.constant 0 : i32
    %11 = arith.cmpi ne, %10, %c0_i32_8 : i32
    scf.if %11 {
      %c0_9 = arith.constant 0 : index
      %c0_10 = arith.constant 0 : index
      %12 = vector.load %arg8[%c0_9, %c0_10] : memref<2x256xf32, #tpu.memory_space<vmem>>, vector<2x256xf32>
      %c0_11 = arith.constant 0 : index
      %c0_12 = arith.constant 0 : index
      %13 = vector.load %arg5[%c0_11, %c0_12] : memref<1x256xf32, #tpu.memory_space<vmem>>, vector<1x256xf32>
      %14 = vector.broadcast %13 : vector<1x256xf32> to vector<2x256xf32>
      %15 = arith.mulf %12, %14 : vector<2x256xf32>
      %c0_13 = arith.constant 0 : index
      %c0_14 = arith.constant 0 : index
      %16 = vector.load %arg6[%c0_13, %c0_14] : memref<1x256xf32, #tpu.memory_space<vmem>>, vector<1x256xf32>
      %17 = vector.broadcast %16 : vector<1x256xf32> to vector<2x256xf32>
      %18 = arith.addf %15, %17 : vector<2x256xf32>
      %cst_15 = arith.constant 0.000000e+00 : f32
      %19 = vector.broadcast %cst_15 : f32 to vector<2x256xf32>
      %20 = arith.maximumf %18, %19 : vector<2x256xf32>
      %21 = arith.truncf %20 : vector<2x256xf32> to vector<2x256xbf16>
      %c0_16 = arith.constant 0 : index
      %c0_17 = arith.constant 0 : index
      %22 = vector.load %arg7[%c0_16, %c0_17] : memref<2x256xbf16, #tpu.memory_space<vmem>>, vector<2x256xbf16>
      tpu.vector_store %arg7[%c0_16, %c0_17], %21 {strides = array<i32>} : memref<2x256xbf16, #tpu.memory_space<vmem>>, vector<2x256xbf16>,
    } else {
    }
    return
  }
  func.func @transform_0(%arg0: i32, %arg1: i32, %arg2: i32) -> (i32, i32) {
    %c0_i32 = arith.constant 0 : i32
    return %arg0, %arg2 : i32, i32
  }
  func.func @transform_1(%arg0: i32, %arg1: i32, %arg2: i32) -> (i32, i32) {
    %c0_i32 = arith.constant 0 : i32
    return %arg2, %arg1 : i32, i32
  }
  func.func @transform_2(%arg0: i32, %arg1: i32, %arg2: i32) -> (i32, i32) {
    %c0_i32 = arith.constant 0 : i32
    %c0_i32_0 = arith.constant 0 : i32
    return %c0_i32, %arg1 : i32, i32
  }
  func.func @transform_3(%arg0: i32, %arg1: i32, %arg2: i32) -> (i32, i32) {
    %c0_i32 = arith.constant 0 : i32
    %c0_i32_0 = arith.constant 0 : i32
    return %c0_i32, %arg1 : i32, i32
  }
  func.func @transform_4(%arg0: i32, %arg1: i32, %arg2: i32) -> (i32, i32) {
    %c0_i32 = arith.constant 0 : i32
    return %arg0, %arg1 : i32, i32
  }
}

module attributes {stable_mosaic.version = 11 : i64} {
  func.func @_mm_affine_skip_kernel(%arg0: i32, %arg1: i32, %arg2: i32, %arg3: memref<2x768xbf16, #tpu.memory_space<vmem>>, %arg4: memref<768x256xbf16, #tpu.memory_space<vmem>>, %arg5: memref<1x256xf32, #tpu.memory_space<vmem>>, %arg6: memref<1x256xf32, #tpu.memory_space<vmem>>, %arg7: memref<2x256xbf16, #tpu.memory_space<vmem>>, %arg8: memref<2x256xbf16, #tpu.memory_space<vmem>>, %arg9: memref<2x256xf32, #tpu.memory_space<vmem>>) attributes {dimension_semantics = [#tpu.dimension_semantics<parallel>, #tpu.dimension_semantics<parallel>, #tpu.dimension_semantics<arbitrary>], iteration_bounds = array<i64: 1, 2, 6>, scalar_prefetch = 0 : i64, scratch_operands = 1 : i64, tpu.core_type = #tpu.core_type<tc>, window_params = [{transform_indices = @transform_0, window_bounds = array<i64: 2, 768>}, {transform_indices = @transform_1, window_bounds = array<i64: 768, 256>}, {transform_indices = @transform_2, window_bounds = array<i64: 1, 256>}, {transform_indices = @transform_3, window_bounds = array<i64: 1, 256>}, {transform_indices = @transform_4, window_bounds = array<i64: 2, 256>}, {transform_indices = @transform_5, window_bounds = array<i64: 2, 256>}]} {
    %c0_i32 = arith.constant 0 : i32
    %0 = arith.cmpi eq, %arg2, %c0_i32 : i32
    %1 = arith.extui %0 : i1 to i32
    %c0_i32_0 = arith.constant 0 : i32
    %2 = arith.cmpi ne, %1, %c0_i32_0 : i32
    scf.if %2 {
      %cst_9 = arith.constant 0.000000e+00 : f32
      %12 = vector.broadcast %cst_9 : f32 to vector<2x256xf32>
      %c0_10 = arith.constant 0 : index
      %c0_11 = arith.constant 0 : index
      %13 = vector.load %arg9[%c0_10, %c0_11] : memref<2x256xf32, #tpu.memory_space<vmem>>, vector<2x256xf32>
      tpu.vector_store %arg9[%c0_10, %c0_11], %12 {strides = array<i32>} : memref<2x256xf32, #tpu.memory_space<vmem>>, vector<2x256xf32>,
    } else {
    }
    %c0 = arith.constant 0 : index
    %c0_1 = arith.constant 0 : index
    %3 = vector.load %arg9[%c0, %c0_1] : memref<2x256xf32, #tpu.memory_space<vmem>>, vector<2x256xf32>
    %c0_2 = arith.constant 0 : index
    %c0_3 = arith.constant 0 : index
    %4 = vector.load %arg3[%c0_2, %c0_3] : memref<2x768xbf16, #tpu.memory_space<vmem>>, vector<2x768xbf16>
    %c0_4 = arith.constant 0 : index
    %c0_5 = arith.constant 0 : index
    %5 = vector.load %arg4[%c0_4, %c0_5] : memref<768x256xbf16, #tpu.memory_space<vmem>>, vector<768x256xbf16>
    %cst = arith.constant dense<0.000000e+00> : vector<2x256xf32>
    %6 = tpu.matmul %4, %5, %cst {dimension_numbers = #tpu.dot_dimension_numbers<[1], [0], [0], [1], [0, 0, 1, 1], [], []>} : vector<2x768xbf16>, vector<768x256xbf16>, vector<2x256xf32> -> vector<2x256xf32>
    %7 = arith.addf %3, %6 : vector<2x256xf32>
    %c0_6 = arith.constant 0 : index
    %c0_7 = arith.constant 0 : index
    %8 = vector.load %arg9[%c0_6, %c0_7] : memref<2x256xf32, #tpu.memory_space<vmem>>, vector<2x256xf32>
    tpu.vector_store %arg9[%c0_6, %c0_7], %7 {strides = array<i32>} : memref<2x256xf32, #tpu.memory_space<vmem>>, vector<2x256xf32>,
    %c5_i32 = arith.constant 5 : i32
    %9 = arith.cmpi eq, %arg2, %c5_i32 : i32
    %10 = arith.extui %9 : i1 to i32
    %c0_i32_8 = arith.constant 0 : i32
    %11 = arith.cmpi ne, %10, %c0_i32_8 : i32
    scf.if %11 {
      %c0_9 = arith.constant 0 : index
      %c0_10 = arith.constant 0 : index
      %12 = vector.load %arg9[%c0_9, %c0_10] : memref<2x256xf32, #tpu.memory_space<vmem>>, vector<2x256xf32>
      %c0_11 = arith.constant 0 : index
      %c0_12 = arith.constant 0 : index
      %13 = vector.load %arg5[%c0_11, %c0_12] : memref<1x256xf32, #tpu.memory_space<vmem>>, vector<1x256xf32>
      %14 = vector.broadcast %13 : vector<1x256xf32> to vector<2x256xf32>
      %15 = arith.mulf %12, %14 : vector<2x256xf32>
      %c0_13 = arith.constant 0 : index
      %c0_14 = arith.constant 0 : index
      %16 = vector.load %arg6[%c0_13, %c0_14] : memref<1x256xf32, #tpu.memory_space<vmem>>, vector<1x256xf32>
      %17 = vector.broadcast %16 : vector<1x256xf32> to vector<2x256xf32>
      %18 = arith.addf %15, %17 : vector<2x256xf32>
      %cst_15 = arith.constant 0.000000e+00 : f32
      %19 = vector.broadcast %cst_15 : f32 to vector<2x256xf32>
      %20 = arith.maximumf %18, %19 : vector<2x256xf32>
      %c0_16 = arith.constant 0 : index
      %c0_17 = arith.constant 0 : index
      %21 = vector.load %arg7[%c0_16, %c0_17] : memref<2x256xbf16, #tpu.memory_space<vmem>>, vector<2x256xbf16>
      %22 = arith.extf %21 : vector<2x256xbf16> to vector<2x256xf32>
      %23 = arith.addf %20, %22 : vector<2x256xf32>
      %cst_18 = arith.constant 0.000000e+00 : f32
      %24 = vector.broadcast %cst_18 : f32 to vector<2x256xf32>
      %25 = arith.maximumf %23, %24 : vector<2x256xf32>
      %26 = arith.truncf %25 : vector<2x256xf32> to vector<2x256xbf16>
      %c0_19 = arith.constant 0 : index
      %c0_20 = arith.constant 0 : index
      %27 = vector.load %arg8[%c0_19, %c0_20] : memref<2x256xbf16, #tpu.memory_space<vmem>>, vector<2x256xbf16>
      tpu.vector_store %arg8[%c0_19, %c0_20], %26 {strides = array<i32>} : memref<2x256xbf16, #tpu.memory_space<vmem>>, vector<2x256xbf16>,
    } else {
    }
    return
  }
  func.func @transform_0(%arg0: i32, %arg1: i32, %arg2: i32) -> (i32, i32) {
    %c0_i32 = arith.constant 0 : i32
    return %arg0, %arg2 : i32, i32
  }
  func.func @transform_1(%arg0: i32, %arg1: i32, %arg2: i32) -> (i32, i32) {
    %c0_i32 = arith.constant 0 : i32
    return %arg2, %arg1 : i32, i32
  }
  func.func @transform_2(%arg0: i32, %arg1: i32, %arg2: i32) -> (i32, i32) {
    %c0_i32 = arith.constant 0 : i32
    %c0_i32_0 = arith.constant 0 : i32
    return %c0_i32, %arg1 : i32, i32
  }
  func.func @transform_3(%arg0: i32, %arg1: i32, %arg2: i32) -> (i32, i32) {
    %c0_i32 = arith.constant 0 : i32
    %c0_i32_0 = arith.constant 0 : i32
    return %c0_i32, %arg1 : i32, i32
  }
  func.func @transform_4(%arg0: i32, %arg1: i32, %arg2: i32) -> (i32, i32) {
    %c0_i32 = arith.constant 0 : i32
    return %arg0, %arg1 : i32, i32
  }
  func.func @transform_5(%arg0: i32, %arg1: i32, %arg2: i32) -> (i32, i32) {
    %c0_i32 = arith.constant 0 : i32
    return %arg0, %arg1 : i32, i32
  }
}

module attributes {stable_mosaic.version = 11 : i64} {
  func.func @_mm_affine_kernel(%arg0: i32, %arg1: i32, %arg2: i32, %arg3: memref<2x768xbf16, #tpu.memory_space<vmem>>, %arg4: memref<768x256xbf16, #tpu.memory_space<vmem>>, %arg5: memref<1x256xf32, #tpu.memory_space<vmem>>, %arg6: memref<1x256xf32, #tpu.memory_space<vmem>>, %arg7: memref<2x256xbf16, #tpu.memory_space<vmem>>, %arg8: memref<2x256xf32, #tpu.memory_space<vmem>>) attributes {dimension_semantics = [#tpu.dimension_semantics<parallel>, #tpu.dimension_semantics<parallel>, #tpu.dimension_semantics<arbitrary>], iteration_bounds = array<i64: 1, 2, 6>, scalar_prefetch = 0 : i64, scratch_operands = 1 : i64, tpu.core_type = #tpu.core_type<tc>, window_params = [{transform_indices = @transform_0, window_bounds = array<i64: 2, 768>}, {transform_indices = @transform_1, window_bounds = array<i64: 768, 256>}, {transform_indices = @transform_2, window_bounds = array<i64: 1, 256>}, {transform_indices = @transform_3, window_bounds = array<i64: 1, 256>}, {transform_indices = @transform_4, window_bounds = array<i64: 2, 256>}]} {
    %c0_i32 = arith.constant 0 : i32
    %0 = arith.cmpi eq, %arg2, %c0_i32 : i32
    %1 = arith.extui %0 : i1 to i32
    %c0_i32_0 = arith.constant 0 : i32
    %2 = arith.cmpi ne, %1, %c0_i32_0 : i32
    scf.if %2 {
      %cst_9 = arith.constant 0.000000e+00 : f32
      %12 = vector.broadcast %cst_9 : f32 to vector<2x256xf32>
      %c0_10 = arith.constant 0 : index
      %c0_11 = arith.constant 0 : index
      %13 = vector.load %arg8[%c0_10, %c0_11] : memref<2x256xf32, #tpu.memory_space<vmem>>, vector<2x256xf32>
      tpu.vector_store %arg8[%c0_10, %c0_11], %12 {strides = array<i32>} : memref<2x256xf32, #tpu.memory_space<vmem>>, vector<2x256xf32>,
    } else {
    }
    %c0 = arith.constant 0 : index
    %c0_1 = arith.constant 0 : index
    %3 = vector.load %arg8[%c0, %c0_1] : memref<2x256xf32, #tpu.memory_space<vmem>>, vector<2x256xf32>
    %c0_2 = arith.constant 0 : index
    %c0_3 = arith.constant 0 : index
    %4 = vector.load %arg3[%c0_2, %c0_3] : memref<2x768xbf16, #tpu.memory_space<vmem>>, vector<2x768xbf16>
    %c0_4 = arith.constant 0 : index
    %c0_5 = arith.constant 0 : index
    %5 = vector.load %arg4[%c0_4, %c0_5] : memref<768x256xbf16, #tpu.memory_space<vmem>>, vector<768x256xbf16>
    %cst = arith.constant dense<0.000000e+00> : vector<2x256xf32>
    %6 = tpu.matmul %4, %5, %cst {dimension_numbers = #tpu.dot_dimension_numbers<[1], [0], [0], [1], [0, 0, 1, 1], [], []>} : vector<2x768xbf16>, vector<768x256xbf16>, vector<2x256xf32> -> vector<2x256xf32>
    %7 = arith.addf %3, %6 : vector<2x256xf32>
    %c0_6 = arith.constant 0 : index
    %c0_7 = arith.constant 0 : index
    %8 = vector.load %arg8[%c0_6, %c0_7] : memref<2x256xf32, #tpu.memory_space<vmem>>, vector<2x256xf32>
    tpu.vector_store %arg8[%c0_6, %c0_7], %7 {strides = array<i32>} : memref<2x256xf32, #tpu.memory_space<vmem>>, vector<2x256xf32>,
    %c5_i32 = arith.constant 5 : i32
    %9 = arith.cmpi eq, %arg2, %c5_i32 : i32
    %10 = arith.extui %9 : i1 to i32
    %c0_i32_8 = arith.constant 0 : i32
    %11 = arith.cmpi ne, %10, %c0_i32_8 : i32
    scf.if %11 {
      %c0_9 = arith.constant 0 : index
      %c0_10 = arith.constant 0 : index
      %12 = vector.load %arg8[%c0_9, %c0_10] : memref<2x256xf32, #tpu.memory_space<vmem>>, vector<2x256xf32>
      %c0_11 = arith.constant 0 : index
      %c0_12 = arith.constant 0 : index
      %13 = vector.load %arg5[%c0_11, %c0_12] : memref<1x256xf32, #tpu.memory_space<vmem>>, vector<1x256xf32>
      %14 = vector.broadcast %13 : vector<1x256xf32> to vector<2x256xf32>
      %15 = arith.mulf %12, %14 : vector<2x256xf32>
      %c0_13 = arith.constant 0 : index
      %c0_14 = arith.constant 0 : index
      %16 = vector.load %arg6[%c0_13, %c0_14] : memref<1x256xf32, #tpu.memory_space<vmem>>, vector<1x256xf32>
      %17 = vector.broadcast %16 : vector<1x256xf32> to vector<2x256xf32>
      %18 = arith.addf %15, %17 : vector<2x256xf32>
      %cst_15 = arith.constant 0.000000e+00 : f32
      %19 = vector.broadcast %cst_15 : f32 to vector<2x256xf32>
      %20 = arith.maximumf %18, %19 : vector<2x256xf32>
      %21 = arith.truncf %20 : vector<2x256xf32> to vector<2x256xbf16>
      %c0_16 = arith.constant 0 : index
      %c0_17 = arith.constant 0 : index
      %22 = vector.load %arg7[%c0_16, %c0_17] : memref<2x256xbf16, #tpu.memory_space<vmem>>, vector<2x256xbf16>
      tpu.vector_store %arg7[%c0_16, %c0_17], %21 {strides = array<i32>} : memref<2x256xbf16, #tpu.memory_space<vmem>>, vector<2x256xbf16>,
    } else {
    }
    return
  }
  func.func @transform_0(%arg0: i32, %arg1: i32, %arg2: i32) -> (i32, i32) {
    %c0_i32 = arith.constant 0 : i32
    return %arg0, %arg2 : i32, i32
  }
  func.func @transform_1(%arg0: i32, %arg1: i32, %arg2: i32) -> (i32, i32) {
    %c0_i32 = arith.constant 0 : i32
    return %arg2, %arg1 : i32, i32
  }
  func.func @transform_2(%arg0: i32, %arg1: i32, %arg2: i32) -> (i32, i32) {
    %c0_i32 = arith.constant 0 : i32
    %c0_i32_0 = arith.constant 0 : i32
    return %c0_i32, %arg1 : i32, i32
  }
  func.func @transform_3(%arg0: i32, %arg1: i32, %arg2: i32) -> (i32, i32) {
    %c0_i32 = arith.constant 0 : i32
    %c0_i32_0 = arith.constant 0 : i32
    return %c0_i32, %arg1 : i32, i32
  }
  func.func @transform_4(%arg0: i32, %arg1: i32, %arg2: i32) -> (i32, i32) {
    %c0_i32 = arith.constant 0 : i32
    return %arg0, %arg1 : i32, i32
  }
}

module attributes {stable_mosaic.version = 11 : i64} {
  func.func @_pool_fc_kernel(%arg0: memref<2x1x512xbf16, #tpu.memory_space<vmem>>, %arg1: memref<512x128xbf16, #tpu.memory_space<vmem>>, %arg2: memref<1x128xf32, #tpu.memory_space<vmem>>, %arg3: memref<2x128xf32, #tpu.memory_space<vmem>>) attributes {dimension_semantics = [], scalar_prefetch = 0 : i64, scratch_operands = 0 : i64, tpu.core_type = #tpu.core_type<tc>} {
    %c0 = arith.constant 0 : index
    %c0_0 = arith.constant 0 : index
    %c0_1 = arith.constant 0 : index
    %0 = vector.load %arg0[%c0, %c0_0, %c0_1] : memref<2x1x512xbf16, #tpu.memory_space<vmem>>, vector<2x1x512xbf16>
    %1 = arith.extf %0 : vector<2x1x512xbf16> to vector<2x1x512xf32>
    %cst = arith.constant dense<0.000000e+00> : vector<2x512xf32>
    %2 = vector.multi_reduction <add>, %1, %cst [1] : vector<2x1x512xf32> to vector<2x512xf32>
    %cst_2 = arith.constant 1.000000e+00 : f32
    %3 = vector.broadcast %cst_2 : f32 to vector<2x512xf32>
    %4 = arith.divf %2, %3 : vector<2x512xf32>
    %5 = arith.truncf %4 : vector<2x512xf32> to vector<2x512xbf16>
    %c0_3 = arith.constant 0 : index
    %c0_4 = arith.constant 0 : index
    %6 = vector.load %arg1[%c0_3, %c0_4] : memref<512x128xbf16, #tpu.memory_space<vmem>>, vector<512x128xbf16>
    %cst_5 = arith.constant dense<0.000000e+00> : vector<2x128xf32>
    %7 = tpu.matmul %5, %6, %cst_5 {dimension_numbers = #tpu.dot_dimension_numbers<[1], [0], [0], [1], [0, 0, 1, 1], [], []>} : vector<2x512xbf16>, vector<512x128xbf16>, vector<2x128xf32> -> vector<2x128xf32>
    %c0_6 = arith.constant 0 : index
    %c0_7 = arith.constant 0 : index
    %8 = vector.load %arg2[%c0_6, %c0_7] : memref<1x128xf32, #tpu.memory_space<vmem>>, vector<1x128xf32>
    %9 = vector.broadcast %8 : vector<1x128xf32> to vector<2x128xf32>
    %10 = arith.addf %7, %9 : vector<2x128xf32>
    %c0_8 = arith.constant 0 : index
    %c0_9 = arith.constant 0 : index
    %11 = vector.load %arg3[%c0_8, %c0_9] : memref<2x128xf32, #tpu.memory_space<vmem>>, vector<2x128xf32>
    tpu.vector_store %arg3[%c0_8, %c0_9], %10 {strides = array<i32>} : memref<2x128xf32, #tpu.memory_space<vmem>>, vector<2x128xf32>,
    return
  }
}

</mosaic_0001>

<bundles_post_ra>
// kernel: _lambda_.23
= control target key start
LH: loop header
LB: loop body
LE: loop exit
PB: predicated region body
PF: predicated region fallthrough
CT: control target
= control target key end

     0   :  { %v2037_v0 = vmov 0   ;;  %vm22_vm0 = vcmask 523264   ;;  %v2038_v19 = vmov 0.0   ;;  %vm1610_vm1 = vcmask 519168   ;;  %s2936_s1 = inlined_call_operand.vmem [shape: bf16[256,64], index: 1, kind: input, shape index: {}]   ;;  %s2937_s0 = inlined_call_operand.vmem [shape: bf16[512,256], index: 0, kind: input, shape index: {}]   ;;  %s2938_s2 = inlined_call_operand.vmem [shape: f32[1,64], index: 2, kind: input, shape index: {}]   ;;  %s2939_s3 = inlined_call_operand.vmem [shape: f32[1,64], index: 3, kind: input, shape index: {}]   ;;  %s2940_s4 = inlined_call_operand.vmem [shape: bf16[512,64], index: 4, kind: output, shape index: {}]  }
   0x1   :  { %663 = vmatprep.subr.bf16.mxu0 %v2037_v0  ;;  %1889 = vmatprep.subr.bf16.mxu1 %v2037_v0  ;;  %v1923_v1 = vld [vmem:[%s2936_s1] sm:$0xff]   ;;  %v1924_v2 = vld [vmem:[%s2936_s1 + $0x8] sm:$0xff]   ;;  %v1925_v3 = vld [vmem:[%s2936_s1 + $0x10] sm:$0xff]   ;;  %23 = vst.msk [vmem:[#allocation2] sm:$0xff] %vm22_vm0, %v2038_v19 }
   0x2   :  { %664 = vmatpush1.bf16.msra.mxu0 %v1923_v1  ;;  %1905 = vmatpush1.bf16.msra.mxu1 %v1923_v1  ;;  %v1926_v4 = vld [vmem:[%s2936_s1 + $0x18] sm:$0xff]   ;;  %v1927_v5 = vld [vmem:[%s2936_s1 + $0x20] sm:$0xff]   ;;  %v1928_v7 = vld [vmem:[%s2936_s1 + $0x28] sm:$0xff]   ;;  %24 = vst.msk [vmem:[#allocation2 + $0x8] sm:$0xff] %vm22_vm0, %v2038_v19 }
   0x3   :  { %665 = vmatprep.subr.bf16.mxu0 %v2037_v0  ;;  %1890 = vmatprep.subr.bf16.mxu1 %v2037_v0  ;;  %v1941_v6 = vld [vmem:[%s2937_s0 + $0x4] ss:$8 sps:$4 sm:$0xff]   ;;  %v1929_v9 = vld [vmem:[%s2936_s1 + $0x30] sm:$0xff]   ;;  %v1930_v10 = vld [vmem:[%s2936_s1 + $0x38] sm:$0xff]   ;;  %25 = vst.msk [vmem:[#allocation2 + $0x10] sm:$0xff] %vm22_vm0, %v2038_v19 }
   0x4   :  { %v1944_v8 = vld [vmem:[%s2937_s0 + $0x104] ss:$8 sps:$4 sm:$0xff]   ;;  %695 = vmatprep.mubr.bf16.mxu0 %v1941_v6  ;;  %v1933_v13 = vld [vmem:[%s2936_s1 + $0x50] sm:$0xff]   ;;  %v1934_v14 = vld [vmem:[%s2936_s1 + $0x58] sm:$0xff]   ;;  %26 = vst.msk [vmem:[#allocation2 + $0x18] sm:$0xff] %vm22_vm0, %v2038_v19 }
   0x5   :  { %823 = vmatprep.mubr.bf16.mxu1 %v1944_v8  ;;  %v1931_v11 = vld [vmem:[%s2936_s1 + $0x40] sm:$0xff]   ;;  %v1932_v12 = vld [vmem:[%s2936_s1 + $0x48] sm:$0xff]   ;;  %v1937_v17 = vld [vmem:[%s2936_s1 + $0x70] sm:$0xff]   ;;  %27 = vst.msk [vmem:[#allocation2 + $0x20] sm:$0xff] %vm22_vm0, %v2038_v19 }
   0x6   :  { %666 = vmatpush1.bf16.msra.mxu0 %v1924_v2  ;;  %1906 = vmatpush1.bf16.msra.mxu1 %v1924_v2  ;;  %v1935_v15 = vld [vmem:[%s2936_s1 + $0x60] sm:$0xff]   ;;  %v1936_v16 = vld [vmem:[%s2936_s1 + $0x68] sm:$0xff]   ;;  %v2148_v18 = vld [vmem:[%s2936_s1 + $0x78] sm:$0xff]   ;;  %28 = vst.msk [vmem:[#allocation2 + $0x28] sm:$0xff] %vm22_vm0, %v2038_v19 }
   0x7   :  { %667 = vmatprep.subr.bf16.mxu0 %v2037_v0  ;;  %1891 = vmatprep.subr.bf16.mxu1 %v2037_v0  ;;  %29 = vst.msk [vmem:[#allocation2 + $0x30] sm:$0xff] %vm22_vm0, %v2038_v19  ;;  %30 = vst.msk [vmem:[#allocation2 + $0x38] sm:$0xff] %vm22_vm0, %v2038_v19  ;;  %v1939_v20 = vld [vmem:[%s2937_s0] ss:$8 sps:$4 sm:$0xff]   ;;  %v1945_v22 = vld [vmem:[%s2937_s0 + $0x14] ss:$8 sps:$4 sm:$0xff]  }
   0x8   :  { %31 = vst.msk [vmem:[#allocation2 + $0x40] sm:$0xff] %vm22_vm0, %v2038_v19  ;;  %32 = vst.msk [vmem:[#allocation2 + $0x48] sm:$0xff] %vm22_vm0, %v2038_v19  ;;  %v1942_v21 = vld [vmem:[%s2937_s0 + $0x100] ss:$8 sps:$4 sm:$0xff]   ;;  %v1947_v23 = vld [vmem:[%s2937_s0 + $0x114] ss:$8 sps:$4 sm:$0xff]  }
   0x9   :  { %33 = vst.msk [vmem:[#allocation2 + $0x50] sm:$0xff] %vm22_vm0, %v2038_v19  ;;  %34 = vst.msk [vmem:[#allocation2 + $0x58] sm:$0xff] %vm22_vm0, %v2038_v19  ;;  %v1949_v24 = vld [vmem:[%s2937_s0 + $0x10] ss:$8 sps:$4 sm:$0xff]   ;;  %v1951_v26 = vld [vmem:[%s2937_s0 + $0x24] ss:$8 sps:$4 sm:$0xff]  }
   0xa   :  { %668 = vmatpush1.bf16.msra.mxu0 %v1925_v3  ;;  %1907 = vmatpush1.bf16.msra.mxu1 %v1925_v3  ;;  %35 = vst.msk [vmem:[#allocation2 + $0x60] sm:$0xff] %vm22_vm0, %v2038_v19  ;;  %36 = vst.msk [vmem:[#allocation2 + $0x68] sm:$0xff] %vm22_vm0, %v2038_v19  ;;  %v1950_v25 = vld [vmem:[%s2937_s0 + $0x110] ss:$8 sps:$4 sm:$0xff]   ;;  %v1953_v27 = vld [vmem:[%s2937_s0 + $0x124] ss:$8 sps:$4 sm:$0xff]  }
   0xb   :  { %669 = vmatprep.subr.bf16.mxu0 %v2037_v0  ;;  %1892 = vmatprep.subr.bf16.mxu1 %v2037_v0  ;;  %37 = vst.msk [vmem:[#allocation2 + $0x70] sm:$0xff] %vm22_vm0, %v2038_v19  ;;  %38 = vst.msk [vmem:[#allocation2 + $0x78] sm:$0xff] %vm22_vm0, %v2038_v19  ;;  %v1955_v28 = vld [vmem:[%s2937_s0 + $0x20] ss:$8 sps:$4 sm:$0xff]   ;;  %v1957_v30 = vld [vmem:[%s2937_s0 + $0x34] ss:$8 sps:$4 sm:$0xff]  }
   0xc   :  { %39 = vst.msk [vmem:[#allocation2 + $0x80] sm:$0xff] %vm22_vm0, %v2038_v19  ;;  %40 = vst.msk [vmem:[#allocation2 + $0x88] sm:$0xff] %vm22_vm0, %v2038_v19  ;;  %v1956_v29 = vld [vmem:[%s2937_s0 + $0x120] ss:$8 sps:$4 sm:$0xff]   ;;  %v1959_v31 = vld [vmem:[%s2937_s0 + $0x134] ss:$8 sps:$4 sm:$0xff]  }
   0xd   :  { %41 = vst.msk [vmem:[#allocation2 + $0x90] sm:$0xff] %vm22_vm0, %v2038_v19  ;;  %42 = vst.msk [vmem:[#allocation2 + $0x98] sm:$0xff] %vm22_vm0, %v2038_v19  ;;  %v1961_v32 = vld [vmem:[%s2937_s0 + $0x30] ss:$8 sps:$4 sm:$0xff]   ;;  %v1963_v34 = vld [vmem:[%s2937_s0 + $0x44] ss:$8 sps:$4 sm:$0xff]  }
   0xe   :  { %670 = vmatpush1.bf16.msra.mxu0 %v1926_v4  ;;  %1908 = vmatpush1.bf16.msra.mxu1 %v1926_v4  ;;  %43 = vst.msk [vmem:[#allocation2 + $0xa0] sm:$0xff] %vm22_vm0, %v2038_v19  ;;  %44 = vst.msk [vmem:[#allocation2 + $0xa8] sm:$0xff] %vm22_vm0, %v2038_v19  ;;  %v1962_v33 = vld [vmem:[%s2937_s0 + $0x130] ss:$8 sps:$4 sm:$0xff]   ;;  %v1965_v35 = vld [vmem:[%s2937_s0 + $0x144] ss:$8 sps:$4 sm:$0xff]  }
   0xf   :  { %671 = vmatprep.subr.bf16.mxu0 %v2037_v0  ;;  %1893 = vmatprep.subr.bf16.mxu1 %v2037_v0  ;;  %45 = vst.msk [vmem:[#allocation2 + $0xb0] sm:$0xff] %vm22_vm0, %v2038_v19  ;;  %46 = vst.msk [vmem:[#allocation2 + $0xb8] sm:$0xff] %vm22_vm0, %v2038_v19  ;;  %v1967_v36 = vld [vmem:[%s2937_s0 + $0x40] ss:$8 sps:$4 sm:$0xff]   ;;  %v1969_v38 = vld [vmem:[%s2937_s0 + $0x54] ss:$8 sps:$4 sm:$0xff]  }
  0x10   :  { %47 = vst.msk [vmem:[#allocation2 + $0xc0] sm:$0xff] %vm22_vm0, %v2038_v19  ;;  %48 = vst.msk [vmem:[#allocation2 + $0xc8] sm:$0xff] %vm22_vm0, %v2038_v19  ;;  %v1968_v37 = vld [vmem:[%s2937_s0 + $0x140] ss:$8 sps:$4 sm:$0xff]   ;;  %v1971_v39 = vld [vmem:[%s2937_s0 + $0x154] ss:$8 sps:$4 sm:$0xff]  }
  0x11   :  { %49 = vst.msk [vmem:[#allocation2 + $0xd0] sm:$0xff] %vm22_vm0, %v2038_v19  ;;  %50 = vst.msk [vmem:[#allocation2 + $0xd8] sm:$0xff] %vm22_vm0, %v2038_v19  ;;  %v1973_v40 = vld [vmem:[%s2937_s0 + $0x50] ss:$8 sps:$4 sm:$0xff]   ;;  %v1975_v42 = vld [vmem:[%s2937_s0 + $0x64] ss:$8 sps:$4 sm:$0xff]  }
  0x12   :  { %672 = vmatpush1.bf16.msra.mxu0 %v1927_v5  ;;  %1909 = vmatpush1.bf16.msra.mxu1 %v1927_v5  ;;  %51 = vst.msk [vmem:[#allocation2 + $0xe0] sm:$0xff] %vm22_vm0, %v2038_v19  ;;  %52 = vst.msk [vmem:[#allocation2 + $0xe8] sm:$0xff] %vm22_vm0, %v2038_v19  ;;  %v1974_v41 = vld [vmem:[%s2937_s0 + $0x150] ss:$8 sps:$4 sm:$0xff]   ;;  %v1977_v43 = vld [vmem:[%s2937_s0 + $0x164] ss:$8 sps:$4 sm:$0xff]  }
  0x13   :  { %673 = vmatprep.subr.bf16.mxu0 %v2037_v0  ;;  %1894 = vmatprep.subr.bf16.mxu1 %v2037_v0  ;;  %53 = vst.msk [vmem:[#allocation2 + $0xf0] sm:$0xff] %vm22_vm0, %v2038_v19  ;;  %54 = vst.msk [vmem:[#allocation2 + $0xf8] sm:$0xff] %vm22_vm0, %v2038_v19  ;;  %v1979_v44 = vld [vmem:[%s2937_s0 + $0x60] ss:$8 sps:$4 sm:$0xff]   ;;  %v1981_v46 = vld [vmem:[%s2937_s0 + $0x74] ss:$8 sps:$4 sm:$0xff]  }
  0x14   :  { %55 = vst.msk [vmem:[#allocation2 + $0x100] sm:$0xff] %vm22_vm0, %v2038_v19  ;;  %56 = vst.msk [vmem:[#allocation2 + $0x108] sm:$0xff] %vm22_vm0, %v2038_v19  ;;  %v1980_v45 = vld [vmem:[%s2937_s0 + $0x160] ss:$8 sps:$4 sm:$0xff]   ;;  %v1983_v47 = vld [vmem:[%s2937_s0 + $0x174] ss:$8 sps:$4 sm:$0xff]  }
  0x15   :  { %57 = vst.msk [vmem:[#allocation2 + $0x110] sm:$0xff] %vm22_vm0, %v2038_v19  ;;  %58 = vst.msk [vmem:[#allocation2 + $0x118] sm:$0xff] %vm22_vm0, %v2038_v19  ;;  %v1985_v48 = vld [vmem:[%s2937_s0 + $0x70] ss:$8 sps:$4 sm:$0xff]   ;;  %v1987_v50 = vld [vmem:[%s2937_s0 + $0x84] ss:$8 sps:$4 sm:$0xff]  }
  0x16   :  { %674 = vmatpush1.bf16.msra.mxu0 %v1928_v7  ;;  %1910 = vmatpush1.bf16.msra.mxu1 %v1928_v7  ;;  %59 = vst.msk [vmem:[#allocation2 + $0x120] sm:$0xff] %vm22_vm0, %v2038_v19  ;;  %60 = vst.msk [vmem:[#allocation2 + $0x128] sm:$0xff] %vm22_vm0, %v2038_v19  ;;  %v1986_v49 = vld [vmem:[%s2937_s0 + $0x170] ss:$8 sps:$4 sm:$0xff]   ;;  %v1989_v51 = vld [vmem:[%s2937_s0 + $0x184] ss:$8 sps:$4 sm:$0xff]  }
  0x17   :  { %675 = vmatprep.subr.bf16.mxu0 %v2037_v0  ;;  %1895 = vmatprep.subr.bf16.mxu1 %v2037_v0  ;;  %61 = vst.msk [vmem:[#allocation2 + $0x130] sm:$0xff] %vm22_vm0, %v2038_v19  ;;  %62 = vst.msk [vmem:[#allocation2 + $0x138] sm:$0xff] %vm22_vm0, %v2038_v19  ;;  %v1991_v52 = vld [vmem:[%s2937_s0 + $0x80] ss:$8 sps:$4 sm:$0xff]   ;;  %v1993_v54 = vld [vmem:[%s2937_s0 + $0x94] ss:$8 sps:$4 sm:$0xff]  }
  0x18   :  { %63 = vst.msk [vmem:[#allocation2 + $0x140] sm:$0xff] %vm22_vm0, %v2038_v19  ;;  %64 = vst.msk [vmem:[#allocation2 + $0x148] sm:$0xff] %vm22_vm0, %v2038_v19  ;;  %v1992_v53 = vld [vmem:[%s2937_s0 + $0x180] ss:$8 sps:$4 sm:$0xff]   ;;  %v1995_v55 = vld [vmem:[%s2937_s0 + $0x194] ss:$8 sps:$4 sm:$0xff]  }
  0x19   :  { %65 = vst.msk [vmem:[#allocation2 + $0x150] sm:$0xff] %vm22_vm0, %v2038_v19  ;;  %66 = vst.msk [vmem:[#allocation2 + $0x158] sm:$0xff] %vm22_vm0, %v2038_v19  ;;  %v1997_v56 = vld [vmem:[%s2937_s0 + $0x90] ss:$8 sps:$4 sm:$0xff]   ;;  %v1999_v58 = vld [vmem:[%s2937_s0 + $0xa4] ss:$8 sps:$4 sm:$0xff]  }
  0x1a   :  { %676 = vmatpush1.bf16.msra.mxu0 %v1929_v9  ;;  %1911 = vmatpush1.bf16.msra.mxu1 %v1929_v9  ;;  %67 = vst.msk [vmem:[#allocation2 + $0x160] sm:$0xff] %vm22_vm0, %v2038_v19  ;;  %68 = vst.msk [vmem:[#allocation2 + $0x168] sm:$0xff] %vm22_vm0, %v2038_v19  ;;  %v1998_v57 = vld [vmem:[%s2937_s0 + $0x190] ss:$8 sps:$4 sm:$0xff]   ;;  %v2001_v59 = vld [vmem:[%s2937_s0 + $0x1a4] ss:$8 sps:$4 sm:$0xff]  }
  0x1b   :  { %677 = vmatprep.subr.bf16.mxu0 %v2037_v0  ;;  %1896 = vmatprep.subr.bf16.mxu1 %v2037_v0  ;;  %69 = vst.msk [vmem:[#allocation2 + $0x170] sm:$0xff] %vm22_vm0, %v2038_v19  ;;  %70 = vst.msk [vmem:[#allocation2 + $0x178] sm:$0xff] %vm22_vm0, %v2038_v19  ;;  %v2003_v60 = vld [vmem:[%s2937_s0 + $0xa0] ss:$8 sps:$4 sm:$0xff]   ;;  %v2005_v62 = vld [vmem:[%s2937_s0 + $0xb4] ss:$8 sps:$4 sm:$0xff]  }
  0x1c   :  { %71 = vst.msk [vmem:[#allocation2 + $0x180] sm:$0xff] %vm22_vm0, %v2038_v19  ;;  %72 = vst.msk [vmem:[#allocation2 + $0x188] sm:$0xff] %vm22_vm0, %v2038_v19  ;;  %v2004_v61 = vld [vmem:[%s2937_s0 + $0x1a0] ss:$8 sps:$4 sm:$0xff]   ;;  %v2007_v63 = vld [vmem:[%s2937_s0 + $0x1b4] ss:$8 sps:$4 sm:$0xff]  }
  0x1d   :  { %73 = vst.msk [vmem:[#allocation2 + $0x190] sm:$0xff] %vm22_vm0, %v2038_v19  ;;  %74 = vst.msk [vmem:[#allocation2 + $0x198] sm:$0xff] %vm22_vm0, %v2038_v19  ;;  %v2010_v1 = vld [vmem:[%s2937_s0 + $0x1b0] ss:$8 sps:$4 sm:$0xff]   ;;  %v2011_v2 = vld [vmem:[%s2937_s0 + $0xc4] ss:$8 sps:$4 sm:$0xff]  }
  0x1e   :  { %678 = vmatpush1.bf16.msra.mxu0 %v1930_v10  ;;  %1912 = vmatpush1.bf16.msra.mxu1 %v1930_v10  ;;  %75 = vst.msk [vmem:[#allocation2 + $0x1a0] sm:$0xff] %vm22_vm0, %v2038_v19  ;;  %76 = vst.msk [vmem:[#allocation2 + $0x1a8] sm:$0xff] %vm22_vm0, %v2038_v19  ;;  %v2013_v3 = vld [vmem:[%s2937_s0 + $0x1c4] ss:$8 sps:$4 sm:$0xff]   ;;  %v2015_v4 = vld [vmem:[%s2937_s0 + $0xc0] ss:$8 sps:$4 sm:$0xff]  }
  0x1f   :  { %679 = vmatprep.subr.bf16.mxu0 %v2037_v0  ;;  %1897 = vmatprep.subr.bf16.mxu1 %v2037_v0  ;;  %77 = vst.msk [vmem:[#allocation2 + $0x1b0] sm:$0xff] %vm22_vm0, %v2038_v19  ;;  %78 = vst.msk [vmem:[#allocation2 + $0x1b8] sm:$0xff] %vm22_vm0, %v2038_v19  ;;  %v2016_v5 = vld [vmem:[%s2937_s0 + $0x1c0] ss:$8 sps:$4 sm:$0xff]   ;;  %v2017_v6 = vld [vmem:[%s2937_s0 + $0xd4] ss:$8 sps:$4 sm:$0xff]  }
  0x20   :  { %79 = vst.msk [vmem:[#allocation2 + $0x1c0] sm:$0xff] %vm22_vm0, %v2038_v19  ;;  %80 = vst.msk [vmem:[#allocation2 + $0x1c8] sm:$0xff] %vm22_vm0, %v2038_v19  ;;  %v2019_v7 = vld [vmem:[%s2937_s0 + $0x1d4] ss:$8 sps:$4 sm:$0xff]   ;;  %v2021_v8 = vld [vmem:[%s2937_s0 + $0xd0] ss:$8 sps:$4 sm:$0xff]  }
  0x21   :  { %81 = vst.msk [vmem:[#allocation2 + $0x1d0] sm:$0xff] %vm22_vm0, %v2038_v19  ;;  %82 = vst.msk [vmem:[#allocation2 + $0x1d8] sm:$0xff] %vm22_vm0, %v2038_v19  ;;  %v2022_v9 = vld [vmem:[%s2937_s0 + $0x1d0] ss:$8 sps:$4 sm:$0xff]   ;;  %v2023_v10 = vld [vmem:[%s2937_s0 + $0xe4] ss:$8 sps:$4 sm:$0xff]  }
  0x22   :  { %680 = vmatpush1.bf16.msra.mxu0 %v1931_v11  ;;  %1913 = vmatpush1.bf16.msra.mxu1 %v1931_v11  ;;  %83 = vst.msk [vmem:[#allocation2 + $0x1e0] sm:$0xff] %vm22_vm0, %v2038_v19  ;;  %84 = vst.msk [vmem:[#allocation2 + $0x1e8] sm:$0xff] %vm22_vm0, %v2038_v19  ;;  %v2025_v11 = vld [vmem:[%s2937_s0 + $0x1e4] ss:$8 sps:$4 sm:$0xff]  }
  0x23   :  { %681 = vmatprep.subr.bf16.mxu0 %v2037_v0  ;;  %1898 = vmatprep.subr.bf16.mxu1 %v2037_v0  ;;  %85 = vst.msk [vmem:[#allocation2 + $0x1f0] sm:$0xff] %vm22_vm0, %v2038_v19  ;;  %86 = vst.msk [vmem:[#allocation2 + $0x1f8] sm:$0xff] %vm22_vm0, %v2038_v19  ;;  %v119_v19 = vld [vmem:[#allocation2 + $0x100] sm:$0xff] }
  0x26   :  { %682 = vmatpush1.bf16.msra.mxu0 %v1932_v12  ;;  %1914 = vmatpush1.bf16.msra.mxu1 %v1932_v12  ;;  %v2027_v12 = vld [vmem:[%s2937_s0 + $0xe0] ss:$8 sps:$4 sm:$0xff]  }
  0x27   :  { %683 = vmatprep.subr.bf16.mxu0 %v2037_v0  ;;  %1899 = vmatprep.subr.bf16.mxu1 %v2037_v0 }
  0x2a   :  { %684 = vmatpush1.bf16.msra.mxu0 %v1933_v13  ;;  %1915 = vmatpush1.bf16.msra.mxu1 %v1933_v13  ;;  %v2028_v13 = vld [vmem:[%s2937_s0 + $0x1e0] ss:$8 sps:$4 sm:$0xff]  }
  0x2b   :  { %685 = vmatprep.subr.bf16.mxu0 %v2037_v0  ;;  %1900 = vmatprep.subr.bf16.mxu1 %v2037_v0 }
  0x2e   :  { %686 = vmatpush1.bf16.msra.mxu0 %v1934_v14  ;;  %1916 = vmatpush1.bf16.msra.mxu1 %v1934_v14  ;;  %v2029_v14 = vld [vmem:[%s2937_s0 + $0xf4] ss:$8 sps:$4 sm:$0xff]  }
  0x2f   :  { %687 = vmatprep.subr.bf16.mxu0 %v2037_v0  ;;  %1901 = vmatprep.subr.bf16.mxu1 %v2037_v0 }
  0x32   :  { %688 = vmatpush1.bf16.msra.mxu0 %v1935_v15  ;;  %1917 = vmatpush1.bf16.msra.mxu1 %v1935_v15  ;;  %v2031_v15 = vld [vmem:[%s2937_s0 + $0x1f4] ss:$8 sps:$4 sm:$0xff]  }
  0x33   :  { %689 = vmatprep.subr.bf16.mxu0 %v2037_v0  ;;  %1902 = vmatprep.subr.bf16.mxu1 %v2037_v0 }
  0x36   :  { %690 = vmatpush1.bf16.msra.mxu0 %v1936_v16  ;;  %1918 = vmatpush1.bf16.msra.mxu1 %v1936_v16  ;;  %v2033_v16 = vld [vmem:[%s2937_s0 + $0xf0] ss:$8 sps:$4 sm:$0xff]  }
  0x37   :  { %691 = vmatprep.subr.bf16.mxu0 %v2037_v0  ;;  %1903 = vmatprep.subr.bf16.mxu1 %v2037_v0 }
  0x3a   :  { %692 = vmatpush1.bf16.msra.mxu0 %v1937_v17  ;;  %1919 = vmatpush1.bf16.msra.mxu1 %v1937_v17  ;;  %v2034_v17 = vld [vmem:[%s2937_s0 + $0x1f0] ss:$8 sps:$4 sm:$0xff]  }
  0x3b   :  { %693 = vmatprep.subr.bf16.mxu0 %v2037_v0  ;;  %1904 = vmatprep.subr.bf16.mxu1 %v2037_v0  ;;  %v2009_v0 = vld [vmem:[%s2937_s0 + $0xb0] ss:$8 sps:$4 sm:$0xff]  }
  0x3e   :  { %694 = vmatpush1.bf16.msra.mxu0 %v2148_v18  ;;  %1920 = vmatpush1.bf16.msra.mxu1 %v2148_v18  ;;  %v87_v18 = vld [vmem:[#allocation2] sm:$0xff] }
  0x41   :  { %696 = vmatmul.mubr.bf16.vlgmr.msra.gmra.mrb[0].mxu0 %v1939_v20  ;;  %824 = vmatmul.mubr.bf16.vlgmr.msra.gmra.mrb[0].mxu1 %v1942_v21 }
  0x42   :  { %703 = vmatprep.mubr.bf16.mxu0 %v1945_v22  ;;  %831 = vmatprep.mubr.bf16.mxu1 %v1947_v23  ;;  %v88_v22 = vld [vmem:[#allocation2 + $0x8] sm:$0xff] }
  0x43   :  { %v120_v23 = vld [vmem:[#allocation2 + $0x108] sm:$0xff] }
  0x49   :  { %704 = vmatmul.mubr.bf16.gmra.mrb[4].mxu0 %v1949_v24  ;;  %832 = vmatmul.mubr.bf16.gmra.mrb[4].mxu1 %v1950_v25 }
  0x4a   :  { %711 = vmatprep.mubr.bf16.mxu0 %v1951_v26  ;;  %839 = vmatprep.mubr.bf16.mxu1 %v1953_v27 }
  0x51   :  { %712 = vmatmul.mubr.bf16.gmra.mrb[8].mxu0 %v1955_v28  ;;  %840 = vmatmul.mubr.bf16.gmra.mrb[8].mxu1 %v1956_v29 }
  0x52   :  { %719 = vmatprep.mubr.bf16.mxu0 %v1957_v30  ;;  %847 = vmatprep.mubr.bf16.mxu1 %v1959_v31 }
  0x59   :  { %720 = vmatmul.mubr.bf16.gmra.mrb[12].mxu0 %v1961_v32  ;;  %848 = vmatmul.mubr.bf16.gmra.mrb[12].mxu1 %v1962_v33 }
  0x5a   :  { %727 = vmatprep.mubr.bf16.mxu0 %v1963_v34  ;;  %855 = vmatprep.mubr.bf16.mxu1 %v1965_v35  ;;  %v89_v34 = vld [vmem:[#allocation2 + $0x10] sm:$0xff] }
  0x5b   :  { %v121_v35 = vld [vmem:[#allocation2 + $0x110] sm:$0xff] }
  0x61   :  { %728 = vmatmul.mubr.bf16.gmra.mrb[16].mxu0 %v1967_v36  ;;  %856 = vmatmul.mubr.bf16.gmra.mrb[16].mxu1 %v1968_v37  ;;  %v2475_v36 = vld [vmem:[%s2938_s2] ss:$0 sm:$0xff] }
  0x62   :  { %735 = vmatprep.mubr.bf16.mxu0 %v1969_v38  ;;  %863 = vmatprep.mubr.bf16.mxu1 %v1971_v39  ;;  %v90_v39 = vld [vmem:[#allocation2 + $0x18] sm:$0xff] }
  0x69   :  { %736 = vmatmul.mubr.bf16.gmra.mrb[20].mxu0 %v1973_v40  ;;  %864 = vmatmul.mubr.bf16.gmra.mrb[20].mxu1 %v1974_v41  ;;  %v122_v40 = vld [vmem:[#allocation2 + $0x118] sm:$0xff] }
  0x6a   :  { %743 = vmatprep.mubr.bf16.mxu0 %v1975_v42  ;;  %871 = vmatprep.mubr.bf16.mxu1 %v1977_v43 }
  0x71   :  { %744 = vmatmul.mubr.bf16.gmra.mrb[24].mxu0 %v1979_v44  ;;  %872 = vmatmul.mubr.bf16.gmra.mrb[24].mxu1 %v1980_v45 }
  0x72   :  { %751 = vmatprep.mubr.bf16.mxu0 %v1981_v46  ;;  %879 = vmatprep.mubr.bf16.mxu1 %v1983_v47  ;;  %v2480_v46 = vld [vmem:[%s2939_s3] ss:$0 sm:$0xff] }
  0x79   :  { %752 = vmatmul.mubr.bf16.gmra.mrb[28].mxu0 %v1985_v48  ;;  %880 = vmatmul.mubr.bf16.gmra.mrb[28].mxu1 %v1986_v49 }
  0x7a   :  { %759 = vmatprep.mubr.bf16.mxu0 %v1987_v50  ;;  %887 = vmatprep.mubr.bf16.mxu1 %v1989_v51 }
  0x81   :  { %760 = vmatmul.mubr.bf16.gmra.mrb[32].mxu0 %v1991_v52  ;;  %888 = vmatmul.mubr.bf16.gmra.mrb[32].mxu1 %v1992_v53 }
  0x82   :  { %767 = vmatprep.mubr.bf16.mxu0 %v1993_v54  ;;  %895 = vmatprep.mubr.bf16.mxu1 %v1995_v55 }
  0x89   :  { %768 = vmatmul.mubr.bf16.gmra.mrb[36].mxu0 %v1997_v56  ;;  %896 = vmatmul.mubr.bf16.gmra.mrb[36].mxu1 %v1998_v57 }
  0x8a   :  { %775 = vmatprep.mubr.bf16.mxu0 %v1999_v58  ;;  %903 = vmatprep.mubr.bf16.mxu1 %v2001_v59 }
  0x91   :  { %776 = vmatmul.mubr.bf16.gmra.mrb[40].mxu0 %v2003_v60  ;;  %904 = vmatmul.mubr.bf16.gmra.mrb[40].mxu1 %v2004_v61 }
  0x92   :  { %783 = vmatprep.mubr.bf16.mxu0 %v2005_v62  ;;  %911 = vmatprep.mubr.bf16.mxu1 %v2007_v63 }
  0x99   :  { %784 = vmatmul.mubr.bf16.gmra.mrb[44].mxu0 %v2009_v0  ;;  %912 = vmatmul.mubr.bf16.gmra.mrb[44].mxu1 %v2010_v1 }
  0x9a   :  { %791 = vmatprep.mubr.bf16.mxu0 %v2011_v2  ;;  %919 = vmatprep.mubr.bf16.mxu1 %v2013_v3  ;;  %v91_v2 = vld [vmem:[#allocation2 + $0x20] sm:$0xff] }
  0x9b   :  { %v123_v3 = vld [vmem:[#allocation2 + $0x120] sm:$0xff] }
  0xa1   :  { %792 = vmatmul.mubr.bf16.gmra.mrb[48].mxu0 %v2015_v4  ;;  %920 = vmatmul.mubr.bf16.gmra.mrb[48].mxu1 %v2016_v5 }
  0xa2   :  { %799 = vmatprep.mubr.bf16.mxu0 %v2017_v6  ;;  %927 = vmatprep.mubr.bf16.mxu1 %v2019_v7 }
  0xa9   :  { %800 = vmatmul.mubr.bf16.gmra.mrb[52].mxu0 %v2021_v8  ;;  %928 = vmatmul.mubr.bf16.gmra.mrb[52].mxu1 %v2022_v9 }
  0xaa   :  { %807 = vmatprep.mubr.bf16.mxu0 %v2023_v10  ;;  %935 = vmatprep.mubr.bf16.mxu1 %v2025_v11 }
  0xb1   :  { %808 = vmatmul.mubr.bf16.gmra.mrb[56].mxu0 %v2027_v12  ;;  %936 = vmatmul.mubr.bf16.gmra.mrb[56].mxu1 %v2028_v13  ;;  %v92_v12 = vld [vmem:[#allocation2 + $0x28] sm:$0xff] }
  0xb2   :  { %815 = vmatprep.mubr.bf16.mxu0 %v2029_v14  ;;  %943 = vmatprep.mubr.bf16.mxu1 %v2031_v15  ;;  %v124_v13 = vld [vmem:[#allocation2 + $0x128] sm:$0xff] }
  0xb9   :  { %816 = vmatmul.mubr.bf16.gmra.mrb[60].mxu0 %v2033_v16  ;;  %944 = vmatmul.mubr.bf16.gmra.mrb[60].mxu1 %v2034_v17 }
 0x114   :  { %v697_v20 = vpop.f32.mrb[0].mxu0  ;;  %v825_v21 = vpop.f32.mrb[0].mxu1 }
 0x115   :  { %v952_v24 = vadd.f32 %v697_v20, %v87_v18  ;;  %v984_v25 = vadd.f32 %v825_v21, %v119_v19  ;;  %v699_v26 = vpop.f32.mrb[1].mxu0  ;;  %v827_v27 = vpop.f32.mrb[1].mxu1 }
 0x116   :  { %v700_v28 = vpop.f32.mrb[2].mxu0  ;;  %v828_v29 = vpop.f32.mrb[2].mxu1 }
 0x117   :  { %1017 = vst.msk [vmem:[#allocation2] sm:$0xff] %vm22_vm0, %v952_v24  ;;  %1049 = vst.msk [vmem:[#allocation2 + $0x100] sm:$0xff] %vm22_vm0, %v984_v25  ;;  %v953_v30 = vadd.f32 %v700_v28, %v88_v22  ;;  %v985_v31 = vadd.f32 %v828_v29, %v120_v23  ;;  %v702_v32 = vpop.f32.mrb[3].mxu0  ;;  %v830_v33 = vpop.f32.mrb[3].mxu1 }
 0x119   :  { %1018 = vst.msk [vmem:[#allocation2 + $0x8] sm:$0xff] %vm22_vm0, %v953_v30  ;;  %1050 = vst.msk [vmem:[#allocation2 + $0x108] sm:$0xff] %vm22_vm0, %v985_v31 }
 0x11c   :  { %v705_v37 = vpop.f32.mrb[4].mxu0  ;;  %v833_v38 = vpop.f32.mrb[4].mxu1 }
 0x11d   :  { %v954_v41 = vadd.f32 %v705_v37, %v89_v34  ;;  %v986_v42 = vadd.f32 %v833_v38, %v121_v35  ;;  %v707_v43 = vpop.f32.mrb[5].mxu0  ;;  %v835_v44 = vpop.f32.mrb[5].mxu1 }
 0x11e   :  { %v1084_v45 = vld [vmem:[#allocation2] sm:$0xff]  ;;  %v708_v48 = vpop.f32.mrb[6].mxu0  ;;  %v836_v49 = vpop.f32.mrb[6].mxu1  ;;  %v94_v43 = vld [vmem:[#allocation2 + $0x38] sm:$0xff] }
 0x11f   :  { %v1116_v47 = vld [vmem:[#allocation2 + $0x100] sm:$0xff]  ;;  %v1155_v50 = vmul.f32 %v2475_v36, %v1084_v45  ;;  %1019 = vst.msk [vmem:[#allocation2 + $0x10] sm:$0xff] %vm22_vm0, %v954_v41  ;;  %1051 = vst.msk [vmem:[#allocation2 + $0x110] sm:$0xff] %vm22_vm0, %v986_v42  ;;  %v955_v52 = vadd.f32 %v708_v48, %v90_v39  ;;  %v987_v53 = vadd.f32 %v836_v49, %v122_v40  ;;  %v710_v54 = vpop.f32.mrb[7].mxu0  ;;  %v838_v55 = vpop.f32.mrb[7].mxu1  ;;  %v93_v39 = vld [vmem:[#allocation2 + $0x30] sm:$0xff] }
 0x120   :  { %v1187_v51 = vmul.f32 %v2475_v36, %v1116_v47  ;;  %v1085_v56 = vld [vmem:[#allocation2 + $0x8] sm:$0xff]  ;;  %v125_v40 = vld [vmem:[#allocation2 + $0x130] sm:$0xff]  ;;  %v126_v44 = vld [vmem:[#allocation2 + $0x138] sm:$0xff] }
 0x121   :  { %v1117_v57 = vld [vmem:[#allocation2 + $0x108] sm:$0xff]  ;;  %v1226_v58 = vadd.f32 %v2480_v46, %v1155_v50  ;;  %v1156_v60 = vmul.f32 %v2475_v36, %v1085_v56  ;;  %1020 = vst.msk [vmem:[#allocation2 + $0x18] sm:$0xff] %vm22_vm0, %v955_v52  ;;  %1052 = vst.msk [vmem:[#allocation2 + $0x118] sm:$0xff] %vm22_vm0, %v987_v53 }
 0x122   :  { %v1258_v59 = vadd.f32 %v2480_v46, %v1187_v51  ;;  %v1188_v61 = vmul.f32 %v2475_v36, %v1117_v57 }
 0x123   :  { %v1290_v62 = vmax.f32 %v1226_v58, 0.0  ;;  %v1227_v0 = vadd.f32 %v2480_v46, %v1156_v60 }
 0x124   :  { %v1322_v63 = vmax.f32 %v1258_v59, 0.0  ;;  %v1259_v1 = vadd.f32 %v2480_v46, %v1188_v61  ;;  %v713_v4 = vpop.f32.mrb[8].mxu0  ;;  %v841_v5 = vpop.f32.mrb[8].mxu1 }
 0x125   :  { %v1825_v6 = vpack.c.bf16 %v1290_v62, %v1290_v62  ;;  %v1291_v8 = vmax.f32 %v1227_v0, 0.0  ;;  %v715_v10 = vpop.f32.mrb[9].mxu0  ;;  %v843_v11 = vpop.f32.mrb[9].mxu1  ;;  %v956_v16 = vadd.f32 %v713_v4, %v91_v2  ;;  %v988_v17 = vadd.f32 %v841_v5, %v123_v3 }
 0x126   :  { %v1857_v7 = vpack.c.bf16 %v1322_v63, %v1322_v63  ;;  %v1323_v9 = vmax.f32 %v1259_v1, 0.0  ;;  %v1086_v14 = vld [vmem:[#allocation2 + $0x10] sm:$0xff]  ;;  %v716_v18 = vpop.f32.mrb[10].mxu0  ;;  %v844_v19 = vpop.f32.mrb[10].mxu1 }
 0x127   :  { %v1118_v15 = vld [vmem:[#allocation2 + $0x110] sm:$0xff]  ;;  %1611 = vst.msk [vmem:[%s2940_s4] sm:$0xf] %vm1610_vm1, %v1825_v6  ;;  %v1826_v20 = vpack.c.bf16 %v1291_v8, %v1291_v8  ;;  %v1157_v22 = vmul.f32 %v2475_v36, %v1086_v14  ;;  %v718_v24 = vpop.f32.mrb[11].mxu0  ;;  %v846_v25 = vpop.f32.mrb[11].mxu1  ;;  %v957_v28 = vadd.f32 %v716_v18, %v92_v12  ;;  %v989_v29 = vadd.f32 %v844_v19, %v124_v13  ;;  %v95_v8 = vld [vmem:[#allocation2 + $0x40] sm:$0xff] }
 0x128   :  { %1643 = vst.msk [vmem:[%s2940_s4 + $0x80] sm:$0xf] %vm1610_vm1, %v1857_v7  ;;  %v1858_v21 = vpack.c.bf16 %v1323_v9, %v1323_v9  ;;  %v1189_v23 = vmul.f32 %v2475_v36, %v1118_v15  ;;  %v1087_v26 = vld [vmem:[#allocation2 + $0x18] sm:$0xff]  ;;  %v127_v9 = vld [vmem:[#allocation2 + $0x140] sm:$0xff] }
 0x129   :  { %v1119_v27 = vld [vmem:[#allocation2 + $0x118] sm:$0xff]  ;;  %1021 = vst.msk [vmem:[#allocation2 + $0x20] sm:$0xff] %vm22_vm0, %v956_v16  ;;  %1053 = vst.msk [vmem:[#allocation2 + $0x120] sm:$0xff] %vm22_vm0, %v988_v17  ;;  %v1228_v30 = vadd.f32 %v2480_v46, %v1157_v22  ;;  %v1158_v32 = vmul.f32 %v2475_v36, %v1087_v26  ;;  %v96_v16 = vld [vmem:[#allocation2 + $0x48] sm:$0xff] }
 0x12a   :  { %1612 = vst.msk [vmem:[%s2940_s4 + $0x4] sm:$0xf] %vm1610_vm1, %v1826_v20  ;;  %1644 = vst.msk [vmem:[%s2940_s4 + $0x84] sm:$0xf] %vm1610_vm1, %v1858_v21  ;;  %v1260_v31 = vadd.f32 %v2480_v46, %v1189_v23  ;;  %v1190_v33 = vmul.f32 %v2475_v36, %v1119_v27  ;;  %v128_v17 = vld [vmem:[#allocation2 + $0x148] sm:$0xff] }
 0x12b   :  { %1022 = vst.msk [vmem:[#allocation2 + $0x28] sm:$0xff] %vm22_vm0, %v957_v28  ;;  %1054 = vst.msk [vmem:[#allocation2 + $0x128] sm:$0xff] %vm22_vm0, %v989_v29  ;;  %v1292_v34 = vmax.f32 %v1228_v30, 0.0  ;;  %v1229_v37 = vadd.f32 %v2480_v46, %v1158_v32 }
 0x12c   :  { %v1324_v35 = vmax.f32 %v1260_v31, 0.0  ;;  %v1261_v38 = vadd.f32 %v2480_v46, %v1190_v33  ;;  %v721_v41 = vpop.f32.mrb[12].mxu0  ;;  %v849_v42 = vpop.f32.mrb[12].mxu1 }
 0x12d   :  { %v1827_v45 = vpack.c.bf16 %v1292_v34, %v1292_v34  ;;  %v1293_v48 = vmax.f32 %v1229_v37, 0.0  ;;  %v723_v50 = vpop.f32.mrb[13].mxu0  ;;  %v851_v51 = vpop.f32.mrb[13].mxu1  ;;  %v958_v52 = vadd.f32 %v721_v41, %v93_v39  ;;  %v990_v53 = vadd.f32 %v849_v42, %v125_v40 }
 0x12e   :  { %v1859_v47 = vpack.c.bf16 %v1324_v35, %v1324_v35  ;;  %v1325_v49 = vmax.f32 %v1261_v38, 0.0  ;;  %v724_v54 = vpop.f32.mrb[14].mxu0  ;;  %v852_v55 = vpop.f32.mrb[14].mxu1 }
 0x12f   :  { %1613 = vst.msk [vmem:[%s2940_s4 + $0x8] sm:$0xf] %vm1610_vm1, %v1827_v45  ;;  %v1828_v56 = vpack.c.bf16 %v1293_v48, %v1293_v48  ;;  %v959_v60 = vadd.f32 %v724_v54, %v94_v43  ;;  %v991_v61 = vadd.f32 %v852_v55, %v126_v44  ;;  %v726_v62 = vpop.f32.mrb[15].mxu0  ;;  %v854_v63 = vpop.f32.mrb[15].mxu1  ;;  %v97_v45 = vld [vmem:[#allocation2 + $0x50] sm:$0xff] }
 0x130   :  { %1645 = vst.msk [vmem:[%s2940_s4 + $0x88] sm:$0xf] %vm1610_vm1, %v1859_v47  ;;  %v1860_v57 = vpack.c.bf16 %v1325_v49, %v1325_v49  ;;  %v1088_v58 = vld [vmem:[#allocation2 + $0x20] sm:$0xff]  ;;  %v129_v47 = vld [vmem:[#allocation2 + $0x150] sm:$0xff] }
 0x131   :  { %v1120_v59 = vld [vmem:[#allocation2 + $0x120] sm:$0xff]  ;;  %v1159_v0 = vmul.f32 %v2475_v36, %v1088_v58  ;;  %1023 = vst.msk [vmem:[#allocation2 + $0x30] sm:$0xff] %vm22_vm0, %v958_v52  ;;  %1055 = vst.msk [vmem:[#allocation2 + $0x130] sm:$0xff] %vm22_vm0, %v990_v53 }
 0x132   :  { %v1191_v1 = vmul.f32 %v2475_v36, %v1120_v59  ;;  %1614 = vst.msk [vmem:[%s2940_s4 + $0xc] sm:$0xf] %vm1610_vm1, %v1828_v56  ;;  %1646 = vst.msk [vmem:[%s2940_s4 + $0x8c] sm:$0xf] %vm1610_vm1, %v1860_v57  ;;  %v1089_v2 = vld [vmem:[#allocation2 + $0x28] sm:$0xff] }
 0x133   :  { %v1121_v3 = vld [vmem:[#allocation2 + $0x128] sm:$0xff]  ;;  %1024 = vst.msk [vmem:[#allocation2 + $0x38] sm:$0xff] %vm22_vm0, %v959_v60  ;;  %1056 = vst.msk [vmem:[#allocation2 + $0x138] sm:$0xff] %vm22_vm0, %v991_v61  ;;  %v1230_v4 = vadd.f32 %v2480_v46, %v1159_v0  ;;  %v1160_v6 = vmul.f32 %v2475_v36, %v1089_v2  ;;  %v98_v60 = vld [vmem:[#allocation2 + $0x58] sm:$0xff] }
 0x134   :  { %v1262_v5 = vadd.f32 %v2480_v46, %v1191_v1  ;;  %v1192_v7 = vmul.f32 %v2475_v36, %v1121_v3  ;;  %v729_v14 = vpop.f32.mrb[16].mxu0  ;;  %v857_v15 = vpop.f32.mrb[16].mxu1  ;;  %v130_v61 = vld [vmem:[#allocation2 + $0x158] sm:$0xff] }
 0x135   :  { %v1294_v10 = vmax.f32 %v1230_v4, 0.0  ;;  %v1231_v12 = vadd.f32 %v2480_v46, %v1160_v6  ;;  %v960_v18 = vadd.f32 %v729_v14, %v95_v8  ;;  %v992_v19 = vadd.f32 %v857_v15, %v127_v9  ;;  %v731_v20 = vpop.f32.mrb[17].mxu0  ;;  %v859_v21 = vpop.f32.mrb[17].mxu1 }
 0x136   :  { %v1326_v11 = vmax.f32 %v1262_v5, 0.0  ;;  %v1263_v13 = vadd.f32 %v2480_v46, %v1192_v7  ;;  %v732_v26 = vpop.f32.mrb[18].mxu0  ;;  %v860_v27 = vpop.f32.mrb[18].mxu1 }
 0x137   :  { %v1829_v22 = vpack.c.bf16 %v1294_v10, %v1294_v10  ;;  %v1295_v24 = vmax.f32 %v1231_v12, 0.0  ;;  %1025 = vst.msk [vmem:[#allocation2 + $0x40] sm:$0xff] %vm22_vm0, %v960_v18  ;;  %1057 = vst.msk [vmem:[#allocation2 + $0x140] sm:$0xff] %vm22_vm0, %v992_v19  ;;  %v961_v30 = vadd.f32 %v732_v26, %v96_v16  ;;  %v993_v31 = vadd.f32 %v860_v27, %v128_v17  ;;  %v734_v32 = vpop.f32.mrb[19].mxu0  ;;  %v862_v33 = vpop.f32.mrb[19].mxu1 }
 0x138   :  { %v1861_v23 = vpack.c.bf16 %v1326_v11, %v1326_v11  ;;  %v1327_v25 = vmax.f32 %v1263_v13, 0.0  ;;  %v1090_v28 = vld [vmem:[#allocation2 + $0x30] sm:$0xff]  ;;  %v100_v32 = vld [vmem:[#allocation2 + $0x68] sm:$0xff] }
 0x139   :  { %v1122_v29 = vld [vmem:[#allocation2 + $0x130] sm:$0xff]  ;;  %1615 = vst.msk [vmem:[%s2940_s4 + $0x10] sm:$0xf] %vm1610_vm1, %v1829_v22  ;;  %v1830_v34 = vpack.c.bf16 %v1295_v24, %v1295_v24  ;;  %v1161_v37 = vmul.f32 %v2475_v36, %v1090_v28  ;;  %v99_v22 = vld [vmem:[#allocation2 + $0x60] sm:$0xff]  ;;  %v132_v33 = vld [vmem:[#allocation2 + $0x168] sm:$0xff] }
 0x13a   :  { %1647 = vst.msk [vmem:[%s2940_s4 + $0x90] sm:$0xf] %vm1610_vm1, %v1861_v23  ;;  %v1862_v35 = vpack.c.bf16 %v1327_v25, %v1327_v25  ;;  %v1193_v38 = vmul.f32 %v2475_v36, %v1122_v29  ;;  %v1091_v39 = vld [vmem:[#allocation2 + $0x38] sm:$0xff]  ;;  %v131_v23 = vld [vmem:[#allocation2 + $0x160] sm:$0xff] }
 0x13b   :  { %v1123_v40 = vld [vmem:[#allocation2 + $0x138] sm:$0xff]  ;;  %v1162_v41 = vmul.f32 %v2475_v36, %v1091_v39  ;;  %1026 = vst.msk [vmem:[#allocation2 + $0x48] sm:$0xff] %vm22_vm0, %v961_v30  ;;  %1058 = vst.msk [vmem:[#allocation2 + $0x148] sm:$0xff] %vm22_vm0, %v993_v31  ;;  %v1232_v43 = vadd.f32 %v2480_v46, %v1161_v37 }
 0x13c   :  { %v1194_v42 = vmul.f32 %v2475_v36, %v1123_v40  ;;  %1616 = vst.msk [vmem:[%s2940_s4 + $0x14] sm:$0xf] %vm1610_vm1, %v1830_v34  ;;  %1648 = vst.msk [vmem:[%s2940_s4 + $0x94] sm:$0xf] %vm1610_vm1, %v1862_v35  ;;  %v1264_v44 = vadd.f32 %v2480_v46, %v1193_v38  ;;  %v737_v52 = vpop.f32.mrb[20].mxu0  ;;  %v865_v53 = vpop.f32.mrb[20].mxu1 }
 0x13d   :  { %v1233_v48 = vadd.f32 %v2480_v46, %v1162_v41  ;;  %v1296_v50 = vmax.f32 %v1232_v43, 0.0  ;;  %v962_v56 = vadd.f32 %v737_v52, %v97_v45  ;;  %v994_v57 = vadd.f32 %v865_v53, %v129_v47  ;;  %v739_v58 = vpop.f32.mrb[21].mxu0  ;;  %v867_v59 = vpop.f32.mrb[21].mxu1 }
 0x13e   :  { %v1265_v49 = vadd.f32 %v2480_v46, %v1194_v42  ;;  %v1328_v51 = vmax.f32 %v1264_v44, 0.0  ;;  %v1092_v0 = vld [vmem:[#allocation2 + $0x40] sm:$0xff]  ;;  %v740_v2 = vpop.f32.mrb[22].mxu0  ;;  %v868_v3 = vpop.f32.mrb[22].mxu1 }
 0x13f   :  { %v1297_v54 = vmax.f32 %v1233_v48, 0.0  ;;  %v1831_v62 = vpack.c.bf16 %v1296_v50, %v1296_v50  ;;  %v1124_v1 = vld [vmem:[#allocation2 + $0x140] sm:$0xff]  ;;  %v1163_v6 = vmul.f32 %v2475_v36, %v1092_v0  ;;  %1027 = vst.msk [vmem:[#allocation2 + $0x50] sm:$0xff] %vm22_vm0, %v962_v56  ;;  %1059 = vst.msk [vmem:[#allocation2 + $0x150] sm:$0xff] %vm22_vm0, %v994_v57  ;;  %v742_v8 = vpop.f32.mrb[23].mxu0  ;;  %v870_v9 = vpop.f32.mrb[23].mxu1  ;;  %v963_v12 = vadd.f32 %v740_v2, %v98_v60 }
 0x140   :  { %v1329_v55 = vmax.f32 %v1265_v49, 0.0  ;;  %v1863_v63 = vpack.c.bf16 %v1328_v51, %v1328_v51  ;;  %v1195_v7 = vmul.f32 %v2475_v36, %v1124_v1  ;;  %v995_v13 = vadd.f32 %v868_v3, %v130_v61  ;;  %v101_v56 = vld [vmem:[#allocation2 + $0x70] sm:$0xff]  ;;  %v102_v0 = vld [vmem:[#allocation2 + $0x78] sm:$0xff] }
 0x141   :  { %v1832_v4 = vpack.c.bf16 %v1297_v54, %v1297_v54  ;;  %1617 = vst.msk [vmem:[%s2940_s4 + $0x18] sm:$0xf] %vm1610_vm1, %v1831_v62  ;;  %v1234_v14 = vadd.f32 %v2480_v46, %v1163_v6  ;;  %v133_v57 = vld [vmem:[#allocation2 + $0x170] sm:$0xff]  ;;  %v134_v1 = vld [vmem:[#allocation2 + $0x178] sm:$0xff] }
 0x142   :  { %v1864_v5 = vpack.c.bf16 %v1329_v55, %v1329_v55  ;;  %1649 = vst.msk [vmem:[%s2940_s4 + $0x98] sm:$0xf] %vm1610_vm1, %v1863_v63  ;;  %v1093_v10 = vld [vmem:[#allocation2 + $0x48] sm:$0xff]  ;;  %v1266_v15 = vadd.f32 %v2480_v46, %v1195_v7 }
 0x143   :  { %v1125_v11 = vld [vmem:[#allocation2 + $0x148] sm:$0xff]  ;;  %1618 = vst.msk [vmem:[%s2940_s4 + $0x1c] sm:$0xf] %vm1610_vm1, %v1832_v4  ;;  %v1164_v16 = vmul.f32 %v2475_v36, %v1093_v10  ;;  %v1298_v18 = vmax.f32 %v1234_v14, 0.0 }
 0x144   :  { %1650 = vst.msk [vmem:[%s2940_s4 + $0x9c] sm:$0xf] %vm1610_vm1, %v1864_v5  ;;  %v1196_v17 = vmul.f32 %v2475_v36, %v1125_v11  ;;  %v1330_v19 = vmax.f32 %v1266_v15, 0.0  ;;  %v745_v24 = vpop.f32.mrb[24].mxu0  ;;  %v873_v25 = vpop.f32.mrb[24].mxu1 }
 0x145   :  { %1028 = vst.msk [vmem:[#allocation2 + $0x58] sm:$0xff] %vm22_vm0, %v963_v12  ;;  %1060 = vst.msk [vmem:[#allocation2 + $0x158] sm:$0xff] %vm22_vm0, %v995_v13  ;;  %v1235_v20 = vadd.f32 %v2480_v46, %v1164_v16  ;;  %v1833_v26 = vpack.c.bf16 %v1298_v18, %v1298_v18  ;;  %v747_v30 = vpop.f32.mrb[25].mxu0  ;;  %v875_v31 = vpop.f32.mrb[25].mxu1  ;;  %v964_v37 = vadd.f32 %v745_v24, %v99_v22 }
 0x146   :  { %v1267_v21 = vadd.f32 %v2480_v46, %v1196_v17  ;;  %v1865_v27 = vpack.c.bf16 %v1330_v19, %v1330_v19  ;;  %v1094_v34 = vld [vmem:[#allocation2 + $0x50] sm:$0xff]  ;;  %v996_v38 = vadd.f32 %v873_v25, %v131_v23  ;;  %v748_v39 = vpop.f32.mrb[26].mxu0  ;;  %v876_v40 = vpop.f32.mrb[26].mxu1 }
 0x147   :  { %v1299_v28 = vmax.f32 %v1235_v20, 0.0  ;;  %v1126_v35 = vld [vmem:[#allocation2 + $0x150] sm:$0xff]  ;;  %1619 = vst.msk [vmem:[%s2940_s4 + $0x20] sm:$0xf] %vm1610_vm1, %v1833_v26  ;;  %v1165_v43 = vmul.f32 %v2475_v36, %v1094_v34  ;;  %v750_v45 = vpop.f32.mrb[27].mxu0  ;;  %v878_v47 = vpop.f32.mrb[27].mxu1  ;;  %v965_v48 = vadd.f32 %v748_v39, %v100_v32  ;;  %v997_v49 = vadd.f32 %v876_v40, %v132_v33 }
 0x148   :  { %v1331_v29 = vmax.f32 %v1267_v21, 0.0  ;;  %1651 = vst.msk [vmem:[%s2940_s4 + $0xa0] sm:$0xf] %vm1610_vm1, %v1865_v27  ;;  %v1197_v44 = vmul.f32 %v2475_v36, %v1126_v35 }
 0x149   :  { %v1834_v41 = vpack.c.bf16 %v1299_v28, %v1299_v28  ;;  %1029 = vst.msk [vmem:[#allocation2 + $0x60] sm:$0xff] %vm22_vm0, %v964_v37  ;;  %1061 = vst.msk [vmem:[#allocation2 + $0x160] sm:$0xff] %vm22_vm0, %v996_v38  ;;  %v1236_v50 = vadd.f32 %v2480_v46, %v1165_v43  ;;  %v103_v28 = vld [vmem:[#allocation2 + $0x80] sm:$0xff]  ;;  %v104_v37 = vld [vmem:[#allocation2 + $0x88] sm:$0xff] }
 0x14a   :  { %v1866_v42 = vpack.c.bf16 %v1331_v29, %v1331_v29  ;;  %v1268_v51 = vadd.f32 %v2480_v46, %v1197_v44  ;;  %1030 = vst.msk [vmem:[#allocation2 + $0x68] sm:$0xff] %vm22_vm0, %v965_v48  ;;  %1062 = vst.msk [vmem:[#allocation2 + $0x168] sm:$0xff] %vm22_vm0, %v997_v49  ;;  %v135_v29 = vld [vmem:[#allocation2 + $0x180] sm:$0xff]  ;;  %v136_v38 = vld [vmem:[#allocation2 + $0x188] sm:$0xff] }
 0x14b   :  { %1620 = vst.msk [vmem:[%s2940_s4 + $0x24] sm:$0xf] %vm1610_vm1, %v1834_v41  ;;  %v1300_v58 = vmax.f32 %v1236_v50, 0.0 }
 0x14c   :  { %1652 = vst.msk [vmem:[%s2940_s4 + $0xa4] sm:$0xf] %vm1610_vm1, %v1866_v42  ;;  %v1095_v52 = vld [vmem:[#allocation2 + $0x58] sm:$0xff]  ;;  %v1332_v59 = vmax.f32 %v1268_v51, 0.0  ;;  %v753_v62 = vpop.f32.mrb[28].mxu0  ;;  %v881_v63 = vpop.f32.mrb[28].mxu1 }
 0x14d   :  { %v1127_v53 = vld [vmem:[#allocation2 + $0x158] sm:$0xff]  ;;  %v1166_v54 = vmul.f32 %v2475_v36, %v1095_v52  ;;  %v1835_v2 = vpack.c.bf16 %v1300_v58, %v1300_v58  ;;  %v966_v4 = vadd.f32 %v753_v62, %v101_v56  ;;  %v998_v5 = vadd.f32 %v881_v63, %v133_v57  ;;  %v755_v6 = vpop.f32.mrb[29].mxu0  ;;  %v883_v7 = vpop.f32.mrb[29].mxu1 }
 0x14e   :  { %v1198_v55 = vmul.f32 %v2475_v36, %v1127_v53  ;;  %v1867_v3 = vpack.c.bf16 %v1332_v59, %v1332_v59  ;;  %v756_v10 = vpop.f32.mrb[30].mxu0  ;;  %v884_v11 = vpop.f32.mrb[30].mxu1  ;;  %v105_v6 = vld [vmem:[#allocation2 + $0x90] sm:$0xff] }
 0x14f   :  { %v1237_v60 = vadd.f32 %v2480_v46, %v1166_v54  ;;  %1621 = vst.msk [vmem:[%s2940_s4 + $0x28] sm:$0xf] %vm1610_vm1, %v1835_v2  ;;  %v967_v14 = vadd.f32 %v756_v10, %v102_v0  ;;  %v999_v15 = vadd.f32 %v884_v11, %v134_v1  ;;  %v758_v16 = vpop.f32.mrb[31].mxu0  ;;  %v886_v17 = vpop.f32.mrb[31].mxu1  ;;  %v137_v7 = vld [vmem:[#allocation2 + $0x190] sm:$0xff] }
 0x150   :  { %v1269_v61 = vadd.f32 %v2480_v46, %v1198_v55  ;;  %1653 = vst.msk [vmem:[%s2940_s4 + $0xa8] sm:$0xf] %vm1610_vm1, %v1867_v3  ;;  %v1096_v12 = vld [vmem:[#allocation2 + $0x60] sm:$0xff]  ;;  %v106_v16 = vld [vmem:[#allocation2 + $0x98] sm:$0xff] }
 0x151   :  { %v1301_v8 = vmax.f32 %v1237_v60, 0.0  ;;  %v1128_v13 = vld [vmem:[#allocation2 + $0x160] sm:$0xff]  ;;  %1031 = vst.msk [vmem:[#allocation2 + $0x70] sm:$0xff] %vm22_vm0, %v966_v4  ;;  %1063 = vst.msk [vmem:[#allocation2 + $0x170] sm:$0xff] %vm22_vm0, %v998_v5  ;;  %v1167_v20 = vmul.f32 %v2475_v36, %v1096_v12  ;;  %v1097_v22 = vld [vmem:[#allocation2 + $0x68] sm:$0xff] }
 0x152   :  { %v1333_v9 = vmax.f32 %v1269_v61, 0.0  ;;  %v1199_v21 = vmul.f32 %v2475_v36, %v1128_v13  ;;  %v1129_v23 = vld [vmem:[#allocation2 + $0x168] sm:$0xff]  ;;  %1032 = vst.msk [vmem:[#allocation2 + $0x78] sm:$0xff] %vm22_vm0, %v967_v14  ;;  %1064 = vst.msk [vmem:[#allocation2 + $0x178] sm:$0xff] %vm22_vm0, %v999_v15  ;;  %v1168_v26 = vmul.f32 %v2475_v36, %v1097_v22  ;;  %v138_v17 = vld [vmem:[#allocation2 + $0x198] sm:$0xff] }
 0x153   :  { %v1836_v18 = vpack.c.bf16 %v1301_v8, %v1301_v8  ;;  %v1238_v24 = vadd.f32 %v2480_v46, %v1167_v20  ;;  %v1200_v27 = vmul.f32 %v2475_v36, %v1129_v23 }
 0x154   :  { %v1868_v19 = vpack.c.bf16 %v1333_v9, %v1333_v9  ;;  %v1270_v25 = vadd.f32 %v2480_v46, %v1199_v21  ;;  %v1239_v32 = vadd.f32 %v2480_v46, %v1168_v26  ;;  %v761_v34 = vpop.f32.mrb[32].mxu0  ;;  %v889_v35 = vpop.f32.mrb[32].mxu1 }
 0x155   :  { %1622 = vst.msk [vmem:[%s2940_s4 + $0x2c] sm:$0xf] %vm1610_vm1, %v1836_v18  ;;  %v1302_v30 = vmax.f32 %v1238_v24, 0.0  ;;  %v1271_v33 = vadd.f32 %v2480_v46, %v1200_v27  ;;  %v968_v39 = vadd.f32 %v761_v34, %v103_v28  ;;  %v1000_v40 = vadd.f32 %v889_v35, %v135_v29  ;;  %v763_v41 = vpop.f32.mrb[33].mxu0  ;;  %v891_v42 = vpop.f32.mrb[33].mxu1 }
 0x156   :  { %1654 = vst.msk [vmem:[%s2940_s4 + $0xac] sm:$0xf] %vm1610_vm1, %v1868_v19  ;;  %v1334_v31 = vmax.f32 %v1270_v25, 0.0  ;;  %v1303_v45 = vmax.f32 %v1239_v32, 0.0  ;;  %v764_v50 = vpop.f32.mrb[34].mxu0  ;;  %v892_v51 = vpop.f32.mrb[34].mxu1 }
 0x157   :  { %v1837_v43 = vpack.c.bf16 %v1302_v30, %v1302_v30  ;;  %v1335_v47 = vmax.f32 %v1271_v33, 0.0  ;;  %1033 = vst.msk [vmem:[#allocation2 + $0x80] sm:$0xff] %vm22_vm0, %v968_v39  ;;  %1065 = vst.msk [vmem:[#allocation2 + $0x180] sm:$0xff] %vm22_vm0, %v1000_v40  ;;  %v969_v54 = vadd.f32 %v764_v50, %v104_v37  ;;  %v1001_v55 = vadd.f32 %v892_v51, %v136_v38  ;;  %v766_v56 = vpop.f32.mrb[35].mxu0  ;;  %v894_v57 = vpop.f32.mrb[35].mxu1 }
 0x158   :  { %v1869_v44 = vpack.c.bf16 %v1334_v31, %v1334_v31  ;;  %v1098_v48 = vld [vmem:[#allocation2 + $0x70] sm:$0xff]  ;;  %v1838_v58 = vpack.c.bf16 %v1303_v45, %v1303_v45 }
 0x159   :  { %v1130_v49 = vld [vmem:[#allocation2 + $0x170] sm:$0xff]  ;;  %v1169_v52 = vmul.f32 %v2475_v36, %v1098_v48  ;;  %1623 = vst.msk [vmem:[%s2940_s4 + $0x30] sm:$0xf] %vm1610_vm1, %v1837_v43  ;;  %v1870_v59 = vpack.c.bf16 %v1335_v47, %v1335_v47  ;;  %v1099_v60 = vld [vmem:[#allocation2 + $0x78] sm:$0xff]  ;;  %v107_v43 = vld [vmem:[#allocation2 + $0xa0] sm:$0xff] }
 0x15a   :  { %v1201_v53 = vmul.f32 %v2475_v36, %v1130_v49  ;;  %1655 = vst.msk [vmem:[%s2940_s4 + $0xb0] sm:$0xf] %vm1610_vm1, %v1869_v44  ;;  %v1131_v61 = vld [vmem:[#allocation2 + $0x178] sm:$0xff]  ;;  %v1170_v0 = vmul.f32 %v2475_v36, %v1099_v60  ;;  %1624 = vst.msk [vmem:[%s2940_s4 + $0x34] sm:$0xf] %vm1610_vm1, %v1838_v58  ;;  %v139_v44 = vld [vmem:[#allocation2 + $0x1a0] sm:$0xff] }
 0x15b   :  { %v1240_v62 = vadd.f32 %v2480_v46, %v1169_v52  ;;  %v1202_v1 = vmul.f32 %v2475_v36, %v1131_v61  ;;  %1034 = vst.msk [vmem:[#allocation2 + $0x88] sm:$0xff] %vm22_vm0, %v969_v54  ;;  %1066 = vst.msk [vmem:[#allocation2 + $0x188] sm:$0xff] %vm22_vm0, %v1001_v55  ;;  %v108_v48 = vld [vmem:[#allocation2 + $0xa8] sm:$0xff] }
 0x15c   :  { %v1272_v63 = vadd.f32 %v2480_v46, %v1201_v53  ;;  %1656 = vst.msk [vmem:[%s2940_s4 + $0xb4] sm:$0xf] %vm1610_vm1, %v1870_v59  ;;  %v1241_v4 = vadd.f32 %v2480_v46, %v1170_v0  ;;  %v769_v8 = vpop.f32.mrb[36].mxu0  ;;  %v897_v9 = vpop.f32.mrb[36].mxu1  ;;  %v140_v49 = vld [vmem:[#allocation2 + $0x1a8] sm:$0xff] }
 0x15d   :  { %v1304_v2 = vmax.f32 %v1240_v62, 0.0  ;;  %v1273_v5 = vadd.f32 %v2480_v46, %v1202_v1  ;;  %v771_v14 = vpop.f32.mrb[37].mxu0  ;;  %v899_v15 = vpop.f32.mrb[37].mxu1  ;;  %v970_v20 = vadd.f32 %v769_v8, %v105_v6  ;;  %v1002_v21 = vadd.f32 %v897_v9, %v137_v7 }
 0x15e   :  { %v1336_v3 = vmax.f32 %v1272_v63, 0.0  ;;  %v1305_v12 = vmax.f32 %v1241_v4, 0.0  ;;  %v1100_v18 = vld [vmem:[#allocation2 + $0x80] sm:$0xff]  ;;  %v772_v22 = vpop.f32.mrb[38].mxu0  ;;  %v900_v23 = vpop.f32.mrb[38].mxu1 }
 0x15f   :  { %v1839_v10 = vpack.c.bf16 %v1304_v2, %v1304_v2  ;;  %v1337_v13 = vmax.f32 %v1273_v5, 0.0  ;;  %v1132_v19 = vld [vmem:[#allocation2 + $0x180] sm:$0xff]  ;;  %v1171_v26 = vmul.f32 %v2475_v36, %v1100_v18  ;;  %v774_v28 = vpop.f32.mrb[39].mxu0  ;;  %v902_v29 = vpop.f32.mrb[39].mxu1  ;;  %1035 = vst.msk [vmem:[#allocation2 + $0x90] sm:$0xff] %vm22_vm0, %v970_v20  ;;  %1067 = vst.msk [vmem:[#allocation2 + $0x190] sm:$0xff] %vm22_vm0, %v1002_v21  ;;  %v971_v32 = vadd.f32 %v772_v22, %v106_v16 }
 0x160   :  { %v1871_v11 = vpack.c.bf16 %v1336_v3, %v1336_v3  ;;  %v1840_v24 = vpack.c.bf16 %v1305_v12, %v1305_v12  ;;  %v1203_v27 = vmul.f32 %v2475_v36, %v1132_v19  ;;  %v1003_v33 = vadd.f32 %v900_v23, %v138_v17  ;;  %v109_v12 = vld [vmem:[#allocation2 + $0xb0] sm:$0xff]  ;;  %v110_v20 = vld [vmem:[#allocation2 + $0xb8] sm:$0xff] }
 0x161   :  { %1625 = vst.msk [vmem:[%s2940_s4 + $0x38] sm:$0xf] %vm1610_vm1, %v1839_v10  ;;  %v1872_v25 = vpack.c.bf16 %v1337_v13, %v1337_v13  ;;  %v1242_v34 = vadd.f32 %v2480_v46, %v1171_v26  ;;  %v141_v13 = vld [vmem:[#allocation2 + $0x1b0] sm:$0xff]  ;;  %v142_v21 = vld [vmem:[#allocation2 + $0x1b8] sm:$0xff] }
 0x162   :  { %1657 = vst.msk [vmem:[%s2940_s4 + $0xb8] sm:$0xf] %vm1610_vm1, %v1871_v11  ;;  %v1101_v30 = vld [vmem:[#allocation2 + $0x88] sm:$0xff]  ;;  %1626 = vst.msk [vmem:[%s2940_s4 + $0x3c] sm:$0xf] %vm1610_vm1, %v1840_v24  ;;  %v1274_v35 = vadd.f32 %v2480_v46, %v1203_v27 }
 0x163   :  { %v1133_v31 = vld [vmem:[#allocation2 + $0x188] sm:$0xff]  ;;  %1658 = vst.msk [vmem:[%s2940_s4 + $0xbc] sm:$0xf] %vm1610_vm1, %v1872_v25  ;;  %v1172_v37 = vmul.f32 %v2475_v36, %v1101_v30  ;;  %v1306_v39 = vmax.f32 %v1242_v34, 0.0 }
 0x164   :  { %v1204_v38 = vmul.f32 %v2475_v36, %v1133_v31  ;;  %1036 = vst.msk [vmem:[#allocation2 + $0x98] sm:$0xff] %vm22_vm0, %v971_v32  ;;  %1068 = vst.msk [vmem:[#allocation2 + $0x198] sm:$0xff] %vm22_vm0, %v1003_v33  ;;  %v1338_v40 = vmax.f32 %v1274_v35, 0.0  ;;  %v777_v45 = vpop.f32.mrb[40].mxu0  ;;  %v905_v47 = vpop.f32.mrb[40].mxu1 }
 0x165   :  { %v1243_v41 = vadd.f32 %v2480_v46, %v1172_v37  ;;  %v1841_v50 = vpack.c.bf16 %v1306_v39, %v1306_v39  ;;  %v779_v54 = vpop.f32.mrb[41].mxu0  ;;  %v907_v55 = vpop.f32.mrb[41].mxu1  ;;  %v972_v56 = vadd.f32 %v777_v45, %v107_v43  ;;  %v1004_v57 = vadd.f32 %v905_v47, %v139_v44 }
 0x166   :  { %v1275_v42 = vadd.f32 %v2480_v46, %v1204_v38  ;;  %v1873_v51 = vpack.c.bf16 %v1338_v40, %v1338_v40  ;;  %v780_v58 = vpop.f32.mrb[42].mxu0  ;;  %v908_v59 = vpop.f32.mrb[42].mxu1  ;;  %v1102_v62 = vld [vmem:[#allocation2 + $0x90] sm:$0xff] }
 0x167   :  { %v1307_v52 = vmax.f32 %v1243_v41, 0.0  ;;  %1627 = vst.msk [vmem:[%s2940_s4 + $0x40] sm:$0xf] %vm1610_vm1, %v1841_v50  ;;  %v1134_v63 = vld [vmem:[#allocation2 + $0x190] sm:$0xff]  ;;  %v973_v0 = vadd.f32 %v780_v58, %v108_v48  ;;  %v1005_v1 = vadd.f32 %v908_v59, %v140_v49  ;;  %v782_v2 = vpop.f32.mrb[43].mxu0  ;;  %v910_v3 = vpop.f32.mrb[43].mxu1  ;;  %v1173_v4 = vmul.f32 %v2475_v36, %v1102_v62 }
 0x168   :  { %v1339_v53 = vmax.f32 %v1275_v42, 0.0  ;;  %1659 = vst.msk [vmem:[%s2940_s4 + $0xc0] sm:$0xf] %vm1610_vm1, %v1873_v51  ;;  %v1205_v5 = vmul.f32 %v2475_v36, %v1134_v63  ;;  %v111_v50 = vld [vmem:[#allocation2 + $0xc0] sm:$0xff] }
 0x169   :  { %v1842_v60 = vpack.c.bf16 %v1307_v52, %v1307_v52  ;;  %1037 = vst.msk [vmem:[#allocation2 + $0xa0] sm:$0xff] %vm22_vm0, %v972_v56  ;;  %1069 = vst.msk [vmem:[#allocation2 + $0x1a0] sm:$0xff] %vm22_vm0, %v1004_v57  ;;  %v1244_v8 = vadd.f32 %v2480_v46, %v1173_v4  ;;  %v143_v51 = vld [vmem:[#allocation2 + $0x1c0] sm:$0xff] }
 0x16a   :  { %v1874_v61 = vpack.c.bf16 %v1339_v53, %v1339_v53  ;;  %1038 = vst.msk [vmem:[#allocation2 + $0xa8] sm:$0xff] %vm22_vm0, %v973_v0  ;;  %1070 = vst.msk [vmem:[#allocation2 + $0x1a8] sm:$0xff] %vm22_vm0, %v1005_v1  ;;  %v1276_v9 = vadd.f32 %v2480_v46, %v1205_v5  ;;  %v112_v0 = vld [vmem:[#allocation2 + $0xc8] sm:$0xff] }
 0x16b   :  { %1628 = vst.msk [vmem:[%s2940_s4 + $0x44] sm:$0xf] %vm1610_vm1, %v1842_v60  ;;  %v1103_v6 = vld [vmem:[#allocation2 + $0x98] sm:$0xff]  ;;  %v1308_v14 = vmax.f32 %v1244_v8, 0.0  ;;  %v144_v1 = vld [vmem:[#allocation2 + $0x1c8] sm:$0xff] }
 0x16c   :  { %1660 = vst.msk [vmem:[%s2940_s4 + $0xc4] sm:$0xf] %vm1610_vm1, %v1874_v61  ;;  %v1135_v7 = vld [vmem:[#allocation2 + $0x198] sm:$0xff]  ;;  %v1174_v10 = vmul.f32 %v2475_v36, %v1103_v6  ;;  %v1340_v15 = vmax.f32 %v1276_v9, 0.0  ;;  %v785_v18 = vpop.f32.mrb[44].mxu0  ;;  %v913_v19 = vpop.f32.mrb[44].mxu1 }
 0x16d   :  { %v1206_v11 = vmul.f32 %v2475_v36, %v1135_v7  ;;  %v974_v22 = vadd.f32 %v785_v18, %v109_v12  ;;  %v1006_v23 = vadd.f32 %v913_v19, %v141_v13  ;;  %v787_v24 = vpop.f32.mrb[45].mxu0  ;;  %v915_v25 = vpop.f32.mrb[45].mxu1  ;;  %v1843_v26 = vpack.c.bf16 %v1308_v14, %v1308_v14  ;;  %v2799_v19 = vld [vmem:[%s2938_s2] ss:$0 sm:$0xff] }
 0x16e   :  { %v1245_v16 = vadd.f32 %v2480_v46, %v1174_v10  ;;  %v1875_v27 = vpack.c.bf16 %v1340_v15, %v1340_v15  ;;  %v788_v30 = vpop.f32.mrb[46].mxu0  ;;  %v916_v31 = vpop.f32.mrb[46].mxu1 }
 0x16f   :  { %v1277_v17 = vadd.f32 %v2480_v46, %v1206_v11  ;;  %1039 = vst.msk [vmem:[#allocation2 + $0xb0] sm:$0xff] %vm22_vm0, %v974_v22  ;;  %1071 = vst.msk [vmem:[#allocation2 + $0x1b0] sm:$0xff] %vm22_vm0, %v1006_v23  ;;  %v975_v34 = vadd.f32 %v788_v30, %v110_v20  ;;  %v1007_v35 = vadd.f32 %v916_v31, %v142_v21  ;;  %v790_v37 = vpop.f32.mrb[47].mxu0  ;;  %v918_v38 = vpop.f32.mrb[47].mxu1 }
 0x170   :  { %v1309_v28 = vmax.f32 %v1245_v16, 0.0  ;;  %v1104_v32 = vld [vmem:[#allocation2 + $0xa0] sm:$0xff]  ;;  %1629 = vst.msk [vmem:[%s2940_s4 + $0x48] sm:$0xf] %vm1610_vm1, %v1843_v26  ;;  %1661 = vst.msk [vmem:[%s2940_s4 + $0xc8] sm:$0xf] %vm1610_vm1, %v1875_v27 }
 0x171   :  { %v1341_v29 = vmax.f32 %v1277_v17, 0.0  ;;  %v1136_v33 = vld [vmem:[#allocation2 + $0x1a0] sm:$0xff]  ;;  %v1175_v41 = vmul.f32 %v2475_v36, %v1104_v32  ;;  %v1105_v43 = vld [vmem:[#allocation2 + $0xa8] sm:$0xff]  ;;  %1040 = vst.msk [vmem:[#allocation2 + $0xb8] sm:$0xff] %vm22_vm0, %v975_v34  ;;  %1072 = vst.msk [vmem:[#allocation2 + $0x1b8] sm:$0xff] %vm22_vm0, %v1007_v35 }
 0x172   :  { %v1844_v39 = vpack.c.bf16 %v1309_v28, %v1309_v28  ;;  %v1207_v42 = vmul.f32 %v2475_v36, %v1136_v33  ;;  %v1137_v44 = vld [vmem:[#allocation2 + $0x1a8] sm:$0xff]  ;;  %v1176_v45 = vmul.f32 %v2475_v36, %v1105_v43  ;;  %v113_v26 = vld [vmem:[#allocation2 + $0xd0] sm:$0xff]  ;;  %v114_v37 = vld [vmem:[#allocation2 + $0xd8] sm:$0xff] }
 0x173   :  { %v1876_v40 = vpack.c.bf16 %v1341_v29, %v1341_v29  ;;  %v1208_v47 = vmul.f32 %v2475_v36, %v1137_v44  ;;  %v1246_v48 = vadd.f32 %v2480_v46, %v1175_v41  ;;  %v145_v27 = vld [vmem:[#allocation2 + $0x1d0] sm:$0xff]  ;;  %v146_v38 = vld [vmem:[#allocation2 + $0x1d8] sm:$0xff] }
 0x174   :  { %1630 = vst.msk [vmem:[%s2940_s4 + $0x4c] sm:$0xf] %vm1610_vm1, %v1844_v39  ;;  %v1278_v49 = vadd.f32 %v2480_v46, %v1207_v42  ;;  %v1247_v52 = vadd.f32 %v2480_v46, %v1176_v45  ;;  %v793_v56 = vpop.f32.mrb[48].mxu0  ;;  %v921_v57 = vpop.f32.mrb[48].mxu1 }
 0x175   :  { %1662 = vst.msk [vmem:[%s2940_s4 + $0xcc] sm:$0xf] %vm1610_vm1, %v1876_v40  ;;  %v1279_v53 = vadd.f32 %v2480_v46, %v1208_v47  ;;  %v1310_v54 = vmax.f32 %v1246_v48, 0.0  ;;  %v976_v60 = vadd.f32 %v793_v56, %v111_v50  ;;  %v1008_v61 = vadd.f32 %v921_v57, %v143_v51  ;;  %v795_v62 = vpop.f32.mrb[49].mxu0  ;;  %v923_v63 = vpop.f32.mrb[49].mxu1 }
 0x176   :  { %v1342_v55 = vmax.f32 %v1278_v49, 0.0  ;;  %v1311_v58 = vmax.f32 %v1247_v52, 0.0  ;;  %v1106_v4 = vld [vmem:[#allocation2 + $0xb0] sm:$0xff]  ;;  %v796_v6 = vpop.f32.mrb[50].mxu0  ;;  %v924_v7 = vpop.f32.mrb[50].mxu1 }
 0x177   :  { %v1343_v59 = vmax.f32 %v1279_v53, 0.0  ;;  %v1845_v2 = vpack.c.bf16 %v1310_v54, %v1310_v54  ;;  %v1138_v5 = vld [vmem:[#allocation2 + $0x1b0] sm:$0xff]  ;;  %v1177_v10 = vmul.f32 %v2475_v36, %v1106_v4  ;;  %1041 = vst.msk [vmem:[#allocation2 + $0xc0] sm:$0xff] %vm22_vm0, %v976_v60  ;;  %1073 = vst.msk [vmem:[#allocation2 + $0x1c0] sm:$0xff] %vm22_vm0, %v1008_v61  ;;  %v798_v12 = vpop.f32.mrb[51].mxu0  ;;  %v926_v13 = vpop.f32.mrb[51].mxu1  ;;  %v977_v16 = vadd.f32 %v796_v6, %v112_v0 }
 0x178   :  { %v1877_v3 = vpack.c.bf16 %v1342_v55, %v1342_v55  ;;  %v1846_v8 = vpack.c.bf16 %v1311_v58, %v1311_v58  ;;  %v1209_v11 = vmul.f32 %v2475_v36, %v1138_v5  ;;  %v1107_v14 = vld [vmem:[#allocation2 + $0xb8] sm:$0xff]  ;;  %v1009_v36 = vadd.f32 %v924_v7, %v144_v1  ;;  %v2830_v53 = vld [vmem:[%s2939_s3] ss:$0 sm:$0xff]  ;;  %v116_v4 = vld [vmem:[#allocation2 + $0xe8] sm:$0xff] }
 0x179   :  { %v1878_v9 = vpack.c.bf16 %v1343_v59, %v1343_v59  ;;  %1631 = vst.msk [vmem:[%s2940_s4 + $0x50] sm:$0xf] %vm1610_vm1, %v1845_v2  ;;  %v1139_v15 = vld [vmem:[#allocation2 + $0x1b8] sm:$0xff]  ;;  %v1248_v17 = vadd.f32 %v2480_v46, %v1177_v10  ;;  %v1178_v20 = vmul.f32 %v2799_v19, %v1107_v14  ;;  %v115_v60 = vld [vmem:[#allocation2 + $0xe0] sm:$0xff]  ;;  %v148_v5 = vld [vmem:[#allocation2 + $0x1e8] sm:$0xff] }
 0x17a   :  { %1663 = vst.msk [vmem:[%s2940_s4 + $0xd0] sm:$0xf] %vm1610_vm1, %v1877_v3  ;;  %1632 = vst.msk [vmem:[%s2940_s4 + $0x54] sm:$0xf] %vm1610_vm1, %v1846_v8  ;;  %v1280_v18 = vadd.f32 %v2480_v46, %v1209_v11  ;;  %v1210_v21 = vmul.f32 %v2799_v19, %v1139_v15  ;;  %v147_v61 = vld [vmem:[#allocation2 + $0x1e0] sm:$0xff] }
 0x17b   :  { %1664 = vst.msk [vmem:[%s2940_s4 + $0xd4] sm:$0xf] %vm1610_vm1, %v1878_v9  ;;  %v1312_v22 = vmax.f32 %v1248_v17, 0.0  ;;  %v1249_v24 = vadd.f32 %v2480_v46, %v1178_v20 }
 0x17c   :  { %1042 = vst.msk [vmem:[#allocation2 + $0xc8] sm:$0xff] %vm22_vm0, %v977_v16  ;;  %1074 = vst.msk [vmem:[#allocation2 + $0x1c8] sm:$0xff] %vm22_vm0, %v1009_v36  ;;  %v1344_v23 = vmax.f32 %v1280_v18, 0.0  ;;  %v1281_v25 = vadd.f32 %v2480_v46, %v1210_v21  ;;  %v801_v28 = vpop.f32.mrb[52].mxu0  ;;  %v929_v29 = vpop.f32.mrb[52].mxu1 }
 0x17d   :  { %v1847_v30 = vpack.c.bf16 %v1312_v22, %v1312_v22  ;;  %v1313_v32 = vmax.f32 %v1249_v24, 0.0  ;;  %v803_v34 = vpop.f32.mrb[53].mxu0  ;;  %v931_v35 = vpop.f32.mrb[53].mxu1  ;;  %v978_v41 = vadd.f32 %v801_v28, %v113_v26  ;;  %v1010_v42 = vadd.f32 %v929_v29, %v145_v27 }
 0x17e   :  { %v1879_v31 = vpack.c.bf16 %v1344_v23, %v1344_v23  ;;  %v1345_v33 = vmax.f32 %v1281_v25, 0.0  ;;  %v1108_v39 = vld [vmem:[#allocation2 + $0xc0] sm:$0xff]  ;;  %v804_v43 = vpop.f32.mrb[54].mxu0  ;;  %v932_v44 = vpop.f32.mrb[54].mxu1 }
 0x17f   :  { %v1140_v40 = vld [vmem:[#allocation2 + $0x1c0] sm:$0xff]  ;;  %1633 = vst.msk [vmem:[%s2940_s4 + $0x58] sm:$0xf] %vm1610_vm1, %v1847_v30  ;;  %v1848_v46 = vpack.c.bf16 %v1313_v32, %v1313_v32  ;;  %v1179_v47 = vmul.f32 %v2799_v19, %v1108_v39  ;;  %v806_v49 = vpop.f32.mrb[55].mxu0  ;;  %v934_v50 = vpop.f32.mrb[55].mxu1  ;;  %v979_v51 = vadd.f32 %v804_v43, %v114_v37  ;;  %v1011_v52 = vadd.f32 %v932_v44, %v146_v38  ;;  %v117_v32 = vld [vmem:[#allocation2 + $0xf0] sm:$0xff] }
 0x180   :  { %1665 = vst.msk [vmem:[%s2940_s4 + $0xd8] sm:$0xf] %vm1610_vm1, %v1879_v31  ;;  %v1880_v45 = vpack.c.bf16 %v1345_v33, %v1345_v33  ;;  %v1211_v48 = vmul.f32 %v2799_v19, %v1140_v40  ;;  %v149_v33 = vld [vmem:[#allocation2 + $0x1f0] sm:$0xff] }
 0x181   :  { %1043 = vst.msk [vmem:[#allocation2 + $0xd0] sm:$0xff] %vm22_vm0, %v978_v41  ;;  %1075 = vst.msk [vmem:[#allocation2 + $0x1d0] sm:$0xff] %vm22_vm0, %v1010_v42  ;;  %v1250_v54 = vadd.f32 %v2830_v53, %v1179_v47  ;;  %v118_v41 = vld [vmem:[#allocation2 + $0xf8] sm:$0xff] }
 0x182   :  { %1634 = vst.msk [vmem:[%s2940_s4 + $0x5c] sm:$0xf] %vm1610_vm1, %v1848_v46  ;;  %1666 = vst.msk [vmem:[%s2940_s4 + $0xdc] sm:$0xf] %vm1610_vm1, %v1880_v45  ;;  %v1282_v55 = vadd.f32 %v2830_v53, %v1211_v48  ;;  %v150_v42 = vld [vmem:[#allocation2 + $0x1f8] sm:$0xff] }
 0x183   :  { %v1109_v56 = vld [vmem:[#allocation2 + $0xc8] sm:$0xff]  ;;  %1044 = vst.msk [vmem:[#allocation2 + $0xd8] sm:$0xff] %vm22_vm0, %v979_v51  ;;  %1076 = vst.msk [vmem:[#allocation2 + $0x1d8] sm:$0xff] %vm22_vm0, %v1011_v52  ;;  %v1314_v62 = vmax.f32 %v1250_v54, 0.0 }
 0x184   :  { %v1141_v57 = vld [vmem:[#allocation2 + $0x1c8] sm:$0xff]  ;;  %v1180_v58 = vmul.f32 %v2799_v19, %v1109_v56  ;;  %v1346_v63 = vmax.f32 %v1282_v55, 0.0  ;;  %v809_v2 = vpop.f32.mrb[56].mxu0  ;;  %v937_v3 = vpop.f32.mrb[56].mxu1 }
 0x185   :  { %v1212_v59 = vmul.f32 %v2799_v19, %v1141_v57  ;;  %v1849_v6 = vpack.c.bf16 %v1314_v62, %v1314_v62  ;;  %v980_v8 = vadd.f32 %v809_v2, %v115_v60  ;;  %v1012_v9 = vadd.f32 %v937_v3, %v147_v61  ;;  %v811_v10 = vpop.f32.mrb[57].mxu0  ;;  %v939_v11 = vpop.f32.mrb[57].mxu1 }
 0x186   :  { %v1251_v0 = vadd.f32 %v2830_v53, %v1180_v58  ;;  %v1881_v7 = vpack.c.bf16 %v1346_v63, %v1346_v63  ;;  %v812_v14 = vpop.f32.mrb[58].mxu0  ;;  %v940_v15 = vpop.f32.mrb[58].mxu1 }
 0x187   :  { %v1283_v1 = vadd.f32 %v2830_v53, %v1212_v59  ;;  %1635 = vst.msk [vmem:[%s2940_s4 + $0x60] sm:$0xf] %vm1610_vm1, %v1849_v6  ;;  %v981_v17 = vadd.f32 %v812_v14, %v116_v4  ;;  %v1013_v18 = vadd.f32 %v940_v15, %v148_v5  ;;  %v814_v20 = vpop.f32.mrb[59].mxu0  ;;  %v942_v21 = vpop.f32.mrb[59].mxu1 }
 0x188   :  { %v1315_v12 = vmax.f32 %v1251_v0, 0.0  ;;  %1667 = vst.msk [vmem:[%s2940_s4 + $0xe0] sm:$0xf] %vm1610_vm1, %v1881_v7  ;;  %v1110_v16 = vld [vmem:[#allocation2 + $0xd0] sm:$0xff] }
 0x189   :  { %v1347_v13 = vmax.f32 %v1283_v1, 0.0  ;;  %v1142_v36 = vld [vmem:[#allocation2 + $0x1d0] sm:$0xff]  ;;  %1045 = vst.msk [vmem:[#allocation2 + $0xe0] sm:$0xff] %vm22_vm0, %v980_v8  ;;  %1077 = vst.msk [vmem:[#allocation2 + $0x1e0] sm:$0xff] %vm22_vm0, %v1012_v9  ;;  %v1181_v24 = vmul.f32 %v2799_v19, %v1110_v16 }
 0x18a   :  { %v1850_v22 = vpack.c.bf16 %v1315_v12, %v1315_v12  ;;  %v1213_v25 = vmul.f32 %v2799_v19, %v1142_v36  ;;  %v1111_v26 = vld [vmem:[#allocation2 + $0xd8] sm:$0xff]  ;;  %1046 = vst.msk [vmem:[#allocation2 + $0xe8] sm:$0xff] %vm22_vm0, %v981_v17  ;;  %1078 = vst.msk [vmem:[#allocation2 + $0x1e8] sm:$0xff] %vm22_vm0, %v1013_v18 }
 0x18b   :  { %v1882_v23 = vpack.c.bf16 %v1347_v13, %v1347_v13  ;;  %v1143_v27 = vld [vmem:[#allocation2 + $0x1d8] sm:$0xff]  ;;  %v1252_v28 = vadd.f32 %v2830_v53, %v1181_v24  ;;  %v1182_v30 = vmul.f32 %v2799_v19, %v1111_v26 }
 0x18c   :  { %1636 = vst.msk [vmem:[%s2940_s4 + $0x64] sm:$0xf] %vm1610_vm1, %v1850_v22  ;;  %v1284_v29 = vadd.f32 %v2830_v53, %v1213_v25  ;;  %v1214_v31 = vmul.f32 %v2799_v19, %v1143_v27  ;;  %v817_v39 = vpop.f32.mrb[60].mxu0  ;;  %v945_v40 = vpop.f32.mrb[60].mxu1 }
 0x18d   :  { %1668 = vst.msk [vmem:[%s2940_s4 + $0xe4] sm:$0xf] %vm1610_vm1, %v1882_v23  ;;  %v1316_v34 = vmax.f32 %v1252_v28, 0.0  ;;  %v1253_v37 = vadd.f32 %v2830_v53, %v1182_v30  ;;  %v982_v43 = vadd.f32 %v817_v39, %v117_v32  ;;  %v1014_v44 = vadd.f32 %v945_v40, %v149_v33  ;;  %v819_v46 = vpop.f32.mrb[61].mxu0  ;;  %v947_v45 = vpop.f32.mrb[61].mxu1 }
 0x18e   :  { %v1348_v35 = vmax.f32 %v1284_v29, 0.0  ;;  %v1285_v38 = vadd.f32 %v2830_v53, %v1214_v31  ;;  %v820_v54 = vpop.f32.mrb[62].mxu0  ;;  %v948_v55 = vpop.f32.mrb[62].mxu1 }
 0x18f   :  { %v1851_v47 = vpack.c.bf16 %v1316_v34, %v1316_v34  ;;  %v1317_v49 = vmax.f32 %v1253_v37, 0.0  ;;  %1047 = vst.msk [vmem:[#allocation2 + $0xf0] sm:$0xff] %vm22_vm0, %v982_v43  ;;  %1079 = vst.msk [vmem:[#allocation2 + $0x1f0] sm:$0xff] %vm22_vm0, %v1014_v44  ;;  %v983_v58 = vadd.f32 %v820_v54, %v118_v41  ;;  %v1015_v59 = vadd.f32 %v948_v55, %v150_v42  ;;  %v822_v60 = vpop.f32.mrb[63].mxu0  ;;  %v950_v61 = vpop.f32.mrb[63].mxu1 }
 0x190   :  { %v1883_v48 = vpack.c.bf16 %v1348_v35, %v1348_v35  ;;  %v1349_v50 = vmax.f32 %v1285_v38, 0.0  ;;  %v1112_v51 = vld [vmem:[#allocation2 + $0xe0] sm:$0xff] }
 0x191   :  { %v1144_v52 = vld [vmem:[#allocation2 + $0x1e0] sm:$0xff]  ;;  %v1183_v56 = vmul.f32 %v2799_v19, %v1112_v51  ;;  %1637 = vst.msk [vmem:[%s2940_s4 + $0x68] sm:$0xf] %vm1610_vm1, %v1851_v47  ;;  %v1852_v62 = vpack.c.bf16 %v1317_v49, %v1317_v49  ;;  %v1113_v0 = vld [vmem:[#allocation2 + $0xe8] sm:$0xff] }
 0x192   :  { %v1215_v57 = vmul.f32 %v2799_v19, %v1144_v52  ;;  %1669 = vst.msk [vmem:[%s2940_s4 + $0xe8] sm:$0xf] %vm1610_vm1, %v1883_v48  ;;  %v1884_v63 = vpack.c.bf16 %v1349_v50, %v1349_v50  ;;  %v1145_v1 = vld [vmem:[#allocation2 + $0x1e8] sm:$0xff]  ;;  %v1184_v4 = vmul.f32 %v2799_v19, %v1113_v0 }
 0x193   :  { %v1254_v2 = vadd.f32 %v2830_v53, %v1183_v56  ;;  %v1216_v5 = vmul.f32 %v2799_v19, %v1145_v1  ;;  %1048 = vst.msk [vmem:[#allocation2 + $0xf8] sm:$0xff] %vm22_vm0, %v983_v58  ;;  %1080 = vst.msk [vmem:[#allocation2 + $0x1f8] sm:$0xff] %vm22_vm0, %v1015_v59 }
 0x194   :  { %v1286_v3 = vadd.f32 %v2830_v53, %v1215_v57  ;;  %1638 = vst.msk [vmem:[%s2940_s4 + $0x6c] sm:$0xf] %vm1610_vm1, %v1852_v62  ;;  %1670 = vst.msk [vmem:[%s2940_s4 + $0xec] sm:$0xf] %vm1610_vm1, %v1884_v63  ;;  %v1255_v8 = vadd.f32 %v2830_v53, %v1184_v4 }
 0x195   :  { %v1318_v6 = vmax.f32 %v1254_v2, 0.0  ;;  %v1287_v9 = vadd.f32 %v2830_v53, %v1216_v5 }
 0x196   :  { %v1350_v7 = vmax.f32 %v1286_v3, 0.0  ;;  %v1319_v12 = vmax.f32 %v1255_v8, 0.0  ;;  %v1114_v14 = vld [vmem:[#allocation2 + $0xf0] sm:$0xff] }
 0x197   :  { %v1853_v10 = vpack.c.bf16 %v1318_v6, %v1318_v6  ;;  %v1351_v13 = vmax.f32 %v1287_v9, 0.0  ;;  %v1146_v15 = vld [vmem:[#allocation2 + $0x1f0] sm:$0xff]  ;;  %v1185_v17 = vmul.f32 %v2799_v19, %v1114_v14 }
 0x198   :  { %v1885_v11 = vpack.c.bf16 %v1350_v7, %v1350_v7  ;;  %v1854_v16 = vpack.c.bf16 %v1319_v12, %v1319_v12  ;;  %v1217_v18 = vmul.f32 %v2799_v19, %v1146_v15 }
 0x199   :  { %1639 = vst.msk [vmem:[%s2940_s4 + $0x70] sm:$0xf] %vm1610_vm1, %v1853_v10  ;;  %v1886_v36 = vpack.c.bf16 %v1351_v13, %v1351_v13  ;;  %v1256_v22 = vadd.f32 %v2830_v53, %v1185_v17 }
 0x19a   :  { %1671 = vst.msk [vmem:[%s2940_s4 + $0xf0] sm:$0xf] %vm1610_vm1, %v1885_v11  ;;  %v1115_v20 = vld [vmem:[#allocation2 + $0xf8] sm:$0xff]  ;;  %1640 = vst.msk [vmem:[%s2940_s4 + $0x74] sm:$0xf] %vm1610_vm1, %v1854_v16  ;;  %v1288_v23 = vadd.f32 %v2830_v53, %v1217_v18 }
 0x19b   :  { %v1147_v21 = vld [vmem:[#allocation2 + $0x1f8] sm:$0xff]  ;;  %1672 = vst.msk [vmem:[%s2940_s4 + $0xf4] sm:$0xf] %vm1610_vm1, %v1886_v36  ;;  %v1186_v24 = vmul.f32 %v2799_v19, %v1115_v20  ;;  %v1320_v26 = vmax.f32 %v1256_v22, 0.0 }
 0x19c   :  { %v1218_v25 = vmul.f32 %v2799_v19, %v1147_v21  ;;  %v1352_v27 = vmax.f32 %v1288_v23, 0.0 }
 0x19d   :  { %v1257_v28 = vadd.f32 %v2830_v53, %v1186_v24  ;;  %v1855_v30 = vpack.c.bf16 %v1320_v26, %v1320_v26 }
 0x19e   :  { %v1289_v29 = vadd.f32 %v2830_v53, %v1218_v25  ;;  %v1887_v31 = vpack.c.bf16 %v1352_v27, %v1352_v27 }
 0x19f   :  { %v1321_v32 = vmax.f32 %v1257_v28, 0.0  ;;  %1641 = vst.msk [vmem:[%s2940_s4 + $0x78] sm:$0xf] %vm1610_vm1, %v1855_v30 }
 0x1a0   :  { %v1353_v33 = vmax.f32 %v1289_v29, 0.0  ;;  %1673 = vst.msk [vmem:[%s2940_s4 + $0xf8] sm:$0xf] %vm1610_vm1, %v1887_v31 }
 0x1a1   :  { %v1856_v19 = vpack.c.bf16 %v1321_v32, %v1321_v32 }
 0x1a2   :  { %v1888_v34 = vpack.c.bf16 %v1353_v33, %v1353_v33 }
 0x1a3   :  { %1642 = vst.msk [vmem:[%s2940_s4 + $0x7c] sm:$0xf] %vm1610_vm1, %v1856_v19 }
 0x1a4   :  { %1674 = vst.msk [vmem:[%s2940_s4 + $0xfc] sm:$0xf] %vm1610_vm1, %v1888_v34 }

// kernel: _lambda_.24
= control target key start
LH: loop header
LB: loop body
LE: loop exit
PB: predicated region body
PF: predicated region fallthrough
CT: control target
= control target key end

     0   :  { %vm22_vm0 = vcmask 523264   ;;  %vm1100_vm1 = vcmask 519168   ;;  %s1964_s1 = inlined_call_operand.vmem [shape: bf16[640,64], index: 1, kind: input, shape index: {}]   ;;  %s1965_s0 = inlined_call_operand.vmem [shape: bf16[128,640], index: 0, kind: input, shape index: {}]   ;;  %s1966_s2 = inlined_call_operand.vmem [shape: f32[1,64], index: 2, kind: input, shape index: {}]   ;;  %s1967_s3 = inlined_call_operand.vmem [shape: f32[1,64], index: 3, kind: input, shape index: {}]   ;;  %s1968_s4 = inlined_call_operand.vmem [shape: bf16[128,64], index: 4, kind: output, shape index: {}]  }
   0x1   :  { %v1428_v0 = vld [vmem:[%s1964_s1 + $0x40] sm:$0xff]   ;;  %v1432_v4 = vld [vmem:[%s1964_s1 + $0x48] sm:$0xff]   ;;  %v1436_v8 = vld [vmem:[%s1964_s1 + $0x50] sm:$0xff]  }
   0x2   :  { %v1429_v1 = vld [vmem:[%s1964_s1 + $0xc0] sm:$0xff]   ;;  %1235 = vmatprep.subr.bf16.mxu0 %v1428_v0  ;;  %v1433_v5 = vld [vmem:[%s1964_s1 + $0xc8] sm:$0xff]   ;;  %v1437_v9 = vld [vmem:[%s1964_s1 + $0xd0] sm:$0xff]  }
   0x3   :  { %v1430_v2 = vld [vmem:[%s1964_s1] sm:$0xff]   ;;  %1299 = vmatprep.subr.bf16.mxu1 %v1429_v1  ;;  %v1434_v6 = vld [vmem:[%s1964_s1 + $0x8] sm:$0xff]   ;;  %v1438_v10 = vld [vmem:[%s1964_s1 + $0x10] sm:$0xff]  }
   0x4   :  { %v1431_v3 = vld [vmem:[%s1964_s1 + $0x80] sm:$0xff]   ;;  %1236 = vmatpush3.bf16.msra.mxu0 %v1430_v2  ;;  %v1435_v7 = vld [vmem:[%s1964_s1 + $0x88] sm:$0xff]   ;;  %v1439_v11 = vld [vmem:[%s1964_s1 + $0x90] sm:$0xff]  }
   0x5   :  { %1300 = vmatpush3.bf16.msra.mxu1 %v1431_v3  ;;  %1237 = vmatprep.subr.bf16.mxu0 %v1432_v4  ;;  %v1440_v12 = vld [vmem:[%s1964_s1 + $0x58] sm:$0xff]   ;;  %v1444_v16 = vld [vmem:[%s1964_s1 + $0x60] sm:$0xff]   ;;  %v1448_v20 = vld [vmem:[%s1964_s1 + $0x68] sm:$0xff]  }
   0x6   :  { %1301 = vmatprep.subr.bf16.mxu1 %v1433_v5  ;;  %v1441_v13 = vld [vmem:[%s1964_s1 + $0xd8] sm:$0xff]   ;;  %v1445_v17 = vld [vmem:[%s1964_s1 + $0xe0] sm:$0xff]   ;;  %v1449_v21 = vld [vmem:[%s1964_s1 + $0xe8] sm:$0xff]  }
   0x7   :  { %v1442_v14 = vld [vmem:[%s1964_s1 + $0x18] sm:$0xff]   ;;  %v1446_v18 = vld [vmem:[%s1964_s1 + $0x20] sm:$0xff]   ;;  %v1450_v22 = vld [vmem:[%s1964_s1 + $0x28] sm:$0xff]  }
   0x8   :  { %1238 = vmatpush3.bf16.msra.mxu0 %v1434_v6  ;;  %v1443_v15 = vld [vmem:[%s1964_s1 + $0x98] sm:$0xff]   ;;  %v1447_v19 = vld [vmem:[%s1964_s1 + $0xa0] sm:$0xff]   ;;  %v1451_v23 = vld [vmem:[%s1964_s1 + $0xa8] sm:$0xff]  }
   0x9   :  { %1302 = vmatpush3.bf16.msra.mxu1 %v1435_v7  ;;  %1239 = vmatprep.subr.bf16.mxu0 %v1436_v8  ;;  %v1452_v24 = vld [vmem:[%s1964_s1 + $0x70] sm:$0xff]   ;;  %v1456_v28 = vld [vmem:[%s1964_s1 + $0x78] sm:$0xff]   ;;  %v1465_v35 = vld [vmem:[%s1965_s0 + $0xc] ss:$20 sps:$4 sm:$0xff]  }
   0xa   :  { %1303 = vmatprep.subr.bf16.mxu1 %v1437_v9  ;;  %v1453_v25 = vld [vmem:[%s1964_s1 + $0xf0] sm:$0xff]   ;;  %v1457_v29 = vld [vmem:[%s1964_s1 + $0xf8] sm:$0xff]   ;;  %v1466_v36 = vld [vmem:[%s1964_s1 + $0x100] sm:$0xff]   ;;  %760 = vmatprep.mubr.bf16.mxu1 %v1465_v35 }
   0xb   :  { %v1454_v26 = vld [vmem:[%s1964_s1 + $0x30] sm:$0xff]   ;;  %v1458_v30 = vld [vmem:[%s1964_s1 + $0x38] sm:$0xff]   ;;  %v1467_v37 = vld [vmem:[%s1965_s0 + $0x2c] ss:$20 sps:$4 sm:$0xff]  }
   0xc   :  { %1240 = vmatpush3.bf16.msra.mxu0 %v1438_v10  ;;  %v1455_v27 = vld [vmem:[%s1964_s1 + $0xb0] sm:$0xff]   ;;  %v1459_v31 = vld [vmem:[%s1964_s1 + $0xb8] sm:$0xff]   ;;  %v1473_v39 = vld [vmem:[%s1964_s1 + $0x108] sm:$0xff]  }
   0xd   :  { %1304 = vmatpush3.bf16.msra.mxu1 %v1439_v11  ;;  %1241 = vmatprep.subr.bf16.mxu0 %v1440_v12  ;;  %v1460_v32 = vld [vmem:[%s1965_s0] ss:$20 sps:$4 sm:$0xff]   ;;  %v1462_v33 = vld [vmem:[%s1965_s0 + $0x4] ss:$20 sps:$4 sm:$0xff]   ;;  %v1463_v34 = vld [vmem:[%s1965_s0 + $0x8] ss:$20 sps:$4 sm:$0xff]  }
   0xe   :  { %1305 = vmatprep.subr.bf16.mxu1 %v1441_v13  ;;  %663 = vmatprep.mubr.bf16.mxu0 %v1462_v33  ;;  %v1469_v38 = vld [vmem:[%s1965_s0 + $0x34] ss:$20 sps:$4 sm:$0xff]   ;;  %v1472_v41 = vld [vmem:[%s1965_s0 + $0x30] ss:$20 sps:$4 sm:$0xff]   ;;  %v1487_v45 = vld [vmem:[%s1964_s1 + $0x118] sm:$0xff]  }
   0xf   :  { %v1471_v40 = vld [vmem:[%s1965_s0 + $0x28] ss:$20 sps:$4 sm:$0xff]   ;;  %v1480_v44 = vld [vmem:[%s1964_s1 + $0x110] sm:$0xff]   ;;  %v1479_v47 = vld [vmem:[%s1965_s0 + $0x58] ss:$20 sps:$4 sm:$0xff]  }
  0x10   :  { %1242 = vmatpush3.bf16.msra.mxu0 %v1442_v14  ;;  %v1474_v42 = vld [vmem:[%s1965_s0 + $0x54] ss:$20 sps:$4 sm:$0xff]   ;;  %v1476_v43 = vld [vmem:[%s1965_s0 + $0x5c] ss:$20 sps:$4 sm:$0xff]   ;;  %v1483_v49 = vld [vmem:[%s1965_s0 + $0x84] ss:$20 sps:$4 sm:$0xff]  }
  0x11   :  { %1306 = vmatpush3.bf16.msra.mxu1 %v1443_v15  ;;  %1243 = vmatprep.subr.bf16.mxu0 %v1444_v16  ;;  %v1478_v46 = vld [vmem:[%s1965_s0 + $0x50] ss:$20 sps:$4 sm:$0xff]   ;;  %v1501_v51 = vld [vmem:[%s1964_s1 + $0x128] sm:$0xff]   ;;  %v1486_v53 = vld [vmem:[%s1965_s0 + $0x80] ss:$20 sps:$4 sm:$0xff]   ;;  %v1524_v16 = vmov 0.0  }
  0x12   :  { %1307 = vmatprep.subr.bf16.mxu1 %v1445_v17  ;;  %v1481_v48 = vld [vmem:[%s1965_s0 + $0x7c] ss:$20 sps:$4 sm:$0xff]   ;;  %v1494_v50 = vld [vmem:[%s1964_s1 + $0x120] sm:$0xff]   ;;  %v1485_v52 = vld [vmem:[%s1965_s0 + $0x78] ss:$20 sps:$4 sm:$0xff]   ;;  %25 = vst.msk [vmem:[#allocation2 + $0x10] sm:$0xff] %vm22_vm0, %v1524_v16 }
  0x13   :  { %v1488_v54 = vld [vmem:[%s1965_s0 + $0xa4] ss:$20 sps:$4 sm:$0xff]   ;;  %v1508_v55 = vld [vmem:[%s1964_s1 + $0x130] sm:$0xff]   ;;  %v1490_v56 = vld [vmem:[%s1965_s0 + $0xac] ss:$20 sps:$4 sm:$0xff]   ;;  %23 = vst.msk [vmem:[#allocation2] sm:$0xff] %vm22_vm0, %v1524_v16 }
  0x14   :  { %1244 = vmatpush3.bf16.msra.mxu0 %v1446_v18  ;;  %v1515_v57 = vld [vmem:[%s1964_s1 + $0x138] sm:$0xff]   ;;  %v1492_v58 = vld [vmem:[%s1965_s0 + $0xa0] ss:$20 sps:$4 sm:$0xff]   ;;  %v1500_v63 = vld [vmem:[%s1965_s0 + $0xd0] ss:$20 sps:$4 sm:$0xff]   ;;  %24 = vst.msk [vmem:[#allocation2 + $0x8] sm:$0xff] %vm22_vm0, %v1524_v16 }
  0x15   :  { %1308 = vmatpush3.bf16.msra.mxu1 %v1447_v19  ;;  %1245 = vmatprep.subr.bf16.mxu0 %v1448_v20  ;;  %v1493_v59 = vld [vmem:[%s1965_s0 + $0xa8] ss:$20 sps:$4 sm:$0xff]   ;;  %v1495_v60 = vld [vmem:[%s1965_s0 + $0xcc] ss:$20 sps:$4 sm:$0xff]   ;;  %v1506_v2 = vld [vmem:[%s1965_s0 + $0xf0] ss:$20 sps:$4 sm:$0xff]  }
  0x16   :  { %1309 = vmatprep.subr.bf16.mxu1 %v1449_v21  ;;  %v1497_v61 = vld [vmem:[%s1965_s0 + $0xd4] ss:$20 sps:$4 sm:$0xff]   ;;  %v1504_v1 = vld [vmem:[%s1965_s0 + $0xfc] ss:$20 sps:$4 sm:$0xff]   ;;  %v1507_v3 = vld [vmem:[%s1965_s0 + $0xf8] ss:$20 sps:$4 sm:$0xff]  }
  0x17   :  { %v1499_v62 = vld [vmem:[%s1965_s0 + $0xc8] ss:$20 sps:$4 sm:$0xff]   ;;  %v1511_v5 = vld [vmem:[%s1965_s0 + $0x124] ss:$20 sps:$4 sm:$0xff]   ;;  %v1514_v7 = vld [vmem:[%s1965_s0 + $0x120] ss:$20 sps:$4 sm:$0xff]  }
  0x18   :  { %1246 = vmatpush3.bf16.msra.mxu0 %v1450_v22  ;;  %v1502_v0 = vld [vmem:[%s1965_s0 + $0xf4] ss:$20 sps:$4 sm:$0xff]   ;;  %v1509_v4 = vld [vmem:[%s1965_s0 + $0x11c] ss:$20 sps:$4 sm:$0xff]   ;;  %v1513_v6 = vld [vmem:[%s1965_s0 + $0x118] ss:$20 sps:$4 sm:$0xff]  }
  0x19   :  { %1310 = vmatpush3.bf16.msra.mxu1 %v1451_v23  ;;  %1247 = vmatprep.subr.bf16.mxu0 %v1452_v24  ;;  %v1516_v8 = vld [vmem:[%s1965_s0 + $0x10] ss:$20 sps:$4 sm:$0xff]   ;;  %v1518_v10 = vld [vmem:[%s1965_s0 + $0x38] ss:$20 sps:$4 sm:$0xff]   ;;  %v1520_v12 = vld [vmem:[%s1965_s0 + $0x60] ss:$20 sps:$4 sm:$0xff]  }
  0x1a   :  { %1311 = vmatprep.subr.bf16.mxu1 %v1453_v25  ;;  %v1517_v9 = vld [vmem:[%s1965_s0 + $0xb0] ss:$20 sps:$4 sm:$0xff]   ;;  %v1519_v11 = vld [vmem:[%s1965_s0 + $0xd8] ss:$20 sps:$4 sm:$0xff]   ;;  %v1521_v13 = vld [vmem:[%s1965_s0 + $0x100] ss:$20 sps:$4 sm:$0xff]  }
  0x1b   :  { %v1522_v14 = vld [vmem:[%s1965_s0 + $0x88] ss:$20 sps:$4 sm:$0xff]   ;;  %26 = vst.msk [vmem:[#allocation2 + $0x18] sm:$0xff] %vm22_vm0, %v1524_v16  ;;  %27 = vst.msk [vmem:[#allocation2 + $0x20] sm:$0xff] %vm22_vm0, %v1524_v16 }
  0x1c   :  { %1248 = vmatpush3.bf16.msra.mxu0 %v1454_v26  ;;  %v1523_v15 = vld [vmem:[%s1965_s0 + $0x128] ss:$20 sps:$4 sm:$0xff]   ;;  %28 = vst.msk [vmem:[#allocation2 + $0x28] sm:$0xff] %vm22_vm0, %v1524_v16  ;;  %29 = vst.msk [vmem:[#allocation2 + $0x30] sm:$0xff] %vm22_vm0, %v1524_v16 }
  0x1d   :  { %1312 = vmatpush3.bf16.msra.mxu1 %v1455_v27  ;;  %1249 = vmatprep.subr.bf16.mxu0 %v1456_v28  ;;  %30 = vst.msk [vmem:[#allocation2 + $0x38] sm:$0xff] %vm22_vm0, %v1524_v16  ;;  %31 = vst.msk [vmem:[#allocation2 + $0x40] sm:$0xff] %vm22_vm0, %v1524_v16 }
  0x1e   :  { %1313 = vmatprep.subr.bf16.mxu1 %v1457_v29  ;;  %32 = vst.msk [vmem:[#allocation2 + $0x48] sm:$0xff] %vm22_vm0, %v1524_v16  ;;  %33 = vst.msk [vmem:[#allocation2 + $0x50] sm:$0xff] %vm22_vm0, %v1524_v16 }
  0x1f   :  { %34 = vst.msk [vmem:[#allocation2 + $0x58] sm:$0xff] %vm22_vm0, %v1524_v16  ;;  %35 = vst.msk [vmem:[#allocation2 + $0x60] sm:$0xff] %vm22_vm0, %v1524_v16 }
  0x20   :  { %1250 = vmatpush3.bf16.msra.mxu0 %v1458_v30  ;;  %36 = vst.msk [vmem:[#allocation2 + $0x68] sm:$0xff] %vm22_vm0, %v1524_v16  ;;  %37 = vst.msk [vmem:[#allocation2 + $0x70] sm:$0xff] %vm22_vm0, %v1524_v16 }
  0x21   :  { %1314 = vmatpush3.bf16.msra.mxu1 %v1459_v31  ;;  %1379 = vmatprep.subr.bf16.mxu0 %v1466_v36  ;;  %38 = vst.msk [vmem:[#allocation2 + $0x78] sm:$0xff] %vm22_vm0, %v1524_v16 }
  0x22   :  { %1411 = vmatprep.subr.bf16.mxu1 %v1466_v36 }
  0x23   :  { %664 = vmatmul.mubr.bf16.vlgmr.msra.gmra.mrb[0].mxu0 %v1460_v32 }
  0x24   :  { %761 = vmatmul.mubr.bf16.vlgmr.msra.gmra.mrb[0].mxu1 %v1463_v34  ;;  %1380 = vmatpush3.bf16.msra.mxu0 %v1466_v36 }
  0x25   :  { %1419 = vmatpush3.bf16.msra.mxu1 %v1466_v36  ;;  %671 = vmatprep.mubr.bf16.mxu0 %v1467_v37 }
  0x26   :  { %768 = vmatprep.mubr.bf16.mxu1 %v1469_v38  ;;  %1381 = vmatprep.subr.bf16.mxu0 %v1473_v39 }
  0x27   :  { %1412 = vmatprep.subr.bf16.mxu1 %v1473_v39 }
  0x28   :  { %1382 = vmatpush3.bf16.msra.mxu0 %v1473_v39 }
  0x29   :  { %1420 = vmatpush3.bf16.msra.mxu1 %v1473_v39  ;;  %1383 = vmatprep.subr.bf16.mxu0 %v1480_v44 }
  0x2a   :  { %1413 = vmatprep.subr.bf16.mxu1 %v1480_v44 }
  0x2b   :  { %672 = vmatmul.mubr.bf16.gmra.mrb[4].mxu0 %v1471_v40 }
  0x2c   :  { %769 = vmatmul.mubr.bf16.gmra.mrb[4].mxu1 %v1472_v41  ;;  %679 = vmatprep.mubr.bf16.mxu0 %v1474_v42 }
  0x2d   :  { %776 = vmatprep.mubr.bf16.mxu1 %v1476_v43  ;;  %1384 = vmatpush3.bf16.msra.mxu0 %v1480_v44 }
  0x2e   :  { %1421 = vmatpush3.bf16.msra.mxu1 %v1480_v44  ;;  %1385 = vmatprep.subr.bf16.mxu0 %v1487_v45 }
  0x2f   :  { %1414 = vmatprep.subr.bf16.mxu1 %v1487_v45 }
  0x31   :  { %1386 = vmatpush3.bf16.msra.mxu0 %v1487_v45 }
  0x32   :  { %1422 = vmatpush3.bf16.msra.mxu1 %v1487_v45  ;;  %1387 = vmatprep.subr.bf16.mxu0 %v1494_v50 }
  0x33   :  { %680 = vmatmul.mubr.bf16.gmra.mrb[8].mxu0 %v1478_v46  ;;  %1415 = vmatprep.subr.bf16.mxu1 %v1494_v50 }
  0x34   :  { %777 = vmatmul.mubr.bf16.gmra.mrb[8].mxu1 %v1479_v47  ;;  %687 = vmatprep.mubr.bf16.mxu0 %v1481_v48 }
  0x35   :  { %784 = vmatprep.mubr.bf16.mxu1 %v1483_v49  ;;  %1388 = vmatpush3.bf16.msra.mxu0 %v1494_v50 }
  0x36   :  { %1423 = vmatpush3.bf16.msra.mxu1 %v1494_v50  ;;  %1389 = vmatprep.subr.bf16.mxu0 %v1501_v51 }
  0x37   :  { %1416 = vmatprep.subr.bf16.mxu1 %v1501_v51 }
  0x39   :  { %1390 = vmatpush3.bf16.msra.mxu0 %v1501_v51 }
  0x3a   :  { %1424 = vmatpush3.bf16.msra.mxu1 %v1501_v51  ;;  %1391 = vmatprep.subr.bf16.mxu0 %v1508_v55 }
  0x3b   :  { %688 = vmatmul.mubr.bf16.gmra.mrb[12].mxu0 %v1485_v52  ;;  %1417 = vmatprep.subr.bf16.mxu1 %v1508_v55 }
  0x3c   :  { %785 = vmatmul.mubr.bf16.gmra.mrb[12].mxu1 %v1486_v53  ;;  %695 = vmatprep.mubr.bf16.mxu0 %v1488_v54 }
  0x3d   :  { %792 = vmatprep.mubr.bf16.mxu1 %v1490_v56  ;;  %1392 = vmatpush3.bf16.msra.mxu0 %v1508_v55 }
  0x3e   :  { %1425 = vmatpush3.bf16.msra.mxu1 %v1508_v55  ;;  %1393 = vmatprep.subr.bf16.mxu0 %v1515_v57 }
  0x3f   :  { %1418 = vmatprep.subr.bf16.mxu1 %v1515_v57 }
  0x41   :  { %1394 = vmatpush3.bf16.msra.mxu0 %v1515_v57 }
  0x42   :  { %1426 = vmatpush3.bf16.msra.mxu1 %v1515_v57 }
  0x43   :  { %696 = vmatmul.mubr.bf16.gmra.mrb[16].mxu0 %v1492_v58 }
  0x44   :  { %793 = vmatmul.mubr.bf16.gmra.mrb[16].mxu1 %v1493_v59  ;;  %703 = vmatprep.mubr.bf16.mxu0 %v1495_v60 }
  0x45   :  { %800 = vmatprep.mubr.bf16.mxu1 %v1497_v61 }
  0x4b   :  { %704 = vmatmul.mubr.bf16.gmra.mrb[20].mxu0 %v1499_v62 }
  0x4c   :  { %801 = vmatmul.mubr.bf16.gmra.mrb[20].mxu1 %v1500_v63  ;;  %711 = vmatprep.mubr.bf16.mxu0 %v1502_v0 }
  0x4d   :  { %808 = vmatprep.mubr.bf16.mxu1 %v1504_v1 }
  0x53   :  { %712 = vmatmul.mubr.bf16.gmra.mrb[24].mxu0 %v1506_v2 }
  0x54   :  { %809 = vmatmul.mubr.bf16.gmra.mrb[24].mxu1 %v1507_v3  ;;  %719 = vmatprep.mubr.bf16.mxu0 %v1509_v4 }
  0x55   :  { %816 = vmatprep.mubr.bf16.mxu1 %v1511_v5 }
  0x5b   :  { %720 = vmatmul.mubr.bf16.gmra.mrb[28].mxu0 %v1513_v6 }
  0x5c   :  { %817 = vmatmul.mubr.bf16.gmra.mrb[28].mxu1 %v1514_v7  ;;  %1395 = vmatprep.mubr.bf16.mxu0 %v1516_v8 }
  0x5d   :  { %1403 = vmatprep.mubr.bf16.mxu1 %v1517_v9 }
  0x63   :  { %1396 = vmatmul.mubr.bf16.vlgmr.msra.gmra.mrb[32].mxu0 %v1518_v10 }
  0x64   :  { %1404 = vmatmul.mubr.bf16.vlgmr.msra.gmra.mrb[32].mxu1 %v1519_v11  ;;  %1399 = vmatprep.mubr.bf16.mxu0 %v1520_v12 }
  0x65   :  { %1407 = vmatprep.mubr.bf16.mxu1 %v1521_v13 }
  0x6b   :  { %1400 = vmatmul.mubr.bf16.gmra.mrb[36].mxu0 %v1522_v14 }
  0x6c   :  { %1408 = vmatmul.mubr.bf16.gmra.mrb[36].mxu1 %v1523_v15 }
  0xf6   :  { %v1251_v17 = vpop.f32.mrb[0].mxu0 }
  0xf7   :  { %v1315_v18 = vpop.f32.mrb[0].mxu1  ;;  %v1252_v19 = vpop.f32.mrb[1].mxu0 }
  0xf8   :  { %v1253_v20 = vadd.f32 %v1252_v19, %v1251_v17  ;;  %v1316_v21 = vpop.f32.mrb[1].mxu1  ;;  %v1254_v22 = vpop.f32.mrb[2].mxu0 }
  0xf9   :  { %v1317_v23 = vadd.f32 %v1316_v21, %v1315_v18  ;;  %v1318_v24 = vpop.f32.mrb[2].mxu1  ;;  %v1255_v25 = vpop.f32.mrb[3].mxu0 }
  0xfa   :  { %v1256_v26 = vadd.f32 %v1255_v25, %v1254_v22  ;;  %v1319_v27 = vpop.f32.mrb[3].mxu1 }
  0xfb   :  { %v1320_v28 = vadd.f32 %v1319_v27, %v1318_v24  ;;  %v1806_v29 = vadd.f32 %v1317_v23, %v1253_v20 }
  0xfd   :  { %v1808_v30 = vadd.f32 %v1320_v28, %v1256_v26 }
  0xfe   :  { %v1257_v31 = vpop.f32.mrb[4].mxu0 }
  0xff   :  { %v1321_v32 = vpop.f32.mrb[4].mxu1  ;;  %v1258_v33 = vpop.f32.mrb[5].mxu0 }
 0x100   :  { %v1259_v34 = vadd.f32 %v1258_v33, %v1257_v31  ;;  %v1322_v35 = vpop.f32.mrb[5].mxu1  ;;  %v1260_v36 = vpop.f32.mrb[6].mxu0 }
 0x101   :  { %v1323_v37 = vadd.f32 %v1322_v35, %v1321_v32  ;;  %v1324_v38 = vpop.f32.mrb[6].mxu1  ;;  %v1261_v39 = vpop.f32.mrb[7].mxu0 }
 0x102   :  { %v1262_v40 = vadd.f32 %v1261_v39, %v1260_v36  ;;  %v1325_v41 = vpop.f32.mrb[7].mxu1 }
 0x103   :  { %v1326_v42 = vadd.f32 %v1325_v41, %v1324_v38  ;;  %v1810_v43 = vadd.f32 %v1323_v37, %v1259_v34 }
 0x105   :  { %v1812_v44 = vadd.f32 %v1326_v42, %v1262_v40 }
 0x106   :  { %v1263_v45 = vpop.f32.mrb[8].mxu0 }
 0x107   :  { %v1327_v46 = vpop.f32.mrb[8].mxu1  ;;  %v1264_v47 = vpop.f32.mrb[9].mxu0 }
 0x108   :  { %v1265_v48 = vadd.f32 %v1264_v47, %v1263_v45  ;;  %v1328_v49 = vpop.f32.mrb[9].mxu1  ;;  %v1266_v50 = vpop.f32.mrb[10].mxu0 }
 0x109   :  { %v1329_v51 = vadd.f32 %v1328_v49, %v1327_v46  ;;  %v1330_v52 = vpop.f32.mrb[10].mxu1  ;;  %v1267_v53 = vpop.f32.mrb[11].mxu0 }
 0x10a   :  { %v1268_v54 = vadd.f32 %v1267_v53, %v1266_v50  ;;  %v1331_v55 = vpop.f32.mrb[11].mxu1 }
 0x10b   :  { %v1332_v56 = vadd.f32 %v1331_v55, %v1330_v52  ;;  %v1814_v57 = vadd.f32 %v1329_v51, %v1265_v48 }
 0x10d   :  { %v1816_v58 = vadd.f32 %v1332_v56, %v1268_v54 }
 0x10e   :  { %v1269_v59 = vpop.f32.mrb[12].mxu0 }
 0x10f   :  { %v1333_v60 = vpop.f32.mrb[12].mxu1  ;;  %v1270_v61 = vpop.f32.mrb[13].mxu0 }
 0x110   :  { %v1271_v62 = vadd.f32 %v1270_v61, %v1269_v59  ;;  %v1334_v63 = vpop.f32.mrb[13].mxu1  ;;  %v1272_v0 = vpop.f32.mrb[14].mxu0 }
 0x111   :  { %v1335_v1 = vadd.f32 %v1334_v63, %v1333_v60  ;;  %v1336_v2 = vpop.f32.mrb[14].mxu1  ;;  %v1273_v3 = vpop.f32.mrb[15].mxu0 }
 0x112   :  { %v1274_v4 = vadd.f32 %v1273_v3, %v1272_v0  ;;  %v1337_v5 = vpop.f32.mrb[15].mxu1 }
 0x113   :  { %v1338_v6 = vadd.f32 %v1337_v5, %v1336_v2  ;;  %v1818_v7 = vadd.f32 %v1335_v1, %v1271_v62 }
 0x115   :  { %v1820_v8 = vadd.f32 %v1338_v6, %v1274_v4 }
 0x116   :  { %v1275_v9 = vpop.f32.mrb[16].mxu0 }
 0x117   :  { %v1339_v10 = vpop.f32.mrb[16].mxu1  ;;  %v1276_v11 = vpop.f32.mrb[17].mxu0 }
 0x118   :  { %v1277_v12 = vadd.f32 %v1276_v11, %v1275_v9  ;;  %v1340_v13 = vpop.f32.mrb[17].mxu1  ;;  %v1278_v14 = vpop.f32.mrb[18].mxu0  ;;  %v41_v9 = vld [vmem:[#allocation2 + $0x10] sm:$0xff] }
 0x119   :  { %v1341_v15 = vadd.f32 %v1340_v13, %v1339_v10  ;;  %v1342_v16 = vpop.f32.mrb[18].mxu1  ;;  %v1279_v17 = vpop.f32.mrb[19].mxu0 }
 0x11a   :  { %v1280_v18 = vadd.f32 %v1279_v17, %v1278_v14  ;;  %v1343_v19 = vpop.f32.mrb[19].mxu1  ;;  %v39_v14 = vld [vmem:[#allocation2] sm:$0xff] }
 0x11b   :  { %v1344_v20 = vadd.f32 %v1343_v19, %v1342_v16  ;;  %v795_v21 = vadd.f32 %v1341_v15, %v1277_v12  ;;  %v49_v12 = vld [vmem:[#allocation2 + $0x50] sm:$0xff] }
 0x11d   :  { %v1822_v22 = vadd.f32 %v1344_v20, %v1280_v18  ;;  %v47_v18 = vld [vmem:[#allocation2 + $0x40] sm:$0xff]  ;;  %v42_v20 = vld [vmem:[#allocation2 + $0x18] sm:$0xff] }
 0x11e   :  { %v1281_v23 = vpop.f32.mrb[20].mxu0 }
 0x11f   :  { %v1345_v24 = vpop.f32.mrb[20].mxu1  ;;  %v1282_v25 = vpop.f32.mrb[21].mxu0 }
 0x120   :  { %v1283_v26 = vadd.f32 %v1282_v25, %v1281_v23  ;;  %v1346_v27 = vpop.f32.mrb[21].mxu1  ;;  %v1284_v28 = vpop.f32.mrb[22].mxu0 }
 0x121   :  { %v1347_v31 = vadd.f32 %v1346_v27, %v1345_v24  ;;  %v1348_v32 = vpop.f32.mrb[22].mxu1  ;;  %v1285_v33 = vpop.f32.mrb[23].mxu0  ;;  %v50_v27 = vld [vmem:[#allocation2 + $0x58] sm:$0xff] }
 0x122   :  { %v1286_v34 = vadd.f32 %v1285_v33, %v1284_v28  ;;  %v1349_v35 = vpop.f32.mrb[23].mxu1 }
 0x123   :  { %v1350_v36 = vadd.f32 %v1349_v35, %v1348_v32  ;;  %v803_v37 = vadd.f32 %v1347_v31, %v1283_v26  ;;  %v40_v31 = vld [vmem:[#allocation2 + $0x8] sm:$0xff] }
 0x125   :  { %v806_v38 = vadd.f32 %v1350_v36, %v1286_v34  ;;  %v48_v36 = vld [vmem:[#allocation2 + $0x48] sm:$0xff] }
 0x126   :  { %v1287_v39 = vpop.f32.mrb[24].mxu0 }
 0x127   :  { %v1351_v40 = vpop.f32.mrb[24].mxu1  ;;  %v1288_v41 = vpop.f32.mrb[25].mxu0 }
 0x128   :  { %v1289_v42 = vadd.f32 %v1288_v41, %v1287_v39  ;;  %v1352_v45 = vpop.f32.mrb[25].mxu1  ;;  %v1290_v46 = vpop.f32.mrb[26].mxu0 }
 0x129   :  { %v1353_v47 = vadd.f32 %v1352_v45, %v1351_v40  ;;  %v1354_v48 = vpop.f32.mrb[26].mxu1  ;;  %v1291_v49 = vpop.f32.mrb[27].mxu0 }
 0x12a   :  { %v1292_v50 = vadd.f32 %v1291_v49, %v1290_v46  ;;  %v1355_v51 = vpop.f32.mrb[27].mxu1  ;;  %v43_v46 = vld [vmem:[#allocation2 + $0x20] sm:$0xff] }
 0x12b   :  { %v1356_v52 = vadd.f32 %v1355_v51, %v1354_v48  ;;  %v1824_v53 = vadd.f32 %v1353_v47, %v1289_v42  ;;  %v53_v42 = vld [vmem:[#allocation2 + $0x70] sm:$0xff]  ;;  %v1847_v48 = vld [vmem:[%s1966_s2] ss:$0 sm:$0xff] }
 0x12c   :  { %v51_v51 = vld [vmem:[#allocation2 + $0x60] sm:$0xff] }
 0x12d   :  { %v1826_v54 = vadd.f32 %v1356_v52, %v1292_v50 }
 0x12e   :  { %v1293_v55 = vpop.f32.mrb[28].mxu0 }
 0x12f   :  { %v1357_v56 = vpop.f32.mrb[28].mxu1  ;;  %v1294_v59 = vpop.f32.mrb[29].mxu0 }
 0x130   :  { %v1295_v60 = vadd.f32 %v1294_v59, %v1293_v55  ;;  %v1358_v61 = vpop.f32.mrb[29].mxu1  ;;  %v1296_v62 = vpop.f32.mrb[30].mxu0  ;;  %v46_v55 = vld [vmem:[#allocation2 + $0x38] sm:$0xff] }
 0x131   :  { %v1359_v63 = vadd.f32 %v1358_v61, %v1357_v56  ;;  %v1360_v0 = vpop.f32.mrb[30].mxu1  ;;  %v1297_v1 = vpop.f32.mrb[31].mxu0  ;;  %v54_v61 = vld [vmem:[#allocation2 + $0x78] sm:$0xff] }
 0x132   :  { %v1298_v2 = vadd.f32 %v1297_v1, %v1296_v62  ;;  %v1361_v3 = vpop.f32.mrb[31].mxu1 }
 0x133   :  { %v1362_v4 = vadd.f32 %v1361_v3, %v1360_v0  ;;  %v819_v5 = vadd.f32 %v1359_v63, %v1295_v60  ;;  %v44_v63 = vld [vmem:[#allocation2 + $0x28] sm:$0xff] }
 0x135   :  { %v1828_v6 = vadd.f32 %v1362_v4, %v1298_v2  ;;  %v1855_v2 = vld [vmem:[%s1967_s3] ss:$0 sm:$0xff] }
 0x136   :  { %v1397_v10 = vpop.f32.mrb[32].mxu0 }
 0x137   :  { %v868_v11 = vadd.f32 %v1397_v10, %v1810_v43  ;;  %v1405_v13 = vpop.f32.mrb[32].mxu1  ;;  %v859_v15 = vpop.f32.mrb[33].mxu0 }
 0x138   :  { %v900_v16 = vadd.f32 %v1405_v13, %v803_v37  ;;  %v860_v17 = vadd.f32 %v859_v15, %v1806_v29  ;;  %v891_v19 = vpop.f32.mrb[33].mxu1  ;;  %v1398_v23 = vpop.f32.mrb[34].mxu0 }
 0x139   :  { %v924_v24 = vadd.f32 %v868_v11, %v41_v9  ;;  %v892_v25 = vadd.f32 %v891_v19, %v795_v21  ;;  %v871_v26 = vadd.f32 %v1398_v23, %v1812_v44  ;;  %v1406_v28 = vpop.f32.mrb[34].mxu1  ;;  %v862_v32 = vpop.f32.mrb[35].mxu0  ;;  %v52_v9 = vld [vmem:[#allocation2 + $0x68] sm:$0xff] }
 0x13a   :  { %v932_v43 = vadd.f32 %v900_v16, %v49_v12  ;;  %v922_v33 = vadd.f32 %v860_v17, %v39_v14  ;;  %v903_v34 = vadd.f32 %v1406_v28, %v806_v38  ;;  %v863_v35 = vadd.f32 %v862_v32, %v1808_v30  ;;  %v894_v37 = vpop.f32.mrb[35].mxu1  ;;  %v45_v30 = vld [vmem:[#allocation2 + $0x30] sm:$0xff] }
 0x13b   :  { %941 = vst.msk [vmem:[#allocation2 + $0x10] sm:$0xff] %vm22_vm0, %v924_v24  ;;  %v930_v29 = vadd.f32 %v892_v25, %v47_v18  ;;  %v925_v39 = vadd.f32 %v871_v26, %v42_v20  ;;  %v895_v40 = vadd.f32 %v894_v37, %v1822_v22 }
 0x13c   :  { %949 = vst.msk [vmem:[#allocation2 + $0x50] sm:$0xff] %vm22_vm0, %v932_v43  ;;  %939 = vst.msk [vmem:[#allocation2] sm:$0xff] %vm22_vm0, %v922_v33  ;;  %v933_v44 = vadd.f32 %v903_v34, %v50_v27  ;;  %v923_v21 = vadd.f32 %v863_v35, %v40_v31 }
 0x13d   :  { %947 = vst.msk [vmem:[#allocation2 + $0x40] sm:$0xff] %vm22_vm0, %v930_v29  ;;  %942 = vst.msk [vmem:[#allocation2 + $0x18] sm:$0xff] %vm22_vm0, %v925_v39  ;;  %v931_v38 = vadd.f32 %v895_v40, %v48_v36 }
 0x13e   :  { %950 = vst.msk [vmem:[#allocation2 + $0x58] sm:$0xff] %vm22_vm0, %v933_v44  ;;  %940 = vst.msk [vmem:[#allocation2 + $0x8] sm:$0xff] %vm22_vm0, %v923_v21  ;;  %v1401_v41 = vpop.f32.mrb[36].mxu0 }
 0x13f   :  { %948 = vst.msk [vmem:[#allocation2 + $0x48] sm:$0xff] %vm22_vm0, %v931_v38  ;;  %v884_v22 = vadd.f32 %v1401_v41, %v1818_v7  ;;  %v1409_v45 = vpop.f32.mrb[36].mxu1  ;;  %v875_v47 = vpop.f32.mrb[37].mxu0 }
 0x140   :  { %v916_v49 = vadd.f32 %v1409_v45, %v819_v5  ;;  %v876_v50 = vadd.f32 %v875_v47, %v1814_v57  ;;  %v907_v52 = vpop.f32.mrb[37].mxu1  ;;  %v1402_v56 = vpop.f32.mrb[38].mxu0 }
 0x141   :  { %v928_v59 = vadd.f32 %v884_v22, %v45_v30  ;;  %v908_v7 = vadd.f32 %v907_v52, %v1824_v53  ;;  %v887_v60 = vadd.f32 %v1402_v56, %v1820_v8  ;;  %v1410_v62 = vpop.f32.mrb[38].mxu1  ;;  %v878_v0 = vpop.f32.mrb[39].mxu0 }
 0x142   :  { %v960_v1 = vld [vmem:[#allocation2 + $0x10] sm:$0xff]  ;;  %v936_v57 = vadd.f32 %v916_v49, %v53_v42  ;;  %v926_v3 = vadd.f32 %v876_v50, %v43_v46  ;;  %v919_v4 = vadd.f32 %v1410_v62, %v1828_v6  ;;  %v879_v5 = vadd.f32 %v878_v0, %v1816_v58  ;;  %v910_v53 = vpop.f32.mrb[39].mxu1 }
 0x143   :  { %v983_v8 = vmul.f32 %v1847_v48, %v960_v1  ;;  %v968_v10 = vld [vmem:[#allocation2 + $0x50] sm:$0xff]  ;;  %v958_v11 = vld [vmem:[#allocation2] sm:$0xff]  ;;  %945 = vst.msk [vmem:[#allocation2 + $0x30] sm:$0xff] %vm22_vm0, %v928_v59  ;;  %v934_v12 = vadd.f32 %v908_v7, %v51_v51  ;;  %v929_v13 = vadd.f32 %v887_v60, %v46_v55  ;;  %v911_v14 = vadd.f32 %v910_v53, %v1826_v54 }
 0x144   :  { %v991_v15 = vmul.f32 %v1847_v48, %v968_v10  ;;  %v981_v16 = vmul.f32 %v1847_v48, %v958_v11  ;;  %v966_v17 = vld [vmem:[#allocation2 + $0x40] sm:$0xff]  ;;  %v961_v6 = vld [vmem:[#allocation2 + $0x18] sm:$0xff]  ;;  %953 = vst.msk [vmem:[#allocation2 + $0x70] sm:$0xff] %vm22_vm0, %v936_v57  ;;  %943 = vst.msk [vmem:[#allocation2 + $0x20] sm:$0xff] %vm22_vm0, %v926_v3  ;;  %v937_v58 = vadd.f32 %v919_v4, %v54_v61 }
 0x145   :  { %v927_v18 = vadd.f32 %v879_v5, %v44_v63  ;;  %v1006_v19 = vadd.f32 %v1855_v2, %v983_v8  ;;  %v989_v20 = vmul.f32 %v1847_v48, %v966_v17  ;;  %v984_v23 = vmul.f32 %v1847_v48, %v961_v6  ;;  %v969_v24 = vld [vmem:[#allocation2 + $0x58] sm:$0xff]  ;;  %v959_v54 = vld [vmem:[#allocation2 + $0x8] sm:$0xff]  ;;  %951 = vst.msk [vmem:[#allocation2 + $0x60] sm:$0xff] %vm22_vm0, %v934_v12 }
 0x146   :  { %946 = vst.msk [vmem:[#allocation2 + $0x38] sm:$0xff] %vm22_vm0, %v929_v13  ;;  %v935_v25 = vadd.f32 %v911_v14, %v52_v9  ;;  %v1014_v26 = vadd.f32 %v1855_v2, %v991_v15  ;;  %v1004_v27 = vadd.f32 %v1855_v2, %v981_v16  ;;  %v992_v28 = vmul.f32 %v1847_v48, %v969_v24  ;;  %v967_v32 = vld [vmem:[#allocation2 + $0x48] sm:$0xff] }
 0x147   :  { %v982_v31 = vmul.f32 %v1847_v48, %v959_v54  ;;  %954 = vst.msk [vmem:[#allocation2 + $0x78] sm:$0xff] %vm22_vm0, %v937_v58  ;;  %944 = vst.msk [vmem:[#allocation2 + $0x28] sm:$0xff] %vm22_vm0, %v927_v18  ;;  %v1022_v43 = vmax.f32 %v1006_v19, 0.0  ;;  %v1012_v33 = vadd.f32 %v1855_v2, %v989_v20  ;;  %v1007_v34 = vadd.f32 %v1855_v2, %v984_v23 }
 0x148   :  { %v990_v35 = vmul.f32 %v1847_v48, %v967_v32  ;;  %952 = vst.msk [vmem:[#allocation2 + $0x68] sm:$0xff] %vm22_vm0, %v935_v25  ;;  %v1030_v36 = vmax.f32 %v1014_v26, 0.0  ;;  %v1020_v37 = vmax.f32 %v1004_v27, 0.0  ;;  %v1015_v29 = vadd.f32 %v1855_v2, %v992_v28 }
 0x149   :  { %v1005_v39 = vadd.f32 %v1855_v2, %v982_v31  ;;  %v1221_v40 = vpack.c.bf16 %v1022_v43, %v1022_v43  ;;  %v1028_v44 = vmax.f32 %v1012_v33, 0.0  ;;  %v1023_v21 = vmax.f32 %v1007_v34, 0.0 }
 0x14a   :  { %v1013_v38 = vadd.f32 %v1855_v2, %v990_v35  ;;  %v1229_v30 = vpack.c.bf16 %v1030_v36, %v1030_v36  ;;  %v1219_v41 = vpack.c.bf16 %v1020_v37, %v1020_v37  ;;  %v1031_v22 = vmax.f32 %v1015_v29, 0.0  ;;  %v964_v45 = vld [vmem:[#allocation2 + $0x30] sm:$0xff] }
 0x14b   :  { %v1021_v42 = vmax.f32 %v1005_v39, 0.0  ;;  %1103 = vst.msk [vmem:[%s1968_s4 + $0x8] sm:$0xf] %vm1100_vm1, %v1221_v40  ;;  %v1227_v46 = vpack.c.bf16 %v1028_v44, %v1028_v44  ;;  %v1222_v47 = vpack.c.bf16 %v1023_v21, %v1023_v21  ;;  %v987_v50 = vmul.f32 %v1847_v48, %v964_v45  ;;  %v972_v51 = vld [vmem:[#allocation2 + $0x70] sm:$0xff]  ;;  %v962_v52 = vld [vmem:[#allocation2 + $0x20] sm:$0xff] }
 0x14c   :  { %v1029_v49 = vmax.f32 %v1013_v38, 0.0  ;;  %1111 = vst.msk [vmem:[%s1968_s4 + $0x28] sm:$0xf] %vm1100_vm1, %v1229_v30  ;;  %1101 = vst.msk [vmem:[%s1968_s4] sm:$0xf] %vm1100_vm1, %v1219_v41  ;;  %v1230_v55 = vpack.c.bf16 %v1031_v22, %v1031_v22  ;;  %v995_v59 = vmul.f32 %v1847_v48, %v972_v51  ;;  %v985_v7 = vmul.f32 %v1847_v48, %v962_v52  ;;  %v970_v60 = vld [vmem:[#allocation2 + $0x60] sm:$0xff] }
 0x14d   :  { %v1220_v56 = vpack.c.bf16 %v1021_v42, %v1021_v42  ;;  %v965_v61 = vld [vmem:[#allocation2 + $0x38] sm:$0xff]  ;;  %1109 = vst.msk [vmem:[%s1968_s4 + $0x20] sm:$0xf] %vm1100_vm1, %v1227_v46  ;;  %1104 = vst.msk [vmem:[%s1968_s4 + $0xc] sm:$0xf] %vm1100_vm1, %v1222_v47  ;;  %v1010_v63 = vadd.f32 %v1855_v2, %v987_v50  ;;  %v993_v0 = vmul.f32 %v1847_v48, %v970_v60 }
 0x14e   :  { %v1228_v62 = vpack.c.bf16 %v1029_v49, %v1029_v49  ;;  %v988_v1 = vmul.f32 %v1847_v48, %v965_v61  ;;  %v973_v57 = vld [vmem:[#allocation2 + $0x78] sm:$0xff]  ;;  %v963_v3 = vld [vmem:[#allocation2 + $0x28] sm:$0xff]  ;;  %1112 = vst.msk [vmem:[%s1968_s4 + $0x2c] sm:$0xf] %vm1100_vm1, %v1230_v55  ;;  %v1018_v4 = vadd.f32 %v1855_v2, %v995_v59  ;;  %v1008_v5 = vadd.f32 %v1855_v2, %v985_v7 }
 0x14f   :  { %1102 = vst.msk [vmem:[%s1968_s4 + $0x4] sm:$0xf] %vm1100_vm1, %v1220_v56  ;;  %v996_v9 = vmul.f32 %v1847_v48, %v973_v57  ;;  %v986_v53 = vmul.f32 %v1847_v48, %v963_v3  ;;  %v971_v8 = vld [vmem:[#allocation2 + $0x68] sm:$0xff]  ;;  %v1026_v10 = vmax.f32 %v1010_v63, 0.0  ;;  %v1016_v11 = vadd.f32 %v1855_v2, %v993_v0 }
 0x150   :  { %1110 = vst.msk [vmem:[%s1968_s4 + $0x24] sm:$0xf] %vm1100_vm1, %v1228_v62  ;;  %v1011_v12 = vadd.f32 %v1855_v2, %v988_v1  ;;  %v994_v13 = vmul.f32 %v1847_v48, %v971_v8  ;;  %v1034_v14 = vmax.f32 %v1018_v4, 0.0  ;;  %v1024_v15 = vmax.f32 %v1008_v5, 0.0 }
 0x151   :  { %v1019_v16 = vadd.f32 %v1855_v2, %v996_v9  ;;  %v1009_v17 = vadd.f32 %v1855_v2, %v986_v53  ;;  %v1225_v6 = vpack.c.bf16 %v1026_v10, %v1026_v10  ;;  %v1032_v58 = vmax.f32 %v1016_v11, 0.0 }
 0x152   :  { %v1027_v18 = vmax.f32 %v1011_v12, 0.0  ;;  %v1017_v19 = vadd.f32 %v1855_v2, %v994_v13  ;;  %v1233_v20 = vpack.c.bf16 %v1034_v14, %v1034_v14  ;;  %v1223_v23 = vpack.c.bf16 %v1024_v15, %v1024_v15 }
 0x153   :  { %v1035_v24 = vmax.f32 %v1019_v16, 0.0  ;;  %v1025_v54 = vmax.f32 %v1009_v17, 0.0  ;;  %1107 = vst.msk [vmem:[%s1968_s4 + $0x18] sm:$0xf] %vm1100_vm1, %v1225_v6  ;;  %v1231_v48 = vpack.c.bf16 %v1032_v58, %v1032_v58 }
 0x154   :  { %v1226_v25 = vpack.c.bf16 %v1027_v18, %v1027_v18  ;;  %v1033_v26 = vmax.f32 %v1017_v19, 0.0  ;;  %1115 = vst.msk [vmem:[%s1968_s4 + $0x38] sm:$0xf] %vm1100_vm1, %v1233_v20  ;;  %1105 = vst.msk [vmem:[%s1968_s4 + $0x10] sm:$0xf] %vm1100_vm1, %v1223_v23 }
 0x155   :  { %v1234_v2 = vpack.c.bf16 %v1035_v24, %v1035_v24  ;;  %v1224_v27 = vpack.c.bf16 %v1025_v54, %v1025_v54  ;;  %1113 = vst.msk [vmem:[%s1968_s4 + $0x30] sm:$0xf] %vm1100_vm1, %v1231_v48 }
 0x156   :  { %1108 = vst.msk [vmem:[%s1968_s4 + $0x1c] sm:$0xf] %vm1100_vm1, %v1226_v25  ;;  %v1232_v28 = vpack.c.bf16 %v1033_v26, %v1033_v26 }
 0x157   :  { %1116 = vst.msk [vmem:[%s1968_s4 + $0x3c] sm:$0xf] %vm1100_vm1, %v1234_v2  ;;  %1106 = vst.msk [vmem:[%s1968_s4 + $0x14] sm:$0xf] %vm1100_vm1, %v1224_v27 }
 0x158   :  { %1114 = vst.msk [vmem:[%s1968_s4 + $0x34] sm:$0xf] %vm1100_vm1, %v1232_v28 }

// kernel: _lambda_.25
= control target key start
LH: loop header
LB: loop body
LE: loop exit
PB: predicated region body
PF: predicated region fallthrough
CT: control target
= control target key end

     0   :  { %vm25_vm0 = vcmask 523264   ;;  %vm1167_vm1 = vcmask 519168   ;;  %s2169_s1 = inlined_call_operand.vmem [shape: bf16[640,64], index: 1, kind: input, shape index: {}]   ;;  %s2170_s0 = inlined_call_operand.vmem [shape: bf16[128,640], index: 0, kind: input, shape index: {}]   ;;  %s2171_s4 = inlined_call_operand.vmem [shape: bf16[128,64], index: 4, kind: input, shape index: {}]   ;;  %s2172_s2 = inlined_call_operand.vmem [shape: f32[1,64], index: 2, kind: input, shape index: {}]   ;;  %s2173_s3 = inlined_call_operand.vmem [shape: f32[1,64], index: 3, kind: input, shape index: {}]   ;;  %s2174_s5 = inlined_call_operand.vmem [shape: bf16[128,64], index: 5, kind: output, shape index: {}]  }
   0x1   :  { %v1534_v0 = vld [vmem:[%s2169_s1 + $0x40] sm:$0xff]   ;;  %v1538_v4 = vld [vmem:[%s2169_s1 + $0x48] sm:$0xff]   ;;  %v1542_v8 = vld [vmem:[%s2169_s1 + $0x50] sm:$0xff]  }
   0x2   :  { %v1535_v1 = vld [vmem:[%s2169_s1 + $0xc0] sm:$0xff]   ;;  %1341 = vmatprep.subr.bf16.mxu0 %v1534_v0  ;;  %v1539_v5 = vld [vmem:[%s2169_s1 + $0xc8] sm:$0xff]   ;;  %v1543_v9 = vld [vmem:[%s2169_s1 + $0xd0] sm:$0xff]  }
   0x3   :  { %v1536_v2 = vld [vmem:[%s2169_s1] sm:$0xff]   ;;  %1405 = vmatprep.subr.bf16.mxu1 %v1535_v1  ;;  %v1540_v6 = vld [vmem:[%s2169_s1 + $0x8] sm:$0xff]   ;;  %v1544_v10 = vld [vmem:[%s2169_s1 + $0x10] sm:$0xff]  }
   0x4   :  { %v1537_v3 = vld [vmem:[%s2169_s1 + $0x80] sm:$0xff]   ;;  %1342 = vmatpush3.bf16.msra.mxu0 %v1536_v2  ;;  %v1541_v7 = vld [vmem:[%s2169_s1 + $0x88] sm:$0xff]   ;;  %v1545_v11 = vld [vmem:[%s2169_s1 + $0x90] sm:$0xff]  }
   0x5   :  { %1406 = vmatpush3.bf16.msra.mxu1 %v1537_v3  ;;  %1343 = vmatprep.subr.bf16.mxu0 %v1538_v4  ;;  %v1546_v12 = vld [vmem:[%s2169_s1 + $0x58] sm:$0xff]   ;;  %v1550_v16 = vld [vmem:[%s2169_s1 + $0x60] sm:$0xff]   ;;  %v1554_v20 = vld [vmem:[%s2169_s1 + $0x68] sm:$0xff]  }
   0x6   :  { %1407 = vmatprep.subr.bf16.mxu1 %v1539_v5  ;;  %v1547_v13 = vld [vmem:[%s2169_s1 + $0xd8] sm:$0xff]   ;;  %v1551_v17 = vld [vmem:[%s2169_s1 + $0xe0] sm:$0xff]   ;;  %v1555_v21 = vld [vmem:[%s2169_s1 + $0xe8] sm:$0xff]  }
   0x7   :  { %v1548_v14 = vld [vmem:[%s2169_s1 + $0x18] sm:$0xff]   ;;  %v1552_v18 = vld [vmem:[%s2169_s1 + $0x20] sm:$0xff]   ;;  %v1556_v22 = vld [vmem:[%s2169_s1 + $0x28] sm:$0xff]  }
   0x8   :  { %1344 = vmatpush3.bf16.msra.mxu0 %v1540_v6  ;;  %v1549_v15 = vld [vmem:[%s2169_s1 + $0x98] sm:$0xff]   ;;  %v1553_v19 = vld [vmem:[%s2169_s1 + $0xa0] sm:$0xff]   ;;  %v1557_v23 = vld [vmem:[%s2169_s1 + $0xa8] sm:$0xff]  }
   0x9   :  { %1408 = vmatpush3.bf16.msra.mxu1 %v1541_v7  ;;  %1345 = vmatprep.subr.bf16.mxu0 %v1542_v8  ;;  %v1558_v24 = vld [vmem:[%s2169_s1 + $0x70] sm:$0xff]   ;;  %v1562_v28 = vld [vmem:[%s2169_s1 + $0x78] sm:$0xff]   ;;  %v1571_v35 = vld [vmem:[%s2170_s0 + $0xc] ss:$20 sps:$4 sm:$0xff]  }
   0xa   :  { %1409 = vmatprep.subr.bf16.mxu1 %v1543_v9  ;;  %v1559_v25 = vld [vmem:[%s2169_s1 + $0xf0] sm:$0xff]   ;;  %v1563_v29 = vld [vmem:[%s2169_s1 + $0xf8] sm:$0xff]   ;;  %v1572_v36 = vld [vmem:[%s2169_s1 + $0x100] sm:$0xff]   ;;  %763 = vmatprep.mubr.bf16.mxu1 %v1571_v35 }
   0xb   :  { %v1560_v26 = vld [vmem:[%s2169_s1 + $0x30] sm:$0xff]   ;;  %v1564_v30 = vld [vmem:[%s2169_s1 + $0x38] sm:$0xff]   ;;  %v1573_v37 = vld [vmem:[%s2170_s0 + $0x2c] ss:$20 sps:$4 sm:$0xff]  }
   0xc   :  { %1346 = vmatpush3.bf16.msra.mxu0 %v1544_v10  ;;  %v1561_v27 = vld [vmem:[%s2169_s1 + $0xb0] sm:$0xff]   ;;  %v1565_v31 = vld [vmem:[%s2169_s1 + $0xb8] sm:$0xff]   ;;  %v1579_v39 = vld [vmem:[%s2169_s1 + $0x108] sm:$0xff]  }
   0xd   :  { %1410 = vmatpush3.bf16.msra.mxu1 %v1545_v11  ;;  %1347 = vmatprep.subr.bf16.mxu0 %v1546_v12  ;;  %v1566_v32 = vld [vmem:[%s2170_s0] ss:$20 sps:$4 sm:$0xff]   ;;  %v1568_v33 = vld [vmem:[%s2170_s0 + $0x4] ss:$20 sps:$4 sm:$0xff]   ;;  %v1569_v34 = vld [vmem:[%s2170_s0 + $0x8] ss:$20 sps:$4 sm:$0xff]  }
   0xe   :  { %1411 = vmatprep.subr.bf16.mxu1 %v1547_v13  ;;  %666 = vmatprep.mubr.bf16.mxu0 %v1568_v33  ;;  %v1575_v38 = vld [vmem:[%s2170_s0 + $0x34] ss:$20 sps:$4 sm:$0xff]   ;;  %v1578_v41 = vld [vmem:[%s2170_s0 + $0x30] ss:$20 sps:$4 sm:$0xff]   ;;  %v1593_v45 = vld [vmem:[%s2169_s1 + $0x118] sm:$0xff]  }
   0xf   :  { %v1577_v40 = vld [vmem:[%s2170_s0 + $0x28] ss:$20 sps:$4 sm:$0xff]   ;;  %v1586_v44 = vld [vmem:[%s2169_s1 + $0x110] sm:$0xff]   ;;  %v1585_v47 = vld [vmem:[%s2170_s0 + $0x58] ss:$20 sps:$4 sm:$0xff]  }
  0x10   :  { %1348 = vmatpush3.bf16.msra.mxu0 %v1548_v14  ;;  %v1580_v42 = vld [vmem:[%s2170_s0 + $0x54] ss:$20 sps:$4 sm:$0xff]   ;;  %v1582_v43 = vld [vmem:[%s2170_s0 + $0x5c] ss:$20 sps:$4 sm:$0xff]   ;;  %v1589_v49 = vld [vmem:[%s2170_s0 + $0x84] ss:$20 sps:$4 sm:$0xff]  }
  0x11   :  { %1412 = vmatpush3.bf16.msra.mxu1 %v1549_v15  ;;  %1349 = vmatprep.subr.bf16.mxu0 %v1550_v16  ;;  %v1584_v46 = vld [vmem:[%s2170_s0 + $0x50] ss:$20 sps:$4 sm:$0xff]   ;;  %v1607_v51 = vld [vmem:[%s2169_s1 + $0x128] sm:$0xff]   ;;  %v1592_v53 = vld [vmem:[%s2170_s0 + $0x80] ss:$20 sps:$4 sm:$0xff]   ;;  %v1630_v16 = vmov 0.0  }
  0x12   :  { %1413 = vmatprep.subr.bf16.mxu1 %v1551_v17  ;;  %v1587_v48 = vld [vmem:[%s2170_s0 + $0x7c] ss:$20 sps:$4 sm:$0xff]   ;;  %v1600_v50 = vld [vmem:[%s2169_s1 + $0x120] sm:$0xff]   ;;  %v1591_v52 = vld [vmem:[%s2170_s0 + $0x78] ss:$20 sps:$4 sm:$0xff]   ;;  %28 = vst.msk [vmem:[#allocation2 + $0x10] sm:$0xff] %vm25_vm0, %v1630_v16 }
  0x13   :  { %v1594_v54 = vld [vmem:[%s2170_s0 + $0xa4] ss:$20 sps:$4 sm:$0xff]   ;;  %v1614_v55 = vld [vmem:[%s2169_s1 + $0x130] sm:$0xff]   ;;  %v1596_v56 = vld [vmem:[%s2170_s0 + $0xac] ss:$20 sps:$4 sm:$0xff]   ;;  %26 = vst.msk [vmem:[#allocation2] sm:$0xff] %vm25_vm0, %v1630_v16 }
  0x14   :  { %1350 = vmatpush3.bf16.msra.mxu0 %v1552_v18  ;;  %v1621_v57 = vld [vmem:[%s2169_s1 + $0x138] sm:$0xff]   ;;  %v1598_v58 = vld [vmem:[%s2170_s0 + $0xa0] ss:$20 sps:$4 sm:$0xff]   ;;  %v1606_v63 = vld [vmem:[%s2170_s0 + $0xd0] ss:$20 sps:$4 sm:$0xff]   ;;  %27 = vst.msk [vmem:[#allocation2 + $0x8] sm:$0xff] %vm25_vm0, %v1630_v16 }
  0x15   :  { %1414 = vmatpush3.bf16.msra.mxu1 %v1553_v19  ;;  %1351 = vmatprep.subr.bf16.mxu0 %v1554_v20  ;;  %v1599_v59 = vld [vmem:[%s2170_s0 + $0xa8] ss:$20 sps:$4 sm:$0xff]   ;;  %v1601_v60 = vld [vmem:[%s2170_s0 + $0xcc] ss:$20 sps:$4 sm:$0xff]   ;;  %v1612_v2 = vld [vmem:[%s2170_s0 + $0xf0] ss:$20 sps:$4 sm:$0xff]  }
  0x16   :  { %1415 = vmatprep.subr.bf16.mxu1 %v1555_v21  ;;  %v1603_v61 = vld [vmem:[%s2170_s0 + $0xd4] ss:$20 sps:$4 sm:$0xff]   ;;  %v1610_v1 = vld [vmem:[%s2170_s0 + $0xfc] ss:$20 sps:$4 sm:$0xff]   ;;  %v1613_v3 = vld [vmem:[%s2170_s0 + $0xf8] ss:$20 sps:$4 sm:$0xff]  }
  0x17   :  { %v1605_v62 = vld [vmem:[%s2170_s0 + $0xc8] ss:$20 sps:$4 sm:$0xff]   ;;  %v1617_v5 = vld [vmem:[%s2170_s0 + $0x124] ss:$20 sps:$4 sm:$0xff]   ;;  %v1620_v7 = vld [vmem:[%s2170_s0 + $0x120] ss:$20 sps:$4 sm:$0xff]  }
  0x18   :  { %1352 = vmatpush3.bf16.msra.mxu0 %v1556_v22  ;;  %v1608_v0 = vld [vmem:[%s2170_s0 + $0xf4] ss:$20 sps:$4 sm:$0xff]   ;;  %v1615_v4 = vld [vmem:[%s2170_s0 + $0x11c] ss:$20 sps:$4 sm:$0xff]   ;;  %v1619_v6 = vld [vmem:[%s2170_s0 + $0x118] ss:$20 sps:$4 sm:$0xff]  }
  0x19   :  { %1416 = vmatpush3.bf16.msra.mxu1 %v1557_v23  ;;  %1353 = vmatprep.subr.bf16.mxu0 %v1558_v24  ;;  %v1622_v8 = vld [vmem:[%s2170_s0 + $0x10] ss:$20 sps:$4 sm:$0xff]   ;;  %v1624_v10 = vld [vmem:[%s2170_s0 + $0x38] ss:$20 sps:$4 sm:$0xff]   ;;  %v1626_v12 = vld [vmem:[%s2170_s0 + $0x60] ss:$20 sps:$4 sm:$0xff]  }
  0x1a   :  { %1417 = vmatprep.subr.bf16.mxu1 %v1559_v25  ;;  %v1623_v9 = vld [vmem:[%s2170_s0 + $0xb0] ss:$20 sps:$4 sm:$0xff]   ;;  %v1625_v11 = vld [vmem:[%s2170_s0 + $0xd8] ss:$20 sps:$4 sm:$0xff]   ;;  %v1627_v13 = vld [vmem:[%s2170_s0 + $0x100] ss:$20 sps:$4 sm:$0xff]  }
  0x1b   :  { %v1628_v14 = vld [vmem:[%s2170_s0 + $0x88] ss:$20 sps:$4 sm:$0xff]   ;;  %29 = vst.msk [vmem:[#allocation2 + $0x18] sm:$0xff] %vm25_vm0, %v1630_v16  ;;  %30 = vst.msk [vmem:[#allocation2 + $0x20] sm:$0xff] %vm25_vm0, %v1630_v16 }
  0x1c   :  { %1354 = vmatpush3.bf16.msra.mxu0 %v1560_v26  ;;  %v1629_v15 = vld [vmem:[%s2170_s0 + $0x128] ss:$20 sps:$4 sm:$0xff]   ;;  %31 = vst.msk [vmem:[#allocation2 + $0x28] sm:$0xff] %vm25_vm0, %v1630_v16  ;;  %32 = vst.msk [vmem:[#allocation2 + $0x30] sm:$0xff] %vm25_vm0, %v1630_v16 }
  0x1d   :  { %1418 = vmatpush3.bf16.msra.mxu1 %v1561_v27  ;;  %1355 = vmatprep.subr.bf16.mxu0 %v1562_v28  ;;  %33 = vst.msk [vmem:[#allocation2 + $0x38] sm:$0xff] %vm25_vm0, %v1630_v16  ;;  %34 = vst.msk [vmem:[#allocation2 + $0x40] sm:$0xff] %vm25_vm0, %v1630_v16 }
  0x1e   :  { %1419 = vmatprep.subr.bf16.mxu1 %v1563_v29  ;;  %35 = vst.msk [vmem:[#allocation2 + $0x48] sm:$0xff] %vm25_vm0, %v1630_v16  ;;  %36 = vst.msk [vmem:[#allocation2 + $0x50] sm:$0xff] %vm25_vm0, %v1630_v16 }
  0x1f   :  { %37 = vst.msk [vmem:[#allocation2 + $0x58] sm:$0xff] %vm25_vm0, %v1630_v16  ;;  %38 = vst.msk [vmem:[#allocation2 + $0x60] sm:$0xff] %vm25_vm0, %v1630_v16 }
  0x20   :  { %1356 = vmatpush3.bf16.msra.mxu0 %v1564_v30  ;;  %39 = vst.msk [vmem:[#allocation2 + $0x68] sm:$0xff] %vm25_vm0, %v1630_v16  ;;  %40 = vst.msk [vmem:[#allocation2 + $0x70] sm:$0xff] %vm25_vm0, %v1630_v16 }
  0x21   :  { %1420 = vmatpush3.bf16.msra.mxu1 %v1565_v31  ;;  %1485 = vmatprep.subr.bf16.mxu0 %v1572_v36  ;;  %41 = vst.msk [vmem:[#allocation2 + $0x78] sm:$0xff] %vm25_vm0, %v1630_v16 }
  0x22   :  { %1517 = vmatprep.subr.bf16.mxu1 %v1572_v36 }
  0x23   :  { %667 = vmatmul.mubr.bf16.vlgmr.msra.gmra.mrb[0].mxu0 %v1566_v32 }
  0x24   :  { %764 = vmatmul.mubr.bf16.vlgmr.msra.gmra.mrb[0].mxu1 %v1569_v34  ;;  %1486 = vmatpush3.bf16.msra.mxu0 %v1572_v36 }
  0x25   :  { %1525 = vmatpush3.bf16.msra.mxu1 %v1572_v36  ;;  %674 = vmatprep.mubr.bf16.mxu0 %v1573_v37 }
  0x26   :  { %771 = vmatprep.mubr.bf16.mxu1 %v1575_v38  ;;  %1487 = vmatprep.subr.bf16.mxu0 %v1579_v39 }
  0x27   :  { %1518 = vmatprep.subr.bf16.mxu1 %v1579_v39 }
  0x28   :  { %1488 = vmatpush3.bf16.msra.mxu0 %v1579_v39 }
  0x29   :  { %1526 = vmatpush3.bf16.msra.mxu1 %v1579_v39  ;;  %1489 = vmatprep.subr.bf16.mxu0 %v1586_v44 }
  0x2a   :  { %1519 = vmatprep.subr.bf16.mxu1 %v1586_v44 }
  0x2b   :  { %675 = vmatmul.mubr.bf16.gmra.mrb[4].mxu0 %v1577_v40 }
  0x2c   :  { %772 = vmatmul.mubr.bf16.gmra.mrb[4].mxu1 %v1578_v41  ;;  %682 = vmatprep.mubr.bf16.mxu0 %v1580_v42 }
  0x2d   :  { %779 = vmatprep.mubr.bf16.mxu1 %v1582_v43  ;;  %1490 = vmatpush3.bf16.msra.mxu0 %v1586_v44 }
  0x2e   :  { %1527 = vmatpush3.bf16.msra.mxu1 %v1586_v44  ;;  %1491 = vmatprep.subr.bf16.mxu0 %v1593_v45 }
  0x2f   :  { %1520 = vmatprep.subr.bf16.mxu1 %v1593_v45 }
  0x31   :  { %1492 = vmatpush3.bf16.msra.mxu0 %v1593_v45 }
  0x32   :  { %1528 = vmatpush3.bf16.msra.mxu1 %v1593_v45  ;;  %1493 = vmatprep.subr.bf16.mxu0 %v1600_v50 }
  0x33   :  { %683 = vmatmul.mubr.bf16.gmra.mrb[8].mxu0 %v1584_v46  ;;  %1521 = vmatprep.subr.bf16.mxu1 %v1600_v50 }
  0x34   :  { %780 = vmatmul.mubr.bf16.gmra.mrb[8].mxu1 %v1585_v47  ;;  %690 = vmatprep.mubr.bf16.mxu0 %v1587_v48 }
  0x35   :  { %787 = vmatprep.mubr.bf16.mxu1 %v1589_v49  ;;  %1494 = vmatpush3.bf16.msra.mxu0 %v1600_v50 }
  0x36   :  { %1529 = vmatpush3.bf16.msra.mxu1 %v1600_v50  ;;  %1495 = vmatprep.subr.bf16.mxu0 %v1607_v51 }
  0x37   :  { %1522 = vmatprep.subr.bf16.mxu1 %v1607_v51 }
  0x39   :  { %1496 = vmatpush3.bf16.msra.mxu0 %v1607_v51 }
  0x3a   :  { %1530 = vmatpush3.bf16.msra.mxu1 %v1607_v51  ;;  %1497 = vmatprep.subr.bf16.mxu0 %v1614_v55 }
  0x3b   :  { %691 = vmatmul.mubr.bf16.gmra.mrb[12].mxu0 %v1591_v52  ;;  %1523 = vmatprep.subr.bf16.mxu1 %v1614_v55 }
  0x3c   :  { %788 = vmatmul.mubr.bf16.gmra.mrb[12].mxu1 %v1592_v53  ;;  %698 = vmatprep.mubr.bf16.mxu0 %v1594_v54 }
  0x3d   :  { %795 = vmatprep.mubr.bf16.mxu1 %v1596_v56  ;;  %1498 = vmatpush3.bf16.msra.mxu0 %v1614_v55 }
  0x3e   :  { %1531 = vmatpush3.bf16.msra.mxu1 %v1614_v55  ;;  %1499 = vmatprep.subr.bf16.mxu0 %v1621_v57 }
  0x3f   :  { %1524 = vmatprep.subr.bf16.mxu1 %v1621_v57 }
  0x41   :  { %1500 = vmatpush3.bf16.msra.mxu0 %v1621_v57 }
  0x42   :  { %1532 = vmatpush3.bf16.msra.mxu1 %v1621_v57 }
  0x43   :  { %699 = vmatmul.mubr.bf16.gmra.mrb[16].mxu0 %v1598_v58 }
  0x44   :  { %796 = vmatmul.mubr.bf16.gmra.mrb[16].mxu1 %v1599_v59  ;;  %706 = vmatprep.mubr.bf16.mxu0 %v1601_v60 }
  0x45   :  { %803 = vmatprep.mubr.bf16.mxu1 %v1603_v61 }
  0x4b   :  { %707 = vmatmul.mubr.bf16.gmra.mrb[20].mxu0 %v1605_v62 }
  0x4c   :  { %804 = vmatmul.mubr.bf16.gmra.mrb[20].mxu1 %v1606_v63  ;;  %714 = vmatprep.mubr.bf16.mxu0 %v1608_v0 }
  0x4d   :  { %811 = vmatprep.mubr.bf16.mxu1 %v1610_v1 }
  0x53   :  { %715 = vmatmul.mubr.bf16.gmra.mrb[24].mxu0 %v1612_v2 }
  0x54   :  { %812 = vmatmul.mubr.bf16.gmra.mrb[24].mxu1 %v1613_v3  ;;  %722 = vmatprep.mubr.bf16.mxu0 %v1615_v4 }
  0x55   :  { %819 = vmatprep.mubr.bf16.mxu1 %v1617_v5 }
  0x5b   :  { %723 = vmatmul.mubr.bf16.gmra.mrb[28].mxu0 %v1619_v6 }
  0x5c   :  { %820 = vmatmul.mubr.bf16.gmra.mrb[28].mxu1 %v1620_v7  ;;  %1501 = vmatprep.mubr.bf16.mxu0 %v1622_v8 }
  0x5d   :  { %1509 = vmatprep.mubr.bf16.mxu1 %v1623_v9 }
  0x63   :  { %1502 = vmatmul.mubr.bf16.vlgmr.msra.gmra.mrb[32].mxu0 %v1624_v10 }
  0x64   :  { %1510 = vmatmul.mubr.bf16.vlgmr.msra.gmra.mrb[32].mxu1 %v1625_v11  ;;  %1505 = vmatprep.mubr.bf16.mxu0 %v1626_v12 }
  0x65   :  { %1513 = vmatprep.mubr.bf16.mxu1 %v1627_v13 }
  0x6b   :  { %1506 = vmatmul.mubr.bf16.gmra.mrb[36].mxu0 %v1628_v14 }
  0x6c   :  { %1514 = vmatmul.mubr.bf16.gmra.mrb[36].mxu1 %v1629_v15 }
  0xf6   :  { %v1357_v17 = vpop.f32.mrb[0].mxu0 }
  0xf7   :  { %v1421_v18 = vpop.f32.mrb[0].mxu1  ;;  %v1358_v19 = vpop.f32.mrb[1].mxu0 }
  0xf8   :  { %v1359_v20 = vadd.f32 %v1358_v19, %v1357_v17  ;;  %v1422_v21 = vpop.f32.mrb[1].mxu1  ;;  %v1360_v22 = vpop.f32.mrb[2].mxu0 }
  0xf9   :  { %v1423_v23 = vadd.f32 %v1422_v21, %v1421_v18  ;;  %v1424_v24 = vpop.f32.mrb[2].mxu1  ;;  %v1361_v25 = vpop.f32.mrb[3].mxu0 }
  0xfa   :  { %v1362_v26 = vadd.f32 %v1361_v25, %v1360_v22  ;;  %v1425_v27 = vpop.f32.mrb[3].mxu1 }
  0xfb   :  { %v1426_v28 = vadd.f32 %v1425_v27, %v1424_v24  ;;  %v1917_v29 = vadd.f32 %v1423_v23, %v1359_v20 }
  0xfd   :  { %v1919_v30 = vadd.f32 %v1426_v28, %v1362_v26 }
  0xfe   :  { %v1363_v31 = vpop.f32.mrb[4].mxu0 }
  0xff   :  { %v1427_v32 = vpop.f32.mrb[4].mxu1  ;;  %v1364_v33 = vpop.f32.mrb[5].mxu0 }
 0x100   :  { %v1365_v34 = vadd.f32 %v1364_v33, %v1363_v31  ;;  %v1428_v35 = vpop.f32.mrb[5].mxu1  ;;  %v1366_v36 = vpop.f32.mrb[6].mxu0 }
 0x101   :  { %v1429_v37 = vadd.f32 %v1428_v35, %v1427_v32  ;;  %v1430_v38 = vpop.f32.mrb[6].mxu1  ;;  %v1367_v39 = vpop.f32.mrb[7].mxu0 }
 0x102   :  { %v1368_v40 = vadd.f32 %v1367_v39, %v1366_v36  ;;  %v1431_v41 = vpop.f32.mrb[7].mxu1 }
 0x103   :  { %v1432_v42 = vadd.f32 %v1431_v41, %v1430_v38  ;;  %v1921_v43 = vadd.f32 %v1429_v37, %v1365_v34 }
 0x105   :  { %v1923_v44 = vadd.f32 %v1432_v42, %v1368_v40 }
 0x106   :  { %v1369_v45 = vpop.f32.mrb[8].mxu0 }
 0x107   :  { %v1433_v46 = vpop.f32.mrb[8].mxu1  ;;  %v1370_v47 = vpop.f32.mrb[9].mxu0 }
 0x108   :  { %v1371_v48 = vadd.f32 %v1370_v47, %v1369_v45  ;;  %v1434_v49 = vpop.f32.mrb[9].mxu1  ;;  %v1372_v50 = vpop.f32.mrb[10].mxu0 }
 0x109   :  { %v1435_v51 = vadd.f32 %v1434_v49, %v1433_v46  ;;  %v1436_v52 = vpop.f32.mrb[10].mxu1  ;;  %v1373_v53 = vpop.f32.mrb[11].mxu0 }
 0x10a   :  { %v1374_v54 = vadd.f32 %v1373_v53, %v1372_v50  ;;  %v1437_v55 = vpop.f32.mrb[11].mxu1 }
 0x10b   :  { %v1438_v56 = vadd.f32 %v1437_v55, %v1436_v52  ;;  %v1925_v57 = vadd.f32 %v1435_v51, %v1371_v48 }
 0x10d   :  { %v1927_v58 = vadd.f32 %v1438_v56, %v1374_v54 }
 0x10e   :  { %v1375_v59 = vpop.f32.mrb[12].mxu0 }
 0x10f   :  { %v1439_v60 = vpop.f32.mrb[12].mxu1  ;;  %v1376_v61 = vpop.f32.mrb[13].mxu0 }
 0x110   :  { %v1377_v62 = vadd.f32 %v1376_v61, %v1375_v59  ;;  %v1440_v63 = vpop.f32.mrb[13].mxu1  ;;  %v1378_v0 = vpop.f32.mrb[14].mxu0 }
 0x111   :  { %v1441_v1 = vadd.f32 %v1440_v63, %v1439_v60  ;;  %v1442_v2 = vpop.f32.mrb[14].mxu1  ;;  %v1379_v3 = vpop.f32.mrb[15].mxu0 }
 0x112   :  { %v1380_v4 = vadd.f32 %v1379_v3, %v1378_v0  ;;  %v1443_v5 = vpop.f32.mrb[15].mxu1 }
 0x113   :  { %v1444_v6 = vadd.f32 %v1443_v5, %v1442_v2  ;;  %v1929_v7 = vadd.f32 %v1441_v1, %v1377_v62 }
 0x115   :  { %v1931_v8 = vadd.f32 %v1444_v6, %v1380_v4 }
 0x116   :  { %v1381_v9 = vpop.f32.mrb[16].mxu0 }
 0x117   :  { %v1445_v10 = vpop.f32.mrb[16].mxu1  ;;  %v1382_v11 = vpop.f32.mrb[17].mxu0 }
 0x118   :  { %v1383_v12 = vadd.f32 %v1382_v11, %v1381_v9  ;;  %v1446_v13 = vpop.f32.mrb[17].mxu1  ;;  %v1384_v14 = vpop.f32.mrb[18].mxu0  ;;  %v44_v9 = vld [vmem:[#allocation2 + $0x10] sm:$0xff] }
 0x119   :  { %v1447_v15 = vadd.f32 %v1446_v13, %v1445_v10  ;;  %v1448_v16 = vpop.f32.mrb[18].mxu1  ;;  %v1385_v17 = vpop.f32.mrb[19].mxu0 }
 0x11a   :  { %v1386_v18 = vadd.f32 %v1385_v17, %v1384_v14  ;;  %v1449_v19 = vpop.f32.mrb[19].mxu1  ;;  %v42_v14 = vld [vmem:[#allocation2] sm:$0xff]  ;;  %v1949_v17 = vld [vmem:[%s2171_s4 + $0x8] sm:$0xff]  }
 0x11b   :  { %v1450_v20 = vadd.f32 %v1449_v19, %v1448_v16  ;;  %v1933_v21 = vadd.f32 %v1447_v15, %v1383_v12  ;;  %v52_v12 = vld [vmem:[#allocation2 + $0x50] sm:$0xff]  ;;  %v50_v16 = vld [vmem:[#allocation2 + $0x40] sm:$0xff] }
 0x11d   :  { %v1935_v22 = vadd.f32 %v1450_v20, %v1386_v18 }
 0x11e   :  { %v1387_v23 = vpop.f32.mrb[20].mxu0 }
 0x11f   :  { %v1451_v24 = vpop.f32.mrb[20].mxu1  ;;  %v1388_v25 = vpop.f32.mrb[21].mxu0 }
 0x120   :  { %v1389_v26 = vadd.f32 %v1388_v25, %v1387_v23  ;;  %v1452_v27 = vpop.f32.mrb[21].mxu1  ;;  %v1390_v28 = vpop.f32.mrb[22].mxu0  ;;  %v45_v23 = vld [vmem:[#allocation2 + $0x18] sm:$0xff] }
 0x121   :  { %v1453_v31 = vadd.f32 %v1452_v27, %v1451_v24  ;;  %v1454_v32 = vpop.f32.mrb[22].mxu1  ;;  %v1391_v33 = vpop.f32.mrb[23].mxu0  ;;  %v53_v25 = vld [vmem:[#allocation2 + $0x58] sm:$0xff]  ;;  %v1960_v27 = vld [vmem:[%s2171_s4] sm:$0xff]  }
 0x122   :  { %v1392_v34 = vadd.f32 %v1391_v33, %v1390_v28  ;;  %v1455_v35 = vpop.f32.mrb[23].mxu1 }
 0x123   :  { %v1456_v36 = vadd.f32 %v1455_v35, %v1454_v32  ;;  %v806_v37 = vadd.f32 %v1453_v31, %v1389_v26  ;;  %v43_v32 = vld [vmem:[#allocation2 + $0x8] sm:$0xff] }
 0x125   :  { %v809_v38 = vadd.f32 %v1456_v36, %v1392_v34  ;;  %v1967_v36 = vld [vmem:[%s2171_s4 + $0x20] sm:$0xff]  }
 0x126   :  { %v1393_v39 = vpop.f32.mrb[24].mxu0 }
 0x127   :  { %v1457_v40 = vpop.f32.mrb[24].mxu1  ;;  %v1394_v41 = vpop.f32.mrb[25].mxu0 }
 0x128   :  { %v1395_v42 = vadd.f32 %v1394_v41, %v1393_v39  ;;  %v1458_v45 = vpop.f32.mrb[25].mxu1  ;;  %v1396_v46 = vpop.f32.mrb[26].mxu0 }
 0x129   :  { %v1459_v47 = vadd.f32 %v1458_v45, %v1457_v40  ;;  %v1460_v48 = vpop.f32.mrb[26].mxu1  ;;  %v1397_v49 = vpop.f32.mrb[27].mxu0  ;;  %v51_v40 = vld [vmem:[#allocation2 + $0x48] sm:$0xff] }
 0x12a   :  { %v1398_v50 = vadd.f32 %v1397_v49, %v1396_v46  ;;  %v1461_v51 = vpop.f32.mrb[27].mxu1  ;;  %v1976_v46 = vld [vmem:[%s2171_s4 + $0x18] sm:$0xff]   ;;  %v1990_v49 = vld [vmem:[%s2171_s4 + $0x10] sm:$0xff]  }
 0x12b   :  { %v1462_v52 = vadd.f32 %v1461_v51, %v1460_v48  ;;  %v1937_v53 = vadd.f32 %v1459_v47, %v1395_v42  ;;  %v1304_v47 = vunpack.c.l.bf16 %v1960_v27  ;;  %v1320_v51 = vunpack.c.l.bf16 %v1967_v36 }
 0x12d   :  { %v1939_v54 = vadd.f32 %v1462_v52, %v1398_v50  ;;  %v1995_v50 = vld [vmem:[%s2171_s4 + $0x30] sm:$0xff]   ;;  %v1309_v52 = vunpack.c.h.bf16 %v1949_v17 }
 0x12e   :  { %v1399_v55 = vpop.f32.mrb[28].mxu0 }
 0x12f   :  { %v1463_v56 = vpop.f32.mrb[28].mxu1  ;;  %v1400_v59 = vpop.f32.mrb[29].mxu0 }
 0x130   :  { %v1401_v60 = vadd.f32 %v1400_v59, %v1399_v55  ;;  %v1464_v61 = vpop.f32.mrb[29].mxu1  ;;  %v1402_v62 = vpop.f32.mrb[30].mxu0  ;;  %v1305_v59 = vunpack.c.h.bf16 %v1960_v27 }
 0x131   :  { %v1465_v63 = vadd.f32 %v1464_v61, %v1463_v56  ;;  %v1466_v0 = vpop.f32.mrb[30].mxu1  ;;  %v1403_v1 = vpop.f32.mrb[31].mxu0  ;;  %v48_v61 = vld [vmem:[#allocation2 + $0x30] sm:$0xff] }
 0x132   :  { %v1404_v2 = vadd.f32 %v1403_v1, %v1402_v62  ;;  %v1467_v3 = vpop.f32.mrb[31].mxu1 }
 0x133   :  { %v1468_v4 = vadd.f32 %v1467_v3, %v1466_v0  ;;  %v1941_v5 = vadd.f32 %v1465_v63, %v1401_v60  ;;  %v1321_v60 = vunpack.c.h.bf16 %v1967_v36  ;;  %v1316_v63 = vunpack.c.l.bf16 %v1976_v46 }
 0x135   :  { %v1943_v6 = vadd.f32 %v1468_v4, %v1404_v2  ;;  %v56_v2 = vld [vmem:[#allocation2 + $0x70] sm:$0xff]  ;;  %v46_v4 = vld [vmem:[#allocation2 + $0x20] sm:$0xff] }
 0x136   :  { %v1503_v10 = vpop.f32.mrb[32].mxu0 }
 0x137   :  { %v871_v11 = vadd.f32 %v1503_v10, %v1921_v43  ;;  %v1511_v13 = vpop.f32.mrb[32].mxu1  ;;  %v862_v15 = vpop.f32.mrb[33].mxu0  ;;  %v1955_v43 = vld [vmem:[%s2171_s4 + $0x28] sm:$0xff]   ;;  %v1312_v10 = vunpack.c.l.bf16 %v1990_v49 }
 0x138   :  { %v903_v18 = vadd.f32 %v1511_v13, %v806_v37  ;;  %v863_v19 = vadd.f32 %v862_v15, %v1917_v29  ;;  %v894_v20 = vpop.f32.mrb[33].mxu1  ;;  %v1504_v24 = vpop.f32.mrb[34].mxu0  ;;  %v1325_v55 = vunpack.c.h.bf16 %v1955_v43  ;;  %v2016_v13 = vld [vmem:[%s2172_s2] ss:$0 sm:$0xff] }
 0x139   :  { %v927_v26 = vadd.f32 %v871_v11, %v44_v9  ;;  %v895_v28 = vadd.f32 %v894_v20, %v1933_v21  ;;  %v874_v31 = vadd.f32 %v1504_v24, %v1923_v44  ;;  %v1512_v29 = vpop.f32.mrb[34].mxu1  ;;  %v865_v33 = vpop.f32.mrb[35].mxu0  ;;  %v1308_v21 = vunpack.c.l.bf16 %v1949_v17 }
 0x13a   :  { %v935_v34 = vadd.f32 %v903_v18, %v52_v12  ;;  %v925_v35 = vadd.f32 %v863_v19, %v42_v14  ;;  %v906_v37 = vadd.f32 %v1512_v29, %v809_v38  ;;  %v866_v39 = vadd.f32 %v865_v33, %v1919_v30  ;;  %v897_v41 = vpop.f32.mrb[35].mxu1  ;;  %v1981_v38 = vld [vmem:[%s2171_s4 + $0x38] sm:$0xff]   ;;  %v47_v29 = vld [vmem:[#allocation2 + $0x28] sm:$0xff]  ;;  %v2028_v33 = vld [vmem:[%s2173_s3] ss:$0 sm:$0xff] }
 0x13b   :  { %944 = vst.msk [vmem:[#allocation2 + $0x10] sm:$0xff] %vm25_vm0, %v927_v26  ;;  %v933_v44 = vadd.f32 %v895_v28, %v50_v16  ;;  %v928_v42 = vadd.f32 %v874_v31, %v45_v23  ;;  %v898_v45 = vadd.f32 %v897_v41, %v1935_v22  ;;  %v1324_v30 = vunpack.c.l.bf16 %v1955_v43  ;;  %v49_v18 = vld [vmem:[#allocation2 + $0x38] sm:$0xff] }
 0x13c   :  { %952 = vst.msk [vmem:[#allocation2 + $0x50] sm:$0xff] %vm25_vm0, %v935_v34  ;;  %942 = vst.msk [vmem:[#allocation2] sm:$0xff] %vm25_vm0, %v925_v35  ;;  %v936_v48 = vadd.f32 %v906_v37, %v53_v25  ;;  %v926_v22 = vadd.f32 %v866_v39, %v43_v32  ;;  %v1332_v0 = vunpack.c.l.bf16 %v1981_v38  ;;  %v1328_v11 = vunpack.c.l.bf16 %v1995_v50  ;;  %v57_v28 = vld [vmem:[#allocation2 + $0x78] sm:$0xff]  ;;  %v55_v39 = vld [vmem:[#allocation2 + $0x68] sm:$0xff] }
 0x13d   :  { %950 = vst.msk [vmem:[#allocation2 + $0x40] sm:$0xff] %vm25_vm0, %v933_v44  ;;  %945 = vst.msk [vmem:[#allocation2 + $0x18] sm:$0xff] %vm25_vm0, %v928_v42  ;;  %v934_v56 = vadd.f32 %v898_v45, %v51_v40  ;;  %v1317_v12 = vunpack.c.h.bf16 %v1976_v46  ;;  %v1333_v20 = vunpack.c.h.bf16 %v1981_v38  ;;  %v1313_v23 = vunpack.c.h.bf16 %v1990_v49 }
 0x13e   :  { %953 = vst.msk [vmem:[#allocation2 + $0x58] sm:$0xff] %vm25_vm0, %v936_v48  ;;  %943 = vst.msk [vmem:[#allocation2 + $0x8] sm:$0xff] %vm25_vm0, %v926_v22  ;;  %v1507_v62 = vpop.f32.mrb[36].mxu0 }
 0x13f   :  { %951 = vst.msk [vmem:[#allocation2 + $0x48] sm:$0xff] %vm25_vm0, %v934_v56  ;;  %v887_v1 = vadd.f32 %v1507_v62, %v1929_v7  ;;  %v1515_v3 = vpop.f32.mrb[36].mxu1  ;;  %v878_v9 = vpop.f32.mrb[37].mxu0  ;;  %v54_v7 = vld [vmem:[#allocation2 + $0x60] sm:$0xff] }
 0x140   :  { %v919_v14 = vadd.f32 %v1515_v3, %v1941_v5  ;;  %v879_v15 = vadd.f32 %v878_v9, %v1925_v57  ;;  %v910_v16 = vpop.f32.mrb[37].mxu1  ;;  %v1508_v19 = vpop.f32.mrb[38].mxu0  ;;  %v1329_v5 = vunpack.c.h.bf16 %v1995_v50 }
 0x141   :  { %v931_v24 = vadd.f32 %v887_v1, %v48_v61  ;;  %v911_v25 = vadd.f32 %v910_v16, %v1937_v53  ;;  %v890_v26 = vadd.f32 %v1508_v19, %v1931_v8  ;;  %v1516_v31 = vpop.f32.mrb[38].mxu1  ;;  %v881_v32 = vpop.f32.mrb[39].mxu0 }
 0x142   :  { %v963_v57 = vld [vmem:[#allocation2 + $0x10] sm:$0xff]  ;;  %v939_v34 = vadd.f32 %v919_v14, %v56_v2  ;;  %v929_v35 = vadd.f32 %v879_v15, %v46_v4  ;;  %v922_v37 = vadd.f32 %v1516_v31, %v1943_v6  ;;  %v882_v53 = vadd.f32 %v881_v32, %v1927_v58  ;;  %v913_v8 = vpop.f32.mrb[39].mxu1 }
 0x143   :  { %v986_v40 = vmul.f32 %v2016_v13, %v963_v57  ;;  %v971_v41 = vld [vmem:[#allocation2 + $0x50] sm:$0xff]  ;;  %v961_v44 = vld [vmem:[#allocation2] sm:$0xff]  ;;  %948 = vst.msk [vmem:[#allocation2 + $0x30] sm:$0xff] %vm25_vm0, %v931_v24  ;;  %v937_v42 = vadd.f32 %v911_v25, %v54_v7  ;;  %v932_v45 = vadd.f32 %v890_v26, %v49_v18  ;;  %v914_v48 = vadd.f32 %v913_v8, %v1939_v54 }
 0x144   :  { %v994_v22 = vmul.f32 %v2016_v13, %v971_v41  ;;  %v984_v56 = vmul.f32 %v2016_v13, %v961_v44  ;;  %v969_v6 = vld [vmem:[#allocation2 + $0x40] sm:$0xff]  ;;  %v964_v61 = vld [vmem:[#allocation2 + $0x18] sm:$0xff]  ;;  %956 = vst.msk [vmem:[#allocation2 + $0x70] sm:$0xff] %vm25_vm0, %v939_v34  ;;  %946 = vst.msk [vmem:[#allocation2 + $0x20] sm:$0xff] %vm25_vm0, %v929_v35  ;;  %v940_v58 = vadd.f32 %v922_v37, %v57_v28 }
 0x145   :  { %v930_v62 = vadd.f32 %v882_v53, %v47_v29  ;;  %v1009_v1 = vadd.f32 %v2028_v33, %v986_v40  ;;  %v992_v2 = vmul.f32 %v2016_v13, %v969_v6  ;;  %v987_v3 = vmul.f32 %v2016_v13, %v964_v61  ;;  %v972_v54 = vld [vmem:[#allocation2 + $0x58] sm:$0xff]  ;;  %v962_v4 = vld [vmem:[#allocation2 + $0x8] sm:$0xff]  ;;  %954 = vst.msk [vmem:[#allocation2 + $0x60] sm:$0xff] %vm25_vm0, %v937_v42 }
 0x146   :  { %949 = vst.msk [vmem:[#allocation2 + $0x38] sm:$0xff] %vm25_vm0, %v932_v45  ;;  %v938_v9 = vadd.f32 %v914_v48, %v55_v39  ;;  %v1017_v14 = vadd.f32 %v2028_v33, %v994_v22  ;;  %v1007_v15 = vadd.f32 %v2028_v33, %v984_v56  ;;  %v995_v7 = vmul.f32 %v2016_v13, %v972_v54  ;;  %v970_v18 = vld [vmem:[#allocation2 + $0x48] sm:$0xff] }
 0x147   :  { %v985_v16 = vmul.f32 %v2016_v13, %v962_v4  ;;  %957 = vst.msk [vmem:[#allocation2 + $0x78] sm:$0xff] %vm25_vm0, %v940_v58  ;;  %947 = vst.msk [vmem:[#allocation2 + $0x28] sm:$0xff] %vm25_vm0, %v930_v62  ;;  %v1025_v19 = vmax.f32 %v1009_v1, 0.0  ;;  %v1015_v24 = vadd.f32 %v2028_v33, %v992_v2  ;;  %v1010_v25 = vadd.f32 %v2028_v33, %v987_v3 }
 0x148   :  { %v993_v26 = vmul.f32 %v2016_v13, %v970_v18  ;;  %955 = vst.msk [vmem:[#allocation2 + $0x68] sm:$0xff] %vm25_vm0, %v938_v9  ;;  %v1033_v28 = vmax.f32 %v1017_v14, 0.0  ;;  %v1023_v31 = vmax.f32 %v1007_v15, 0.0  ;;  %v1018_v29 = vadd.f32 %v2028_v33, %v995_v7 }
 0x149   :  { %v1008_v32 = vadd.f32 %v2028_v33, %v985_v16  ;;  %v1073_v57 = vadd.f32 %v1308_v21, %v1025_v19  ;;  %v1031_v34 = vmax.f32 %v1015_v24, 0.0  ;;  %v1026_v35 = vmax.f32 %v1010_v25, 0.0 }
 0x14a   :  { %v1016_v37 = vadd.f32 %v2028_v33, %v993_v26  ;;  %v1081_v53 = vadd.f32 %v1324_v30, %v1033_v28  ;;  %v1071_v39 = vadd.f32 %v1304_v47, %v1023_v31  ;;  %v1034_v8 = vmax.f32 %v1018_v29, 0.0  ;;  %v967_v56 = vld [vmem:[#allocation2 + $0x30] sm:$0xff] }
 0x14b   :  { %v1024_v40 = vmax.f32 %v1008_v32, 0.0  ;;  %v1089_v41 = vmax.f32 %v1073_v57, 0.0  ;;  %v1079_v44 = vadd.f32 %v1320_v51, %v1031_v34  ;;  %v1074_v42 = vadd.f32 %v1309_v52, %v1026_v35  ;;  %v975_v51 = vld [vmem:[#allocation2 + $0x70] sm:$0xff]  ;;  %v965_v62 = vld [vmem:[#allocation2 + $0x20] sm:$0xff] }
 0x14c   :  { %v1032_v21 = vmax.f32 %v1016_v37, 0.0  ;;  %v1097_v45 = vmax.f32 %v1081_v53, 0.0  ;;  %v1087_v48 = vmax.f32 %v1071_v39, 0.0  ;;  %v1082_v22 = vadd.f32 %v1325_v55, %v1034_v8  ;;  %v973_v3 = vld [vmem:[#allocation2 + $0x60] sm:$0xff] }
 0x14d   :  { %v1072_v30 = vadd.f32 %v1305_v59, %v1024_v40  ;;  %v1288_v47 = vpack.c.bf16 %v1089_v41, %v1089_v41  ;;  %v1095_v6 = vmax.f32 %v1079_v44, 0.0  ;;  %v1090_v61 = vmax.f32 %v1074_v42, 0.0  ;;  %v968_v54 = vld [vmem:[#allocation2 + $0x38] sm:$0xff] }
 0x14e   :  { %v1080_v58 = vadd.f32 %v1321_v60, %v1032_v21  ;;  %v1296_v17 = vpack.c.bf16 %v1097_v45, %v1097_v45  ;;  %v1286_v52 = vpack.c.bf16 %v1087_v48, %v1087_v48  ;;  %v1098_v1 = vmax.f32 %v1082_v22, 0.0  ;;  %v976_v36 = vld [vmem:[#allocation2 + $0x78] sm:$0xff]  ;;  %v966_v60 = vld [vmem:[#allocation2 + $0x28] sm:$0xff] }
 0x14f   :  { %v1088_v2 = vmax.f32 %v1072_v30, 0.0  ;;  %1170 = vst.msk [vmem:[%s2174_s5 + $0x8] sm:$0xf] %vm1167_vm1, %v1288_v47  ;;  %v1294_v43 = vpack.c.bf16 %v1095_v6, %v1095_v6  ;;  %v1289_v27 = vpack.c.bf16 %v1090_v61, %v1090_v61  ;;  %v990_v59 = vmul.f32 %v2016_v13, %v967_v56  ;;  %v974_v7 = vld [vmem:[#allocation2 + $0x68] sm:$0xff] }
 0x150   :  { %v1096_v55 = vmax.f32 %v1080_v58, 0.0  ;;  %1178 = vst.msk [vmem:[%s2174_s5 + $0x28] sm:$0xf] %vm1167_vm1, %v1296_v17  ;;  %1168 = vst.msk [vmem:[%s2174_s5] sm:$0xf] %vm1167_vm1, %v1286_v52  ;;  %v1297_v4 = vpack.c.bf16 %v1098_v1, %v1098_v1  ;;  %v998_v14 = vmul.f32 %v2016_v13, %v975_v51  ;;  %v988_v15 = vmul.f32 %v2016_v13, %v965_v62 }
 0x151   :  { %v1287_v9 = vpack.c.bf16 %v1088_v2, %v1088_v2  ;;  %1176 = vst.msk [vmem:[%s2174_s5 + $0x20] sm:$0xf] %vm1167_vm1, %v1294_v43  ;;  %1171 = vst.msk [vmem:[%s2174_s5 + $0xc] sm:$0xf] %vm1167_vm1, %v1289_v27  ;;  %v1013_v18 = vadd.f32 %v2028_v33, %v990_v59  ;;  %v996_v19 = vmul.f32 %v2016_v13, %v973_v3 }
 0x152   :  { %v1295_v16 = vpack.c.bf16 %v1096_v55, %v1096_v55  ;;  %v991_v24 = vmul.f32 %v2016_v13, %v968_v54  ;;  %1179 = vst.msk [vmem:[%s2174_s5 + $0x2c] sm:$0xf] %vm1167_vm1, %v1297_v4  ;;  %v1021_v25 = vadd.f32 %v2028_v33, %v998_v14  ;;  %v1011_v26 = vadd.f32 %v2028_v33, %v988_v15 }
 0x153   :  { %1169 = vst.msk [vmem:[%s2174_s5 + $0x4] sm:$0xf] %vm1167_vm1, %v1287_v9  ;;  %v999_v28 = vmul.f32 %v2016_v13, %v976_v36  ;;  %v989_v31 = vmul.f32 %v2016_v13, %v966_v60  ;;  %v1029_v29 = vmax.f32 %v1013_v18, 0.0  ;;  %v1019_v32 = vadd.f32 %v2028_v33, %v996_v19 }
 0x154   :  { %1177 = vst.msk [vmem:[%s2174_s5 + $0x24] sm:$0xf] %vm1167_vm1, %v1295_v16  ;;  %v1014_v57 = vadd.f32 %v2028_v33, %v991_v24  ;;  %v997_v34 = vmul.f32 %v2016_v13, %v974_v7  ;;  %v1037_v35 = vmax.f32 %v1021_v25, 0.0  ;;  %v1027_v37 = vmax.f32 %v1011_v26, 0.0 }
 0x155   :  { %v1022_v53 = vadd.f32 %v2028_v33, %v999_v28  ;;  %v1012_v39 = vadd.f32 %v2028_v33, %v989_v31  ;;  %v1077_v8 = vadd.f32 %v1316_v63, %v1029_v29  ;;  %v1035_v40 = vmax.f32 %v1019_v32, 0.0 }
 0x156   :  { %v1030_v41 = vmax.f32 %v1014_v57, 0.0  ;;  %v1020_v44 = vadd.f32 %v2028_v33, %v997_v34  ;;  %v1085_v42 = vadd.f32 %v1332_v0, %v1037_v35  ;;  %v1075_v21 = vadd.f32 %v1312_v10, %v1027_v37 }
 0x157   :  { %v1038_v13 = vmax.f32 %v1022_v53, 0.0  ;;  %v1028_v45 = vmax.f32 %v1012_v39, 0.0  ;;  %v1093_v48 = vmax.f32 %v1077_v8, 0.0  ;;  %v1083_v22 = vadd.f32 %v1328_v11, %v1035_v40 }
 0x158   :  { %v1078_v30 = vadd.f32 %v1317_v12, %v1030_v41  ;;  %v1036_v63 = vmax.f32 %v1020_v44, 0.0  ;;  %v1101_v56 = vmax.f32 %v1085_v42, 0.0  ;;  %v1091_v47 = vmax.f32 %v1075_v21, 0.0 }
 0x159   :  { %v1086_v33 = vadd.f32 %v1333_v20, %v1038_v13  ;;  %v1076_v0 = vadd.f32 %v1313_v23, %v1028_v45  ;;  %v1292_v6 = vpack.c.bf16 %v1093_v48, %v1093_v48  ;;  %v1099_v10 = vmax.f32 %v1083_v22, 0.0 }
 0x15a   :  { %v1094_v61 = vmax.f32 %v1078_v30, 0.0  ;;  %v1084_v58 = vadd.f32 %v1329_v5, %v1036_v63  ;;  %v1300_v51 = vpack.c.bf16 %v1101_v56, %v1101_v56  ;;  %v1290_v11 = vpack.c.bf16 %v1091_v47, %v1091_v47 }
 0x15b   :  { %v1102_v62 = vmax.f32 %v1086_v33, 0.0  ;;  %v1092_v46 = vmax.f32 %v1076_v0, 0.0  ;;  %1174 = vst.msk [vmem:[%s2174_s5 + $0x18] sm:$0xf] %vm1167_vm1, %v1292_v6  ;;  %v1298_v38 = vpack.c.bf16 %v1099_v10, %v1099_v10 }
 0x15c   :  { %v1293_v12 = vpack.c.bf16 %v1094_v61, %v1094_v61  ;;  %v1100_v20 = vmax.f32 %v1084_v58, 0.0  ;;  %1182 = vst.msk [vmem:[%s2174_s5 + $0x38] sm:$0xf] %vm1167_vm1, %v1300_v51  ;;  %1172 = vst.msk [vmem:[%s2174_s5 + $0x10] sm:$0xf] %vm1167_vm1, %v1290_v11 }
 0x15d   :  { %v1301_v49 = vpack.c.bf16 %v1102_v62, %v1102_v62  ;;  %v1291_v50 = vpack.c.bf16 %v1092_v46, %v1092_v46  ;;  %1180 = vst.msk [vmem:[%s2174_s5 + $0x30] sm:$0xf] %vm1167_vm1, %v1298_v38 }
 0x15e   :  { %1175 = vst.msk [vmem:[%s2174_s5 + $0x1c] sm:$0xf] %vm1167_vm1, %v1293_v12  ;;  %v1299_v23 = vpack.c.bf16 %v1100_v20, %v1100_v20 }
 0x15f   :  { %1183 = vst.msk [vmem:[%s2174_s5 + $0x3c] sm:$0xf] %vm1167_vm1, %v1301_v49  ;;  %1173 = vst.msk [vmem:[%s2174_s5 + $0x14] sm:$0xf] %vm1167_vm1, %v1291_v50 }
 0x160   :  { %1181 = vst.msk [vmem:[%s2174_s5 + $0x34] sm:$0xf] %vm1167_vm1, %v1299_v23 }

// kernel: _lambda_.29
= control target key start
LH: loop header
LB: loop body
LE: loop exit
PB: predicated region body
PF: predicated region fallthrough
CT: control target
= control target key end

     0   :  { %s1024_s1 = inlined_call_operand.vmem [shape: bf16[640,128], index: 1, kind: input, shape index: {}]   ;;  %s1025_s0 = inlined_call_operand.vmem [shape: bf16[32,640], index: 0, kind: input, shape index: {}]   ;;  %s1026_s2 = inlined_call_operand.vmem [shape: f32[1,128], index: 2, kind: input, shape index: {}]   ;;  %s1027_s3 = inlined_call_operand.vmem [shape: f32[1,128], index: 3, kind: input, shape index: {}]   ;;  %s1028_s4 = inlined_call_operand.vmem [shape: bf16[32,128], index: 4, kind: output, shape index: {}]  }
   0x1   :  { %v783_v0 = vld [vmem:[%s1024_s1 + $0x40] sm:$0xff]   ;;  %v787_v4 = vld [vmem:[%s1024_s1 + $0x48] sm:$0xff]   ;;  %v791_v8 = vld [vmem:[%s1024_s1 + $0x50] sm:$0xff]  }
   0x2   :  { %v784_v1 = vld [vmem:[%s1024_s1 + $0xc0] sm:$0xff]   ;;  %697 = vmatprep.subr.bf16.mxu0 %v783_v0  ;;  %v788_v5 = vld [vmem:[%s1024_s1 + $0xc8] sm:$0xff]   ;;  %v792_v9 = vld [vmem:[%s1024_s1 + $0xd0] sm:$0xff]  }
   0x3   :  { %v785_v2 = vld [vmem:[%s1024_s1] sm:$0xff]   ;;  %725 = vmatprep.subr.bf16.mxu1 %v784_v1  ;;  %v789_v6 = vld [vmem:[%s1024_s1 + $0x8] sm:$0xff]   ;;  %v793_v10 = vld [vmem:[%s1024_s1 + $0x10] sm:$0xff]  }
   0x4   :  { %v786_v3 = vld [vmem:[%s1024_s1 + $0x80] sm:$0xff]   ;;  %698 = vmatpush3.bf16.msra.mxu0 %v785_v2  ;;  %v790_v7 = vld [vmem:[%s1024_s1 + $0x88] sm:$0xff]   ;;  %v794_v11 = vld [vmem:[%s1024_s1 + $0x90] sm:$0xff]  }
   0x5   :  { %726 = vmatpush3.bf16.msra.mxu1 %v786_v3  ;;  %699 = vmatprep.subr.bf16.mxu0 %v787_v4  ;;  %v795_v12 = vld [vmem:[%s1024_s1 + $0x58] sm:$0xff]   ;;  %v799_v16 = vld [vmem:[%s1024_s1 + $0x60] sm:$0xff]   ;;  %v803_v20 = vld [vmem:[%s1024_s1 + $0x68] sm:$0xff]  }
   0x6   :  { %727 = vmatprep.subr.bf16.mxu1 %v788_v5  ;;  %v796_v13 = vld [vmem:[%s1024_s1 + $0xd8] sm:$0xff]   ;;  %v800_v17 = vld [vmem:[%s1024_s1 + $0xe0] sm:$0xff]   ;;  %v804_v21 = vld [vmem:[%s1024_s1 + $0xe8] sm:$0xff]  }
   0x7   :  { %v797_v14 = vld [vmem:[%s1024_s1 + $0x18] sm:$0xff]   ;;  %v801_v18 = vld [vmem:[%s1024_s1 + $0x20] sm:$0xff]   ;;  %v805_v22 = vld [vmem:[%s1024_s1 + $0x28] sm:$0xff]  }
   0x8   :  { %700 = vmatpush3.bf16.msra.mxu0 %v789_v6  ;;  %v798_v15 = vld [vmem:[%s1024_s1 + $0x98] sm:$0xff]   ;;  %v802_v19 = vld [vmem:[%s1024_s1 + $0xa0] sm:$0xff]   ;;  %v806_v23 = vld [vmem:[%s1024_s1 + $0xa8] sm:$0xff]  }
   0x9   :  { %728 = vmatpush3.bf16.msra.mxu1 %v790_v7  ;;  %701 = vmatprep.subr.bf16.mxu0 %v791_v8  ;;  %v807_v24 = vld [vmem:[%s1024_s1 + $0x70] sm:$0xff]   ;;  %v811_v28 = vld [vmem:[%s1024_s1 + $0x78] sm:$0xff]   ;;  %v820_v35 = vld [vmem:[%s1025_s0 + $0xc] ss:$20 sps:$4 sm:$0xff]  }
   0xa   :  { %729 = vmatprep.subr.bf16.mxu1 %v792_v9  ;;  %v808_v25 = vld [vmem:[%s1024_s1 + $0xf0] sm:$0xff]   ;;  %v812_v29 = vld [vmem:[%s1024_s1 + $0xf8] sm:$0xff]   ;;  %v821_v36 = vld [vmem:[%s1024_s1 + $0x100] sm:$0xff]   ;;  %495 = vmatprep.mubr.bf16.mxu1 %v820_v35 }
   0xb   :  { %v809_v26 = vld [vmem:[%s1024_s1 + $0x30] sm:$0xff]   ;;  %v813_v30 = vld [vmem:[%s1024_s1 + $0x38] sm:$0xff]   ;;  %v822_v37 = vld [vmem:[%s1024_s1 + $0x108] sm:$0xff]  }
   0xc   :  { %702 = vmatpush3.bf16.msra.mxu0 %v793_v10  ;;  %v810_v27 = vld [vmem:[%s1024_s1 + $0xb0] sm:$0xff]   ;;  %v814_v31 = vld [vmem:[%s1024_s1 + $0xb8] sm:$0xff]   ;;  %v826_v39 = vld [vmem:[%s1025_s0 + $0x2c] ss:$20 sps:$4 sm:$0xff]  }
   0xd   :  { %730 = vmatpush3.bf16.msra.mxu1 %v794_v11  ;;  %703 = vmatprep.subr.bf16.mxu0 %v795_v12  ;;  %v815_v32 = vld [vmem:[%s1025_s0] ss:$20 sps:$4 sm:$0xff]   ;;  %v817_v33 = vld [vmem:[%s1025_s0 + $0x4] ss:$20 sps:$4 sm:$0xff]   ;;  %v818_v34 = vld [vmem:[%s1025_s0 + $0x8] ss:$20 sps:$4 sm:$0xff]  }
   0xe   :  { %731 = vmatprep.subr.bf16.mxu1 %v796_v13  ;;  %446 = vmatprep.mubr.bf16.mxu0 %v817_v33  ;;  %v823_v38 = vld [vmem:[%s1024_s1 + $0x110] sm:$0xff]   ;;  %v824_v41 = vld [vmem:[%s1024_s1 + $0x118] sm:$0xff]   ;;  %v825_v45 = vld [vmem:[%s1024_s1 + $0x120] sm:$0xff]  }
   0xf   :  { %v828_v40 = vld [vmem:[%s1025_s0 + $0x34] ss:$20 sps:$4 sm:$0xff]   ;;  %v832_v43 = vld [vmem:[%s1025_s0 + $0x30] ss:$20 sps:$4 sm:$0xff]   ;;  %v834_v48 = vld [vmem:[%s1024_s1 + $0x138] sm:$0xff]  }
  0x10   :  { %704 = vmatpush3.bf16.msra.mxu0 %v797_v14  ;;  %v831_v42 = vld [vmem:[%s1025_s0 + $0x28] ss:$20 sps:$4 sm:$0xff]   ;;  %v835_v44 = vld [vmem:[%s1025_s0 + $0x10] ss:$20 sps:$4 sm:$0xff]   ;;  %v836_v49 = vld [vmem:[%s1025_s0 + $0x38] ss:$20 sps:$4 sm:$0xff]  }
  0x11   :  { %732 = vmatpush3.bf16.msra.mxu1 %v798_v15  ;;  %705 = vmatprep.subr.bf16.mxu0 %v799_v16  ;;  %v830_v46 = vld [vmem:[%s1024_s1 + $0x128] sm:$0xff]   ;;  %v833_v47 = vld [vmem:[%s1024_s1 + $0x130] sm:$0xff]   ;;  %v676_v15 = vld [vmem:[%s1026_s2] ss:$0 sm:$0xff] }
  0x12   :  { %733 = vmatprep.subr.bf16.mxu1 %v800_v17 }
  0x14   :  { %706 = vmatpush3.bf16.msra.mxu0 %v801_v18  ;;  %v677_v18 = vld [vmem:[%s1027_s3] ss:$0 sm:$0xff] }
  0x15   :  { %734 = vmatpush3.bf16.msra.mxu1 %v802_v19  ;;  %707 = vmatprep.subr.bf16.mxu0 %v803_v20 }
  0x16   :  { %735 = vmatprep.subr.bf16.mxu1 %v804_v21 }
  0x18   :  { %708 = vmatpush3.bf16.msra.mxu0 %v805_v22 }
  0x19   :  { %736 = vmatpush3.bf16.msra.mxu1 %v806_v23  ;;  %709 = vmatprep.subr.bf16.mxu0 %v807_v24 }
  0x1a   :  { %737 = vmatprep.subr.bf16.mxu1 %v808_v25 }
  0x1c   :  { %710 = vmatpush3.bf16.msra.mxu0 %v809_v26 }
  0x1d   :  { %738 = vmatpush3.bf16.msra.mxu1 %v810_v27  ;;  %711 = vmatprep.subr.bf16.mxu0 %v811_v28 }
  0x1e   :  { %739 = vmatprep.subr.bf16.mxu1 %v812_v29 }
  0x20   :  { %712 = vmatpush3.bf16.msra.mxu0 %v813_v30 }
  0x21   :  { %740 = vmatpush3.bf16.msra.mxu1 %v814_v31  ;;  %763 = vmatprep.subr.bf16.mxu0 %v821_v36 }
  0x23   :  { %447 = vmatmul.mubr.bf16.vlgmr.msra.gmra.mrb[0].mxu0 %v815_v32 }
  0x24   :  { %496 = vmatmul.mubr.bf16.vlgmr.msra.gmra.mrb[0].mxu1 %v818_v34  ;;  %764 = vmatpush3.bf16.msra.mxu0 %v821_v36 }
  0x25   :  { %765 = vmatprep.subr.bf16.mxu0 %v822_v37  ;;  %454 = vmatprep.mubr.bf16.mxu0 %v826_v39 }
  0x26   :  { %503 = vmatprep.mubr.bf16.mxu1 %v828_v40 }
  0x28   :  { %766 = vmatpush3.bf16.msra.mxu0 %v822_v37 }
  0x29   :  { %767 = vmatprep.subr.bf16.mxu0 %v823_v38 }
  0x2b   :  { %455 = vmatmul.mubr.bf16.gmra.mrb[4].mxu0 %v831_v42 }
  0x2c   :  { %504 = vmatmul.mubr.bf16.gmra.mrb[4].mxu1 %v832_v43  ;;  %768 = vmatpush3.bf16.msra.mxu0 %v823_v38 }
  0x2d   :  { %769 = vmatprep.subr.bf16.mxu0 %v824_v41  ;;  %779 = vmatprep.mubr.bf16.mxu0 %v835_v44 }
  0x30   :  { %770 = vmatpush3.bf16.msra.mxu0 %v824_v41 }
  0x31   :  { %771 = vmatprep.subr.bf16.mxu0 %v825_v45 }
  0x34   :  { %772 = vmatpush3.bf16.msra.mxu0 %v825_v45 }
  0x35   :  { %773 = vmatprep.subr.bf16.mxu0 %v830_v46 }
  0x38   :  { %774 = vmatpush3.bf16.msra.mxu0 %v830_v46 }
  0x39   :  { %775 = vmatprep.subr.bf16.mxu0 %v833_v47 }
  0x3c   :  { %776 = vmatpush3.bf16.msra.mxu0 %v833_v47 }
  0x3d   :  { %777 = vmatprep.subr.bf16.mxu0 %v834_v48 }
  0x40   :  { %778 = vmatpush3.bf16.msra.mxu0 %v834_v48 }
  0x43   :  { %780 = vmatmul.mubr.bf16.vlgmr.msra.gmra.mrb[8].mxu0 %v836_v49 }
  0xf6   :  { %v713_v50 = vpop.f32.mrb[0].mxu0 }
  0xf7   :  { %v741_v51 = vpop.f32.mrb[0].mxu1  ;;  %v714_v52 = vpop.f32.mrb[1].mxu0 }
  0xf8   :  { %v715_v53 = vadd.f32 %v714_v52, %v713_v50  ;;  %v742_v54 = vpop.f32.mrb[1].mxu1  ;;  %v716_v55 = vpop.f32.mrb[2].mxu0 }
  0xf9   :  { %v743_v56 = vadd.f32 %v742_v54, %v741_v51  ;;  %v744_v57 = vpop.f32.mrb[2].mxu1  ;;  %v717_v58 = vpop.f32.mrb[3].mxu0 }
  0xfa   :  { %v718_v59 = vadd.f32 %v717_v58, %v716_v55  ;;  %v745_v60 = vpop.f32.mrb[3].mxu1 }
  0xfb   :  { %v746_v61 = vadd.f32 %v745_v60, %v744_v57  ;;  %v498_v62 = vadd.f32 %v743_v56, %v715_v53 }
  0xfd   :  { %v501_v63 = vadd.f32 %v746_v61, %v718_v59 }
  0xfe   :  { %v719_v0 = vpop.f32.mrb[4].mxu0 }
  0xff   :  { %v747_v1 = vpop.f32.mrb[4].mxu1  ;;  %v720_v2 = vpop.f32.mrb[5].mxu0 }
 0x100   :  { %v721_v3 = vadd.f32 %v720_v2, %v719_v0  ;;  %v748_v4 = vpop.f32.mrb[5].mxu1  ;;  %v722_v5 = vpop.f32.mrb[6].mxu0 }
 0x101   :  { %v749_v6 = vadd.f32 %v748_v4, %v747_v1  ;;  %v750_v7 = vpop.f32.mrb[6].mxu1  ;;  %v723_v8 = vpop.f32.mrb[7].mxu0 }
 0x102   :  { %v724_v9 = vadd.f32 %v723_v8, %v722_v5  ;;  %v751_v10 = vpop.f32.mrb[7].mxu1 }
 0x103   :  { %v752_v11 = vadd.f32 %v751_v10, %v750_v7  ;;  %v506_v12 = vadd.f32 %v749_v6, %v721_v3 }
 0x105   :  { %v509_v13 = vadd.f32 %v752_v11, %v724_v9 }
 0x116   :  { %v781_v14 = vpop.f32.mrb[8].mxu0 }
 0x117   :  { %v555_v16 = vadd.f32 %v781_v14, %v506_v12  ;;  %v546_v17 = vpop.f32.mrb[9].mxu0 }
 0x118   :  { %v547_v19 = vadd.f32 %v546_v17, %v498_v62  ;;  %v782_v20 = vpop.f32.mrb[10].mxu0 }
 0x119   :  { %v585_v21 = vmul.f32 %v676_v15, %v555_v16  ;;  %v558_v22 = vadd.f32 %v782_v20, %v509_v13  ;;  %v549_v23 = vpop.f32.mrb[11].mxu0 }
 0x11a   :  { %v583_v24 = vmul.f32 %v676_v15, %v547_v19  ;;  %v550_v25 = vadd.f32 %v549_v23, %v501_v63 }
 0x11b   :  { %v596_v26 = vadd.f32 %v677_v18, %v585_v21  ;;  %v586_v27 = vmul.f32 %v676_v15, %v558_v22 }
 0x11c   :  { %v594_v28 = vadd.f32 %v677_v18, %v583_v24  ;;  %v584_v29 = vmul.f32 %v676_v15, %v550_v25 }
 0x11d   :  { %v597_v30 = vadd.f32 %v677_v18, %v586_v27  ;;  %v600_v32 = vmax.f32 %v596_v26, 0.0 }
 0x11e   :  { %v595_v31 = vadd.f32 %v677_v18, %v584_v29  ;;  %v598_v34 = vmax.f32 %v594_v28, 0.0 }
 0x11f   :  { %v601_v33 = vmax.f32 %v597_v30, 0.0 }
 0x120   :  { %v599_v35 = vmax.f32 %v595_v31, 0.0 }
 0x121   :  { %v694_v36 = vpack.c.bf16 %v601_v33, %v600_v32 }
 0x122   :  { %v689_v37 = vpack.c.bf16 %v599_v35, %v598_v34 }
 0x123   :  { %696 = vst [vmem:[%s1028_s4 + $0x8] sm:$0xff] %v694_v36  }
 0x124   :  { %690 = vst [vmem:[%s1028_s4] sm:$0xff] %v689_v37  }

// kernel: _lambda_.30
= control target key start
LH: loop header
LB: loop body
LE: loop exit
PB: predicated region body
PF: predicated region fallthrough
CT: control target
= control target key end

     0   :  { %s1251_s18 = smov 0   ;;  %s1253_s19 = smov 0   ;;  %s1370_s0 = inlined_call_operand.vmem [shape: bf16[32,1152], index: 0, kind: input, shape index: {}]   ;;  %s1371_s1 = inlined_call_operand.vmem [shape: bf16[1152,128], index: 1, kind: input, shape index: {}]   ;;  %s1372_s2 = inlined_call_operand.vmem [shape: f32[1,128], index: 2, kind: input, shape index: {}]   ;;  %s1373_s3 = inlined_call_operand.vmem [shape: f32[1,128], index: 3, kind: input, shape index: {}]   ;;  %s1374_s4 = inlined_call_operand.vmem [shape: bf16[32,128], index: 4, kind: input, shape index: {}]   ;;  %s1375_s5 = inlined_call_operand.vmem [shape: bf16[32,128], index: 5, kind: output, shape index: {}]  }
   0x1   :  { %s1255_s20 = smov 0   ;;  %s1257_s21 = smov 0  }
   0x2   :  { %s1259_s22 = smov 0  }
   0x3 LB: > { %s27_s23 = sadd.s32 1, %s1214_s21  ;;  %p50_p1 = scmp.ne.s32.totalorder %s1206_s19, %s1202_s18  ;;  %s1218_s22 = sphi %s1259_s22, %s15_s22   ;;  %s1214_s21 = sphi %s1257_s21, %s1379_s21   ;;  %s1210_s20 = sphi %s1255_s20, %s1378_s20   ;;  %s1206_s19 = sphi %s1253_s19, %s1377_s19   ;;  %s1202_s18 = sphi %s1251_s18, %s1376_s18  }
   0x4   : > { %p28_p0 = scmp.ge.s32.totalorder %s27_s23, 3  ;;  %p51_p2 = scmp.eq.s32.totalorder %s1218_s22, 0 }
   0x5   : > { %s43_s25 = sadd.s32 1, %s1206_s19  ;;  %p968_p5 = scmp.ge.s32.totalorder %s1218_s22, 3 }
   0x6   : > { %s1381_s23 = smov (%p28_p0, %s27_s23), 0  ;;  %p52_p3 = por %p51_p2, %p50_p1 }
   0x7   : > { %s39_s24 = ssub.s32 %s1214_s21, %s1381_s23  ;;  %236 = sbr.rel (%p968_p5) target bundleno = 23 (0x17), region = 28 }
   0x8   : > { %p41_p4 = scmp.eq.s32.totalorder %s39_s24, 0 }
   0xa   : > { %s1286_s26 = scalar_select %p41_p4, %s1206_s19, %s43_s25  }
   0xe   : > { %239 = sbr.rel (!%p52_p3) target bundleno = 23 (0x17), region = 32  ;;  %s241_s27 = sand.u32 (%p52_p3), 1, %s1206_s19  }
   0xf   : > { %s1022_s28 = smul.u32 (%p52_p3), 12, %s1214_s21 }
  0x10   : > { %s1105_s29 = smul.u32 (%p52_p3), 48, %s241_s27 }
  0x11   : > { %s249_s7 = scalar_lea.vmem (%p52_p3), %s1370_s0, %s1022_s28 }
  0x12   : > { %v264_v0 = vld [vmem:[%s249_s7] sm:$0xff] (%p52_p3)  ;;  %v268_v2 = vld [vmem:[%s249_s7 + $0x48] sm:$0xff] (%p52_p3)  ;;  %s243_s8 = scalar_lea.vmem (%p52_p3), [#allocation3], %s1105_s29  ;;  %v974_v6 = vld [vmem:[%s249_s7 + $0x50] sm:$0xf] (%p52_p3) }
  0x13   : > { %v266_v1 = vld [vmem:[%s249_s7 + $0x24] sm:$0xff] (%p52_p3)  ;;  %265 = vst [vmem:[%s243_s8] sm:$0xff] (%p52_p3), %v264_v0  ;;  %269 = vst [vmem:[%s243_s8 + $0x18] sm:$0xff] (%p52_p3), %v268_v2  ;;  %v270_v3 = vld [vmem:[%s249_s7 + $0x6c] sm:$0xff] (%p52_p3) }
  0x14   : > { %267 = vst [vmem:[%s243_s8 + $0xc] sm:$0xff] (%p52_p3), %v266_v1  ;;  %v970_v4 = vld [vmem:[%s249_s7 + $0x8] sm:$0xf] (%p52_p3)  ;;  %v972_v5 = vld [vmem:[%s249_s7 + $0x2c] sm:$0xf] (%p52_p3)  ;;  %271 = vst [vmem:[%s243_s8 + $0x24] sm:$0xff] (%p52_p3), %v270_v3 }
  0x15   : > { %971 = vst [vmem:[%s243_s8 + $0x8] sm:$0xf] %v970_v4  ;;  %973 = vst [vmem:[%s243_s8 + $0x14] sm:$0xf] %v972_v5  ;;  %v976_v7 = vld [vmem:[%s249_s7 + $0x74] sm:$0xf] }
  0x16   : > { %975 = vst [vmem:[%s243_s8 + $0x20] sm:$0xf] %v974_v6  ;;  %977 = vst [vmem:[%s243_s8 + $0x2c] sm:$0xf] %v976_v7 }
  0x17 PF: > { %p978_p6 = scmp.ge.s32.totalorder %s1218_s22, 1  ;;  %p303_p7 = scmp.lt.s32.totalorder %s1218_s22, 4 }
  0x19   : > { %p304_p8 = pnand %p978_p6, %p303_p7 }
  0x1a   : > { %s310_s9 = sand.u32 (!%p304_p8), 1, %s1202_s18   ;;  %s364_s10 = smul.u32 (!%p304_p8), 48, %s1210_s20 }
  0x1b   : > { %307 = sbr.rel (%p304_p8) target bundleno = 324 (0x144), region = 62  ;;  %p980_p10 = scmp.ne.s32.totalorder (!%p304_p8), %s1210_s20, 0 }
  0x1c   : > { %s1106_s11 = smul.u32 (!%p304_p8), 48, %s310_s9  ;;  %p365_p9 = scmp.lt.s32.totalorder (!%p304_p8), %s364_s10, 143 }
  0x1e   : > { %s1303_s16 = scalar_lea.vmem (!%p304_p8), [#allocation3], %s1106_s11 }
  0x22   : > { %s1383_s10 = smov (!%p365_p9, %s364_s10), 143  ;;  %401 = sbr.rel (%p980_p10) target bundleno = 41 (0x29), region = 70 }
  0x23   : > { %s979_s12 = sshll.u32 %s1383_s10, 2  ;;  %v1220_v8 = vmov (!%p980_p10), 0.0  }
  0x24   : > { %s1301_s15 = scalar_lea.vmem %s1371_s1, %s979_s12  ;;  %402 = vst [vmem:[#allocation2] sm:$0xff] (!%p980_p10), %v1220_v8  ;;  %403 = vst [vmem:[#allocation2 + $0x8] sm:$0xff] (!%p980_p10), %v1220_v8 }
  0x25   : > { %404 = vst [vmem:[#allocation2 + $0x10] sm:$0xff] (!%p980_p10), %v1220_v8  ;;  %405 = vst [vmem:[#allocation2 + $0x18] sm:$0xff] (!%p980_p10), %v1220_v8 }
  0x29 PF: > { %v1148_v9 = vld [vmem:[%s1301_s15 + $0x40] sm:$0xff]   ;;  %v1151_v12 = vld [vmem:[%s1301_s15 + $0x48] sm:$0xff]   ;;  %v1154_v15 = vld [vmem:[%s1301_s15 + $0x50] sm:$0xff]   ;;  %p1011_p11 = scmp.ne.s32.totalorder %s1210_s20, 2 }
  0x2a   : > { %v1149_v10 = vld [vmem:[%s1301_s15] sm:$0xff]   ;;  %1047 = vmatprep.subr.bf16.mxu0 %v1148_v9  ;;  %v1152_v13 = vld [vmem:[%s1301_s15 + $0x8] sm:$0xff]   ;;  %v1155_v16 = vld [vmem:[%s1301_s15 + $0x10] sm:$0xff]  }
  0x2b   : > { %v1150_v11 = vld [vmem:[%s1301_s15 + $0x80] sm:$0xff]   ;;  %1048 = vmatpush3.bf16.msra.mxu0 %v1149_v10  ;;  %v1153_v14 = vld [vmem:[%s1301_s15 + $0x88] sm:$0xff]   ;;  %v1156_v17 = vld [vmem:[%s1301_s15 + $0x90] sm:$0xff]  }
  0x2c   : > { %1085 = vmatprep.subr.bf16.mxu1 %v1150_v11  ;;  %1049 = vmatprep.subr.bf16.mxu0 %v1151_v12  ;;  %v1157_v18 = vld [vmem:[%s1301_s15 + $0x58] sm:$0xff]   ;;  %v1160_v21 = vld [vmem:[%s1301_s15 + $0x60] sm:$0xff]   ;;  %v1163_v24 = vld [vmem:[%s1301_s15 + $0x68] sm:$0xff]  }
  0x2d   : > { %1086 = vmatpush3.bf16.msra.mxu1 %v1150_v11  ;;  %v1158_v19 = vld [vmem:[%s1301_s15 + $0x18] sm:$0xff]   ;;  %v1162_v22 = vld [vmem:[%s1301_s15 + $0xa0] sm:$0xff]   ;;  %v1165_v25 = vld [vmem:[%s1301_s15 + $0xa8] sm:$0xff]  }
  0x2e   : > { %1087 = vmatprep.subr.bf16.mxu1 %v1153_v14  ;;  %v1159_v20 = vld [vmem:[%s1301_s15 + $0x98] sm:$0xff]   ;;  %v1161_v23 = vld [vmem:[%s1301_s15 + $0x20] sm:$0xff]   ;;  %v1164_v26 = vld [vmem:[%s1301_s15 + $0x28] sm:$0xff]  }
  0x2f   : > { %1050 = vmatpush3.bf16.msra.mxu0 %v1152_v13  ;;  %v1166_v27 = vld [vmem:[%s1301_s15 + $0x70] sm:$0xff]   ;;  %v1169_v30 = vld [vmem:[%s1301_s15 + $0x78] sm:$0xff]   ;;  %v406_v45 = vld [vmem:[#allocation2] sm:$0xff] }
  0x30   : > { %1051 = vmatprep.subr.bf16.mxu0 %v1154_v15  ;;  %v1167_v28 = vld [vmem:[%s1301_s15 + $0x30] sm:$0xff]   ;;  %v1171_v31 = vld [vmem:[%s1301_s15 + $0xb8] sm:$0xff]   ;;  %v407_v50 = vld [vmem:[#allocation2 + $0x8] sm:$0xff] }
  0x31   : > { %1088 = vmatpush3.bf16.msra.mxu1 %v1153_v14  ;;  %v1168_v29 = vld [vmem:[%s1301_s15 + $0xb0] sm:$0xff]   ;;  %v1170_v34 = vld [vmem:[%s1301_s15 + $0x38] sm:$0xff]   ;;  %v1012_v5 = vld [vmem:[%s1372_s2] ss:$0 sm:$0xff] (!%p1011_p11) }
  0x32   : > { %1089 = vmatprep.subr.bf16.mxu1 %v1156_v17  ;;  %v1174_v32 = vld [vmem:[%s1303_s16 + $0x4] ss:$12 sps:$4 sm:$0xff]   ;;  %v1175_v33 = vld [vmem:[%s1303_s16 + $0x8] ss:$12 sps:$4 sm:$0xff]   ;;  %v1172_v35 = vld [vmem:[%s1303_s16] ss:$12 sps:$4 sm:$0xff]  }
  0x33   : > { %1052 = vmatpush3.bf16.msra.mxu0 %v1155_v16  ;;  %674 = vmatprep.mubr.bf16.mxu0 %v1174_v32  ;;  %v1177_v36 = vld [vmem:[%s1303_s16 + $0x1c] ss:$12 sps:$4 sm:$0xff]   ;;  %v1176_v37 = vld [vmem:[%s1303_s16 + $0x20] ss:$12 sps:$4 sm:$0xff]   ;;  %v1179_v38 = vld [vmem:[%s1303_s16 + $0x18] ss:$12 sps:$4 sm:$0xff]  }
  0x34   : > { %1053 = vmatprep.subr.bf16.mxu0 %v1157_v18  ;;  %1101 = vmatprep.mubr.bf16.mxu1 %v1175_v33  ;;  %v408_v59 = vld [vmem:[#allocation2 + $0x10] sm:$0xff]  ;;  %v409_v63 = vld [vmem:[#allocation2 + $0x18] sm:$0xff]  ;;  %v1013_v8 = vld [vmem:[%s1373_s3] ss:$0 sm:$0xff] (!%p1011_p11) }
  0x35   : > { %1090 = vmatpush3.bf16.msra.mxu1 %v1156_v17  ;;  %v1028_v9 = vld [vmem:[%s1374_s4] sm:$0xff] (!%p1011_p11)   ;;  %v1045_v14 = vld [vmem:[%s1374_s4 + $0x8] sm:$0xff] (!%p1011_p11)  }
  0x36   : > { %1091 = vmatprep.subr.bf16.mxu1 %v1159_v20  ;;  %v1029_v11 = vunpack.c.l.bf16 (!%p1011_p11), %v1028_v9  ;;  %v1030_v17 = vunpack.c.h.bf16 (!%p1011_p11), %v1028_v9 }
  0x37   : > { %1054 = vmatpush3.bf16.msra.mxu0 %v1158_v19 }
  0x38   : > { %1055 = vmatprep.subr.bf16.mxu0 %v1160_v21 }
  0x39   : > { %1092 = vmatpush3.bf16.msra.mxu1 %v1159_v20  ;;  %v1033_v20 = vunpack.c.l.bf16 (!%p1011_p11), %v1045_v14 }
  0x3a   : > { %1093 = vmatprep.subr.bf16.mxu1 %v1162_v22 }
  0x3b   : > { %1056 = vmatpush3.bf16.msra.mxu0 %v1161_v23 }
  0x3c   : > { %1057 = vmatprep.subr.bf16.mxu0 %v1163_v24  ;;  %v1034_v24 = vunpack.c.h.bf16 (!%p1011_p11), %v1045_v14 }
  0x3d   : > { %1094 = vmatpush3.bf16.msra.mxu1 %v1162_v22 }
  0x3e   : > { %1095 = vmatprep.subr.bf16.mxu1 %v1165_v25 }
  0x3f   : > { %1058 = vmatpush3.bf16.msra.mxu0 %v1164_v26 }
  0x40   : > { %1059 = vmatprep.subr.bf16.mxu0 %v1166_v27 }
  0x41   : > { %1096 = vmatpush3.bf16.msra.mxu1 %v1165_v25 }
  0x42   : > { %1097 = vmatprep.subr.bf16.mxu1 %v1168_v29 }
  0x43   : > { %1060 = vmatpush3.bf16.msra.mxu0 %v1167_v28 }
  0x44   : > { %1061 = vmatprep.subr.bf16.mxu0 %v1169_v30 }
  0x45   : > { %1098 = vmatpush3.bf16.msra.mxu1 %v1168_v29 }
  0x46   : > { %1099 = vmatprep.subr.bf16.mxu1 %v1171_v31 }
  0x47   : > { %1062 = vmatpush3.bf16.msra.mxu0 %v1170_v34 }
  0x49   : > { %1100 = vmatpush3.bf16.msra.mxu1 %v1171_v31 }
  0x4a   : > { %675 = vmatmul.mubr.bf16.vlgmr.msra.gmra.mrb[0].mxu0 %v1172_v35 }
  0x4b   : > { %682 = vmatprep.mubr.bf16.mxu0 %v1177_v36 }
  0x4c   : > { %1102 = vmatmul.mubr.bf16.vlgmr.msra.gmra.mrb[0].mxu1 %v1176_v37 }
  0x52   : > { %683 = vmatmul.mubr.bf16.gmra.mrb[4].mxu0 %v1179_v38 }
 0x11d   : > { %v1063_v39 = vpop.f32.mrb[0].mxu0 }
 0x11e   : > { %v1064_v40 = vpop.f32.mrb[1].mxu0 }
 0x11f   : > { %v1065_v41 = vadd.f32 %v1064_v40, %v1063_v39  ;;  %v1066_v42 = vpop.f32.mrb[2].mxu0  ;;  %v1103_v43 = vpop.f32.mrb[0].mxu1 }
 0x120   : > { %v1067_v44 = vpop.f32.mrb[3].mxu0  ;;  %v725_v46 = vpop.f32.mrb[1].mxu1 }
 0x121   : > { %v1068_v47 = vadd.f32 %v1067_v44, %v1066_v42  ;;  %v726_v48 = vadd.f32 %v1065_v41, %v725_v46  ;;  %v1104_v49 = vpop.f32.mrb[2].mxu1 }
 0x122   : > { %v728_v51 = vpop.f32.mrb[3].mxu1 }
 0x123   : > { %v740_v52 = vadd.f32 %v726_v48, %v406_v45  ;;  %v729_v53 = vadd.f32 %v1068_v47, %v728_v51 }
 0x125   : > { %744 = vst [vmem:[#allocation2] sm:$0xff] %v740_v52  ;;  %v741_v54 = vadd.f32 %v729_v53, %v407_v50  ;;  %v1069_v55 = vpop.f32.mrb[4].mxu0 }
 0x126   : > { %v1070_v56 = vpop.f32.mrb[5].mxu0 }
 0x127   : > { %745 = vst [vmem:[#allocation2 + $0x8] sm:$0xff] %v741_v54  ;;  %v1071_v57 = vadd.f32 %v1070_v56, %v1069_v55  ;;  %v1072_v58 = vpop.f32.mrb[6].mxu0 }
 0x128   : > { %v1073_v60 = vpop.f32.mrb[7].mxu0 }
 0x129   : > { %v734_v61 = vadd.f32 %v1103_v43, %v1071_v57  ;;  %v1074_v62 = vadd.f32 %v1073_v60, %v1072_v58  ;;  %751 = sbr.rel (%p1011_p11) target bundleno = 324 (0x144), region = 74 }
 0x12b   : > { %v742_v0 = vadd.f32 %v734_v61, %v408_v59  ;;  %v737_v1 = vadd.f32 %v1104_v49, %v1074_v62 }
 0x12c   : > { %v752_v3 = vld [vmem:[#allocation2] sm:$0xff] (!%p1011_p11) }
 0x12d   : > { %746 = vst [vmem:[#allocation2 + $0x10] sm:$0xff] %v742_v0  ;;  %v743_v2 = vadd.f32 %v737_v1, %v409_v63  ;;  %v763_v6 = vmul.f32 (!%p1011_p11), %v1012_v5, %v752_v3 }
 0x12e   : > { %v753_v4 = vld [vmem:[#allocation2 + $0x8] sm:$0xff] (!%p1011_p11) }
 0x12f   : > { %747 = vst [vmem:[#allocation2 + $0x18] sm:$0xff] %v743_v2  ;;  %v764_v7 = vmul.f32 (!%p1011_p11), %v1012_v5, %v753_v4  ;;  %v774_v15 = vadd.f32 (!%p1011_p11), %v1013_v8, %v763_v6 }
 0x131   : > { %v775_v16 = vadd.f32 %v1013_v8, %v764_v7  ;;  %v778_v21 = vmax.f32 %v774_v15, 0.0 }
 0x133   : > { %v779_v22 = vmax.f32 %v775_v16, 0.0  ;;  %v790_v26 = vadd.f32 %v1029_v11, %v778_v21 }
 0x134   : > { %v754_v10 = vld [vmem:[#allocation2 + $0x10] sm:$0xff] }
 0x135   : > { %v765_v13 = vmul.f32 %v1012_v5, %v754_v10  ;;  %v791_v27 = vadd.f32 %v1030_v17, %v779_v22  ;;  %v794_v30 = vmax.f32 %v790_v26, 0.0 }
 0x136   : > { %v755_v12 = vld [vmem:[#allocation2 + $0x18] sm:$0xff] }
 0x137   : > { %v766_v18 = vmul.f32 %v1012_v5, %v755_v12  ;;  %v776_v19 = vadd.f32 %v1013_v8, %v765_v13  ;;  %v795_v31 = vmax.f32 %v791_v27, 0.0 }
 0x139   : > { %v777_v23 = vadd.f32 %v1013_v8, %v766_v18  ;;  %v780_v25 = vmax.f32 %v776_v19, 0.0  ;;  %v1038_v34 = vpack.c.bf16 %v795_v31, %v794_v30 }
 0x13b   : > { %v781_v28 = vmax.f32 %v777_v23, 0.0  ;;  %v792_v29 = vadd.f32 %v1033_v20, %v780_v25  ;;  %1039 = vst [vmem:[%s1375_s5] sm:$0xff] %v1038_v34  }
 0x13d   : > { %v793_v32 = vadd.f32 %v1034_v24, %v781_v28  ;;  %v796_v33 = vmax.f32 %v792_v29, 0.0 }
 0x13f   : > { %v797_v35 = vmax.f32 %v793_v32, 0.0 }
 0x141   : > { %v1043_v36 = vpack.c.bf16 %v797_v35, %v796_v33 }
 0x143   : > { %1046 = vst [vmem:[%s1375_s5 + $0x8] sm:$0xff] %v1043_v36  }
 0x144 PF: > { %s15_s22 = sadd.s32 1, %s1218_s22   ;;  %s1376_s18 = smov %s1206_s19 }
 0x145   : > { %p12_p12 = scmp.ge.s32.totalorder %s15_s22, 5   ;;  %s1377_s19 = smov %s1286_s26 }
 0x146   : > { %s1378_s20 = smov %s1214_s21  ;;  %s1379_s21 = smov %s1381_s23 }
 0x147   :  { %14 = sbr.rel (!%p12_p12) target bundleno = 3 (0x3), region = 127 }

// kernel: _lambda_.31
= control target key start
LH: loop header
LB: loop body
LE: loop exit
PB: predicated region body
PF: predicated region fallthrough
CT: control target
= control target key end

     0   :  { %s1142_s15 = smov 0   ;;  %s1144_s16 = smov 0   ;;  %s1255_s0 = inlined_call_operand.vmem [shape: bf16[32,1152], index: 0, kind: input, shape index: {}]   ;;  %s1256_s1 = inlined_call_operand.vmem [shape: bf16[1152,128], index: 1, kind: input, shape index: {}]   ;;  %s1257_s2 = inlined_call_operand.vmem [shape: f32[1,128], index: 2, kind: input, shape index: {}]   ;;  %s1258_s3 = inlined_call_operand.vmem [shape: f32[1,128], index: 3, kind: input, shape index: {}]   ;;  %s1259_s4 = inlined_call_operand.vmem [shape: bf16[32,128], index: 4, kind: output, shape index: {}]  }
   0x1   :  { %s1146_s17 = smov 0   ;;  %s1148_s18 = smov 0  }
   0x2   :  { %s1150_s19 = smov 0  }
   0x3 LB: > { %s26_s20 = sadd.s32 1, %s1110_s18  ;;  %p49_p1 = scmp.ne.s32.totalorder %s1102_s16, %s1098_s15  ;;  %s1114_s19 = sphi %s1150_s19, %s14_s19   ;;  %s1110_s18 = sphi %s1148_s18, %s1263_s18   ;;  %s1106_s17 = sphi %s1146_s17, %s1262_s17   ;;  %s1102_s16 = sphi %s1144_s16, %s1261_s16   ;;  %s1098_s15 = sphi %s1142_s15, %s1260_s15  }
   0x4   : > { %p27_p0 = scmp.ge.s32.totalorder %s26_s20, 3  ;;  %p50_p2 = scmp.eq.s32.totalorder %s1114_s19, 0 }
   0x5   : > { %s42_s22 = sadd.s32 1, %s1102_s16  ;;  %p873_p5 = scmp.ge.s32.totalorder %s1114_s19, 3 }
   0x6   : > { %s1265_s20 = smov (%p27_p0, %s26_s20), 0  ;;  %p51_p3 = por %p50_p2, %p49_p1 }
   0x7   : > { %s38_s21 = ssub.s32 %s1110_s18, %s1265_s20  ;;  %195 = sbr.rel (%p873_p5) target bundleno = 23 (0x17), region = 24 }
   0x8   : > { %p40_p4 = scmp.eq.s32.totalorder %s38_s21, 0 }
   0xa   : > { %s1177_s23 = scalar_select %p40_p4, %s1102_s16, %s42_s22  }
   0xe   : > { %198 = sbr.rel (!%p51_p3) target bundleno = 23 (0x17), region = 28  ;;  %s200_s24 = sand.u32 (%p51_p3), 1, %s1102_s16  }
   0xf   : > { %s927_s25 = smul.u32 (%p51_p3), 12, %s1110_s18 }
  0x10   : > { %s1001_s26 = smul.u32 (%p51_p3), 48, %s200_s24 }
  0x11   : > { %s208_s29 = scalar_lea.vmem (%p51_p3), %s1255_s0, %s927_s25 }
  0x12   : > { %v223_v0 = vld [vmem:[%s208_s29] sm:$0xff] (%p51_p3)  ;;  %v227_v2 = vld [vmem:[%s208_s29 + $0x48] sm:$0xff] (%p51_p3)  ;;  %s202_s30 = scalar_lea.vmem (%p51_p3), [#allocation3], %s1001_s26  ;;  %v879_v6 = vld [vmem:[%s208_s29 + $0x50] sm:$0xf] (%p51_p3) }
  0x13   : > { %v225_v1 = vld [vmem:[%s208_s29 + $0x24] sm:$0xff] (%p51_p3)  ;;  %224 = vst [vmem:[%s202_s30] sm:$0xff] (%p51_p3), %v223_v0  ;;  %228 = vst [vmem:[%s202_s30 + $0x18] sm:$0xff] (%p51_p3), %v227_v2  ;;  %v229_v3 = vld [vmem:[%s208_s29 + $0x6c] sm:$0xff] (%p51_p3) }
  0x14   : > { %226 = vst [vmem:[%s202_s30 + $0xc] sm:$0xff] (%p51_p3), %v225_v1  ;;  %v875_v4 = vld [vmem:[%s208_s29 + $0x8] sm:$0xf] (%p51_p3)  ;;  %v877_v5 = vld [vmem:[%s208_s29 + $0x2c] sm:$0xf] (%p51_p3)  ;;  %230 = vst [vmem:[%s202_s30 + $0x24] sm:$0xff] (%p51_p3), %v229_v3 }
  0x15   : > { %876 = vst [vmem:[%s202_s30 + $0x8] sm:$0xf] %v875_v4  ;;  %878 = vst [vmem:[%s202_s30 + $0x14] sm:$0xf] %v877_v5  ;;  %v881_v7 = vld [vmem:[%s208_s29 + $0x74] sm:$0xf] }
  0x16   : > { %880 = vst [vmem:[%s202_s30 + $0x20] sm:$0xf] %v879_v6  ;;  %882 = vst [vmem:[%s202_s30 + $0x2c] sm:$0xf] %v881_v7 }
  0x17 PF: > { %p883_p6 = scmp.ge.s32.totalorder %s1114_s19, 1  ;;  %p262_p7 = scmp.lt.s32.totalorder %s1114_s19, 4 }
  0x19   : > { %p263_p8 = pnand %p883_p6, %p262_p7 }
  0x1a   : > { %s269_s5 = sand.u32 (!%p263_p8), 1, %s1098_s15   ;;  %s313_s6 = smul.u32 (!%p263_p8), 48, %s1106_s17 }
  0x1b   : > { %266 = sbr.rel (%p263_p8) target bundleno = 320 (0x140), region = 58  ;;  %p885_p10 = scmp.ne.s32.totalorder (!%p263_p8), %s1106_s17, 0 }
  0x1c   : > { %s1002_s7 = smul.u32 (!%p263_p8), 48, %s269_s5  ;;  %p314_p9 = scmp.lt.s32.totalorder (!%p263_p8), %s313_s6, 143 }
  0x1e   : > { %s1194_s12 = scalar_lea.vmem (!%p263_p8), [#allocation3], %s1002_s7 }
  0x22   : > { %s1267_s6 = smov (!%p314_p9, %s313_s6), 143  ;;  %341 = sbr.rel (%p885_p10) target bundleno = 41 (0x29), region = 66 }
  0x23   : > { %s884_s8 = sshll.u32 %s1267_s6, 2  ;;  %v1116_v8 = vmov (!%p885_p10), 0.0  }
  0x24   : > { %s1192_s11 = scalar_lea.vmem %s1256_s1, %s884_s8  ;;  %342 = vst [vmem:[#allocation2] sm:$0xff] (!%p885_p10), %v1116_v8  ;;  %343 = vst [vmem:[#allocation2 + $0x8] sm:$0xff] (!%p885_p10), %v1116_v8 }
  0x25   : > { %344 = vst [vmem:[#allocation2 + $0x10] sm:$0xff] (!%p885_p10), %v1116_v8  ;;  %345 = vst [vmem:[#allocation2 + $0x18] sm:$0xff] (!%p885_p10), %v1116_v8 }
  0x29 PF: > { %v1044_v9 = vld [vmem:[%s1192_s11 + $0x40] sm:$0xff]   ;;  %v1047_v12 = vld [vmem:[%s1192_s11 + $0x48] sm:$0xff]   ;;  %v1050_v15 = vld [vmem:[%s1192_s11 + $0x50] sm:$0xff]   ;;  %p916_p11 = scmp.ne.s32.totalorder %s1106_s17, 2 }
  0x2a   : > { %v1045_v10 = vld [vmem:[%s1192_s11] sm:$0xff]   ;;  %943 = vmatprep.subr.bf16.mxu0 %v1044_v9  ;;  %v1048_v13 = vld [vmem:[%s1192_s11 + $0x8] sm:$0xff]   ;;  %v1051_v16 = vld [vmem:[%s1192_s11 + $0x10] sm:$0xff]  }
  0x2b   : > { %v1046_v11 = vld [vmem:[%s1192_s11 + $0x80] sm:$0xff]   ;;  %944 = vmatpush3.bf16.msra.mxu0 %v1045_v10  ;;  %v1049_v14 = vld [vmem:[%s1192_s11 + $0x88] sm:$0xff]   ;;  %v1052_v17 = vld [vmem:[%s1192_s11 + $0x90] sm:$0xff]  }
  0x2c   : > { %981 = vmatprep.subr.bf16.mxu1 %v1046_v11  ;;  %945 = vmatprep.subr.bf16.mxu0 %v1047_v12  ;;  %v1053_v18 = vld [vmem:[%s1192_s11 + $0x58] sm:$0xff]   ;;  %v1056_v21 = vld [vmem:[%s1192_s11 + $0x60] sm:$0xff]   ;;  %v1059_v24 = vld [vmem:[%s1192_s11 + $0x68] sm:$0xff]  }
  0x2d   : > { %982 = vmatpush3.bf16.msra.mxu1 %v1046_v11  ;;  %v1054_v19 = vld [vmem:[%s1192_s11 + $0x18] sm:$0xff]   ;;  %v1058_v22 = vld [vmem:[%s1192_s11 + $0xa0] sm:$0xff]   ;;  %v1061_v25 = vld [vmem:[%s1192_s11 + $0xa8] sm:$0xff]  }
  0x2e   : > { %983 = vmatprep.subr.bf16.mxu1 %v1049_v14  ;;  %v1055_v20 = vld [vmem:[%s1192_s11 + $0x98] sm:$0xff]   ;;  %v1057_v23 = vld [vmem:[%s1192_s11 + $0x20] sm:$0xff]   ;;  %v1060_v26 = vld [vmem:[%s1192_s11 + $0x28] sm:$0xff]  }
  0x2f   : > { %946 = vmatpush3.bf16.msra.mxu0 %v1048_v13  ;;  %v1062_v27 = vld [vmem:[%s1192_s11 + $0x70] sm:$0xff]   ;;  %v1065_v30 = vld [vmem:[%s1192_s11 + $0x78] sm:$0xff]   ;;  %v346_v45 = vld [vmem:[#allocation2] sm:$0xff] }
  0x30   : > { %947 = vmatprep.subr.bf16.mxu0 %v1050_v15  ;;  %v1063_v28 = vld [vmem:[%s1192_s11 + $0x30] sm:$0xff]   ;;  %v1067_v31 = vld [vmem:[%s1192_s11 + $0xb8] sm:$0xff]   ;;  %v347_v50 = vld [vmem:[#allocation2 + $0x8] sm:$0xff] }
  0x31   : > { %984 = vmatpush3.bf16.msra.mxu1 %v1049_v14  ;;  %v1064_v29 = vld [vmem:[%s1192_s11 + $0xb0] sm:$0xff]   ;;  %v1066_v34 = vld [vmem:[%s1192_s11 + $0x38] sm:$0xff]   ;;  %v917_v5 = vld [vmem:[%s1257_s2] ss:$0 sm:$0xff] (!%p916_p11) }
  0x32   : > { %985 = vmatprep.subr.bf16.mxu1 %v1052_v17  ;;  %v1070_v32 = vld [vmem:[%s1194_s12 + $0x4] ss:$12 sps:$4 sm:$0xff]   ;;  %v1071_v33 = vld [vmem:[%s1194_s12 + $0x8] ss:$12 sps:$4 sm:$0xff]   ;;  %v1068_v35 = vld [vmem:[%s1194_s12] ss:$12 sps:$4 sm:$0xff]  }
  0x33   : > { %948 = vmatpush3.bf16.msra.mxu0 %v1051_v16  ;;  %614 = vmatprep.mubr.bf16.mxu0 %v1070_v32  ;;  %v1073_v36 = vld [vmem:[%s1194_s12 + $0x1c] ss:$12 sps:$4 sm:$0xff]   ;;  %v1072_v37 = vld [vmem:[%s1194_s12 + $0x20] ss:$12 sps:$4 sm:$0xff]   ;;  %v1075_v38 = vld [vmem:[%s1194_s12 + $0x18] ss:$12 sps:$4 sm:$0xff]  }
  0x34   : > { %949 = vmatprep.subr.bf16.mxu0 %v1053_v18  ;;  %997 = vmatprep.mubr.bf16.mxu1 %v1071_v33  ;;  %v348_v59 = vld [vmem:[#allocation2 + $0x10] sm:$0xff]  ;;  %v349_v63 = vld [vmem:[#allocation2 + $0x18] sm:$0xff]  ;;  %v918_v8 = vld [vmem:[%s1258_s3] ss:$0 sm:$0xff] (!%p916_p11) }
  0x35   : > { %986 = vmatpush3.bf16.msra.mxu1 %v1052_v17 }
  0x36   : > { %987 = vmatprep.subr.bf16.mxu1 %v1055_v20 }
  0x37   : > { %950 = vmatpush3.bf16.msra.mxu0 %v1054_v19 }
  0x38   : > { %951 = vmatprep.subr.bf16.mxu0 %v1056_v21 }
  0x39   : > { %988 = vmatpush3.bf16.msra.mxu1 %v1055_v20 }
  0x3a   : > { %989 = vmatprep.subr.bf16.mxu1 %v1058_v22 }
  0x3b   : > { %952 = vmatpush3.bf16.msra.mxu0 %v1057_v23 }
  0x3c   : > { %953 = vmatprep.subr.bf16.mxu0 %v1059_v24 }
  0x3d   : > { %990 = vmatpush3.bf16.msra.mxu1 %v1058_v22 }
  0x3e   : > { %991 = vmatprep.subr.bf16.mxu1 %v1061_v25 }
  0x3f   : > { %954 = vmatpush3.bf16.msra.mxu0 %v1060_v26 }
  0x40   : > { %955 = vmatprep.subr.bf16.mxu0 %v1062_v27 }
  0x41   : > { %992 = vmatpush3.bf16.msra.mxu1 %v1061_v25 }
  0x42   : > { %993 = vmatprep.subr.bf16.mxu1 %v1064_v29 }
  0x43   : > { %956 = vmatpush3.bf16.msra.mxu0 %v1063_v28 }
  0x44   : > { %957 = vmatprep.subr.bf16.mxu0 %v1065_v30 }
  0x45   : > { %994 = vmatpush3.bf16.msra.mxu1 %v1064_v29 }
  0x46   : > { %995 = vmatprep.subr.bf16.mxu1 %v1067_v31 }
  0x47   : > { %958 = vmatpush3.bf16.msra.mxu0 %v1066_v34 }
  0x49   : > { %996 = vmatpush3.bf16.msra.mxu1 %v1067_v31 }
  0x4a   : > { %615 = vmatmul.mubr.bf16.vlgmr.msra.gmra.mrb[0].mxu0 %v1068_v35 }
  0x4b   : > { %622 = vmatprep.mubr.bf16.mxu0 %v1073_v36 }
  0x4c   : > { %998 = vmatmul.mubr.bf16.vlgmr.msra.gmra.mrb[0].mxu1 %v1072_v37 }
  0x52   : > { %623 = vmatmul.mubr.bf16.gmra.mrb[4].mxu0 %v1075_v38 }
 0x11d   : > { %v959_v39 = vpop.f32.mrb[0].mxu0 }
 0x11e   : > { %v960_v40 = vpop.f32.mrb[1].mxu0 }
 0x11f   : > { %v961_v41 = vadd.f32 %v960_v40, %v959_v39  ;;  %v962_v42 = vpop.f32.mrb[2].mxu0  ;;  %v999_v43 = vpop.f32.mrb[0].mxu1 }
 0x120   : > { %v963_v44 = vpop.f32.mrb[3].mxu0  ;;  %v665_v46 = vpop.f32.mrb[1].mxu1 }
 0x121   : > { %v964_v47 = vadd.f32 %v963_v44, %v962_v42  ;;  %v666_v48 = vadd.f32 %v961_v41, %v665_v46  ;;  %v1000_v49 = vpop.f32.mrb[2].mxu1 }
 0x122   : > { %v668_v51 = vpop.f32.mrb[3].mxu1 }
 0x123   : > { %v680_v52 = vadd.f32 %v666_v48, %v346_v45  ;;  %v669_v53 = vadd.f32 %v964_v47, %v668_v51 }
 0x125   : > { %684 = vst [vmem:[#allocation2] sm:$0xff] %v680_v52  ;;  %v681_v54 = vadd.f32 %v669_v53, %v347_v50  ;;  %v965_v55 = vpop.f32.mrb[4].mxu0 }
 0x126   : > { %v966_v56 = vpop.f32.mrb[5].mxu0 }
 0x127   : > { %685 = vst [vmem:[#allocation2 + $0x8] sm:$0xff] %v681_v54  ;;  %v967_v57 = vadd.f32 %v966_v56, %v965_v55  ;;  %v968_v58 = vpop.f32.mrb[6].mxu0 }
 0x128   : > { %v969_v60 = vpop.f32.mrb[7].mxu0 }
 0x129   : > { %v674_v61 = vadd.f32 %v999_v43, %v967_v57  ;;  %v970_v62 = vadd.f32 %v969_v60, %v968_v58  ;;  %691 = sbr.rel (%p916_p11) target bundleno = 320 (0x140), region = 70 }
 0x12b   : > { %v682_v0 = vadd.f32 %v674_v61, %v348_v59  ;;  %v677_v1 = vadd.f32 %v1000_v49, %v970_v62 }
 0x12c   : > { %v692_v3 = vld [vmem:[#allocation2] sm:$0xff] (!%p916_p11) }
 0x12d   : > { %686 = vst [vmem:[#allocation2 + $0x10] sm:$0xff] %v682_v0  ;;  %v683_v2 = vadd.f32 %v677_v1, %v349_v63  ;;  %v703_v6 = vmul.f32 (!%p916_p11), %v917_v5, %v692_v3 }
 0x12e   : > { %v693_v4 = vld [vmem:[#allocation2 + $0x8] sm:$0xff] (!%p916_p11) }
 0x12f   : > { %687 = vst [vmem:[#allocation2 + $0x18] sm:$0xff] %v683_v2  ;;  %v704_v7 = vmul.f32 (!%p916_p11), %v917_v5, %v693_v4  ;;  %v714_v13 = vadd.f32 (!%p916_p11), %v918_v8, %v703_v6 }
 0x131   : > { %v715_v14 = vadd.f32 %v918_v8, %v704_v7  ;;  %v718_v17 = vmax.f32 %v714_v13, 0.0 }
 0x133   : > { %v719_v18 = vmax.f32 %v715_v14, 0.0 }
 0x134   : > { %v694_v9 = vld [vmem:[#allocation2 + $0x10] sm:$0xff] }
 0x135   : > { %v705_v11 = vmul.f32 %v917_v5, %v694_v9  ;;  %v935_v21 = vpack.c.bf16 %v719_v18, %v718_v17 }
 0x136   : > { %v695_v10 = vld [vmem:[#allocation2 + $0x18] sm:$0xff] }
 0x137   : > { %v706_v12 = vmul.f32 %v917_v5, %v695_v10  ;;  %v716_v15 = vadd.f32 %v918_v8, %v705_v11  ;;  %936 = vst [vmem:[%s1259_s4] sm:$0xff] %v935_v21  }
 0x139   : > { %v717_v16 = vadd.f32 %v918_v8, %v706_v12  ;;  %v720_v19 = vmax.f32 %v716_v15, 0.0 }
 0x13b   : > { %v721_v20 = vmax.f32 %v717_v16, 0.0 }
 0x13d   : > { %v940_v22 = vpack.c.bf16 %v721_v20, %v720_v19 }
 0x13f   : > { %942 = vst [vmem:[%s1259_s4 + $0x8] sm:$0xff] %v940_v22  }
 0x140 PF: > { %s14_s19 = sadd.s32 1, %s1114_s19   ;;  %s1260_s15 = smov %s1102_s16 }
 0x141   : > { %p11_p12 = scmp.ge.s32.totalorder %s14_s19, 5   ;;  %s1261_s16 = smov %s1177_s23 }
 0x142   : > { %s1262_s17 = smov %s1110_s18  ;;  %s1263_s18 = smov %s1265_s20 }
 0x143   :  { %13 = sbr.rel (!%p11_p12) target bundleno = 3 (0x3), region = 120 }

// kernel: _lambda_.34
= control target key start
LH: loop header
LB: loop body
LE: loop exit
PB: predicated region body
PF: predicated region fallthrough
CT: control target
= control target key end

     0   :  { %s1114_s15 = smov 0   ;;  %s1116_s16 = smov 0   ;;  %s1216_s0 = inlined_call_operand.vmem [shape: bf16[8,1152], index: 0, kind: input, shape index: {}]   ;;  %s1217_s1 = inlined_call_operand.vmem [shape: bf16[1152,256], index: 1, kind: input, shape index: {}]   ;;  %s1218_s2 = inlined_call_operand.vmem [shape: f32[1,256], index: 2, kind: input, shape index: {}]   ;;  %s1219_s3 = inlined_call_operand.vmem [shape: f32[1,256], index: 3, kind: input, shape index: {}]   ;;  %s1220_s4 = inlined_call_operand.vmem [shape: bf16[8,256], index: 4, kind: output, shape index: {}]  }
   0x1   :  { %s1118_s17 = smov 0  }
   0x2 LB: > { %s26_s18 = sadd.s32 1, %s1081_s16  ;;  %p898_p0 = scmp.ge.s32.totalorder %s1085_s17, 1  ;;  %s1085_s17 = sphi %s1118_s17, %s14_s17   ;;  %s1081_s16 = sphi %s1116_s16, %s1222_s16   ;;  %s1077_s15 = sphi %s1114_s15, %s1221_s15  }
   0x3   : > { %p27_p1 = scmp.ge.s32.totalorder %s26_s18, 3  ;;  %p229_p2 = scmp.lt.s32.totalorder %s1085_s17, 4 }
   0x5   : > { %s1224_s18 = smov (%p27_p1, %s26_s18), 0  ;;  %p230_p3 = pnand %p898_p0, %p229_p2 }
   0x6   : > { %s281_s19 = smul.u32 (!%p230_p3), 3, %s1077_s15  ;;  %p902_p6 = scmp.ne.s32.totalorder (!%p230_p3), %s1077_s15, 0 }
   0x7   : > { %233 = sbr.rel (%p230_p3) target bundleno = 323 (0x143), region = 36 }
   0x8   : > { %s291_s20 = smul.u32 (!%p230_p3), 48, %s1077_s15  ;;  %p284_p4 = scmp.lt.s32.totalorder (!%p230_p3), %s281_s19, 8 }
   0xa   : > { %p293_p5 = scmp.lt.s32.totalorder (!%p230_p3), %s291_s20, 143 }
   0xe   : > { %s1226_s19 = smov (!%p284_p4, %s281_s19), 8  ;;  %s1228_s20 = smov (!%p293_p5, %s291_s20), 143 }
   0xf   : > { %s899_s21 = sshll.u32 %s1226_s19, 2  ;;  %s960_s25 = sshll.u32 %s1228_s20, 3  ;;  %v1087_v0 = vmov (!%p902_p6), 0.0  }
  0x10   : > { %s1139_s24 = scalar_lea.vmem %s1216_s0, %s899_s21  ;;  %s1144_s28 = scalar_lea.vmem %s1217_s1, %s960_s25  ;;  %328 = vst [vmem:[#allocation2] sm:$0xff] (!%p902_p6), %v1087_v0  ;;  %329 = vst [vmem:[#allocation2 + $0x8] sm:$0xff] (!%p902_p6), %v1087_v0 }
  0x11   : > { %327 = sbr.rel (%p902_p6) target bundleno = 24 (0x18), region = 40 }
  0x18 PF: > { %v988_v1 = vld [vmem:[%s1144_s28 + $0x4] ss:$8 sps:$4 sm:$0xff]   ;;  %v990_v2 = vld [vmem:[%s1144_s28] ss:$8 sps:$4 sm:$0xff]   ;;  %v1088_v3 = vmov 0   ;;  %p954_p7 = scmp.ne.s32.totalorder %s1077_s15, 2 }
  0x19   : > { %706 = vmatprep.mubr.bf16.mxu1 %v1088_v3  ;;  %633 = vmatprep.subr.bf16.mxu0 %v988_v1  ;;  %v991_v4 = vld [vmem:[%s1144_s28 + $0x14] ss:$8 sps:$4 sm:$0xff]   ;;  %v993_v5 = vld [vmem:[%s1144_s28 + $0x10] ss:$8 sps:$4 sm:$0xff]   ;;  %v994_v6 = vld [vmem:[%s1144_s28 + $0x24] ss:$8 sps:$4 sm:$0xff]  }
  0x1a   : > { %634 = vmatpush1.bf16.msra.mxu0 %v990_v2  ;;  %v996_v7 = vld [vmem:[%s1144_s28 + $0x20] ss:$8 sps:$4 sm:$0xff]   ;;  %v997_v8 = vld [vmem:[%s1144_s28 + $0x34] ss:$8 sps:$4 sm:$0xff]   ;;  %v999_v9 = vld [vmem:[%s1144_s28 + $0x30] ss:$8 sps:$4 sm:$0xff]  }
  0x1b   : > { %635 = vmatprep.subr.bf16.mxu0 %v991_v4  ;;  %v1012_v10 = vld [vmem:[%s1144_s28 + $0x104] ss:$8 sps:$4 sm:$0xff]   ;;  %v1014_v11 = vld [vmem:[%s1144_s28 + $0x100] ss:$8 sps:$4 sm:$0xff]   ;;  %v1018_v13 = vld [vmem:[%s1144_s28 + $0x114] ss:$8 sps:$4 sm:$0xff]   ;;  %v727_v4 = vlaneseq (!%p954_p7) }
  0x1c   : > { %v1000_v12 = vld [vmem:[%s1144_s28 + $0x44] ss:$8 sps:$4 sm:$0xff]   ;;  %674 = vmatprep.subr.bf16.mxu1 %v1012_v10  ;;  %v1020_v14 = vld [vmem:[%s1144_s28 + $0x110] ss:$8 sps:$4 sm:$0xff]   ;;  %v1002_v15 = vld [vmem:[%s1144_s28 + $0x40] ss:$8 sps:$4 sm:$0xff]  }
  0x1d   : > { %675 = vmatpush1.bf16.msra.mxu1 %v1014_v11  ;;  %v1003_v16 = vld [vmem:[%s1144_s28 + $0x54] ss:$8 sps:$4 sm:$0xff]   ;;  %v1024_v17 = vld [vmem:[%s1144_s28 + $0x124] ss:$8 sps:$4 sm:$0xff]   ;;  %v1026_v18 = vld [vmem:[%s1144_s28 + $0x120] ss:$8 sps:$4 sm:$0xff]  }
  0x1e   : > { %636 = vmatpush1.bf16.msra.mxu0 %v993_v5  ;;  %676 = vmatprep.subr.bf16.mxu1 %v1018_v13  ;;  %v1005_v19 = vld [vmem:[%s1144_s28 + $0x50] ss:$8 sps:$4 sm:$0xff]   ;;  %v1030_v20 = vld [vmem:[%s1144_s28 + $0x134] ss:$8 sps:$4 sm:$0xff]   ;;  %v1006_v21 = vld [vmem:[%s1144_s28 + $0x64] ss:$8 sps:$4 sm:$0xff]  }
  0x1f   : > { %637 = vmatprep.subr.bf16.mxu0 %v994_v6  ;;  %v1032_v22 = vld [vmem:[%s1144_s28 + $0x130] ss:$8 sps:$4 sm:$0xff]   ;;  %v1008_v23 = vld [vmem:[%s1144_s28 + $0x60] ss:$8 sps:$4 sm:$0xff]   ;;  %v1036_v24 = vld [vmem:[%s1144_s28 + $0x144] ss:$8 sps:$4 sm:$0xff]  }
  0x20   : > { %v1009_v25 = vld [vmem:[%s1144_s28 + $0x74] ss:$8 sps:$4 sm:$0xff]   ;;  %v1038_v26 = vld [vmem:[%s1144_s28 + $0x140] ss:$8 sps:$4 sm:$0xff]   ;;  %v1011_v27 = vld [vmem:[%s1144_s28 + $0x70] ss:$8 sps:$4 sm:$0xff]  }
  0x21   : > { %677 = vmatpush1.bf16.msra.mxu1 %v1020_v14  ;;  %v1042_v28 = vld [vmem:[%s1144_s28 + $0x154] ss:$8 sps:$4 sm:$0xff]   ;;  %v1015_v29 = vld [vmem:[%s1144_s28 + $0x84] ss:$8 sps:$4 sm:$0xff]   ;;  %v1044_v30 = vld [vmem:[%s1144_s28 + $0x150] ss:$8 sps:$4 sm:$0xff]  }
  0x22   : > { %638 = vmatpush1.bf16.msra.mxu0 %v996_v7  ;;  %678 = vmatprep.subr.bf16.mxu1 %v1024_v17  ;;  %v1017_v31 = vld [vmem:[%s1144_s28 + $0x80] ss:$8 sps:$4 sm:$0xff]   ;;  %v1048_v32 = vld [vmem:[%s1144_s28 + $0x164] ss:$8 sps:$4 sm:$0xff]   ;;  %v1021_v33 = vld [vmem:[%s1144_s28 + $0x94] ss:$8 sps:$4 sm:$0xff]  }
  0x23   : > { %639 = vmatprep.subr.bf16.mxu0 %v997_v8  ;;  %v332_v34 = vld [vmem:[%s1139_s24] sm:$0xff]  ;;  %v1023_v37 = vld [vmem:[%s1144_s28 + $0x90] ss:$8 sps:$4 sm:$0xff]   ;;  %v1054_v38 = vld [vmem:[%s1144_s28 + $0x174] ss:$8 sps:$4 sm:$0xff]   ;;  %v728_v5 = vshrl.u32 (!%p954_p7), %v727_v4, 7 }
  0x24   : > { %v904_v35 = vcombine.high %v332_v34, %v332_v34  ;;  %v1050_v36 = vld [vmem:[%s1144_s28 + $0x160] ss:$8 sps:$4 sm:$0xff]   ;;  %v1027_v39 = vld [vmem:[%s1144_s28 + $0xa4] ss:$8 sps:$4 sm:$0xff]   ;;  %v1056_v40 = vld [vmem:[%s1144_s28 + $0x170] ss:$8 sps:$4 sm:$0xff]   ;;  %v903_v53 = vcombine.low %v332_v34, %v332_v34 }
  0x25   : > { %679 = vmatpush1.bf16.msra.mxu1 %v1026_v18  ;;  %v1029_v41 = vld [vmem:[%s1144_s28 + $0xa0] ss:$8 sps:$4 sm:$0xff]   ;;  %v1033_v42 = vld [vmem:[%s1144_s28 + $0xb4] ss:$8 sps:$4 sm:$0xff]   ;;  %v1035_v44 = vld [vmem:[%s1144_s28 + $0xb0] ss:$8 sps:$4 sm:$0xff]  }
  0x26   : > { %640 = vmatpush1.bf16.msra.mxu0 %v999_v9  ;;  %680 = vmatprep.subr.bf16.mxu1 %v1030_v20  ;;  %v1060_v43 = vld [vmem:[%s1139_s24 + $0x8] ss:$0 sps:$4 sm:$0xff]   ;;  %v1039_v45 = vld [vmem:[%s1144_s28 + $0xc4] ss:$8 sps:$4 sm:$0xff]   ;;  %v1045_v47 = vld [vmem:[%s1144_s28 + $0xd4] ss:$8 sps:$4 sm:$0xff]  }
  0x27   : > { %641 = vmatprep.subr.bf16.mxu0 %v1000_v12  ;;  %665 = vmatprep.mubr.bf16.mxu0 %v904_v35  ;;  %v1041_v46 = vld [vmem:[%s1144_s28 + $0xc0] ss:$8 sps:$4 sm:$0xff]   ;;  %v1047_v48 = vld [vmem:[%s1144_s28 + $0xd0] ss:$8 sps:$4 sm:$0xff]   ;;  %v1051_v49 = vld [vmem:[%s1144_s28 + $0xe4] ss:$8 sps:$4 sm:$0xff]  }
  0x28   : > { %v1053_v50 = vld [vmem:[%s1144_s28 + $0xe0] ss:$8 sps:$4 sm:$0xff]   ;;  %v1057_v51 = vld [vmem:[%s1144_s28 + $0xf4] ss:$8 sps:$4 sm:$0xff]   ;;  %v1059_v52 = vld [vmem:[%s1144_s28 + $0xf0] ss:$8 sps:$4 sm:$0xff]  }
  0x29   : > { %681 = vmatpush1.bf16.msra.mxu1 %v1032_v22  ;;  %v330_v58 = vld [vmem:[#allocation2] sm:$0xff]  ;;  %v331_v61 = vld [vmem:[#allocation2 + $0x8] sm:$0xff]  ;;  %v729_v8 = vsub.s32 (!%p954_p7), 0, %v728_v5  ;;  %v733_v9 = vsub.s32 (!%p954_p7), 1, %v728_v5 }
  0x2a   : > { %642 = vmatpush1.bf16.msra.mxu0 %v1002_v15  ;;  %682 = vmatprep.subr.bf16.mxu1 %v1036_v24  ;;  %v725_v6 = vld [vmem:[%s1218_s2] sm:$0x3] (!%p954_p7) }
  0x2b   : > { %643 = vmatprep.subr.bf16.mxu0 %v1003_v16  ;;  %v739_v7 = vld [vmem:[%s1219_s3] sm:$0x3] (!%p954_p7)  ;;  %v730_v12 = vrot.slane (!%p954_p7), %v725_v6, %v729_v8  ;;  %v734_v13 = vrot.slane (!%p954_p7), %v725_v6, %v733_v9 }
  0x2c   : > { %v744_v14 = vrot.slane (!%p954_p7), %v739_v7, %v729_v8  ;;  %v748_v15 = vrot.slane (!%p954_p7), %v739_v7, %v733_v9 }
  0x2d   : > { %683 = vmatpush1.bf16.msra.mxu1 %v1038_v26 }
  0x2e   : > { %644 = vmatpush1.bf16.msra.mxu0 %v1005_v19  ;;  %684 = vmatprep.subr.bf16.mxu1 %v1042_v28 }
  0x2f   : > { %645 = vmatprep.subr.bf16.mxu0 %v1006_v21 }
  0x31   : > { %685 = vmatpush1.bf16.msra.mxu1 %v1044_v30 }
  0x32   : > { %646 = vmatpush1.bf16.msra.mxu0 %v1008_v23  ;;  %686 = vmatprep.subr.bf16.mxu1 %v1048_v32 }
  0x33   : > { %647 = vmatprep.subr.bf16.mxu0 %v1009_v25 }
  0x35   : > { %687 = vmatpush1.bf16.msra.mxu1 %v1050_v36 }
  0x36   : > { %648 = vmatpush1.bf16.msra.mxu0 %v1011_v27  ;;  %688 = vmatprep.subr.bf16.mxu1 %v1054_v38 }
  0x37   : > { %649 = vmatprep.subr.bf16.mxu0 %v1015_v29 }
  0x39   : > { %689 = vmatpush1.bf16.msra.mxu1 %v1056_v40 }
  0x3a   : > { %650 = vmatpush1.bf16.msra.mxu0 %v1017_v31 }
  0x3b   : > { %651 = vmatprep.subr.bf16.mxu0 %v1021_v33 }
  0x3c   : > { %707 = vmatmul.mubr.bf16.vlgmr.msra.gmra.mrb[0].mxu1 %v1060_v43 }
  0x3e   : > { %652 = vmatpush1.bf16.msra.mxu0 %v1023_v37 }
  0x3f   : > { %653 = vmatprep.subr.bf16.mxu0 %v1027_v39 }
  0x42   : > { %654 = vmatpush1.bf16.msra.mxu0 %v1029_v41 }
  0x43   : > { %655 = vmatprep.subr.bf16.mxu0 %v1033_v42 }
  0x46   : > { %656 = vmatpush1.bf16.msra.mxu0 %v1035_v44 }
  0x47   : > { %657 = vmatprep.subr.bf16.mxu0 %v1039_v45 }
  0x4a   : > { %658 = vmatpush1.bf16.msra.mxu0 %v1041_v46 }
  0x4b   : > { %659 = vmatprep.subr.bf16.mxu0 %v1045_v47 }
  0x4e   : > { %660 = vmatpush1.bf16.msra.mxu0 %v1047_v48 }
  0x4f   : > { %661 = vmatprep.subr.bf16.mxu0 %v1051_v49 }
  0x52   : > { %662 = vmatpush1.bf16.msra.mxu0 %v1053_v50 }
  0x53   : > { %663 = vmatprep.subr.bf16.mxu0 %v1057_v51 }
  0x56   : > { %664 = vmatpush1.bf16.msra.mxu0 %v1059_v52 }
  0x59   : > { %666 = vmatmul.mubr.bf16.vlgmr.msra.gmra.mrb[0].mxu0 %v903_v53 }
 0x10f   : > { %v708_v54 = vpop.f32.mrb[0].mxu1 }
 0x110   : > { %v710_v55 = vpop.f32.mrb[1].mxu1 }
 0x111   : > { %v712_v56 = vpop.f32.mrb[2].mxu1 }
 0x112   : > { %v713_v57 = vpop.f32.mrb[3].mxu1 }
 0x12c   : > { %v667_v59 = vpop.f32.mrb[0].mxu0  ;;  %722 = sbr.rel (%p954_p7) target bundleno = 323 (0x143), region = 44 }
 0x12d   : > { %v709_v60 = vadd.f32 %v708_v54, %v667_v59  ;;  %v669_v62 = vpop.f32.mrb[1].mxu0 }
 0x12e   : > { %v711_v63 = vadd.f32 %v710_v55, %v669_v62  ;;  %v671_v0 = vpop.f32.mrb[2].mxu0 }
 0x12f   : > { %v715_v1 = vadd.f32 %v709_v60, %v330_v58  ;;  %v672_v2 = vpop.f32.mrb[3].mxu0 }
 0x130   : > { %v716_v3 = vadd.f32 %v711_v63, %v331_v61 }
 0x131   : > { %717 = vst [vmem:[#allocation2] sm:$0xff] %v715_v1 }
 0x132   : > { %718 = vst [vmem:[#allocation2 + $0x8] sm:$0xff] %v716_v3 }
 0x138   : > { %v723_v10 = vld [vmem:[#allocation2] sm:$0xff] }
 0x139   : > { %v724_v11 = vld [vmem:[#allocation2 + $0x8] sm:$0xff]  ;;  %v737_v16 = vmul.f32 %v730_v12, %v723_v10 }
 0x13a   : > { %v738_v17 = vmul.f32 %v734_v13, %v724_v11 }
 0x13b   : > { %v751_v18 = vadd.f32 %v744_v14, %v737_v16 }
 0x13c   : > { %v752_v19 = vadd.f32 %v748_v15, %v738_v17 }
 0x13d   : > { %v753_v20 = vmax.f32 %v751_v18, 0.0 }
 0x13e   : > { %v754_v21 = vmax.f32 %v752_v19, 0.0 }
 0x140   : > { %v961_v22 = vpack.c.bf16 %v754_v21, %v753_v20 }
 0x142   : > { %763 = vst [vmem:[%s1220_s4] sm:$0xff] %v961_v22 }
 0x143 PF: > { %s14_s17 = sadd.s32 1, %s1085_s17   ;;  %s1221_s15 = smov %s1081_s16 }
 0x144   : > { %p11_p8 = scmp.ge.s32.totalorder %s14_s17, 5   ;;  %s1222_s16 = smov %s1224_s18 }
 0x146   :  { %13 = sbr.rel (!%p11_p8) target bundleno = 2 (0x2), region = 83 }

// kernel: _lambda_.35
= control target key start
LH: loop header
LB: loop body
LE: loop exit
PB: predicated region body
PF: predicated region fallthrough
CT: control target
= control target key end

     0   :  { %s1674_s18 = smov 0   ;;  %s1676_s19 = smov 0   ;;  %s1834_s0 = inlined_call_operand.vmem [shape: bf16[8,2304], index: 0, kind: input, shape index: {}]   ;;  %s1835_s1 = inlined_call_operand.vmem [shape: bf16[2304,256], index: 1, kind: input, shape index: {}]   ;;  %s1836_s2 = inlined_call_operand.vmem [shape: f32[1,256], index: 2, kind: input, shape index: {}]   ;;  %s1837_s3 = inlined_call_operand.vmem [shape: f32[1,256], index: 3, kind: input, shape index: {}]   ;;  %s1838_s4 = inlined_call_operand.vmem [shape: bf16[8,256], index: 4, kind: input, shape index: {}]   ;;  %s1839_s5 = inlined_call_operand.vmem [shape: bf16[8,256], index: 5, kind: output, shape index: {}]  }
   0x1   :  { %s1678_s20 = smov 0  }
   0x2 LB: > { %s27_s21 = sadd.s32 1, %s1637_s19  ;;  %p1329_p0 = scmp.ge.s32.totalorder %s1641_s20, 1  ;;  %s1641_s20 = sphi %s1678_s20, %s15_s20   ;;  %s1637_s19 = sphi %s1676_s19, %s1841_s19   ;;  %s1633_s18 = sphi %s1674_s18, %s1840_s18  }
   0x3   : > { %p28_p1 = scmp.ge.s32.totalorder %s27_s21, 3  ;;  %p271_p2 = scmp.lt.s32.totalorder %s1641_s20, 4 }
   0x5   : > { %s1843_s21 = smov (%p28_p1, %s27_s21), 0  ;;  %p272_p3 = pnand %p1329_p0, %p271_p2 }
   0x6   : > { %s334_s22 = smul.u32 (!%p272_p3), 6, %s1633_s18  ;;  %p1333_p6 = scmp.ne.s32.totalorder (!%p272_p3), %s1633_s18, 0 }
   0x7   : > { %275 = sbr.rel (%p272_p3) target bundleno = 391 (0x187), region = 40 }
   0x8   : > { %s344_s23 = smul.u32 (!%p272_p3), 96, %s1633_s18  ;;  %p337_p4 = scmp.lt.s32.totalorder (!%p272_p3), %s334_s22, 17 }
   0xa   : > { %p346_p5 = scmp.lt.s32.totalorder (!%p272_p3), %s344_s23, 287 }
   0xe   : > { %s1845_s22 = smov (!%p337_p4, %s334_s22), 17  ;;  %s1847_s23 = smov (!%p346_p5, %s344_s23), 287 }
   0xf   : > { %s1330_s24 = sshll.u32 %s1845_s22, 2  ;;  %s1442_s28 = sshll.u32 %s1847_s23, 3  ;;  %v1643_v0 = vmov (!%p1333_p6), 0.0  }
  0x10   : > { %s1699_s27 = scalar_lea.vmem %s1834_s0, %s1330_s24  ;;  %s1704_s6 = scalar_lea.vmem %s1835_s1, %s1442_s28  ;;  %390 = vst [vmem:[#allocation2] sm:$0xff] (!%p1333_p6), %v1643_v0  ;;  %391 = vst [vmem:[#allocation2 + $0x8] sm:$0xff] (!%p1333_p6), %v1643_v0 }
  0x11   : > { %389 = sbr.rel (%p1333_p6) target bundleno = 24 (0x18), region = 44 }
  0x18 PF: > { %v1469_v1 = vld [vmem:[%s1704_s6 + $0x4] ss:$8 sps:$4 sm:$0xff]   ;;  %v1473_v3 = vld [vmem:[%s1704_s6] ss:$8 sps:$4 sm:$0xff]   ;;  %v1475_v5 = vld [vmem:[%s1704_s6 + $0x14] ss:$8 sps:$4 sm:$0xff]  }
  0x19   : > { %v1471_v2 = vld [vmem:[%s1704_s6 + $0x104] ss:$8 sps:$4 sm:$0xff]   ;;  %994 = vmatprep.subr.bf16.mxu0 %v1469_v1  ;;  %v1474_v4 = vld [vmem:[%s1704_s6 + $0x100] ss:$8 sps:$4 sm:$0xff]   ;;  %v1477_v6 = vld [vmem:[%s1704_s6 + $0x114] ss:$8 sps:$4 sm:$0xff]  }
  0x1a   : > { %1035 = vmatprep.subr.bf16.mxu1 %v1471_v2  ;;  %995 = vmatpush1.bf16.msra.mxu0 %v1473_v3  ;;  %v1479_v7 = vld [vmem:[%s1704_s6 + $0x10] ss:$8 sps:$4 sm:$0xff]   ;;  %v1481_v9 = vld [vmem:[%s1704_s6 + $0x24] ss:$8 sps:$4 sm:$0xff]   ;;  %v1485_v11 = vld [vmem:[%s1704_s6 + $0x20] ss:$8 sps:$4 sm:$0xff]  }
  0x1b   : > { %1036 = vmatpush1.bf16.msra.mxu1 %v1474_v4  ;;  %996 = vmatprep.subr.bf16.mxu0 %v1475_v5  ;;  %v1480_v8 = vld [vmem:[%s1704_s6 + $0x110] ss:$8 sps:$4 sm:$0xff]   ;;  %v1483_v10 = vld [vmem:[%s1704_s6 + $0x124] ss:$8 sps:$4 sm:$0xff]   ;;  %v1486_v12 = vld [vmem:[%s1704_s6 + $0x120] ss:$8 sps:$4 sm:$0xff]  }
  0x1c   : > { %1037 = vmatprep.subr.bf16.mxu1 %v1477_v6  ;;  %v1487_v13 = vld [vmem:[%s1704_s6 + $0x34] ss:$8 sps:$4 sm:$0xff]   ;;  %v1491_v15 = vld [vmem:[%s1704_s6 + $0x30] ss:$8 sps:$4 sm:$0xff]   ;;  %v1493_v17 = vld [vmem:[%s1704_s6 + $0x44] ss:$8 sps:$4 sm:$0xff]  }
  0x1d   : > { %v1489_v14 = vld [vmem:[%s1704_s6 + $0x134] ss:$8 sps:$4 sm:$0xff]   ;;  %v1492_v16 = vld [vmem:[%s1704_s6 + $0x130] ss:$8 sps:$4 sm:$0xff]   ;;  %v1495_v18 = vld [vmem:[%s1704_s6 + $0x144] ss:$8 sps:$4 sm:$0xff]  }
  0x1e   : > { %997 = vmatpush1.bf16.msra.mxu0 %v1479_v7  ;;  %v1497_v19 = vld [vmem:[%s1704_s6 + $0x40] ss:$8 sps:$4 sm:$0xff]   ;;  %v1499_v21 = vld [vmem:[%s1704_s6 + $0x54] ss:$8 sps:$4 sm:$0xff]   ;;  %v1503_v23 = vld [vmem:[%s1704_s6 + $0x50] ss:$8 sps:$4 sm:$0xff]  }
  0x1f   : > { %1038 = vmatpush1.bf16.msra.mxu1 %v1480_v8  ;;  %998 = vmatprep.subr.bf16.mxu0 %v1481_v9  ;;  %v1498_v20 = vld [vmem:[%s1704_s6 + $0x140] ss:$8 sps:$4 sm:$0xff]   ;;  %v1501_v22 = vld [vmem:[%s1704_s6 + $0x154] ss:$8 sps:$4 sm:$0xff]   ;;  %v1504_v24 = vld [vmem:[%s1704_s6 + $0x150] ss:$8 sps:$4 sm:$0xff]  }
  0x20   : > { %1039 = vmatprep.subr.bf16.mxu1 %v1483_v10  ;;  %v1505_v25 = vld [vmem:[%s1704_s6 + $0x64] ss:$8 sps:$4 sm:$0xff]   ;;  %v1509_v27 = vld [vmem:[%s1704_s6 + $0x60] ss:$8 sps:$4 sm:$0xff]   ;;  %v1511_v29 = vld [vmem:[%s1704_s6 + $0x74] ss:$8 sps:$4 sm:$0xff]  }
  0x21   : > { %v1507_v26 = vld [vmem:[%s1704_s6 + $0x164] ss:$8 sps:$4 sm:$0xff]   ;;  %v1510_v28 = vld [vmem:[%s1704_s6 + $0x160] ss:$8 sps:$4 sm:$0xff]   ;;  %v1513_v30 = vld [vmem:[%s1704_s6 + $0x174] ss:$8 sps:$4 sm:$0xff]  }
  0x22   : > { %999 = vmatpush1.bf16.msra.mxu0 %v1485_v11  ;;  %v1515_v31 = vld [vmem:[%s1704_s6 + $0x70] ss:$8 sps:$4 sm:$0xff]   ;;  %v1517_v33 = vld [vmem:[%s1704_s6 + $0x84] ss:$8 sps:$4 sm:$0xff]   ;;  %v1521_v35 = vld [vmem:[%s1704_s6 + $0x80] ss:$8 sps:$4 sm:$0xff]  }
  0x23   : > { %1040 = vmatpush1.bf16.msra.mxu1 %v1486_v12  ;;  %1000 = vmatprep.subr.bf16.mxu0 %v1487_v13  ;;  %v1516_v32 = vld [vmem:[%s1704_s6 + $0x170] ss:$8 sps:$4 sm:$0xff]   ;;  %v1519_v34 = vld [vmem:[%s1704_s6 + $0x184] ss:$8 sps:$4 sm:$0xff]   ;;  %v1522_v36 = vld [vmem:[%s1704_s6 + $0x180] ss:$8 sps:$4 sm:$0xff]  }
  0x24   : > { %1041 = vmatprep.subr.bf16.mxu1 %v1489_v14  ;;  %v1523_v37 = vld [vmem:[%s1704_s6 + $0x94] ss:$8 sps:$4 sm:$0xff]   ;;  %v1527_v39 = vld [vmem:[%s1704_s6 + $0x90] ss:$8 sps:$4 sm:$0xff]   ;;  %v1529_v41 = vld [vmem:[%s1704_s6 + $0xa4] ss:$8 sps:$4 sm:$0xff]  }
  0x25   : > { %v1525_v38 = vld [vmem:[%s1704_s6 + $0x194] ss:$8 sps:$4 sm:$0xff]   ;;  %v1528_v40 = vld [vmem:[%s1704_s6 + $0x190] ss:$8 sps:$4 sm:$0xff]   ;;  %v1531_v42 = vld [vmem:[%s1704_s6 + $0x1a4] ss:$8 sps:$4 sm:$0xff]  }
  0x26   : > { %1001 = vmatpush1.bf16.msra.mxu0 %v1491_v15  ;;  %v1533_v43 = vld [vmem:[%s1704_s6 + $0xa0] ss:$8 sps:$4 sm:$0xff]   ;;  %v1535_v45 = vld [vmem:[%s1704_s6 + $0xb4] ss:$8 sps:$4 sm:$0xff]   ;;  %v1539_v50 = vld [vmem:[%s1704_s6 + $0xb0] ss:$8 sps:$4 sm:$0xff]  }
  0x27   : > { %1042 = vmatpush1.bf16.msra.mxu1 %v1492_v16  ;;  %1002 = vmatprep.subr.bf16.mxu0 %v1493_v17  ;;  %v1534_v44 = vld [vmem:[%s1704_s6 + $0x1a0] ss:$8 sps:$4 sm:$0xff]   ;;  %v1537_v46 = vld [vmem:[%s1704_s6 + $0x1b4] ss:$8 sps:$4 sm:$0xff]   ;;  %v1540_v51 = vld [vmem:[%s1704_s6 + $0x1b0] ss:$8 sps:$4 sm:$0xff]  }
  0x28   : > { %1043 = vmatprep.subr.bf16.mxu1 %v1495_v18  ;;  %v394_v47 = vld [vmem:[%s1699_s27] sm:$0xff]  ;;  %v395_v49 = vld [vmem:[%s1699_s27 + $0x8] sm:$0xff]  ;;  %v1547_v57 = vld [vmem:[%s1704_s6 + $0xd4] ss:$8 sps:$4 sm:$0xff]   ;;  %p1436_p7 = scmp.ne.s32.totalorder %s1633_s18, 2 }
  0x29   : > { %v1335_v48 = vcombine.high %v394_v47, %v394_v47  ;;  %v1337_v52 = vcombine.high %v395_v49, %v395_v49  ;;  %v1541_v53 = vld [vmem:[%s1704_s6 + $0xc4] ss:$8 sps:$4 sm:$0xff]   ;;  %v1545_v55 = vld [vmem:[%s1704_s6 + $0xc0] ss:$8 sps:$4 sm:$0xff]   ;;  %v1549_v58 = vld [vmem:[%s1704_s6 + $0x1d4] ss:$8 sps:$4 sm:$0xff]   ;;  %v1334_v6 = vcombine.low %v394_v47, %v394_v47  ;;  %v1336_v7 = vcombine.low %v395_v49, %v395_v49 }
  0x2a   : > { %1003 = vmatpush1.bf16.msra.mxu0 %v1497_v19  ;;  %v1543_v54 = vld [vmem:[%s1704_s6 + $0x1c4] ss:$8 sps:$4 sm:$0xff]   ;;  %v1546_v56 = vld [vmem:[%s1704_s6 + $0x1c0] ss:$8 sps:$4 sm:$0xff]   ;;  %v1551_v59 = vld [vmem:[%s1704_s6 + $0xd0] ss:$8 sps:$4 sm:$0xff]  }
  0x2b   : > { %1044 = vmatpush1.bf16.msra.mxu1 %v1498_v20  ;;  %1004 = vmatprep.subr.bf16.mxu0 %v1499_v21  ;;  %v1552_v60 = vld [vmem:[%s1704_s6 + $0x1d0] ss:$8 sps:$4 sm:$0xff]   ;;  %v1553_v61 = vld [vmem:[%s1704_s6 + $0xe4] ss:$8 sps:$4 sm:$0xff]   ;;  %v1557_v63 = vld [vmem:[%s1704_s6 + $0xe0] ss:$8 sps:$4 sm:$0xff]  }
  0x2c   : > { %1045 = vmatprep.subr.bf16.mxu1 %v1501_v22  ;;  %1026 = vmatprep.mubr.bf16.mxu0 %v1335_v48  ;;  %v1555_v62 = vld [vmem:[%s1704_s6 + $0x1e4] ss:$8 sps:$4 sm:$0xff]   ;;  %v1558_v0 = vld [vmem:[%s1704_s6 + $0x1e0] ss:$8 sps:$4 sm:$0xff]   ;;  %v1559_v1 = vld [vmem:[%s1704_s6 + $0xf4] ss:$8 sps:$4 sm:$0xff]  }
  0x2d   : > { %1067 = vmatprep.mubr.bf16.mxu1 %v1337_v52  ;;  %v1561_v2 = vld [vmem:[%s1704_s6 + $0x1f4] ss:$8 sps:$4 sm:$0xff]   ;;  %v1563_v3 = vld [vmem:[%s1704_s6 + $0xf0] ss:$8 sps:$4 sm:$0xff]   ;;  %v1571_v5 = vld [vmem:[%s1704_s6 + $0x204] ss:$8 sps:$4 sm:$0xff]  }
  0x2e   : > { %1005 = vmatpush1.bf16.msra.mxu0 %v1503_v23  ;;  %v1564_v4 = vld [vmem:[%s1704_s6 + $0x1f0] ss:$8 sps:$4 sm:$0xff]   ;;  %v1569_v8 = vld [vmem:[%s1704_s6 + $0x200] ss:$8 sps:$4 sm:$0xff]   ;;  %v1574_v10 = vld [vmem:[%s1704_s6 + $0x214] ss:$8 sps:$4 sm:$0xff]  }
  0x2f   : > { %1046 = vmatpush1.bf16.msra.mxu1 %v1504_v24  ;;  %1006 = vmatprep.subr.bf16.mxu0 %v1505_v25  ;;  %v1776_v9 = vld [vmem:[%s1699_s27 + $0x10] sm:$0xff]  ;;  %v1577_v13 = vld [vmem:[%s1704_s6 + $0x224] ss:$8 sps:$4 sm:$0xff]   ;;  %v1575_v14 = vld [vmem:[%s1704_s6 + $0x220] ss:$8 sps:$4 sm:$0xff]  }
  0x30   : > { %1047 = vmatprep.subr.bf16.mxu1 %v1507_v26  ;;  %v1339_v11 = vcombine.high %v1776_v9, %v1776_v9  ;;  %v1572_v12 = vld [vmem:[%s1704_s6 + $0x210] ss:$8 sps:$4 sm:$0xff]   ;;  %v1580_v15 = vld [vmem:[%s1704_s6 + $0x234] ss:$8 sps:$4 sm:$0xff]   ;;  %v1583_v17 = vld [vmem:[%s1704_s6 + $0x244] ss:$8 sps:$4 sm:$0xff]  }
  0x31   : > { %v1578_v16 = vld [vmem:[%s1704_s6 + $0x230] ss:$8 sps:$4 sm:$0xff]   ;;  %v1581_v18 = vld [vmem:[%s1704_s6 + $0x240] ss:$8 sps:$4 sm:$0xff]   ;;  %v1586_v19 = vld [vmem:[%s1704_s6 + $0x254] ss:$8 sps:$4 sm:$0xff]  }
  0x32   : > { %1007 = vmatpush1.bf16.msra.mxu0 %v1509_v27  ;;  %v1584_v20 = vld [vmem:[%s1704_s6 + $0x250] ss:$8 sps:$4 sm:$0xff]   ;;  %v1589_v21 = vld [vmem:[%s1704_s6 + $0x264] ss:$8 sps:$4 sm:$0xff]   ;;  %v1587_v22 = vld [vmem:[%s1704_s6 + $0x260] ss:$8 sps:$4 sm:$0xff]  }
  0x33   : > { %1048 = vmatpush1.bf16.msra.mxu1 %v1510_v28  ;;  %1008 = vmatprep.subr.bf16.mxu0 %v1511_v29  ;;  %v1592_v23 = vld [vmem:[%s1704_s6 + $0x274] ss:$8 sps:$4 sm:$0xff]   ;;  %v1590_v24 = vld [vmem:[%s1704_s6 + $0x270] ss:$8 sps:$4 sm:$0xff]   ;;  %v1595_v25 = vld [vmem:[%s1704_s6 + $0x284] ss:$8 sps:$4 sm:$0xff]  }
  0x34   : > { %1049 = vmatprep.subr.bf16.mxu1 %v1513_v30  ;;  %v1593_v26 = vld [vmem:[%s1704_s6 + $0x280] ss:$8 sps:$4 sm:$0xff]   ;;  %v1598_v27 = vld [vmem:[%s1704_s6 + $0x294] ss:$8 sps:$4 sm:$0xff]   ;;  %v1596_v28 = vld [vmem:[%s1704_s6 + $0x290] ss:$8 sps:$4 sm:$0xff]  }
  0x35   : > { %v1601_v29 = vld [vmem:[%s1704_s6 + $0x2a4] ss:$8 sps:$4 sm:$0xff]   ;;  %v1599_v30 = vld [vmem:[%s1704_s6 + $0x2a0] ss:$8 sps:$4 sm:$0xff]  }
  0x36   : > { %1009 = vmatpush1.bf16.msra.mxu0 %v1515_v31  ;;  %v1604_v31 = vld [vmem:[%s1704_s6 + $0x2b4] ss:$8 sps:$4 sm:$0xff]   ;;  %v392_v52 = vld [vmem:[#allocation2] sm:$0xff] }
  0x37   : > { %1050 = vmatpush1.bf16.msra.mxu1 %v1516_v32  ;;  %1010 = vmatprep.subr.bf16.mxu0 %v1517_v33  ;;  %v1602_v32 = vld [vmem:[%s1704_s6 + $0x2b0] ss:$8 sps:$4 sm:$0xff]   ;;  %v1607_v33 = vld [vmem:[%s1704_s6 + $0x2c4] ss:$8 sps:$4 sm:$0xff]  }
  0x38   : > { %1051 = vmatprep.subr.bf16.mxu1 %v1519_v34  ;;  %v1605_v34 = vld [vmem:[%s1704_s6 + $0x2c0] ss:$8 sps:$4 sm:$0xff]  }
  0x3a   : > { %1011 = vmatpush1.bf16.msra.mxu0 %v1521_v35  ;;  %v1610_v35 = vld [vmem:[%s1704_s6 + $0x2d4] ss:$8 sps:$4 sm:$0xff]  }
  0x3b   : > { %1052 = vmatpush1.bf16.msra.mxu1 %v1522_v36  ;;  %1012 = vmatprep.subr.bf16.mxu0 %v1523_v37  ;;  %v1608_v36 = vld [vmem:[%s1704_s6 + $0x2d0] ss:$8 sps:$4 sm:$0xff]   ;;  %v1613_v37 = vld [vmem:[%s1704_s6 + $0x2e4] ss:$8 sps:$4 sm:$0xff]  }
  0x3c   : > { %1053 = vmatprep.subr.bf16.mxu1 %v1525_v38  ;;  %v1611_v38 = vld [vmem:[%s1704_s6 + $0x2e0] ss:$8 sps:$4 sm:$0xff]  }
  0x3e   : > { %1013 = vmatpush1.bf16.msra.mxu0 %v1527_v39  ;;  %v1616_v39 = vld [vmem:[%s1704_s6 + $0x2f4] ss:$8 sps:$4 sm:$0xff]  }
  0x3f   : > { %1054 = vmatpush1.bf16.msra.mxu1 %v1528_v40  ;;  %1014 = vmatprep.subr.bf16.mxu0 %v1529_v41  ;;  %v1614_v40 = vld [vmem:[%s1704_s6 + $0x2f0] ss:$8 sps:$4 sm:$0xff]   ;;  %v1338_v41 = vcombine.low %v1776_v9, %v1776_v9 }
  0x40   : > { %1055 = vmatprep.subr.bf16.mxu1 %v1531_v42 }
  0x42   : > { %1015 = vmatpush1.bf16.msra.mxu0 %v1533_v43 }
  0x43   : > { %1056 = vmatpush1.bf16.msra.mxu1 %v1534_v44  ;;  %1016 = vmatprep.subr.bf16.mxu0 %v1535_v45 }
  0x44   : > { %1057 = vmatprep.subr.bf16.mxu1 %v1537_v46 }
  0x46   : > { %1017 = vmatpush1.bf16.msra.mxu0 %v1539_v50 }
  0x47   : > { %1058 = vmatpush1.bf16.msra.mxu1 %v1540_v51  ;;  %1018 = vmatprep.subr.bf16.mxu0 %v1541_v53 }
  0x48   : > { %1059 = vmatprep.subr.bf16.mxu1 %v1543_v54 }
  0x4a   : > { %1019 = vmatpush1.bf16.msra.mxu0 %v1545_v55  ;;  %v393_v55 = vld [vmem:[#allocation2 + $0x8] sm:$0xff] }
  0x4b   : > { %1060 = vmatpush1.bf16.msra.mxu1 %v1546_v56  ;;  %1020 = vmatprep.subr.bf16.mxu0 %v1547_v57 }
  0x4c   : > { %1061 = vmatprep.subr.bf16.mxu1 %v1549_v58 }
  0x4e   : > { %1021 = vmatpush1.bf16.msra.mxu0 %v1551_v59 }
  0x4f   : > { %1062 = vmatpush1.bf16.msra.mxu1 %v1552_v60  ;;  %1022 = vmatprep.subr.bf16.mxu0 %v1553_v61 }
  0x50   : > { %1063 = vmatprep.subr.bf16.mxu1 %v1555_v62  ;;  %v1129_v62 = vlaneseq (!%p1436_p7) }
  0x52   : > { %1023 = vmatpush1.bf16.msra.mxu0 %v1557_v63  ;;  %v1130_v63 = vshrl.u32 (!%p1436_p7), %v1129_v62, 7 }
  0x53   : > { %1064 = vmatpush1.bf16.msra.mxu1 %v1558_v0  ;;  %1024 = vmatprep.subr.bf16.mxu0 %v1559_v1  ;;  %v1127_v0 = vld [vmem:[%s1836_s2] sm:$0x3] (!%p1436_p7) }
  0x54   : > { %1065 = vmatprep.subr.bf16.mxu1 %v1561_v2  ;;  %v1141_v1 = vld [vmem:[%s1837_s3] sm:$0x3] (!%p1436_p7)  ;;  %v1131_v2 = vsub.s32 (!%p1436_p7), 0, %v1130_v63 }
  0x56   : > { %1025 = vmatpush1.bf16.msra.mxu0 %v1563_v3  ;;  %v1135_v3 = vsub.s32 (!%p1436_p7), 1, %v1130_v63 }
  0x57   : > { %1066 = vmatpush1.bf16.msra.mxu1 %v1564_v4  ;;  %1076 = vmatprep.subr.bf16.mxu0 %v1571_v5 }
  0x58   : > { %v1150_v9 = vrot.slane (!%p1436_p7), %v1141_v1, %v1135_v3 }
  0x59   : > { %1027 = vmatmul.mubr.bf16.vlgmr.msra.gmra.mrb[0].mxu0 %v1334_v6  ;;  %v1132_v6 = vrot.slane (!%p1436_p7), %v1127_v0, %v1131_v2 }
  0x5a   : > { %1068 = vmatmul.mubr.bf16.vlgmr.msra.gmra.mrb[0].mxu1 %v1336_v7  ;;  %1077 = vmatpush1.bf16.msra.mxu0 %v1569_v8  ;;  %v1136_v7 = vrot.slane (!%p1436_p7), %v1127_v0, %v1135_v3  ;;  %v1146_v8 = vrot.slane (!%p1436_p7), %v1141_v1, %v1131_v2 }
  0x5b   : > { %1108 = vmatprep.mubr.bf16.mxu0 %v1339_v11  ;;  %1078 = vmatprep.subr.bf16.mxu0 %v1574_v10  ;;  %v1157_v10 = vld [vmem:[%s1838_s4] sm:$0xff] (!%p1436_p7) }
  0x5e   : > { %1079 = vmatpush1.bf16.msra.mxu0 %v1572_v12 }
  0x5f   : > { %1080 = vmatprep.subr.bf16.mxu0 %v1577_v13 }
  0x62   : > { %1081 = vmatpush1.bf16.msra.mxu0 %v1575_v14 }
  0x63   : > { %1082 = vmatprep.subr.bf16.mxu0 %v1580_v15  ;;  %v1158_v15 = vunpack.c.l.bf16 (!%p1436_p7), %v1157_v10 }
  0x66   : > { %1083 = vmatpush1.bf16.msra.mxu0 %v1578_v16  ;;  %v1159_v16 = vunpack.c.h.bf16 (!%p1436_p7), %v1157_v10 }
  0x67   : > { %1084 = vmatprep.subr.bf16.mxu0 %v1583_v17 }
  0x6a   : > { %1085 = vmatpush1.bf16.msra.mxu0 %v1581_v18 }
  0x6b   : > { %1086 = vmatprep.subr.bf16.mxu0 %v1586_v19 }
  0x6e   : > { %1087 = vmatpush1.bf16.msra.mxu0 %v1584_v20 }
  0x6f   : > { %1088 = vmatprep.subr.bf16.mxu0 %v1589_v21 }
  0x72   : > { %1089 = vmatpush1.bf16.msra.mxu0 %v1587_v22 }
  0x73   : > { %1090 = vmatprep.subr.bf16.mxu0 %v1592_v23 }
  0x76   : > { %1091 = vmatpush1.bf16.msra.mxu0 %v1590_v24 }
  0x77   : > { %1092 = vmatprep.subr.bf16.mxu0 %v1595_v25 }
  0x7a   : > { %1093 = vmatpush1.bf16.msra.mxu0 %v1593_v26 }
  0x7b   : > { %1094 = vmatprep.subr.bf16.mxu0 %v1598_v27 }
  0x7e   : > { %1095 = vmatpush1.bf16.msra.mxu0 %v1596_v28 }
  0x7f   : > { %1096 = vmatprep.subr.bf16.mxu0 %v1601_v29 }
  0x82   : > { %1097 = vmatpush1.bf16.msra.mxu0 %v1599_v30 }
  0x83   : > { %1098 = vmatprep.subr.bf16.mxu0 %v1604_v31 }
  0x86   : > { %1099 = vmatpush1.bf16.msra.mxu0 %v1602_v32 }
  0x87   : > { %1100 = vmatprep.subr.bf16.mxu0 %v1607_v33 }
  0x8a   : > { %1101 = vmatpush1.bf16.msra.mxu0 %v1605_v34 }
  0x8b   : > { %1102 = vmatprep.subr.bf16.mxu0 %v1610_v35 }
  0x8e   : > { %1103 = vmatpush1.bf16.msra.mxu0 %v1608_v36 }
  0x8f   : > { %1104 = vmatprep.subr.bf16.mxu0 %v1613_v37 }
  0x92   : > { %1105 = vmatpush1.bf16.msra.mxu0 %v1611_v38 }
  0x93   : > { %1106 = vmatprep.subr.bf16.mxu0 %v1616_v39 }
  0x96   : > { %1107 = vmatpush1.bf16.msra.mxu0 %v1614_v40 }
  0x99   : > { %1109 = vmatmul.mubr.bf16.vlgmr.msra.gmra.mrb[4].mxu0 %v1338_v41 }
 0x12c   : > { %v1028_v42 = vpop.f32.mrb[0].mxu0 }
 0x12d   : > { %v1069_v43 = vpop.f32.mrb[0].mxu1  ;;  %v1030_v45 = vpop.f32.mrb[1].mxu0 }
 0x12e   : > { %v1070_v44 = vadd.f32 %v1069_v43, %v1028_v42  ;;  %v1071_v46 = vpop.f32.mrb[1].mxu1  ;;  %v1032_v48 = vpop.f32.mrb[2].mxu0 }
 0x12f   : > { %v1072_v47 = vadd.f32 %v1071_v46, %v1030_v45  ;;  %v1073_v49 = vpop.f32.mrb[2].mxu1  ;;  %v1033_v50 = vpop.f32.mrb[3].mxu0 }
 0x130   : > { %v1074_v51 = vpop.f32.mrb[3].mxu1 }
 0x16c   : > { %v1110_v53 = vpop.f32.mrb[4].mxu0  ;;  %1124 = sbr.rel (%p1436_p7) target bundleno = 391 (0x187), region = 48 }
 0x16d   : > { %v1111_v54 = vadd.f32 %v1110_v53, %v1070_v44  ;;  %v1112_v56 = vpop.f32.mrb[5].mxu0 }
 0x16e   : > { %v1113_v57 = vadd.f32 %v1112_v56, %v1072_v47  ;;  %v1114_v58 = vpop.f32.mrb[6].mxu0 }
 0x16f   : > { %v1117_v59 = vadd.f32 %v1111_v54, %v392_v52  ;;  %v1115_v60 = vpop.f32.mrb[7].mxu0 }
 0x170   : > { %v1118_v61 = vadd.f32 %v1113_v57, %v393_v55 }
 0x171   : > { %1119 = vst [vmem:[#allocation2] sm:$0xff] %v1117_v59 }
 0x172   : > { %1120 = vst [vmem:[#allocation2 + $0x8] sm:$0xff] %v1118_v61 }
 0x178   : > { %v1125_v4 = vld [vmem:[#allocation2] sm:$0xff] }
 0x179   : > { %v1126_v5 = vld [vmem:[#allocation2 + $0x8] sm:$0xff]  ;;  %v1139_v11 = vmul.f32 %v1132_v6, %v1125_v4 }
 0x17a   : > { %v1140_v12 = vmul.f32 %v1136_v7, %v1126_v5 }
 0x17b   : > { %v1153_v13 = vadd.f32 %v1146_v8, %v1139_v11 }
 0x17c   : > { %v1154_v14 = vadd.f32 %v1150_v9, %v1140_v12 }
 0x17d   : > { %v1155_v17 = vmax.f32 %v1153_v13, 0.0 }
 0x17e   : > { %v1156_v18 = vmax.f32 %v1154_v14, 0.0 }
 0x17f   : > { %v1160_v19 = vadd.f32 %v1158_v15, %v1155_v17 }
 0x180   : > { %v1161_v20 = vadd.f32 %v1159_v16, %v1156_v18 }
 0x181   : > { %v1162_v21 = vmax.f32 %v1160_v19, 0.0 }
 0x182   : > { %v1163_v22 = vmax.f32 %v1161_v20, 0.0 }
 0x184   : > { %v1443_v23 = vpack.c.bf16 %v1163_v22, %v1162_v21 }
 0x186   : > { %1172 = vst [vmem:[%s1839_s5] sm:$0xff] %v1443_v23 }
 0x187 PF: > { %s15_s20 = sadd.s32 1, %s1641_s20   ;;  %s1840_s18 = smov %s1637_s19 }
 0x188   : > { %p12_p8 = scmp.ge.s32.totalorder %s15_s20, 5   ;;  %s1841_s19 = smov %s1843_s21 }
 0x18a   :  { %14 = sbr.rel (!%p12_p8) target bundleno = 2 (0x2), region = 90 }

// kernel: _lambda_.36
= control target key start
LH: loop header
LB: loop body
LE: loop exit
PB: predicated region body
PF: predicated region fallthrough
CT: control target
= control target key end

     0   :  { %s1577_s15 = smov 0   ;;  %s1579_s16 = smov 0   ;;  %s1734_s0 = inlined_call_operand.vmem [shape: bf16[8,2304], index: 0, kind: input, shape index: {}]   ;;  %s1735_s1 = inlined_call_operand.vmem [shape: bf16[2304,256], index: 1, kind: input, shape index: {}]   ;;  %s1736_s2 = inlined_call_operand.vmem [shape: f32[1,256], index: 2, kind: input, shape index: {}]   ;;  %s1737_s3 = inlined_call_operand.vmem [shape: f32[1,256], index: 3, kind: input, shape index: {}]   ;;  %s1738_s4 = inlined_call_operand.vmem [shape: bf16[8,256], index: 4, kind: output, shape index: {}]  }
   0x1   :  { %s1581_s17 = smov 0  }
   0x2 LB: > { %s26_s18 = sadd.s32 1, %s1545_s16  ;;  %p1237_p0 = scmp.ge.s32.totalorder %s1549_s17, 1  ;;  %s1549_s17 = sphi %s1581_s17, %s14_s17   ;;  %s1545_s16 = sphi %s1579_s16, %s1740_s16   ;;  %s1541_s15 = sphi %s1577_s15, %s1739_s15  }
   0x3   : > { %p27_p1 = scmp.ge.s32.totalorder %s26_s18, 3  ;;  %p229_p2 = scmp.lt.s32.totalorder %s1549_s17, 4 }
   0x5   : > { %s1742_s18 = smov (%p27_p1, %s26_s18), 0  ;;  %p230_p3 = pnand %p1237_p0, %p229_p2 }
   0x6   : > { %s281_s19 = smul.u32 (!%p230_p3), 6, %s1541_s15  ;;  %p1241_p6 = scmp.ne.s32.totalorder (!%p230_p3), %s1541_s15, 0 }
   0x7   : > { %233 = sbr.rel (%p230_p3) target bundleno = 387 (0x183), region = 36 }
   0x8   : > { %s291_s20 = smul.u32 (!%p230_p3), 96, %s1541_s15  ;;  %p284_p4 = scmp.lt.s32.totalorder (!%p230_p3), %s281_s19, 17 }
   0xa   : > { %p293_p5 = scmp.lt.s32.totalorder (!%p230_p3), %s291_s20, 287 }
   0xe   : > { %s1744_s19 = smov (!%p284_p4, %s281_s19), 17  ;;  %s1746_s20 = smov (!%p293_p5, %s291_s20), 287 }
   0xf   : > { %s1238_s21 = sshll.u32 %s1744_s19, 2  ;;  %s1350_s25 = sshll.u32 %s1746_s20, 3  ;;  %v1551_v0 = vmov (!%p1241_p6), 0.0  }
  0x10   : > { %s1602_s24 = scalar_lea.vmem %s1734_s0, %s1238_s21  ;;  %s1607_s28 = scalar_lea.vmem %s1735_s1, %s1350_s25  ;;  %327 = vst [vmem:[#allocation2] sm:$0xff] (!%p1241_p6), %v1551_v0  ;;  %328 = vst [vmem:[#allocation2 + $0x8] sm:$0xff] (!%p1241_p6), %v1551_v0 }
  0x11   : > { %326 = sbr.rel (%p1241_p6) target bundleno = 24 (0x18), region = 40 }
  0x18 PF: > { %v1377_v1 = vld [vmem:[%s1607_s28 + $0x4] ss:$8 sps:$4 sm:$0xff]   ;;  %v1381_v3 = vld [vmem:[%s1607_s28] ss:$8 sps:$4 sm:$0xff]   ;;  %v1383_v5 = vld [vmem:[%s1607_s28 + $0x14] ss:$8 sps:$4 sm:$0xff]  }
  0x19   : > { %v1379_v2 = vld [vmem:[%s1607_s28 + $0x104] ss:$8 sps:$4 sm:$0xff]   ;;  %931 = vmatprep.subr.bf16.mxu0 %v1377_v1  ;;  %v1382_v4 = vld [vmem:[%s1607_s28 + $0x100] ss:$8 sps:$4 sm:$0xff]   ;;  %v1385_v6 = vld [vmem:[%s1607_s28 + $0x114] ss:$8 sps:$4 sm:$0xff]  }
  0x1a   : > { %972 = vmatprep.subr.bf16.mxu1 %v1379_v2  ;;  %932 = vmatpush1.bf16.msra.mxu0 %v1381_v3  ;;  %v1387_v7 = vld [vmem:[%s1607_s28 + $0x10] ss:$8 sps:$4 sm:$0xff]   ;;  %v1389_v9 = vld [vmem:[%s1607_s28 + $0x24] ss:$8 sps:$4 sm:$0xff]   ;;  %v1393_v11 = vld [vmem:[%s1607_s28 + $0x20] ss:$8 sps:$4 sm:$0xff]  }
  0x1b   : > { %973 = vmatpush1.bf16.msra.mxu1 %v1382_v4  ;;  %933 = vmatprep.subr.bf16.mxu0 %v1383_v5  ;;  %v1388_v8 = vld [vmem:[%s1607_s28 + $0x110] ss:$8 sps:$4 sm:$0xff]   ;;  %v1391_v10 = vld [vmem:[%s1607_s28 + $0x124] ss:$8 sps:$4 sm:$0xff]   ;;  %v1394_v12 = vld [vmem:[%s1607_s28 + $0x120] ss:$8 sps:$4 sm:$0xff]  }
  0x1c   : > { %974 = vmatprep.subr.bf16.mxu1 %v1385_v6  ;;  %v1395_v13 = vld [vmem:[%s1607_s28 + $0x34] ss:$8 sps:$4 sm:$0xff]   ;;  %v1399_v15 = vld [vmem:[%s1607_s28 + $0x30] ss:$8 sps:$4 sm:$0xff]   ;;  %v1401_v17 = vld [vmem:[%s1607_s28 + $0x44] ss:$8 sps:$4 sm:$0xff]  }
  0x1d   : > { %v1397_v14 = vld [vmem:[%s1607_s28 + $0x134] ss:$8 sps:$4 sm:$0xff]   ;;  %v1400_v16 = vld [vmem:[%s1607_s28 + $0x130] ss:$8 sps:$4 sm:$0xff]   ;;  %v1403_v18 = vld [vmem:[%s1607_s28 + $0x144] ss:$8 sps:$4 sm:$0xff]  }
  0x1e   : > { %934 = vmatpush1.bf16.msra.mxu0 %v1387_v7  ;;  %v1405_v19 = vld [vmem:[%s1607_s28 + $0x40] ss:$8 sps:$4 sm:$0xff]   ;;  %v1407_v21 = vld [vmem:[%s1607_s28 + $0x54] ss:$8 sps:$4 sm:$0xff]   ;;  %v1411_v23 = vld [vmem:[%s1607_s28 + $0x50] ss:$8 sps:$4 sm:$0xff]  }
  0x1f   : > { %975 = vmatpush1.bf16.msra.mxu1 %v1388_v8  ;;  %935 = vmatprep.subr.bf16.mxu0 %v1389_v9  ;;  %v1406_v20 = vld [vmem:[%s1607_s28 + $0x140] ss:$8 sps:$4 sm:$0xff]   ;;  %v1409_v22 = vld [vmem:[%s1607_s28 + $0x154] ss:$8 sps:$4 sm:$0xff]   ;;  %v1412_v24 = vld [vmem:[%s1607_s28 + $0x150] ss:$8 sps:$4 sm:$0xff]  }
  0x20   : > { %976 = vmatprep.subr.bf16.mxu1 %v1391_v10  ;;  %v1413_v25 = vld [vmem:[%s1607_s28 + $0x64] ss:$8 sps:$4 sm:$0xff]   ;;  %v1417_v27 = vld [vmem:[%s1607_s28 + $0x60] ss:$8 sps:$4 sm:$0xff]   ;;  %v1419_v29 = vld [vmem:[%s1607_s28 + $0x74] ss:$8 sps:$4 sm:$0xff]  }
  0x21   : > { %v1415_v26 = vld [vmem:[%s1607_s28 + $0x164] ss:$8 sps:$4 sm:$0xff]   ;;  %v1418_v28 = vld [vmem:[%s1607_s28 + $0x160] ss:$8 sps:$4 sm:$0xff]   ;;  %v1421_v30 = vld [vmem:[%s1607_s28 + $0x174] ss:$8 sps:$4 sm:$0xff]  }
  0x22   : > { %936 = vmatpush1.bf16.msra.mxu0 %v1393_v11  ;;  %v1423_v31 = vld [vmem:[%s1607_s28 + $0x70] ss:$8 sps:$4 sm:$0xff]   ;;  %v1425_v33 = vld [vmem:[%s1607_s28 + $0x84] ss:$8 sps:$4 sm:$0xff]   ;;  %v1429_v35 = vld [vmem:[%s1607_s28 + $0x80] ss:$8 sps:$4 sm:$0xff]  }
  0x23   : > { %977 = vmatpush1.bf16.msra.mxu1 %v1394_v12  ;;  %937 = vmatprep.subr.bf16.mxu0 %v1395_v13  ;;  %v1424_v32 = vld [vmem:[%s1607_s28 + $0x170] ss:$8 sps:$4 sm:$0xff]   ;;  %v1427_v34 = vld [vmem:[%s1607_s28 + $0x184] ss:$8 sps:$4 sm:$0xff]   ;;  %v1430_v36 = vld [vmem:[%s1607_s28 + $0x180] ss:$8 sps:$4 sm:$0xff]  }
  0x24   : > { %978 = vmatprep.subr.bf16.mxu1 %v1397_v14  ;;  %v1431_v37 = vld [vmem:[%s1607_s28 + $0x94] ss:$8 sps:$4 sm:$0xff]   ;;  %v1435_v39 = vld [vmem:[%s1607_s28 + $0x90] ss:$8 sps:$4 sm:$0xff]   ;;  %v1437_v41 = vld [vmem:[%s1607_s28 + $0xa4] ss:$8 sps:$4 sm:$0xff]  }
  0x25   : > { %v1433_v38 = vld [vmem:[%s1607_s28 + $0x194] ss:$8 sps:$4 sm:$0xff]   ;;  %v1436_v40 = vld [vmem:[%s1607_s28 + $0x190] ss:$8 sps:$4 sm:$0xff]   ;;  %v1439_v42 = vld [vmem:[%s1607_s28 + $0x1a4] ss:$8 sps:$4 sm:$0xff]  }
  0x26   : > { %938 = vmatpush1.bf16.msra.mxu0 %v1399_v15  ;;  %v1441_v43 = vld [vmem:[%s1607_s28 + $0xa0] ss:$8 sps:$4 sm:$0xff]   ;;  %v1443_v45 = vld [vmem:[%s1607_s28 + $0xb4] ss:$8 sps:$4 sm:$0xff]   ;;  %v1447_v50 = vld [vmem:[%s1607_s28 + $0xb0] ss:$8 sps:$4 sm:$0xff]  }
  0x27   : > { %979 = vmatpush1.bf16.msra.mxu1 %v1400_v16  ;;  %939 = vmatprep.subr.bf16.mxu0 %v1401_v17  ;;  %v1442_v44 = vld [vmem:[%s1607_s28 + $0x1a0] ss:$8 sps:$4 sm:$0xff]   ;;  %v1445_v46 = vld [vmem:[%s1607_s28 + $0x1b4] ss:$8 sps:$4 sm:$0xff]   ;;  %v1448_v51 = vld [vmem:[%s1607_s28 + $0x1b0] ss:$8 sps:$4 sm:$0xff]  }
  0x28   : > { %980 = vmatprep.subr.bf16.mxu1 %v1403_v18  ;;  %v331_v47 = vld [vmem:[%s1602_s24] sm:$0xff]  ;;  %v332_v49 = vld [vmem:[%s1602_s24 + $0x8] sm:$0xff]  ;;  %v1455_v57 = vld [vmem:[%s1607_s28 + $0xd4] ss:$8 sps:$4 sm:$0xff]   ;;  %p1344_p7 = scmp.ne.s32.totalorder %s1541_s15, 2 }
  0x29   : > { %v1243_v48 = vcombine.high %v331_v47, %v331_v47  ;;  %v1245_v52 = vcombine.high %v332_v49, %v332_v49  ;;  %v1449_v53 = vld [vmem:[%s1607_s28 + $0xc4] ss:$8 sps:$4 sm:$0xff]   ;;  %v1453_v55 = vld [vmem:[%s1607_s28 + $0xc0] ss:$8 sps:$4 sm:$0xff]   ;;  %v1457_v58 = vld [vmem:[%s1607_s28 + $0x1d4] ss:$8 sps:$4 sm:$0xff]   ;;  %v1242_v6 = vcombine.low %v331_v47, %v331_v47  ;;  %v1244_v7 = vcombine.low %v332_v49, %v332_v49 }
  0x2a   : > { %940 = vmatpush1.bf16.msra.mxu0 %v1405_v19  ;;  %v1451_v54 = vld [vmem:[%s1607_s28 + $0x1c4] ss:$8 sps:$4 sm:$0xff]   ;;  %v1454_v56 = vld [vmem:[%s1607_s28 + $0x1c0] ss:$8 sps:$4 sm:$0xff]   ;;  %v1459_v59 = vld [vmem:[%s1607_s28 + $0xd0] ss:$8 sps:$4 sm:$0xff]  }
  0x2b   : > { %981 = vmatpush1.bf16.msra.mxu1 %v1406_v20  ;;  %941 = vmatprep.subr.bf16.mxu0 %v1407_v21  ;;  %v1460_v60 = vld [vmem:[%s1607_s28 + $0x1d0] ss:$8 sps:$4 sm:$0xff]   ;;  %v1461_v61 = vld [vmem:[%s1607_s28 + $0xe4] ss:$8 sps:$4 sm:$0xff]   ;;  %v1465_v63 = vld [vmem:[%s1607_s28 + $0xe0] ss:$8 sps:$4 sm:$0xff]  }
  0x2c   : > { %982 = vmatprep.subr.bf16.mxu1 %v1409_v22  ;;  %963 = vmatprep.mubr.bf16.mxu0 %v1243_v48  ;;  %v1463_v62 = vld [vmem:[%s1607_s28 + $0x1e4] ss:$8 sps:$4 sm:$0xff]   ;;  %v1466_v0 = vld [vmem:[%s1607_s28 + $0x1e0] ss:$8 sps:$4 sm:$0xff]   ;;  %v1467_v1 = vld [vmem:[%s1607_s28 + $0xf4] ss:$8 sps:$4 sm:$0xff]  }
  0x2d   : > { %1004 = vmatprep.mubr.bf16.mxu1 %v1245_v52  ;;  %v1469_v2 = vld [vmem:[%s1607_s28 + $0x1f4] ss:$8 sps:$4 sm:$0xff]   ;;  %v1471_v3 = vld [vmem:[%s1607_s28 + $0xf0] ss:$8 sps:$4 sm:$0xff]   ;;  %v1479_v5 = vld [vmem:[%s1607_s28 + $0x204] ss:$8 sps:$4 sm:$0xff]  }
  0x2e   : > { %942 = vmatpush1.bf16.msra.mxu0 %v1411_v23  ;;  %v1472_v4 = vld [vmem:[%s1607_s28 + $0x1f0] ss:$8 sps:$4 sm:$0xff]   ;;  %v1477_v8 = vld [vmem:[%s1607_s28 + $0x200] ss:$8 sps:$4 sm:$0xff]   ;;  %v1482_v10 = vld [vmem:[%s1607_s28 + $0x214] ss:$8 sps:$4 sm:$0xff]  }
  0x2f   : > { %983 = vmatpush1.bf16.msra.mxu1 %v1412_v24  ;;  %943 = vmatprep.subr.bf16.mxu0 %v1413_v25  ;;  %v1679_v9 = vld [vmem:[%s1602_s24 + $0x10] sm:$0xff]  ;;  %v1485_v13 = vld [vmem:[%s1607_s28 + $0x224] ss:$8 sps:$4 sm:$0xff]   ;;  %v1483_v14 = vld [vmem:[%s1607_s28 + $0x220] ss:$8 sps:$4 sm:$0xff]  }
  0x30   : > { %984 = vmatprep.subr.bf16.mxu1 %v1415_v26  ;;  %v1247_v11 = vcombine.high %v1679_v9, %v1679_v9  ;;  %v1480_v12 = vld [vmem:[%s1607_s28 + $0x210] ss:$8 sps:$4 sm:$0xff]   ;;  %v1488_v15 = vld [vmem:[%s1607_s28 + $0x234] ss:$8 sps:$4 sm:$0xff]   ;;  %v1491_v17 = vld [vmem:[%s1607_s28 + $0x244] ss:$8 sps:$4 sm:$0xff]  }
  0x31   : > { %v1486_v16 = vld [vmem:[%s1607_s28 + $0x230] ss:$8 sps:$4 sm:$0xff]   ;;  %v1489_v18 = vld [vmem:[%s1607_s28 + $0x240] ss:$8 sps:$4 sm:$0xff]   ;;  %v1494_v19 = vld [vmem:[%s1607_s28 + $0x254] ss:$8 sps:$4 sm:$0xff]  }
  0x32   : > { %944 = vmatpush1.bf16.msra.mxu0 %v1417_v27  ;;  %v1492_v20 = vld [vmem:[%s1607_s28 + $0x250] ss:$8 sps:$4 sm:$0xff]   ;;  %v1497_v21 = vld [vmem:[%s1607_s28 + $0x264] ss:$8 sps:$4 sm:$0xff]   ;;  %v1495_v22 = vld [vmem:[%s1607_s28 + $0x260] ss:$8 sps:$4 sm:$0xff]  }
  0x33   : > { %985 = vmatpush1.bf16.msra.mxu1 %v1418_v28  ;;  %945 = vmatprep.subr.bf16.mxu0 %v1419_v29  ;;  %v1500_v23 = vld [vmem:[%s1607_s28 + $0x274] ss:$8 sps:$4 sm:$0xff]   ;;  %v1498_v24 = vld [vmem:[%s1607_s28 + $0x270] ss:$8 sps:$4 sm:$0xff]   ;;  %v1503_v25 = vld [vmem:[%s1607_s28 + $0x284] ss:$8 sps:$4 sm:$0xff]  }
  0x34   : > { %986 = vmatprep.subr.bf16.mxu1 %v1421_v30  ;;  %v1501_v26 = vld [vmem:[%s1607_s28 + $0x280] ss:$8 sps:$4 sm:$0xff]   ;;  %v1506_v27 = vld [vmem:[%s1607_s28 + $0x294] ss:$8 sps:$4 sm:$0xff]   ;;  %v1504_v28 = vld [vmem:[%s1607_s28 + $0x290] ss:$8 sps:$4 sm:$0xff]  }
  0x35   : > { %v1509_v29 = vld [vmem:[%s1607_s28 + $0x2a4] ss:$8 sps:$4 sm:$0xff]   ;;  %v1507_v30 = vld [vmem:[%s1607_s28 + $0x2a0] ss:$8 sps:$4 sm:$0xff]  }
  0x36   : > { %946 = vmatpush1.bf16.msra.mxu0 %v1423_v31  ;;  %v1512_v31 = vld [vmem:[%s1607_s28 + $0x2b4] ss:$8 sps:$4 sm:$0xff]   ;;  %v329_v52 = vld [vmem:[#allocation2] sm:$0xff] }
  0x37   : > { %987 = vmatpush1.bf16.msra.mxu1 %v1424_v32  ;;  %947 = vmatprep.subr.bf16.mxu0 %v1425_v33  ;;  %v1510_v32 = vld [vmem:[%s1607_s28 + $0x2b0] ss:$8 sps:$4 sm:$0xff]   ;;  %v1515_v33 = vld [vmem:[%s1607_s28 + $0x2c4] ss:$8 sps:$4 sm:$0xff]  }
  0x38   : > { %988 = vmatprep.subr.bf16.mxu1 %v1427_v34  ;;  %v1513_v34 = vld [vmem:[%s1607_s28 + $0x2c0] ss:$8 sps:$4 sm:$0xff]  }
  0x3a   : > { %948 = vmatpush1.bf16.msra.mxu0 %v1429_v35  ;;  %v1518_v35 = vld [vmem:[%s1607_s28 + $0x2d4] ss:$8 sps:$4 sm:$0xff]  }
  0x3b   : > { %989 = vmatpush1.bf16.msra.mxu1 %v1430_v36  ;;  %949 = vmatprep.subr.bf16.mxu0 %v1431_v37  ;;  %v1516_v36 = vld [vmem:[%s1607_s28 + $0x2d0] ss:$8 sps:$4 sm:$0xff]   ;;  %v1521_v37 = vld [vmem:[%s1607_s28 + $0x2e4] ss:$8 sps:$4 sm:$0xff]  }
  0x3c   : > { %990 = vmatprep.subr.bf16.mxu1 %v1433_v38  ;;  %v1519_v38 = vld [vmem:[%s1607_s28 + $0x2e0] ss:$8 sps:$4 sm:$0xff]  }
  0x3e   : > { %950 = vmatpush1.bf16.msra.mxu0 %v1435_v39  ;;  %v1524_v39 = vld [vmem:[%s1607_s28 + $0x2f4] ss:$8 sps:$4 sm:$0xff]  }
  0x3f   : > { %991 = vmatpush1.bf16.msra.mxu1 %v1436_v40  ;;  %951 = vmatprep.subr.bf16.mxu0 %v1437_v41  ;;  %v1522_v40 = vld [vmem:[%s1607_s28 + $0x2f0] ss:$8 sps:$4 sm:$0xff]   ;;  %v1246_v41 = vcombine.low %v1679_v9, %v1679_v9 }
  0x40   : > { %992 = vmatprep.subr.bf16.mxu1 %v1439_v42 }
  0x42   : > { %952 = vmatpush1.bf16.msra.mxu0 %v1441_v43 }
  0x43   : > { %993 = vmatpush1.bf16.msra.mxu1 %v1442_v44  ;;  %953 = vmatprep.subr.bf16.mxu0 %v1443_v45 }
  0x44   : > { %994 = vmatprep.subr.bf16.mxu1 %v1445_v46 }
  0x46   : > { %954 = vmatpush1.bf16.msra.mxu0 %v1447_v50 }
  0x47   : > { %995 = vmatpush1.bf16.msra.mxu1 %v1448_v51  ;;  %955 = vmatprep.subr.bf16.mxu0 %v1449_v53 }
  0x48   : > { %996 = vmatprep.subr.bf16.mxu1 %v1451_v54 }
  0x4a   : > { %956 = vmatpush1.bf16.msra.mxu0 %v1453_v55  ;;  %v330_v55 = vld [vmem:[#allocation2 + $0x8] sm:$0xff] }
  0x4b   : > { %997 = vmatpush1.bf16.msra.mxu1 %v1454_v56  ;;  %957 = vmatprep.subr.bf16.mxu0 %v1455_v57 }
  0x4c   : > { %998 = vmatprep.subr.bf16.mxu1 %v1457_v58 }
  0x4e   : > { %958 = vmatpush1.bf16.msra.mxu0 %v1459_v59 }
  0x4f   : > { %999 = vmatpush1.bf16.msra.mxu1 %v1460_v60  ;;  %959 = vmatprep.subr.bf16.mxu0 %v1461_v61 }
  0x50   : > { %1000 = vmatprep.subr.bf16.mxu1 %v1463_v62  ;;  %v1066_v62 = vlaneseq (!%p1344_p7) }
  0x52   : > { %960 = vmatpush1.bf16.msra.mxu0 %v1465_v63  ;;  %v1067_v63 = vshrl.u32 (!%p1344_p7), %v1066_v62, 7 }
  0x53   : > { %1001 = vmatpush1.bf16.msra.mxu1 %v1466_v0  ;;  %961 = vmatprep.subr.bf16.mxu0 %v1467_v1  ;;  %v1064_v0 = vld [vmem:[%s1736_s2] sm:$0x3] (!%p1344_p7) }
  0x54   : > { %1002 = vmatprep.subr.bf16.mxu1 %v1469_v2  ;;  %v1078_v1 = vld [vmem:[%s1737_s3] sm:$0x3] (!%p1344_p7)  ;;  %v1068_v2 = vsub.s32 (!%p1344_p7), 0, %v1067_v63 }
  0x56   : > { %962 = vmatpush1.bf16.msra.mxu0 %v1471_v3  ;;  %v1072_v3 = vsub.s32 (!%p1344_p7), 1, %v1067_v63 }
  0x57   : > { %1003 = vmatpush1.bf16.msra.mxu1 %v1472_v4  ;;  %1013 = vmatprep.subr.bf16.mxu0 %v1479_v5 }
  0x58   : > { %v1087_v9 = vrot.slane (!%p1344_p7), %v1078_v1, %v1072_v3 }
  0x59   : > { %964 = vmatmul.mubr.bf16.vlgmr.msra.gmra.mrb[0].mxu0 %v1242_v6  ;;  %v1069_v6 = vrot.slane (!%p1344_p7), %v1064_v0, %v1068_v2 }
  0x5a   : > { %1005 = vmatmul.mubr.bf16.vlgmr.msra.gmra.mrb[0].mxu1 %v1244_v7  ;;  %1014 = vmatpush1.bf16.msra.mxu0 %v1477_v8  ;;  %v1073_v7 = vrot.slane (!%p1344_p7), %v1064_v0, %v1072_v3  ;;  %v1083_v8 = vrot.slane (!%p1344_p7), %v1078_v1, %v1068_v2 }
  0x5b   : > { %1045 = vmatprep.mubr.bf16.mxu0 %v1247_v11  ;;  %1015 = vmatprep.subr.bf16.mxu0 %v1482_v10 }
  0x5e   : > { %1016 = vmatpush1.bf16.msra.mxu0 %v1480_v12 }
  0x5f   : > { %1017 = vmatprep.subr.bf16.mxu0 %v1485_v13 }
  0x62   : > { %1018 = vmatpush1.bf16.msra.mxu0 %v1483_v14 }
  0x63   : > { %1019 = vmatprep.subr.bf16.mxu0 %v1488_v15 }
  0x66   : > { %1020 = vmatpush1.bf16.msra.mxu0 %v1486_v16 }
  0x67   : > { %1021 = vmatprep.subr.bf16.mxu0 %v1491_v17 }
  0x6a   : > { %1022 = vmatpush1.bf16.msra.mxu0 %v1489_v18 }
  0x6b   : > { %1023 = vmatprep.subr.bf16.mxu0 %v1494_v19 }
  0x6e   : > { %1024 = vmatpush1.bf16.msra.mxu0 %v1492_v20 }
  0x6f   : > { %1025 = vmatprep.subr.bf16.mxu0 %v1497_v21 }
  0x72   : > { %1026 = vmatpush1.bf16.msra.mxu0 %v1495_v22 }
  0x73   : > { %1027 = vmatprep.subr.bf16.mxu0 %v1500_v23 }
  0x76   : > { %1028 = vmatpush1.bf16.msra.mxu0 %v1498_v24 }
  0x77   : > { %1029 = vmatprep.subr.bf16.mxu0 %v1503_v25 }
  0x7a   : > { %1030 = vmatpush1.bf16.msra.mxu0 %v1501_v26 }
  0x7b   : > { %1031 = vmatprep.subr.bf16.mxu0 %v1506_v27 }
  0x7e   : > { %1032 = vmatpush1.bf16.msra.mxu0 %v1504_v28 }
  0x7f   : > { %1033 = vmatprep.subr.bf16.mxu0 %v1509_v29 }
  0x82   : > { %1034 = vmatpush1.bf16.msra.mxu0 %v1507_v30 }
  0x83   : > { %1035 = vmatprep.subr.bf16.mxu0 %v1512_v31 }
  0x86   : > { %1036 = vmatpush1.bf16.msra.mxu0 %v1510_v32 }
  0x87   : > { %1037 = vmatprep.subr.bf16.mxu0 %v1515_v33 }
  0x8a   : > { %1038 = vmatpush1.bf16.msra.mxu0 %v1513_v34 }
  0x8b   : > { %1039 = vmatprep.subr.bf16.mxu0 %v1518_v35 }
  0x8e   : > { %1040 = vmatpush1.bf16.msra.mxu0 %v1516_v36 }
  0x8f   : > { %1041 = vmatprep.subr.bf16.mxu0 %v1521_v37 }
  0x92   : > { %1042 = vmatpush1.bf16.msra.mxu0 %v1519_v38 }
  0x93   : > { %1043 = vmatprep.subr.bf16.mxu0 %v1524_v39 }
  0x96   : > { %1044 = vmatpush1.bf16.msra.mxu0 %v1522_v40 }
  0x99   : > { %1046 = vmatmul.mubr.bf16.vlgmr.msra.gmra.mrb[4].mxu0 %v1246_v41 }
 0x12c   : > { %v965_v42 = vpop.f32.mrb[0].mxu0 }
 0x12d   : > { %v1006_v43 = vpop.f32.mrb[0].mxu1  ;;  %v967_v45 = vpop.f32.mrb[1].mxu0 }
 0x12e   : > { %v1007_v44 = vadd.f32 %v1006_v43, %v965_v42  ;;  %v1008_v46 = vpop.f32.mrb[1].mxu1  ;;  %v969_v48 = vpop.f32.mrb[2].mxu0 }
 0x12f   : > { %v1009_v47 = vadd.f32 %v1008_v46, %v967_v45  ;;  %v1010_v49 = vpop.f32.mrb[2].mxu1  ;;  %v970_v50 = vpop.f32.mrb[3].mxu0 }
 0x130   : > { %v1011_v51 = vpop.f32.mrb[3].mxu1 }
 0x16c   : > { %v1047_v53 = vpop.f32.mrb[4].mxu0  ;;  %1061 = sbr.rel (%p1344_p7) target bundleno = 387 (0x183), region = 44 }
 0x16d   : > { %v1048_v54 = vadd.f32 %v1047_v53, %v1007_v44  ;;  %v1049_v56 = vpop.f32.mrb[5].mxu0 }
 0x16e   : > { %v1050_v57 = vadd.f32 %v1049_v56, %v1009_v47  ;;  %v1051_v58 = vpop.f32.mrb[6].mxu0 }
 0x16f   : > { %v1054_v59 = vadd.f32 %v1048_v54, %v329_v52  ;;  %v1052_v60 = vpop.f32.mrb[7].mxu0 }
 0x170   : > { %v1055_v61 = vadd.f32 %v1050_v57, %v330_v55 }
 0x171   : > { %1056 = vst [vmem:[#allocation2] sm:$0xff] %v1054_v59 }
 0x172   : > { %1057 = vst [vmem:[#allocation2 + $0x8] sm:$0xff] %v1055_v61 }
 0x178   : > { %v1062_v4 = vld [vmem:[#allocation2] sm:$0xff] }
 0x179   : > { %v1063_v5 = vld [vmem:[#allocation2 + $0x8] sm:$0xff]  ;;  %v1076_v10 = vmul.f32 %v1069_v6, %v1062_v4 }
 0x17a   : > { %v1077_v11 = vmul.f32 %v1073_v7, %v1063_v5 }
 0x17b   : > { %v1090_v12 = vadd.f32 %v1083_v8, %v1076_v10 }
 0x17c   : > { %v1091_v13 = vadd.f32 %v1087_v9, %v1077_v11 }
 0x17d   : > { %v1092_v14 = vmax.f32 %v1090_v12, 0.0 }
 0x17e   : > { %v1093_v15 = vmax.f32 %v1091_v13, 0.0 }
 0x180   : > { %v1351_v16 = vpack.c.bf16 %v1093_v15, %v1092_v14 }
 0x182   : > { %1102 = vst [vmem:[%s1738_s4] sm:$0xff] %v1351_v16 }
 0x183 PF: > { %s14_s17 = sadd.s32 1, %s1549_s17   ;;  %s1739_s15 = smov %s1545_s16 }
 0x184   : > { %p11_p8 = scmp.ge.s32.totalorder %s14_s17, 5   ;;  %s1740_s16 = smov %s1742_s18 }
 0x186   :  { %13 = sbr.rel (!%p11_p8) target bundleno = 2 (0x2), region = 83 }

// kernel: _lambda_.38
= control target key start
LH: loop header
LB: loop body
LE: loop exit
PB: predicated region body
PF: predicated region fallthrough
CT: control target
= control target key end

     0   :  { %s2103_s15 = smov 0   ;;  %s2105_s16 = smov 0   ;;  %s2553_s0 = inlined_call_operand.vmem [shape: bf16[2,2304], index: 0, kind: input, shape index: {}]   ;;  %s2554_s1 = inlined_call_operand.vmem [shape: bf16[2304,512], index: 1, kind: input, shape index: {}]   ;;  %s2555_s2 = inlined_call_operand.vmem [shape: f32[1,512], index: 2, kind: input, shape index: {}]   ;;  %s2556_s3 = inlined_call_operand.vmem [shape: f32[1,512], index: 3, kind: input, shape index: {}]   ;;  %s2557_s4 = inlined_call_operand.vmem [shape: bf16[2,512], index: 4, kind: output, shape index: {}]  }
   0x1   :  { %s2107_s17 = smov 0   ;;  %s2109_s18 = smov 0  }
   0x2   :  { %s2111_s19 = smov 0   ;;  %s2113_s20 = smov 0  }
   0x3   :  { %s2115_s21 = smov 0  }
   0x4 LB: > { %s26_s22 = sadd.s32 1, %s2065_s19  ;;  %s29_s23 = sadd.s32 1, %s2069_s20  ;;  %s2073_s21 = sphi %s2115_s21, %s14_s21   ;;  %s2069_s20 = sphi %s2113_s20, %s2563_s20   ;;  %s2065_s19 = sphi %s2111_s19, %s2562_s19   ;;  %s2061_s18 = sphi %s2109_s18, %s2561_s18   ;;  %s2057_s17 = sphi %s2107_s17, %s2560_s17   ;;  %s2053_s16 = sphi %s2105_s16, %s2559_s16   ;;  %s2049_s15 = sphi %s2103_s15, %s2558_s15  }
   0x5   : > { %p27_p0 = scmp.ge.s32.totalorder %s26_s22, 3  ;;  %p77_p1 = scmp.ne.s32.totalorder %s2053_s16, %s2049_s15 }
   0x6   : > { %p78_p2 = scmp.eq.s32.totalorder %s2073_s21, 0  ;;  %s70_s27 = sadd.s32 1, %s2053_s16 }
   0x7   : > { %s2565_s22 = smov (%p27_p0, %s26_s22), 0  ;;  %s2567_s23 = smov (!%p27_p0, %s29_s23), %s2069_s20 }
   0x8   : > { %p79_p3 = por %p78_p2, %p77_p1  ;;  %p31_p4 = scmp.ge.s32.totalorder %s2567_s23, 2 }
   0x9   : > { %s65_s24 = ssub.s32 %s2065_s19, %s2565_s22  ;;  %p1696_p6 = scmp.ge.s32.totalorder %s2073_s21, 6 }
   0xa   : > { %s2569_s23 = smov (%p31_p4, %s2567_s23), 0 }
   0xb   : > { %s66_s25 = ssub.s32 %s2069_s20, %s2569_s23  ;;  %183 = sbr.rel (%p1696_p6) target bundleno = 74 (0x4a), region = 16 }
   0xc   : > { %s67_s26 = sor.u32 %s66_s25, %s65_s24 }
   0xd   : > { %p68_p5 = scmp.eq.s32.totalorder %s67_s26, 0 }
   0xf   : > { %s2154_s28 = scalar_select %p68_p5, %s2053_s16, %s70_s27  }
  0x12   : > { %198 = sbr.rel (!%p79_p3) target bundleno = 74 (0x4a), region = 24  ;;  %s200_s29 = sand.u32 (%p79_p3), 1, %s2053_s16  }
  0x13   : > { %s1813_s30 = smul.u32 (%p79_p3), 768, %s200_s29  ;;  %s1697_s5 = sshll.u32 (%p79_p3), %s2069_s20, 1 }
  0x14   : > { %s1806_s6 = smul.u32 (%p79_p3), 384, %s2065_s19 }
  0x15   : > { %s2168_s12 = scalar_lea.vmem (%p79_p3), [#allocation3], %s1813_s30 }
  0x16   : > { %s206_s7 = sadd.s32 (%p79_p3), %s1806_s6, %s1697_s5 }
  0x17   : > { %s1699_s8 = sshll.u32 (%p79_p3), %s206_s7, 2 }
  0x18   : > { %s2163_s11 = scalar_lea.vmem (%p79_p3), %s2554_s1, %s1699_s8 }
  0x19   : > { %v426_v0 = vld [vmem:[%s2163_s11] sm:$0xff]  ;;  %v428_v1 = vld [vmem:[%s2163_s11 + $0x10] sm:$0xff] }
  0x1a   : > { %v430_v2 = vld [vmem:[%s2163_s11 + $0x20] sm:$0xff]  ;;  %427 = vst [vmem:[%s2168_s12] sm:$0xff] %v426_v0  ;;  %429 = vst [vmem:[%s2168_s12 + $0x8] sm:$0xff] %v428_v1  ;;  %v432_v3 = vld [vmem:[%s2163_s11 + $0x30] sm:$0xff] }
  0x1b   : > { %431 = vst [vmem:[%s2168_s12 + $0x10] sm:$0xff] %v430_v2  ;;  %v434_v4 = vld [vmem:[%s2163_s11 + $0x40] sm:$0xff]  ;;  %v436_v5 = vld [vmem:[%s2163_s11 + $0x50] sm:$0xff]  ;;  %433 = vst [vmem:[%s2168_s12 + $0x18] sm:$0xff] %v432_v3 }
  0x1c   : > { %435 = vst [vmem:[%s2168_s12 + $0x20] sm:$0xff] %v434_v4  ;;  %437 = vst [vmem:[%s2168_s12 + $0x28] sm:$0xff] %v436_v5  ;;  %v438_v6 = vld [vmem:[%s2163_s11 + $0x60] sm:$0xff]  ;;  %v440_v7 = vld [vmem:[%s2163_s11 + $0x70] sm:$0xff] }
  0x1d   : > { %v442_v8 = vld [vmem:[%s2163_s11 + $0x80] sm:$0xff]  ;;  %439 = vst [vmem:[%s2168_s12 + $0x30] sm:$0xff] %v438_v6  ;;  %441 = vst [vmem:[%s2168_s12 + $0x38] sm:$0xff] %v440_v7  ;;  %v444_v9 = vld [vmem:[%s2163_s11 + $0x90] sm:$0xff] }
  0x1e   : > { %443 = vst [vmem:[%s2168_s12 + $0x40] sm:$0xff] %v442_v8  ;;  %v446_v10 = vld [vmem:[%s2163_s11 + $0xa0] sm:$0xff]  ;;  %v448_v11 = vld [vmem:[%s2163_s11 + $0xb0] sm:$0xff]  ;;  %445 = vst [vmem:[%s2168_s12 + $0x48] sm:$0xff] %v444_v9 }
  0x1f   : > { %447 = vst [vmem:[%s2168_s12 + $0x50] sm:$0xff] %v446_v10  ;;  %449 = vst [vmem:[%s2168_s12 + $0x58] sm:$0xff] %v448_v11  ;;  %v450_v12 = vld [vmem:[%s2163_s11 + $0xc0] sm:$0xff]  ;;  %v452_v13 = vld [vmem:[%s2163_s11 + $0xd0] sm:$0xff] }
  0x20   : > { %v454_v14 = vld [vmem:[%s2163_s11 + $0xe0] sm:$0xff]  ;;  %451 = vst [vmem:[%s2168_s12 + $0x60] sm:$0xff] %v450_v12  ;;  %453 = vst [vmem:[%s2168_s12 + $0x68] sm:$0xff] %v452_v13  ;;  %v456_v15 = vld [vmem:[%s2163_s11 + $0xf0] sm:$0xff] }
  0x21   : > { %455 = vst [vmem:[%s2168_s12 + $0x70] sm:$0xff] %v454_v14  ;;  %v458_v16 = vld [vmem:[%s2163_s11 + $0x100] sm:$0xff]  ;;  %v460_v17 = vld [vmem:[%s2163_s11 + $0x110] sm:$0xff]  ;;  %457 = vst [vmem:[%s2168_s12 + $0x78] sm:$0xff] %v456_v15 }
  0x22   : > { %459 = vst [vmem:[%s2168_s12 + $0x80] sm:$0xff] %v458_v16  ;;  %461 = vst [vmem:[%s2168_s12 + $0x88] sm:$0xff] %v460_v17  ;;  %v462_v18 = vld [vmem:[%s2163_s11 + $0x120] sm:$0xff]  ;;  %v464_v19 = vld [vmem:[%s2163_s11 + $0x130] sm:$0xff] }
  0x23   : > { %v466_v20 = vld [vmem:[%s2163_s11 + $0x140] sm:$0xff]  ;;  %463 = vst [vmem:[%s2168_s12 + $0x90] sm:$0xff] %v462_v18  ;;  %465 = vst [vmem:[%s2168_s12 + $0x98] sm:$0xff] %v464_v19  ;;  %v468_v21 = vld [vmem:[%s2163_s11 + $0x150] sm:$0xff] }
  0x24   : > { %467 = vst [vmem:[%s2168_s12 + $0xa0] sm:$0xff] %v466_v20  ;;  %v470_v22 = vld [vmem:[%s2163_s11 + $0x160] sm:$0xff]  ;;  %v472_v23 = vld [vmem:[%s2163_s11 + $0x170] sm:$0xff]  ;;  %469 = vst [vmem:[%s2168_s12 + $0xa8] sm:$0xff] %v468_v21 }
  0x25   : > { %471 = vst [vmem:[%s2168_s12 + $0xb0] sm:$0xff] %v470_v22  ;;  %473 = vst [vmem:[%s2168_s12 + $0xb8] sm:$0xff] %v472_v23  ;;  %v474_v24 = vld [vmem:[%s2163_s11 + $0x180] sm:$0xff]  ;;  %v476_v25 = vld [vmem:[%s2163_s11 + $0x190] sm:$0xff] }
  0x26   : > { %v478_v26 = vld [vmem:[%s2163_s11 + $0x1a0] sm:$0xff]  ;;  %475 = vst [vmem:[%s2168_s12 + $0xc0] sm:$0xff] %v474_v24  ;;  %477 = vst [vmem:[%s2168_s12 + $0xc8] sm:$0xff] %v476_v25  ;;  %v480_v27 = vld [vmem:[%s2163_s11 + $0x1b0] sm:$0xff] }
  0x27   : > { %479 = vst [vmem:[%s2168_s12 + $0xd0] sm:$0xff] %v478_v26  ;;  %v482_v28 = vld [vmem:[%s2163_s11 + $0x1c0] sm:$0xff]  ;;  %v484_v29 = vld [vmem:[%s2163_s11 + $0x1d0] sm:$0xff]  ;;  %481 = vst [vmem:[%s2168_s12 + $0xd8] sm:$0xff] %v480_v27 }
  0x28   : > { %483 = vst [vmem:[%s2168_s12 + $0xe0] sm:$0xff] %v482_v28  ;;  %485 = vst [vmem:[%s2168_s12 + $0xe8] sm:$0xff] %v484_v29  ;;  %v486_v30 = vld [vmem:[%s2163_s11 + $0x1e0] sm:$0xff]  ;;  %v488_v31 = vld [vmem:[%s2163_s11 + $0x1f0] sm:$0xff] }
  0x29   : > { %v490_v32 = vld [vmem:[%s2163_s11 + $0x200] sm:$0xff]  ;;  %487 = vst [vmem:[%s2168_s12 + $0xf0] sm:$0xff] %v486_v30  ;;  %489 = vst [vmem:[%s2168_s12 + $0xf8] sm:$0xff] %v488_v31  ;;  %v492_v33 = vld [vmem:[%s2163_s11 + $0x210] sm:$0xff] }
  0x2a   : > { %491 = vst [vmem:[%s2168_s12 + $0x100] sm:$0xff] %v490_v32  ;;  %v494_v34 = vld [vmem:[%s2163_s11 + $0x220] sm:$0xff]  ;;  %v496_v35 = vld [vmem:[%s2163_s11 + $0x230] sm:$0xff]  ;;  %493 = vst [vmem:[%s2168_s12 + $0x108] sm:$0xff] %v492_v33 }
  0x2b   : > { %495 = vst [vmem:[%s2168_s12 + $0x110] sm:$0xff] %v494_v34  ;;  %497 = vst [vmem:[%s2168_s12 + $0x118] sm:$0xff] %v496_v35  ;;  %v498_v36 = vld [vmem:[%s2163_s11 + $0x240] sm:$0xff]  ;;  %v500_v37 = vld [vmem:[%s2163_s11 + $0x250] sm:$0xff] }
  0x2c   : > { %v502_v38 = vld [vmem:[%s2163_s11 + $0x260] sm:$0xff]  ;;  %499 = vst [vmem:[%s2168_s12 + $0x120] sm:$0xff] %v498_v36  ;;  %501 = vst [vmem:[%s2168_s12 + $0x128] sm:$0xff] %v500_v37  ;;  %v504_v39 = vld [vmem:[%s2163_s11 + $0x270] sm:$0xff] }
  0x2d   : > { %503 = vst [vmem:[%s2168_s12 + $0x130] sm:$0xff] %v502_v38  ;;  %v506_v40 = vld [vmem:[%s2163_s11 + $0x280] sm:$0xff]  ;;  %v508_v41 = vld [vmem:[%s2163_s11 + $0x290] sm:$0xff]  ;;  %505 = vst [vmem:[%s2168_s12 + $0x138] sm:$0xff] %v504_v39 }
  0x2e   : > { %507 = vst [vmem:[%s2168_s12 + $0x140] sm:$0xff] %v506_v40  ;;  %509 = vst [vmem:[%s2168_s12 + $0x148] sm:$0xff] %v508_v41  ;;  %v510_v42 = vld [vmem:[%s2163_s11 + $0x2a0] sm:$0xff]  ;;  %v512_v43 = vld [vmem:[%s2163_s11 + $0x2b0] sm:$0xff] }
  0x2f   : > { %v514_v44 = vld [vmem:[%s2163_s11 + $0x2c0] sm:$0xff]  ;;  %511 = vst [vmem:[%s2168_s12 + $0x150] sm:$0xff] %v510_v42  ;;  %513 = vst [vmem:[%s2168_s12 + $0x158] sm:$0xff] %v512_v43  ;;  %v516_v45 = vld [vmem:[%s2163_s11 + $0x2d0] sm:$0xff] }
  0x30   : > { %515 = vst [vmem:[%s2168_s12 + $0x160] sm:$0xff] %v514_v44  ;;  %v518_v46 = vld [vmem:[%s2163_s11 + $0x2e0] sm:$0xff]  ;;  %v520_v47 = vld [vmem:[%s2163_s11 + $0x2f0] sm:$0xff]  ;;  %517 = vst [vmem:[%s2168_s12 + $0x168] sm:$0xff] %v516_v45 }
  0x31   : > { %519 = vst [vmem:[%s2168_s12 + $0x170] sm:$0xff] %v518_v46  ;;  %521 = vst [vmem:[%s2168_s12 + $0x178] sm:$0xff] %v520_v47  ;;  %v522_v48 = vld [vmem:[%s2163_s11 + $0x300] sm:$0xff]  ;;  %v524_v49 = vld [vmem:[%s2163_s11 + $0x310] sm:$0xff] }
  0x32   : > { %v526_v50 = vld [vmem:[%s2163_s11 + $0x320] sm:$0xff]  ;;  %523 = vst [vmem:[%s2168_s12 + $0x180] sm:$0xff] %v522_v48  ;;  %525 = vst [vmem:[%s2168_s12 + $0x188] sm:$0xff] %v524_v49  ;;  %v528_v51 = vld [vmem:[%s2163_s11 + $0x330] sm:$0xff] }
  0x33   : > { %527 = vst [vmem:[%s2168_s12 + $0x190] sm:$0xff] %v526_v50  ;;  %v530_v52 = vld [vmem:[%s2163_s11 + $0x340] sm:$0xff]  ;;  %v532_v53 = vld [vmem:[%s2163_s11 + $0x350] sm:$0xff]  ;;  %529 = vst [vmem:[%s2168_s12 + $0x198] sm:$0xff] %v528_v51 }
  0x34   : > { %531 = vst [vmem:[%s2168_s12 + $0x1a0] sm:$0xff] %v530_v52  ;;  %533 = vst [vmem:[%s2168_s12 + $0x1a8] sm:$0xff] %v532_v53  ;;  %v534_v54 = vld [vmem:[%s2163_s11 + $0x360] sm:$0xff]  ;;  %v536_v55 = vld [vmem:[%s2163_s11 + $0x370] sm:$0xff] }
  0x35   : > { %v538_v56 = vld [vmem:[%s2163_s11 + $0x380] sm:$0xff]  ;;  %535 = vst [vmem:[%s2168_s12 + $0x1b0] sm:$0xff] %v534_v54  ;;  %537 = vst [vmem:[%s2168_s12 + $0x1b8] sm:$0xff] %v536_v55  ;;  %v540_v57 = vld [vmem:[%s2163_s11 + $0x390] sm:$0xff] }
  0x36   : > { %539 = vst [vmem:[%s2168_s12 + $0x1c0] sm:$0xff] %v538_v56  ;;  %v542_v58 = vld [vmem:[%s2163_s11 + $0x3a0] sm:$0xff]  ;;  %v544_v59 = vld [vmem:[%s2163_s11 + $0x3b0] sm:$0xff]  ;;  %541 = vst [vmem:[%s2168_s12 + $0x1c8] sm:$0xff] %v540_v57 }
  0x37   : > { %543 = vst [vmem:[%s2168_s12 + $0x1d0] sm:$0xff] %v542_v58  ;;  %545 = vst [vmem:[%s2168_s12 + $0x1d8] sm:$0xff] %v544_v59  ;;  %v546_v60 = vld [vmem:[%s2163_s11 + $0x3c0] sm:$0xff]  ;;  %v548_v61 = vld [vmem:[%s2163_s11 + $0x3d0] sm:$0xff] }
  0x38   : > { %v550_v62 = vld [vmem:[%s2163_s11 + $0x3e0] sm:$0xff]  ;;  %547 = vst [vmem:[%s2168_s12 + $0x1e0] sm:$0xff] %v546_v60  ;;  %549 = vst [vmem:[%s2168_s12 + $0x1e8] sm:$0xff] %v548_v61  ;;  %v552_v63 = vld [vmem:[%s2163_s11 + $0x3f0] sm:$0xff] }
  0x39   : > { %551 = vst [vmem:[%s2168_s12 + $0x1f0] sm:$0xff] %v550_v62  ;;  %v554_v0 = vld [vmem:[%s2163_s11 + $0x400] sm:$0xff]  ;;  %v556_v1 = vld [vmem:[%s2163_s11 + $0x410] sm:$0xff]  ;;  %553 = vst [vmem:[%s2168_s12 + $0x1f8] sm:$0xff] %v552_v63 }
  0x3a   : > { %555 = vst [vmem:[%s2168_s12 + $0x200] sm:$0xff] %v554_v0  ;;  %557 = vst [vmem:[%s2168_s12 + $0x208] sm:$0xff] %v556_v1  ;;  %v558_v2 = vld [vmem:[%s2163_s11 + $0x420] sm:$0xff]  ;;  %v560_v3 = vld [vmem:[%s2163_s11 + $0x430] sm:$0xff] }
  0x3b   : > { %v562_v4 = vld [vmem:[%s2163_s11 + $0x440] sm:$0xff]  ;;  %559 = vst [vmem:[%s2168_s12 + $0x210] sm:$0xff] %v558_v2  ;;  %561 = vst [vmem:[%s2168_s12 + $0x218] sm:$0xff] %v560_v3  ;;  %v564_v5 = vld [vmem:[%s2163_s11 + $0x450] sm:$0xff] }
  0x3c   : > { %563 = vst [vmem:[%s2168_s12 + $0x220] sm:$0xff] %v562_v4  ;;  %v566_v6 = vld [vmem:[%s2163_s11 + $0x460] sm:$0xff]  ;;  %v568_v7 = vld [vmem:[%s2163_s11 + $0x470] sm:$0xff]  ;;  %565 = vst [vmem:[%s2168_s12 + $0x228] sm:$0xff] %v564_v5 }
  0x3d   : > { %567 = vst [vmem:[%s2168_s12 + $0x230] sm:$0xff] %v566_v6  ;;  %569 = vst [vmem:[%s2168_s12 + $0x238] sm:$0xff] %v568_v7  ;;  %v570_v8 = vld [vmem:[%s2163_s11 + $0x480] sm:$0xff]  ;;  %v572_v9 = vld [vmem:[%s2163_s11 + $0x490] sm:$0xff] }
  0x3e   : > { %v574_v10 = vld [vmem:[%s2163_s11 + $0x4a0] sm:$0xff]  ;;  %571 = vst [vmem:[%s2168_s12 + $0x240] sm:$0xff] %v570_v8  ;;  %573 = vst [vmem:[%s2168_s12 + $0x248] sm:$0xff] %v572_v9  ;;  %v576_v11 = vld [vmem:[%s2163_s11 + $0x4b0] sm:$0xff] }
  0x3f   : > { %575 = vst [vmem:[%s2168_s12 + $0x250] sm:$0xff] %v574_v10  ;;  %v578_v12 = vld [vmem:[%s2163_s11 + $0x4c0] sm:$0xff]  ;;  %v580_v13 = vld [vmem:[%s2163_s11 + $0x4d0] sm:$0xff]  ;;  %577 = vst [vmem:[%s2168_s12 + $0x258] sm:$0xff] %v576_v11 }
  0x40   : > { %579 = vst [vmem:[%s2168_s12 + $0x260] sm:$0xff] %v578_v12  ;;  %581 = vst [vmem:[%s2168_s12 + $0x268] sm:$0xff] %v580_v13  ;;  %v582_v14 = vld [vmem:[%s2163_s11 + $0x4e0] sm:$0xff]  ;;  %v584_v15 = vld [vmem:[%s2163_s11 + $0x4f0] sm:$0xff] }
  0x41   : > { %v586_v16 = vld [vmem:[%s2163_s11 + $0x500] sm:$0xff]  ;;  %583 = vst [vmem:[%s2168_s12 + $0x270] sm:$0xff] %v582_v14  ;;  %585 = vst [vmem:[%s2168_s12 + $0x278] sm:$0xff] %v584_v15  ;;  %v588_v17 = vld [vmem:[%s2163_s11 + $0x510] sm:$0xff] }
  0x42   : > { %587 = vst [vmem:[%s2168_s12 + $0x280] sm:$0xff] %v586_v16  ;;  %v590_v18 = vld [vmem:[%s2163_s11 + $0x520] sm:$0xff]  ;;  %v592_v19 = vld [vmem:[%s2163_s11 + $0x530] sm:$0xff]  ;;  %589 = vst [vmem:[%s2168_s12 + $0x288] sm:$0xff] %v588_v17 }
  0x43   : > { %591 = vst [vmem:[%s2168_s12 + $0x290] sm:$0xff] %v590_v18  ;;  %593 = vst [vmem:[%s2168_s12 + $0x298] sm:$0xff] %v592_v19  ;;  %v594_v20 = vld [vmem:[%s2163_s11 + $0x540] sm:$0xff]  ;;  %v596_v21 = vld [vmem:[%s2163_s11 + $0x550] sm:$0xff] }
  0x44   : > { %v598_v22 = vld [vmem:[%s2163_s11 + $0x560] sm:$0xff]  ;;  %595 = vst [vmem:[%s2168_s12 + $0x2a0] sm:$0xff] %v594_v20  ;;  %597 = vst [vmem:[%s2168_s12 + $0x2a8] sm:$0xff] %v596_v21  ;;  %v600_v23 = vld [vmem:[%s2163_s11 + $0x570] sm:$0xff] }
  0x45   : > { %599 = vst [vmem:[%s2168_s12 + $0x2b0] sm:$0xff] %v598_v22  ;;  %v602_v24 = vld [vmem:[%s2163_s11 + $0x580] sm:$0xff]  ;;  %v604_v25 = vld [vmem:[%s2163_s11 + $0x590] sm:$0xff]  ;;  %601 = vst [vmem:[%s2168_s12 + $0x2b8] sm:$0xff] %v600_v23 }
  0x46   : > { %603 = vst [vmem:[%s2168_s12 + $0x2c0] sm:$0xff] %v602_v24  ;;  %605 = vst [vmem:[%s2168_s12 + $0x2c8] sm:$0xff] %v604_v25  ;;  %v606_v26 = vld [vmem:[%s2163_s11 + $0x5a0] sm:$0xff]  ;;  %v608_v27 = vld [vmem:[%s2163_s11 + $0x5b0] sm:$0xff] }
  0x47   : > { %v610_v28 = vld [vmem:[%s2163_s11 + $0x5c0] sm:$0xff]  ;;  %607 = vst [vmem:[%s2168_s12 + $0x2d0] sm:$0xff] %v606_v26  ;;  %609 = vst [vmem:[%s2168_s12 + $0x2d8] sm:$0xff] %v608_v27  ;;  %v612_v29 = vld [vmem:[%s2163_s11 + $0x5d0] sm:$0xff] }
  0x48   : > { %611 = vst [vmem:[%s2168_s12 + $0x2e0] sm:$0xff] %v610_v28  ;;  %v614_v30 = vld [vmem:[%s2163_s11 + $0x5e0] sm:$0xff]  ;;  %v616_v31 = vld [vmem:[%s2163_s11 + $0x5f0] sm:$0xff]  ;;  %613 = vst [vmem:[%s2168_s12 + $0x2e8] sm:$0xff] %v612_v29 }
  0x49   : > { %615 = vst [vmem:[%s2168_s12 + $0x2f0] sm:$0xff] %v614_v30  ;;  %617 = vst [vmem:[%s2168_s12 + $0x2f8] sm:$0xff] %v616_v31 }
  0x4a PF: > { %p1700_p7 = scmp.ge.s32.totalorder %s2073_s21, 1  ;;  %p638_p8 = scmp.lt.s32.totalorder %s2073_s21, 7 }
  0x4c   : > { %p639_p9 = pnand %p1700_p7, %p638_p8 }
  0x4d   : > { %s645_s13 = sand.u32 (!%p639_p9), 1, %s2049_s15   ;;  %s689_s14 = smul.u32 (!%p639_p9), 6, %s2057_s17 }
  0x4e   : > { %642 = sbr.rel (%p639_p9) target bundleno = 468 (0x1d4), region = 70  ;;  %s1701_s25 = sshll.u32 (!%p639_p9), %s2061_s18, 1 }
  0x4f   : > { %s1814_s24 = smul.u32 (!%p639_p9), 768, %s645_s13  ;;  %p692_p10 = scmp.lt.s32.totalorder (!%p639_p9), %s689_s14, 17 }
  0x50   : > { %p701_p11 = scmp.lt.s32.totalorder (!%p639_p9), %s1701_s25, 3  ;;  %p1704_p12 = scmp.ne.s32.totalorder (!%p639_p9), %s2057_s17, 0 }
  0x51   : > { %s2384_s11 = scalar_lea.vmem (!%p639_p9), [#allocation3], %s1814_s24 }
  0x55   : > { %s2571_s14 = smov (!%p692_p10, %s689_s14), 17  ;;  %s2573_s25 = smov (!%p701_p11, %s1701_s25), 3 }
  0x56   : > { %s696_s29 = scalar_lea.vmem %s2553_s0, %s2571_s14  ;;  %s703_s15 = scalar_lea.vmem %s2555_s2, %s2573_s25  ;;  %v2075_v32 = vmov (!%p1704_p12), 0.0  }
  0x57   : > { %s708_s7 = scalar_lea.vmem %s2556_s3, %s2573_s25  ;;  %s717_s10 = scalar_lea.vmem %s2557_s4, %s2573_s25  ;;  %723 = vst [vmem:[#allocation2] sm:$0xf] (!%p1704_p12), %v2075_v32 }
  0x58   : > { %722 = sbr.rel (%p1704_p12) target bundleno = 95 (0x5f), region = 78 }
  0x5f PF: > { %v1874_v33 = vld [vmem:[%s2384_s11 + $0x104] ss:$8 sps:$4 sm:$0xff]   ;;  %v1876_v34 = vld [vmem:[%s2384_s11 + $0x100] ss:$8 sps:$4 sm:$0xff]   ;;  %v1877_v35 = vld [vmem:[%s2384_s11 + $0x114] ss:$8 sps:$4 sm:$0xff]   ;;  %v827_v43 = vlaneseq }
  0x60   : > { %1397 = vmatprep.subr.bf16.mxu0 %v1874_v33  ;;  %v1879_v36 = vld [vmem:[%s2384_s11 + $0x110] ss:$8 sps:$4 sm:$0xff]   ;;  %v1880_v37 = vld [vmem:[%s2384_s11 + $0x124] ss:$8 sps:$4 sm:$0xff]   ;;  %v1882_v38 = vld [vmem:[%s2384_s11 + $0x120] ss:$8 sps:$4 sm:$0xff]  }
  0x61   : > { %1398 = vmatpush1.bf16.msra.mxu0 %v1876_v34  ;;  %v1883_v39 = vld [vmem:[%s2384_s11 + $0x134] ss:$8 sps:$4 sm:$0xff]   ;;  %v1885_v40 = vld [vmem:[%s2384_s11 + $0x130] ss:$8 sps:$4 sm:$0xff]   ;;  %v2076_v41 = vmov 1966171168  }
  0x62   : > { %1399 = vmatprep.subr.bf16.mxu0 %v1877_v35  ;;  %v825_v42 = vunpack.c.l.s4 %v2076_v41  ;;  %v1886_v44 = vld [vmem:[%s2384_s11 + $0x144] ss:$8 sps:$4 sm:$0xff]   ;;  %v1888_v45 = vld [vmem:[%s2384_s11 + $0x140] ss:$8 sps:$4 sm:$0xff]   ;;  %v2397_v47 = vshrl.u32 %v827_v43, 7  ;;  %p1801_p13 = scmp.ne.s32.totalorder %s2057_s17, 2 }
  0x63   : > { %v1889_v48 = vld [vmem:[%s2384_s11 + $0x154] ss:$8 sps:$4 sm:$0xff]   ;;  %v1891_v49 = vld [vmem:[%s2384_s11 + $0x150] ss:$8 sps:$4 sm:$0xff]   ;;  %v1892_v51 = vld [vmem:[%s2384_s11 + $0x164] ss:$8 sps:$4 sm:$0xff]  }
  0x64   : > { %v826_v46 = vunpack.c.0.s8 %v825_v42  ;;  %v1921_v52 = vld [vmem:[%s2384_s11 + $0x4] ss:$8 sps:$4 sm:$0xff]   ;;  %v1924_v53 = vld [vmem:[%s2384_s11] ss:$8 sps:$4 sm:$0xff]   ;;  %v1895_v58 = vld [vmem:[%s2384_s11 + $0x174] ss:$8 sps:$4 sm:$0xff]  }
  0x65   : > { %1400 = vmatpush1.bf16.msra.mxu0 %v1879_v36  ;;  %v725_v54 = vld [vmem:[%s696_s29] sm:$0x3f]  ;;  %1356 = vmatprep.subr.bf16.mxu1 %v1921_v52  ;;  %v1931_v61 = vld [vmem:[%s2384_s11 + $0x10] ss:$8 sps:$4 sm:$0xff]   ;;  %v1898_v63 = vld [vmem:[%s2384_s11 + $0x184] ss:$8 sps:$4 sm:$0xff]  }
  0x66   : > { %1401 = vmatprep.subr.bf16.mxu0 %v1880_v37  ;;  %v2402_v50 = vsub.s32 %v826_v46, %v2397_v47  ;;  %v1894_v55 = vld [vmem:[%s2384_s11 + $0x160] ss:$8 sps:$4 sm:$0xff]   ;;  %v823_v56 = vcombine.high %v725_v54, %v725_v54  ;;  %1357 = vmatpush1.bf16.msra.mxu1 %v1924_v53  ;;  %v1929_v60 = vld [vmem:[%s2384_s11 + $0x14] ss:$8 sps:$4 sm:$0xff]   ;;  %v1897_v62 = vld [vmem:[%s2384_s11 + $0x170] ss:$8 sps:$4 sm:$0xff]  }
  0x67   : > { %1358 = vmatprep.subr.bf16.mxu1 %v1929_v60  ;;  %v1935_v2 = vld [vmem:[%s2384_s11 + $0x24] ss:$8 sps:$4 sm:$0xff]   ;;  %v1937_v3 = vld [vmem:[%s2384_s11 + $0x20] ss:$8 sps:$4 sm:$0xff]   ;;  %v1941_v7 = vld [vmem:[%s2384_s11 + $0x34] ss:$8 sps:$4 sm:$0xff]  }
  0x68   : > { %v2414_v57 = vrot.slane %v725_v54, %v2402_v50  ;;  %v2424_v0 = vrot.slane %v823_v56, %v2402_v50  ;;  %v1900_v6 = vld [vmem:[%s2384_s11 + $0x180] ss:$8 sps:$4 sm:$0xff]   ;;  %v1901_v8 = vld [vmem:[%s2384_s11 + $0x194] ss:$8 sps:$4 sm:$0xff]   ;;  %v1943_v9 = vld [vmem:[%s2384_s11 + $0x30] ss:$8 sps:$4 sm:$0xff]  }
  0x69   : > { %1402 = vmatpush1.bf16.msra.mxu0 %v1882_v38  ;;  %v1947_v10 = vld [vmem:[%s2384_s11 + $0x44] ss:$8 sps:$4 sm:$0xff]   ;;  %v1903_v11 = vld [vmem:[%s2384_s11 + $0x190] ss:$8 sps:$4 sm:$0xff]   ;;  %v1949_v13 = vld [vmem:[%s2384_s11 + $0x40] ss:$8 sps:$4 sm:$0xff]  }
  0x6a   : > { %1403 = vmatprep.subr.bf16.mxu0 %v1883_v39  ;;  %v838_v59 = vcombine.high %v2414_v57, %v2414_v57  ;;  %1359 = vmatpush1.bf16.msra.mxu1 %v1931_v61  ;;  %v853_v4 = vrot.slane %v2424_v0, %v2402_v50  ;;  %v1904_v12 = vld [vmem:[%s2384_s11 + $0x1a4] ss:$8 sps:$4 sm:$0xff]   ;;  %v1953_v14 = vld [vmem:[%s2384_s11 + $0x54] ss:$8 sps:$4 sm:$0xff]   ;;  %v1906_v15 = vld [vmem:[%s2384_s11 + $0x1a0] ss:$8 sps:$4 sm:$0xff]   ;;  %v846_v36 = vrot.slane %v2414_v57, %v2402_v50 }
  0x6b   : > { %1360 = vmatprep.subr.bf16.mxu1 %v1935_v2  ;;  %v1907_v16 = vld [vmem:[%s2384_s11 + $0x1b4] ss:$8 sps:$4 sm:$0xff]   ;;  %v1955_v17 = vld [vmem:[%s2384_s11 + $0x50] ss:$8 sps:$4 sm:$0xff]   ;;  %v1959_v18 = vld [vmem:[%s2384_s11 + $0x64] ss:$8 sps:$4 sm:$0xff]   ;;  %v839_v38 = vcombine.high %v2424_v0, %v2424_v0 }
  0x6c   : > { %v860_v1 = vrot.slane %v838_v59, %v2402_v50  ;;  %v1909_v19 = vld [vmem:[%s2384_s11 + $0x1b0] ss:$8 sps:$4 sm:$0xff]   ;;  %v1910_v20 = vld [vmem:[%s2384_s11 + $0x1c4] ss:$8 sps:$4 sm:$0xff]   ;;  %v1961_v21 = vld [vmem:[%s2384_s11 + $0x60] ss:$8 sps:$4 sm:$0xff]   ;;  %v868_v41 = vcombine.high %v846_v36, %v846_v36 }
  0x6d   : > { %1404 = vmatpush1.bf16.msra.mxu0 %v1885_v40  ;;  %v1965_v22 = vld [vmem:[%s2384_s11 + $0x74] ss:$8 sps:$4 sm:$0xff]   ;;  %v1912_v23 = vld [vmem:[%s2384_s11 + $0x1c0] ss:$8 sps:$4 sm:$0xff]   ;;  %v1967_v25 = vld [vmem:[%s2384_s11 + $0x70] ss:$8 sps:$4 sm:$0xff]   ;;  %v867_v43 = vrot.slane %v839_v38, %v2402_v50 }
  0x6e   : > { %1405 = vmatprep.subr.bf16.mxu0 %v1886_v44  ;;  %v869_v5 = vcombine.high %v860_v1, %v860_v1  ;;  %1388 = vmatprep.mubr.bf16.mxu1 %v860_v1  ;;  %v1913_v24 = vld [vmem:[%s2384_s11 + $0x1d4] ss:$8 sps:$4 sm:$0xff]   ;;  %v1971_v26 = vld [vmem:[%s2384_s11 + $0x84] ss:$8 sps:$4 sm:$0xff]   ;;  %v1915_v27 = vld [vmem:[%s2384_s11 + $0x1d0] ss:$8 sps:$4 sm:$0xff]  }
  0x6f   : > { %1361 = vmatpush1.bf16.msra.mxu1 %v1937_v3  ;;  %v1916_v28 = vld [vmem:[%s2384_s11 + $0x1e4] ss:$8 sps:$4 sm:$0xff]   ;;  %v1973_v29 = vld [vmem:[%s2384_s11 + $0x80] ss:$8 sps:$4 sm:$0xff]   ;;  %v1977_v30 = vld [vmem:[%s2384_s11 + $0x94] ss:$8 sps:$4 sm:$0xff]  }
  0x70   : > { %1429 = vmatprep.mubr.bf16.mxu0 %v869_v5  ;;  %1362 = vmatprep.subr.bf16.mxu1 %v1941_v7  ;;  %v1918_v31 = vld [vmem:[%s2384_s11 + $0x1e0] ss:$8 sps:$4 sm:$0xff]   ;;  %v1919_v32 = vld [vmem:[%s2384_s11 + $0x1f4] ss:$8 sps:$4 sm:$0xff]   ;;  %v1979_v33 = vld [vmem:[%s2384_s11 + $0x90] ss:$8 sps:$4 sm:$0xff]  }
  0x71   : > { %1406 = vmatpush1.bf16.msra.mxu0 %v1888_v45  ;;  %v1983_v34 = vld [vmem:[%s2384_s11 + $0xa4] ss:$8 sps:$4 sm:$0xff]   ;;  %v1923_v35 = vld [vmem:[%s2384_s11 + $0x1f0] ss:$8 sps:$4 sm:$0xff]   ;;  %v1985_v39 = vld [vmem:[%s2384_s11 + $0xa0] ss:$8 sps:$4 sm:$0xff]  }
  0x72   : > { %1407 = vmatprep.subr.bf16.mxu0 %v1889_v48  ;;  %v1928_v37 = vld [vmem:[%s2384_s11 + $0x204] ss:$8 sps:$4 sm:$0xff]   ;;  %v1989_v40 = vld [vmem:[%s2384_s11 + $0xb4] ss:$8 sps:$4 sm:$0xff]   ;;  %v1926_v42 = vld [vmem:[%s2384_s11 + $0x200] ss:$8 sps:$4 sm:$0xff]  }
  0x73   : > { %1363 = vmatpush1.bf16.msra.mxu1 %v1943_v9  ;;  %v1934_v44 = vld [vmem:[%s2384_s11 + $0x214] ss:$8 sps:$4 sm:$0xff]   ;;  %v1991_v45 = vld [vmem:[%s2384_s11 + $0xb0] ss:$8 sps:$4 sm:$0xff]   ;;  %v1995_v46 = vld [vmem:[%s2384_s11 + $0xc4] ss:$8 sps:$4 sm:$0xff]  }
  0x74   : > { %1364 = vmatprep.subr.bf16.mxu1 %v1947_v10  ;;  %v1932_v48 = vld [vmem:[%s2384_s11 + $0x210] ss:$8 sps:$4 sm:$0xff]   ;;  %v2001_v52 = vld [vmem:[%s2384_s11 + $0xd4] ss:$8 sps:$4 sm:$0xff]   ;;  %v1938_v53 = vld [vmem:[%s2384_s11 + $0x220] ss:$8 sps:$4 sm:$0xff]  }
  0x75   : > { %1408 = vmatpush1.bf16.msra.mxu0 %v1891_v49  ;;  %v1940_v49 = vld [vmem:[%s2384_s11 + $0x224] ss:$8 sps:$4 sm:$0xff]   ;;  %v1946_v54 = vld [vmem:[%s2384_s11 + $0x234] ss:$8 sps:$4 sm:$0xff]   ;;  %v1944_v57 = vld [vmem:[%s2384_s11 + $0x230] ss:$8 sps:$4 sm:$0xff]  }
  0x76   : > { %1409 = vmatprep.subr.bf16.mxu0 %v1892_v51  ;;  %v1997_v51 = vld [vmem:[%s2384_s11 + $0xc0] ss:$8 sps:$4 sm:$0xff]   ;;  %v2007_v56 = vld [vmem:[%s2384_s11 + $0xe4] ss:$8 sps:$4 sm:$0xff]   ;;  %v2013_v60 = vld [vmem:[%s2384_s11 + $0xf4] ss:$8 sps:$4 sm:$0xff]  }
  0x77   : > { %1365 = vmatpush1.bf16.msra.mxu1 %v1949_v13  ;;  %v2009_v59 = vld [vmem:[%s2384_s11 + $0xe0] ss:$8 sps:$4 sm:$0xff]   ;;  %v1956_v1 = vld [vmem:[%s2384_s11 + $0x250] ss:$8 sps:$4 sm:$0xff]   ;;  %v1964_v2 = vld [vmem:[%s2384_s11 + $0x264] ss:$8 sps:$4 sm:$0xff]  }
  0x78   : > { %1366 = vmatprep.subr.bf16.mxu1 %v1953_v14  ;;  %v1950_v61 = vld [vmem:[%s2384_s11 + $0x240] ss:$8 sps:$4 sm:$0xff]   ;;  %v1970_v5 = vld [vmem:[%s2384_s11 + $0x274] ss:$8 sps:$4 sm:$0xff]   ;;  %v1976_v7 = vld [vmem:[%s2384_s11 + $0x284] ss:$8 sps:$4 sm:$0xff]  }
  0x79   : > { %1410 = vmatpush1.bf16.msra.mxu0 %v1894_v55  ;;  %v2003_v55 = vld [vmem:[%s2384_s11 + $0xd0] ss:$8 sps:$4 sm:$0xff]   ;;  %v1962_v3 = vld [vmem:[%s2384_s11 + $0x260] ss:$8 sps:$4 sm:$0xff]   ;;  %v1982_v9 = vld [vmem:[%s2384_s11 + $0x294] ss:$8 sps:$4 sm:$0xff]  }
  0x7a   : > { %1411 = vmatprep.subr.bf16.mxu0 %v1895_v58  ;;  %v1952_v58 = vld [vmem:[%s2384_s11 + $0x244] ss:$8 sps:$4 sm:$0xff]   ;;  %v1980_v10 = vld [vmem:[%s2384_s11 + $0x290] ss:$8 sps:$4 sm:$0xff]   ;;  %v1994_v13 = vld [vmem:[%s2384_s11 + $0x2b4] ss:$8 sps:$4 sm:$0xff]  }
  0x7b   : > { %1367 = vmatpush1.bf16.msra.mxu1 %v1955_v17  ;;  %v1992_v14 = vld [vmem:[%s2384_s11 + $0x2b0] ss:$8 sps:$4 sm:$0xff]   ;;  %v2006_v17 = vld [vmem:[%s2384_s11 + $0x2d4] ss:$8 sps:$4 sm:$0xff]  }
  0x7c   : > { %1368 = vmatprep.subr.bf16.mxu1 %v1959_v18  ;;  %v2004_v18 = vld [vmem:[%s2384_s11 + $0x2d0] ss:$8 sps:$4 sm:$0xff]   ;;  %v724_v38 = vld [vmem:[#allocation2] sm:$0xf] }
  0x7d   : > { %1412 = vmatpush1.bf16.msra.mxu0 %v1897_v62  ;;  %v1958_v62 = vld [vmem:[%s2384_s11 + $0x254] ss:$8 sps:$4 sm:$0xff]  }
  0x7e   : > { %1413 = vmatprep.subr.bf16.mxu0 %v1898_v63  ;;  %v2015_v63 = vld [vmem:[%s2384_s11 + $0xf0] ss:$8 sps:$4 sm:$0xff]  }
  0x7f   : > { %1369 = vmatpush1.bf16.msra.mxu1 %v1961_v21  ;;  %v2018_v21 = vld [vmem:[%s2384_s11 + $0x2f4] ss:$8 sps:$4 sm:$0xff]  }
  0x80   : > { %1370 = vmatprep.subr.bf16.mxu1 %v1965_v22  ;;  %v2016_v22 = vld [vmem:[%s2384_s11 + $0x2f0] ss:$8 sps:$4 sm:$0xff]  }
  0x81   : > { %1414 = vmatpush1.bf16.msra.mxu0 %v1900_v6  ;;  %v1968_v6 = vld [vmem:[%s2384_s11 + $0x270] ss:$8 sps:$4 sm:$0xff]  }
  0x82   : > { %1415 = vmatprep.subr.bf16.mxu0 %v1901_v8  ;;  %v1974_v8 = vld [vmem:[%s2384_s11 + $0x280] ss:$8 sps:$4 sm:$0xff]  }
  0x83   : > { %1371 = vmatpush1.bf16.msra.mxu1 %v1967_v25 }
  0x84   : > { %1372 = vmatprep.subr.bf16.mxu1 %v1971_v26 }
  0x85   : > { %1416 = vmatpush1.bf16.msra.mxu0 %v1903_v11  ;;  %v1988_v11 = vld [vmem:[%s2384_s11 + $0x2a4] ss:$8 sps:$4 sm:$0xff]  }
  0x86   : > { %1417 = vmatprep.subr.bf16.mxu0 %v1904_v12  ;;  %v1986_v12 = vld [vmem:[%s2384_s11 + $0x2a0] ss:$8 sps:$4 sm:$0xff]  }
  0x87   : > { %1373 = vmatpush1.bf16.msra.mxu1 %v1973_v29 }
  0x88   : > { %1374 = vmatprep.subr.bf16.mxu1 %v1977_v30 }
  0x89   : > { %1418 = vmatpush1.bf16.msra.mxu0 %v1906_v15  ;;  %v2000_v15 = vld [vmem:[%s2384_s11 + $0x2c4] ss:$8 sps:$4 sm:$0xff]  }
  0x8a   : > { %1419 = vmatprep.subr.bf16.mxu0 %v1907_v16  ;;  %v1998_v16 = vld [vmem:[%s2384_s11 + $0x2c0] ss:$8 sps:$4 sm:$0xff]  }
  0x8b   : > { %1375 = vmatpush1.bf16.msra.mxu1 %v1979_v33 }
  0x8c   : > { %1376 = vmatprep.subr.bf16.mxu1 %v1983_v34 }
  0x8d   : > { %1420 = vmatpush1.bf16.msra.mxu0 %v1909_v19  ;;  %v2012_v19 = vld [vmem:[%s2384_s11 + $0x2e4] ss:$8 sps:$4 sm:$0xff]  }
  0x8e   : > { %1421 = vmatprep.subr.bf16.mxu0 %v1910_v20  ;;  %v2010_v20 = vld [vmem:[%s2384_s11 + $0x2e0] ss:$8 sps:$4 sm:$0xff]  }
  0x8f   : > { %1377 = vmatpush1.bf16.msra.mxu1 %v1985_v39 }
  0x90   : > { %1378 = vmatprep.subr.bf16.mxu1 %v1989_v40  ;;  %v1501_v40 = vsub.s32 (!%p1801_p13), 0, %v2397_v47 }
  0x91   : > { %1422 = vmatpush1.bf16.msra.mxu0 %v1912_v23 }
  0x92   : > { %1423 = vmatprep.subr.bf16.mxu0 %v1913_v24 }
  0x93   : > { %1379 = vmatpush1.bf16.msra.mxu1 %v1991_v45 }
  0x94   : > { %1380 = vmatprep.subr.bf16.mxu1 %v1995_v46 }
  0x95   : > { %1424 = vmatpush1.bf16.msra.mxu0 %v1915_v27  ;;  %v2077_v27 = vmov 1983009808  }
  0x96   : > { %1425 = vmatprep.subr.bf16.mxu0 %v1916_v28  ;;  %v1483_v28 = vunpack.c.l.s4 %v2077_v27 }
  0x97   : > { %1381 = vmatpush1.bf16.msra.mxu1 %v1997_v51 }
  0x98   : > { %1382 = vmatprep.subr.bf16.mxu1 %v2001_v52  ;;  %v1484_v29 = vunpack.c.0.s8 %v1483_v28 }
  0x99   : > { %1426 = vmatpush1.bf16.msra.mxu0 %v1918_v31 }
  0x9a   : > { %1427 = vmatprep.subr.bf16.mxu0 %v1919_v32  ;;  %v1487_v34 = vsub.s32 %v1484_v29, %v2397_v47 }
  0x9b   : > { %1383 = vmatpush1.bf16.msra.mxu1 %v2003_v55 }
  0x9c   : > { %1384 = vmatprep.subr.bf16.mxu1 %v2007_v56 }
  0x9d   : > { %1428 = vmatpush1.bf16.msra.mxu0 %v1923_v35 }
  0x9e   : > { %1438 = vmatprep.subr.bf16.mxu0 %v1928_v37 }
  0x9f   : > { %1385 = vmatpush1.bf16.msra.mxu1 %v2009_v59 }
  0xa0   : > { %1430 = vmatmul.mubr.bf16.vlgmr.msra.gmra.mrb[0].mxu0 %v868_v41  ;;  %1386 = vmatprep.subr.bf16.mxu1 %v2013_v60  ;;  %v1505_v41 = vsub.s32 (!%p1801_p13), 1, %v2397_v47 }
  0xa1   : > { %1439 = vmatpush1.bf16.msra.mxu0 %v1926_v42  ;;  %1470 = vmatprep.mubr.bf16.mxu0 %v867_v43  ;;  %v1517_v42 = vld [vmem:[%s708_s7] sm:$0x3] (!%p1801_p13) }
  0xa2   : > { %1440 = vmatprep.subr.bf16.mxu0 %v1934_v44  ;;  %v1522_v45 = vrot.slane (!%p1801_p13), %v1517_v42, %v1501_v40  ;;  %v1526_v46 = vrot.slane (!%p1801_p13), %v1517_v42, %v1505_v41 }
  0xa3   : > { %1387 = vmatpush1.bf16.msra.mxu1 %v2015_v63 }
  0xa5   : > { %1441 = vmatpush1.bf16.msra.mxu0 %v1932_v48 }
  0xa6   : > { %1442 = vmatprep.subr.bf16.mxu0 %v1940_v49  ;;  %1389 = vmatmul.mubr.bf16.vlgmr.msra.gmra.mrb[0].mxu1 %v846_v36  ;;  %v1527_v49 = vcombine.low (!%p1801_p13), %v1522_v45, %v1526_v46 }
  0xa9   : > { %1443 = vmatpush1.bf16.msra.mxu0 %v1938_v53  ;;  %v1534_v53 = vrot.slane (!%p1801_p13), %v1527_v49, %v1487_v34 }
  0xaa   : > { %1444 = vmatprep.subr.bf16.mxu0 %v1946_v54 }
  0xad   : > { %1445 = vmatpush1.bf16.msra.mxu0 %v1944_v57 }
  0xae   : > { %1446 = vmatprep.subr.bf16.mxu0 %v1952_v58 }
  0xb1   : > { %1447 = vmatpush1.bf16.msra.mxu0 %v1950_v61 }
  0xb2   : > { %1448 = vmatprep.subr.bf16.mxu0 %v1958_v62 }
  0xb5   : > { %1449 = vmatpush1.bf16.msra.mxu0 %v1956_v1 }
  0xb6   : > { %1450 = vmatprep.subr.bf16.mxu0 %v1964_v2 }
  0xb9   : > { %1451 = vmatpush1.bf16.msra.mxu0 %v1962_v3 }
  0xba   : > { %1452 = vmatprep.subr.bf16.mxu0 %v1970_v5 }
  0xbd   : > { %1453 = vmatpush1.bf16.msra.mxu0 %v1968_v6 }
  0xbe   : > { %1454 = vmatprep.subr.bf16.mxu0 %v1976_v7 }
  0xc1   : > { %1455 = vmatpush1.bf16.msra.mxu0 %v1974_v8 }
  0xc2   : > { %1456 = vmatprep.subr.bf16.mxu0 %v1982_v9 }
  0xc5   : > { %1457 = vmatpush1.bf16.msra.mxu0 %v1980_v10 }
  0xc6   : > { %1458 = vmatprep.subr.bf16.mxu0 %v1988_v11 }
  0xc9   : > { %1459 = vmatpush1.bf16.msra.mxu0 %v1986_v12 }
  0xca   : > { %1460 = vmatprep.subr.bf16.mxu0 %v1994_v13 }
  0xcd   : > { %1461 = vmatpush1.bf16.msra.mxu0 %v1992_v14 }
  0xce   : > { %1462 = vmatprep.subr.bf16.mxu0 %v2000_v15 }
  0xd1   : > { %1463 = vmatpush1.bf16.msra.mxu0 %v1998_v16 }
  0xd2   : > { %1464 = vmatprep.subr.bf16.mxu0 %v2006_v17 }
  0xd5   : > { %1465 = vmatpush1.bf16.msra.mxu0 %v2004_v18 }
  0xd6   : > { %1466 = vmatprep.subr.bf16.mxu0 %v2012_v19 }
  0xd9   : > { %1467 = vmatpush1.bf16.msra.mxu0 %v2010_v20 }
  0xda   : > { %1468 = vmatprep.subr.bf16.mxu0 %v2018_v21 }
  0xdd   : > { %1469 = vmatpush1.bf16.msra.mxu0 %v2016_v22 }
  0xe0   : > { %1471 = vmatmul.mubr.bf16.vlgmr.msra.gmra.mrb[0].mxu0 %v853_v4  ;;  %v1497_v4 = vld [vmem:[%s703_s15] sm:$0x3] (!%p1801_p13) }
  0xe1   : > { %v1502_v43 = vrot.slane (!%p1801_p13), %v1497_v4, %v1501_v40  ;;  %v1506_v44 = vrot.slane (!%p1801_p13), %v1497_v4, %v1505_v41 }
  0xe3   : > { %v1507_v48 = vcombine.low (!%p1801_p13), %v1502_v43, %v1506_v44 }
  0xe5   : > { %v1514_v52 = vrot.slane (!%p1801_p13), %v1507_v48, %v1487_v34 }
 0x179   : > { %v1390_v23 = vpop.f32.mrb[0].mxu1 }
 0x17a   : > { %v1392_v24 = vpop.f32.mrb[1].mxu1 }
 0x17b   : > { %v1394_v25 = vpop.f32.mrb[2].mxu1 }
 0x17c   : > { %v1395_v26 = vpop.f32.mrb[3].mxu1 }
 0x1b3   : > { %v1472_v30 = vpop.f32.mrb[0].mxu0 }
 0x1b4   : > { %v1807_v31 = vadd.f32 %v1472_v30, %v1390_v23  ;;  %v1474_v32 = vpop.f32.mrb[1].mxu0 }
 0x1b5   : > { %v1808_v33 = vadd.f32 %v1474_v32, %v1392_v24  ;;  %v1476_v35 = vpop.f32.mrb[2].mxu0 }
 0x1b6   : > { %v1477_v36 = vpop.f32.mrb[3].mxu0 }
 0x1b7   : > { %v1481_v37 = vcombine.low %v1807_v31, %v1808_v33  ;;  %1495 = sbr.rel (%p1801_p13) target bundleno = 468 (0x1d4), region = 82 }
 0x1b9   : > { %v1488_v39 = vrot.slane %v1481_v37, %v1487_v34 }
 0x1bb   : > { %v1490_v0 = vadd.f32 %v1488_v39, %v724_v38 }
 0x1bd   : > { %1491 = vst [vmem:[#allocation2] sm:$0xf] %v1490_v0 }
 0x1c4   : > { %v1496_v51 = vld [vmem:[#allocation2] sm:$0xf] }
 0x1c5   : > { %v1516_v54 = vmul.f32 %v1514_v52, %v1496_v51 }
 0x1c7   : > { %v1536_v55 = vadd.f32 %v1534_v53, %v1516_v54 }
 0x1c9   : > { %v1537_v56 = vmax.f32 %v1536_v55, 0.0 }
 0x1cb   : > { %v1545_v57 = vrot.slane %v1537_v56, %v1487_v34 }
 0x1cd   : > { %v1546_v47 = vcombine.high %v1545_v57, %v1545_v57 }
 0x1cf   : > { %v1802_v58 = vpack.c.bf16 %v1546_v47, %v1545_v57 }
 0x1d1   : > { %v1560_v59 = vrot.slane %v1802_v58, %v2402_v50 }
 0x1d3   : > { %1803 = vst.sshfl [vmem:[%s717_s10] sm:$0x5 pattern:$0x73625140] %v1560_v59 }
 0x1d4 PF: > { %s14_s21 = sadd.s32 1, %s2073_s21   ;;  %s2558_s15 = smov %s2053_s16 }
 0x1d5   : > { %p11_p0 = scmp.ge.s32.totalorder %s14_s21, 8   ;;  %s2559_s16 = smov %s2154_s28 }
 0x1d6   : > { %s2560_s17 = smov %s2065_s19  ;;  %s2561_s18 = smov %s2069_s20 }
 0x1d7   : > { %s2562_s19 = smov %s2565_s22  ;;  %s2563_s20 = smov %s2569_s23 }
 0x1d8   :  { %13 = sbr.rel (!%p11_p0) target bundleno = 4 (0x4), region = 126 }

// kernel: _lambda_.42
= control target key start
LH: loop header
LB: loop body
LE: loop exit
PB: predicated region body
PF: predicated region fallthrough
CT: control target
= control target key end

     0   :  { %s1729_s0 = inlined_call_operand.vmem [shape: bf16[2,1,1,9,512], index: 0, kind: input, shape index: {}, may-alias: {0,5}]   ;;  %s1730_s1 = inlined_call_operand.vmem [shape: bf16[2,2304], index: 1, kind: input, shape index: {}]   ;;  %s1731_s2 = inlined_call_operand.vmem [shape: bf16[2304,512], index: 2, kind: input, shape index: {}]   ;;  %s1732_s3 = inlined_call_operand.vmem [shape: f32[1,512], index: 3, kind: input, shape index: {}]   ;;  %s1733_s4 = inlined_call_operand.vmem [shape: f32[1,512], index: 4, kind: input, shape index: {}]   ;;  %s1734_s5 = inlined_call_operand.vmem [shape: bf16[2,1,1,9,512], index: 5, kind: output, shape index: {}, may-alias: {0,5}]  }
   0x1   :  { %1735 = sst [smem:[#allocation5_spill]] %s1731_s2 }
   0x2   :  { %s1237_s18 = smov 0   ;;  %s1239_s19 = smov 0  }
   0x3   :  { %s1241_s0 = smov 0   ;;  %s1243_s20 = smov 0  }
   0x4   :  { %s1245_s21 = smov 0   ;;  %s1247_s22 = smov 0  }
   0x5   :  { %s1249_s23 = smov 0   ;;  %s1251_s24 = smov 0  }
   0x6   :  { %s1253_s25 = smov 0  }
   0x7 LB: > { %s28_s26 = sadd.s32 1, %s1194_s23  ;;  %s31_s27 = sadd.s32 1, %s1198_s24  ;;  %s1202_s25 = sphi %s1253_s25, %s16_s25   ;;  %s1198_s24 = sphi %s1251_s24, %s1746_s24   ;;  %s1194_s23 = sphi %s1249_s23, %s1745_s23   ;;  %s1190_s22 = sphi %s1247_s22, %s1744_s22   ;;  %s1186_s21 = sphi %s1245_s21, %s1743_s21   ;;  %s1182_s20 = sphi %s1243_s20, %s1742_s20   ;;  %s1178_s0 = sphi %s1241_s0, %s1741_s0   ;;  %s1174_s19 = sphi %s1239_s19, %s1740_s19   ;;  %s1170_s18 = sphi %s1237_s18, %s1739_s18  }
   0x8   : > { %p29_p0 = scmp.ge.s32.totalorder %s28_s26, 3  ;;  %p79_p1 = scmp.ne.s32.totalorder %s1182_s20, %s1178_s0 }
   0x9   : > { %s1027_s28 = sadd.s32 4294967295, %s1202_s25   ;;  %p80_p2 = scmp.eq.s32.totalorder %s1202_s25, 0 }
   0xa   : > { %s1748_s26 = smov (%p29_p0, %s28_s26), 0  ;;  %s1750_s27 = smov (!%p29_p0, %s31_s27), %s1198_s24 }
   0xb   : > { %p33_p3 = scmp.ge.s32.totalorder %s1750_s27, 2  ;;  %s67_s29 = ssub.s32 %s1194_s23, %s1748_s26 }
   0xc   : > { %p1293_p4 = por %p80_p2, %p79_p1  ;;  %p162_p5 = scmp.ne.s32.totalorder %s1174_s19, %s1170_s18 }
   0xd   : > { %s1752_s27 = smov (%p33_p3, %s1750_s27), 0  ;;  %s72_s6 = sadd.s32 1, %s1182_s20 }
   0xe   : > { %p163_p6 = scmp.eq.s32.totalorder %s1027_s28, 5  ;;  %s68_s7 = ssub.s32 %s1198_s24, %s1752_s27 }
   0xf   : > { %s152_s8 = sadd.s32 1, %s1174_s19  ;;  %s69_s9 = sor.u32 %s68_s7, %s67_s29 }
  0x10   : > { %p150_p7 = scmp.eq.s32.totalorder %s68_s7, 0  ;;  %p70_p8 = scmp.eq.s32.totalorder %s69_s9, 0 }
  0x11   : > { %p1305_p9 = por %p163_p6, %p162_p5  ;;  %p1030_p10 = scmp.ge.s32.totalorder %s1202_s25, 6 }
  0x12   : > { %s1310_s11 = scalar_select %p150_p7, %s1174_s19, %s152_s8  }
  0x13   : > { %s1313_s12 = scalar_select %p70_p8, %s1182_s20, %s72_s6  }
  0x14   : > { %185 = sbr.rel (%p1030_p10) target bundleno = 85 (0x55), region = 16 }
  0x1b   : > { %200 = sbr.rel (!%p1293_p4) target bundleno = 85 (0x55), region = 24  ;;  %s202_s13 = sand.u32 (%p1293_p4), 1, %s1182_s20  }
  0x1c   : > { %s1054_s14 = smul.u32 (%p1293_p4), 768, %s202_s13  ;;  %s1031_s15 = sshll.u32 (%p1293_p4), %s1198_s24, 1 }
  0x1d   : > { %s1047_s16 = smul.u32 (%p1293_p4), 192, %s1194_s23  ;;  %s1738_s2 = sld [smem:[#allocation5_spill]] (%p1293_p4) }
  0x1e   : > { %s1329_s30 = scalar_lea.vmem (%p1293_p4), [#allocation3], %s1054_s14 }
  0x1f   : > { %s208_s17 = sadd.s32 (%p1293_p4), %s1047_s16, %s1031_s15 }
  0x20   : > { %s1033_s28 = sshll.u32 (%p1293_p4), %s208_s17, 3 }
  0x23   : > { %s1324_s6 = scalar_lea.vmem %s1738_s2, %s1033_s28 }
  0x24   : > { %v223_v0 = vld [vmem:[%s1324_s6] sm:$0xff]  ;;  %v225_v1 = vld [vmem:[%s1324_s6 + $0x8] sm:$0xff] }
  0x25   : > { %v227_v2 = vld [vmem:[%s1324_s6 + $0x20] sm:$0xff]  ;;  %224 = vst [vmem:[%s1329_s30] sm:$0xff] %v223_v0  ;;  %226 = vst [vmem:[%s1329_s30 + $0x8] sm:$0xff] %v225_v1  ;;  %v229_v3 = vld [vmem:[%s1324_s6 + $0x28] sm:$0xff] }
  0x26   : > { %228 = vst [vmem:[%s1329_s30 + $0x10] sm:$0xff] %v227_v2  ;;  %v231_v4 = vld [vmem:[%s1324_s6 + $0x40] sm:$0xff]  ;;  %v233_v5 = vld [vmem:[%s1324_s6 + $0x48] sm:$0xff]  ;;  %230 = vst [vmem:[%s1329_s30 + $0x18] sm:$0xff] %v229_v3 }
  0x27   : > { %232 = vst [vmem:[%s1329_s30 + $0x20] sm:$0xff] %v231_v4  ;;  %234 = vst [vmem:[%s1329_s30 + $0x28] sm:$0xff] %v233_v5  ;;  %v235_v6 = vld [vmem:[%s1324_s6 + $0x60] sm:$0xff]  ;;  %v237_v7 = vld [vmem:[%s1324_s6 + $0x68] sm:$0xff] }
  0x28   : > { %v239_v8 = vld [vmem:[%s1324_s6 + $0x80] sm:$0xff]  ;;  %236 = vst [vmem:[%s1329_s30 + $0x30] sm:$0xff] %v235_v6  ;;  %238 = vst [vmem:[%s1329_s30 + $0x38] sm:$0xff] %v237_v7  ;;  %v241_v9 = vld [vmem:[%s1324_s6 + $0x88] sm:$0xff] }
  0x29   : > { %240 = vst [vmem:[%s1329_s30 + $0x40] sm:$0xff] %v239_v8  ;;  %v243_v10 = vld [vmem:[%s1324_s6 + $0xa0] sm:$0xff]  ;;  %v245_v11 = vld [vmem:[%s1324_s6 + $0xa8] sm:$0xff]  ;;  %242 = vst [vmem:[%s1329_s30 + $0x48] sm:$0xff] %v241_v9 }
  0x2a   : > { %244 = vst [vmem:[%s1329_s30 + $0x50] sm:$0xff] %v243_v10  ;;  %246 = vst [vmem:[%s1329_s30 + $0x58] sm:$0xff] %v245_v11  ;;  %v247_v12 = vld [vmem:[%s1324_s6 + $0xc0] sm:$0xff]  ;;  %v249_v13 = vld [vmem:[%s1324_s6 + $0xc8] sm:$0xff] }
  0x2b   : > { %v251_v14 = vld [vmem:[%s1324_s6 + $0xe0] sm:$0xff]  ;;  %248 = vst [vmem:[%s1329_s30 + $0x60] sm:$0xff] %v247_v12  ;;  %250 = vst [vmem:[%s1329_s30 + $0x68] sm:$0xff] %v249_v13  ;;  %v253_v15 = vld [vmem:[%s1324_s6 + $0xe8] sm:$0xff] }
  0x2c   : > { %252 = vst [vmem:[%s1329_s30 + $0x70] sm:$0xff] %v251_v14  ;;  %v255_v16 = vld [vmem:[%s1324_s6 + $0x100] sm:$0xff]  ;;  %v257_v17 = vld [vmem:[%s1324_s6 + $0x108] sm:$0xff]  ;;  %254 = vst [vmem:[%s1329_s30 + $0x78] sm:$0xff] %v253_v15 }
  0x2d   : > { %256 = vst [vmem:[%s1329_s30 + $0x80] sm:$0xff] %v255_v16  ;;  %258 = vst [vmem:[%s1329_s30 + $0x88] sm:$0xff] %v257_v17  ;;  %v259_v18 = vld [vmem:[%s1324_s6 + $0x120] sm:$0xff]  ;;  %v261_v19 = vld [vmem:[%s1324_s6 + $0x128] sm:$0xff] }
  0x2e   : > { %v263_v20 = vld [vmem:[%s1324_s6 + $0x140] sm:$0xff]  ;;  %260 = vst [vmem:[%s1329_s30 + $0x90] sm:$0xff] %v259_v18  ;;  %262 = vst [vmem:[%s1329_s30 + $0x98] sm:$0xff] %v261_v19  ;;  %v265_v21 = vld [vmem:[%s1324_s6 + $0x148] sm:$0xff] }
  0x2f   : > { %264 = vst [vmem:[%s1329_s30 + $0xa0] sm:$0xff] %v263_v20  ;;  %v267_v22 = vld [vmem:[%s1324_s6 + $0x160] sm:$0xff]  ;;  %v269_v23 = vld [vmem:[%s1324_s6 + $0x168] sm:$0xff]  ;;  %266 = vst [vmem:[%s1329_s30 + $0xa8] sm:$0xff] %v265_v21 }
  0x30   : > { %268 = vst [vmem:[%s1329_s30 + $0xb0] sm:$0xff] %v267_v22  ;;  %270 = vst [vmem:[%s1329_s30 + $0xb8] sm:$0xff] %v269_v23  ;;  %v271_v24 = vld [vmem:[%s1324_s6 + $0x180] sm:$0xff]  ;;  %v273_v25 = vld [vmem:[%s1324_s6 + $0x188] sm:$0xff] }
  0x31   : > { %v275_v26 = vld [vmem:[%s1324_s6 + $0x1a0] sm:$0xff]  ;;  %272 = vst [vmem:[%s1329_s30 + $0xc0] sm:$0xff] %v271_v24  ;;  %274 = vst [vmem:[%s1329_s30 + $0xc8] sm:$0xff] %v273_v25  ;;  %v277_v27 = vld [vmem:[%s1324_s6 + $0x1a8] sm:$0xff] }
  0x32   : > { %276 = vst [vmem:[%s1329_s30 + $0xd0] sm:$0xff] %v275_v26  ;;  %v279_v28 = vld [vmem:[%s1324_s6 + $0x1c0] sm:$0xff]  ;;  %v281_v29 = vld [vmem:[%s1324_s6 + $0x1c8] sm:$0xff]  ;;  %278 = vst [vmem:[%s1329_s30 + $0xd8] sm:$0xff] %v277_v27 }
  0x33   : > { %280 = vst [vmem:[%s1329_s30 + $0xe0] sm:$0xff] %v279_v28  ;;  %282 = vst [vmem:[%s1329_s30 + $0xe8] sm:$0xff] %v281_v29  ;;  %v283_v30 = vld [vmem:[%s1324_s6 + $0x1e0] sm:$0xff]  ;;  %v285_v31 = vld [vmem:[%s1324_s6 + $0x1e8] sm:$0xff] }
  0x34   : > { %v287_v32 = vld [vmem:[%s1324_s6 + $0x200] sm:$0xff]  ;;  %284 = vst [vmem:[%s1329_s30 + $0xf0] sm:$0xff] %v283_v30  ;;  %286 = vst [vmem:[%s1329_s30 + $0xf8] sm:$0xff] %v285_v31  ;;  %v289_v33 = vld [vmem:[%s1324_s6 + $0x208] sm:$0xff] }
  0x35   : > { %288 = vst [vmem:[%s1329_s30 + $0x100] sm:$0xff] %v287_v32  ;;  %v291_v34 = vld [vmem:[%s1324_s6 + $0x220] sm:$0xff]  ;;  %v293_v35 = vld [vmem:[%s1324_s6 + $0x228] sm:$0xff]  ;;  %290 = vst [vmem:[%s1329_s30 + $0x108] sm:$0xff] %v289_v33 }
  0x36   : > { %292 = vst [vmem:[%s1329_s30 + $0x110] sm:$0xff] %v291_v34  ;;  %294 = vst [vmem:[%s1329_s30 + $0x118] sm:$0xff] %v293_v35  ;;  %v295_v36 = vld [vmem:[%s1324_s6 + $0x240] sm:$0xff]  ;;  %v297_v37 = vld [vmem:[%s1324_s6 + $0x248] sm:$0xff] }
  0x37   : > { %v299_v38 = vld [vmem:[%s1324_s6 + $0x260] sm:$0xff]  ;;  %296 = vst [vmem:[%s1329_s30 + $0x120] sm:$0xff] %v295_v36  ;;  %298 = vst [vmem:[%s1329_s30 + $0x128] sm:$0xff] %v297_v37  ;;  %v301_v39 = vld [vmem:[%s1324_s6 + $0x268] sm:$0xff] }
  0x38   : > { %300 = vst [vmem:[%s1329_s30 + $0x130] sm:$0xff] %v299_v38  ;;  %v303_v40 = vld [vmem:[%s1324_s6 + $0x280] sm:$0xff]  ;;  %v305_v41 = vld [vmem:[%s1324_s6 + $0x288] sm:$0xff]  ;;  %302 = vst [vmem:[%s1329_s30 + $0x138] sm:$0xff] %v301_v39 }
  0x39   : > { %304 = vst [vmem:[%s1329_s30 + $0x140] sm:$0xff] %v303_v40  ;;  %306 = vst [vmem:[%s1329_s30 + $0x148] sm:$0xff] %v305_v41  ;;  %v307_v42 = vld [vmem:[%s1324_s6 + $0x2a0] sm:$0xff]  ;;  %v309_v43 = vld [vmem:[%s1324_s6 + $0x2a8] sm:$0xff] }
  0x3a   : > { %v311_v44 = vld [vmem:[%s1324_s6 + $0x2c0] sm:$0xff]  ;;  %308 = vst [vmem:[%s1329_s30 + $0x150] sm:$0xff] %v307_v42  ;;  %310 = vst [vmem:[%s1329_s30 + $0x158] sm:$0xff] %v309_v43  ;;  %v313_v45 = vld [vmem:[%s1324_s6 + $0x2c8] sm:$0xff] }
  0x3b   : > { %312 = vst [vmem:[%s1329_s30 + $0x160] sm:$0xff] %v311_v44  ;;  %v315_v46 = vld [vmem:[%s1324_s6 + $0x2e0] sm:$0xff]  ;;  %v317_v47 = vld [vmem:[%s1324_s6 + $0x2e8] sm:$0xff]  ;;  %314 = vst [vmem:[%s1329_s30 + $0x168] sm:$0xff] %v313_v45 }
  0x3c   : > { %316 = vst [vmem:[%s1329_s30 + $0x170] sm:$0xff] %v315_v46  ;;  %318 = vst [vmem:[%s1329_s30 + $0x178] sm:$0xff] %v317_v47  ;;  %v319_v48 = vld [vmem:[%s1324_s6 + $0x300] sm:$0xff]  ;;  %v321_v49 = vld [vmem:[%s1324_s6 + $0x308] sm:$0xff] }
  0x3d   : > { %v323_v50 = vld [vmem:[%s1324_s6 + $0x320] sm:$0xff]  ;;  %320 = vst [vmem:[%s1329_s30 + $0x180] sm:$0xff] %v319_v48  ;;  %322 = vst [vmem:[%s1329_s30 + $0x188] sm:$0xff] %v321_v49  ;;  %v325_v51 = vld [vmem:[%s1324_s6 + $0x328] sm:$0xff] }
  0x3e   : > { %324 = vst [vmem:[%s1329_s30 + $0x190] sm:$0xff] %v323_v50  ;;  %v327_v52 = vld [vmem:[%s1324_s6 + $0x340] sm:$0xff]  ;;  %v329_v53 = vld [vmem:[%s1324_s6 + $0x348] sm:$0xff]  ;;  %326 = vst [vmem:[%s1329_s30 + $0x198] sm:$0xff] %v325_v51 }
  0x3f   : > { %328 = vst [vmem:[%s1329_s30 + $0x1a0] sm:$0xff] %v327_v52  ;;  %330 = vst [vmem:[%s1329_s30 + $0x1a8] sm:$0xff] %v329_v53  ;;  %v331_v54 = vld [vmem:[%s1324_s6 + $0x360] sm:$0xff]  ;;  %v333_v55 = vld [vmem:[%s1324_s6 + $0x368] sm:$0xff] }
  0x40   : > { %v335_v56 = vld [vmem:[%s1324_s6 + $0x380] sm:$0xff]  ;;  %332 = vst [vmem:[%s1329_s30 + $0x1b0] sm:$0xff] %v331_v54  ;;  %334 = vst [vmem:[%s1329_s30 + $0x1b8] sm:$0xff] %v333_v55  ;;  %v337_v57 = vld [vmem:[%s1324_s6 + $0x388] sm:$0xff] }
  0x41   : > { %336 = vst [vmem:[%s1329_s30 + $0x1c0] sm:$0xff] %v335_v56  ;;  %v339_v58 = vld [vmem:[%s1324_s6 + $0x3a0] sm:$0xff]  ;;  %v341_v59 = vld [vmem:[%s1324_s6 + $0x3a8] sm:$0xff]  ;;  %338 = vst [vmem:[%s1329_s30 + $0x1c8] sm:$0xff] %v337_v57 }
  0x42   : > { %340 = vst [vmem:[%s1329_s30 + $0x1d0] sm:$0xff] %v339_v58  ;;  %342 = vst [vmem:[%s1329_s30 + $0x1d8] sm:$0xff] %v341_v59  ;;  %v343_v60 = vld [vmem:[%s1324_s6 + $0x3c0] sm:$0xff]  ;;  %v345_v61 = vld [vmem:[%s1324_s6 + $0x3c8] sm:$0xff] }
  0x43   : > { %v347_v62 = vld [vmem:[%s1324_s6 + $0x3e0] sm:$0xff]  ;;  %344 = vst [vmem:[%s1329_s30 + $0x1e0] sm:$0xff] %v343_v60  ;;  %346 = vst [vmem:[%s1329_s30 + $0x1e8] sm:$0xff] %v345_v61  ;;  %v349_v63 = vld [vmem:[%s1324_s6 + $0x3e8] sm:$0xff] }
  0x44   : > { %348 = vst [vmem:[%s1329_s30 + $0x1f0] sm:$0xff] %v347_v62  ;;  %v351_v0 = vld [vmem:[%s1324_s6 + $0x400] sm:$0xff]  ;;  %v353_v1 = vld [vmem:[%s1324_s6 + $0x408] sm:$0xff]  ;;  %350 = vst [vmem:[%s1329_s30 + $0x1f8] sm:$0xff] %v349_v63 }
  0x45   : > { %352 = vst [vmem:[%s1329_s30 + $0x200] sm:$0xff] %v351_v0  ;;  %354 = vst [vmem:[%s1329_s30 + $0x208] sm:$0xff] %v353_v1  ;;  %v355_v2 = vld [vmem:[%s1324_s6 + $0x420] sm:$0xff]  ;;  %v357_v3 = vld [vmem:[%s1324_s6 + $0x428] sm:$0xff] }
  0x46   : > { %v359_v4 = vld [vmem:[%s1324_s6 + $0x440] sm:$0xff]  ;;  %356 = vst [vmem:[%s1329_s30 + $0x210] sm:$0xff] %v355_v2  ;;  %358 = vst [vmem:[%s1329_s30 + $0x218] sm:$0xff] %v357_v3  ;;  %v361_v5 = vld [vmem:[%s1324_s6 + $0x448] sm:$0xff] }
  0x47   : > { %360 = vst [vmem:[%s1329_s30 + $0x220] sm:$0xff] %v359_v4  ;;  %v363_v6 = vld [vmem:[%s1324_s6 + $0x460] sm:$0xff]  ;;  %v365_v7 = vld [vmem:[%s1324_s6 + $0x468] sm:$0xff]  ;;  %362 = vst [vmem:[%s1329_s30 + $0x228] sm:$0xff] %v361_v5 }
  0x48   : > { %364 = vst [vmem:[%s1329_s30 + $0x230] sm:$0xff] %v363_v6  ;;  %366 = vst [vmem:[%s1329_s30 + $0x238] sm:$0xff] %v365_v7  ;;  %v367_v8 = vld [vmem:[%s1324_s6 + $0x480] sm:$0xff]  ;;  %v369_v9 = vld [vmem:[%s1324_s6 + $0x488] sm:$0xff] }
  0x49   : > { %v371_v10 = vld [vmem:[%s1324_s6 + $0x4a0] sm:$0xff]  ;;  %368 = vst [vmem:[%s1329_s30 + $0x240] sm:$0xff] %v367_v8  ;;  %370 = vst [vmem:[%s1329_s30 + $0x248] sm:$0xff] %v369_v9  ;;  %v373_v11 = vld [vmem:[%s1324_s6 + $0x4a8] sm:$0xff] }
  0x4a   : > { %372 = vst [vmem:[%s1329_s30 + $0x250] sm:$0xff] %v371_v10  ;;  %v375_v12 = vld [vmem:[%s1324_s6 + $0x4c0] sm:$0xff]  ;;  %v377_v13 = vld [vmem:[%s1324_s6 + $0x4c8] sm:$0xff]  ;;  %374 = vst [vmem:[%s1329_s30 + $0x258] sm:$0xff] %v373_v11 }
  0x4b   : > { %376 = vst [vmem:[%s1329_s30 + $0x260] sm:$0xff] %v375_v12  ;;  %378 = vst [vmem:[%s1329_s30 + $0x268] sm:$0xff] %v377_v13  ;;  %v379_v14 = vld [vmem:[%s1324_s6 + $0x4e0] sm:$0xff]  ;;  %v381_v15 = vld [vmem:[%s1324_s6 + $0x4e8] sm:$0xff] }
  0x4c   : > { %v383_v16 = vld [vmem:[%s1324_s6 + $0x500] sm:$0xff]  ;;  %380 = vst [vmem:[%s1329_s30 + $0x270] sm:$0xff] %v379_v14  ;;  %382 = vst [vmem:[%s1329_s30 + $0x278] sm:$0xff] %v381_v15  ;;  %v385_v17 = vld [vmem:[%s1324_s6 + $0x508] sm:$0xff] }
  0x4d   : > { %384 = vst [vmem:[%s1329_s30 + $0x280] sm:$0xff] %v383_v16  ;;  %v387_v18 = vld [vmem:[%s1324_s6 + $0x520] sm:$0xff]  ;;  %v389_v19 = vld [vmem:[%s1324_s6 + $0x528] sm:$0xff]  ;;  %386 = vst [vmem:[%s1329_s30 + $0x288] sm:$0xff] %v385_v17 }
  0x4e   : > { %388 = vst [vmem:[%s1329_s30 + $0x290] sm:$0xff] %v387_v18  ;;  %390 = vst [vmem:[%s1329_s30 + $0x298] sm:$0xff] %v389_v19  ;;  %v391_v20 = vld [vmem:[%s1324_s6 + $0x540] sm:$0xff]  ;;  %v393_v21 = vld [vmem:[%s1324_s6 + $0x548] sm:$0xff] }
  0x4f   : > { %v395_v22 = vld [vmem:[%s1324_s6 + $0x560] sm:$0xff]  ;;  %392 = vst [vmem:[%s1329_s30 + $0x2a0] sm:$0xff] %v391_v20  ;;  %394 = vst [vmem:[%s1329_s30 + $0x2a8] sm:$0xff] %v393_v21  ;;  %v397_v23 = vld [vmem:[%s1324_s6 + $0x568] sm:$0xff] }
  0x50   : > { %396 = vst [vmem:[%s1329_s30 + $0x2b0] sm:$0xff] %v395_v22  ;;  %v399_v24 = vld [vmem:[%s1324_s6 + $0x580] sm:$0xff]  ;;  %v401_v25 = vld [vmem:[%s1324_s6 + $0x588] sm:$0xff]  ;;  %398 = vst [vmem:[%s1329_s30 + $0x2b8] sm:$0xff] %v397_v23 }
  0x51   : > { %400 = vst [vmem:[%s1329_s30 + $0x2c0] sm:$0xff] %v399_v24  ;;  %402 = vst [vmem:[%s1329_s30 + $0x2c8] sm:$0xff] %v401_v25  ;;  %v403_v26 = vld [vmem:[%s1324_s6 + $0x5a0] sm:$0xff]  ;;  %v405_v27 = vld [vmem:[%s1324_s6 + $0x5a8] sm:$0xff] }
  0x52   : > { %v407_v28 = vld [vmem:[%s1324_s6 + $0x5c0] sm:$0xff]  ;;  %404 = vst [vmem:[%s1329_s30 + $0x2d0] sm:$0xff] %v403_v26  ;;  %406 = vst [vmem:[%s1329_s30 + $0x2d8] sm:$0xff] %v405_v27  ;;  %v409_v29 = vld [vmem:[%s1324_s6 + $0x5c8] sm:$0xff] }
  0x53   : > { %408 = vst [vmem:[%s1329_s30 + $0x2e0] sm:$0xff] %v407_v28  ;;  %v411_v30 = vld [vmem:[%s1324_s6 + $0x5e0] sm:$0xff]  ;;  %v413_v31 = vld [vmem:[%s1324_s6 + $0x5e8] sm:$0xff]  ;;  %410 = vst [vmem:[%s1329_s30 + $0x2e8] sm:$0xff] %v409_v29 }
  0x54   : > { %412 = vst [vmem:[%s1329_s30 + $0x2f0] sm:$0xff] %v411_v30  ;;  %414 = vst [vmem:[%s1329_s30 + $0x2f8] sm:$0xff] %v413_v31 }
  0x55 PF: > { %p1034_p11 = scmp.ge.s32.totalorder %s1202_s25, 1  ;;  %p435_p12 = scmp.lt.s32.totalorder %s1202_s25, 7 }
  0x57   : > { %p436_p13 = pnand %p1034_p11, %p435_p12 }
  0x58   : > { %s442_s8 = sand.u32 (!%p436_p13), 1, %s1178_s0   ;;  %s479_s9 = sand.u32 (!%p436_p13), 1, %s1170_s18  }
  0x59   : > { %439 = sbr.rel (%p436_p13) target bundleno = 484 (0x1e4), region = 55  ;;  %s1524_s14 = sshll.u32 (!%p436_p13), %s479_s9, 1 }
  0x5a   : > { %s1055_s13 = smul.u32 (!%p436_p13), 768, %s442_s8  ;;  %s1528_s16 = sshll.u32 (!%p436_p13), %s1190_s22, 1 }
  0x5b   : > { %s482_s15 = smul.u32 (!%p436_p13), 6, %s1186_s21  ;;  %p494_p1 = scmp.lt.s32.totalorder (!%p436_p13), %s1528_s16, 3 }
  0x5c   : > { %s1548_s9 = scalar_lea.vmem (!%p436_p13), [#allocation3], %s1055_s13  ;;  %s481_s2 = scalar_lea.vmem (!%p436_p13), [#allocation4], %s1524_s14 }
  0x5d   : > { %p485_p0 = scmp.lt.s32.totalorder (!%p436_p13), %s482_s15, 17  ;;  %p1038_p2 = scmp.ne.s32.totalorder (!%p436_p13), %s1186_s21, 0 }
  0x60   : > { %s1754_s15 = smov (!%p485_p0, %s482_s15), 17  ;;  %507 = sbr.rel (%p1038_p2) target bundleno = 103 (0x67), region = 63 }
  0x61   : > { %s1534_s17 = scalar_select %p494_p1, %s1528_s16, 3 }
  0x62   : > { %s489_s18 = scalar_lea.vmem %s1730_s1, %s1754_s15  ;;  %v1204_v32 = vmov (!%p1038_p2), 0.0  }
  0x63   : > { %s496_s22 = scalar_lea.vmem %s1732_s3, %s1534_s17  ;;  %s501_s8 = scalar_lea.vmem %s1733_s4, %s1534_s17  ;;  %508 = vst [vmem:[#allocation2] sm:$0xf] (!%p1038_p2), %v1204_v32 }
  0x67 PF: > { %v544_v33 = vld [vmem:[%s1548_s9 + $0x108] sm:$0xff]  ;;  %v543_v34 = vld [vmem:[%s1548_s9 + $0x100] sm:$0xff]  ;;  %v546_v35 = vld [vmem:[%s1548_s9 + $0x118] sm:$0xff]  ;;  %v612_v36 = vlaneseq  ;;  %v1205_v37 = vmov 1966171168   ;;  %p1039_p3 = scmp.ne.s32.totalorder %s1186_s21, 2 }
  0x68   : > { %702 = vmatprep.subr.bf16.mxu0 %v544_v33  ;;  %v610_v38 = vunpack.c.l.s4 %v1205_v37  ;;  %v545_v39 = vld [vmem:[%s1548_s9 + $0x110] sm:$0xff]  ;;  %v548_v40 = vld [vmem:[%s1548_s9 + $0x128] sm:$0xff]  ;;  %v547_v43 = vld [vmem:[%s1548_s9 + $0x120] sm:$0xff] }
  0x69   : > { %703 = vmatpush1.bf16.msra.mxu0 %v543_v34  ;;  %v1557_v42 = vshrl.u32 %v612_v36, 7  ;;  %v550_v44 = vld [vmem:[%s1548_s9 + $0x138] sm:$0xff]  ;;  %v512_v46 = vld [vmem:[%s1548_s9 + $0x8] sm:$0xff]  ;;  %v549_v47 = vld [vmem:[%s1548_s9 + $0x130] sm:$0xff] }
  0x6a   : > { %704 = vmatprep.subr.bf16.mxu0 %v546_v35  ;;  %v611_v41 = vunpack.c.0.s8 %v610_v38  ;;  %661 = vmatprep.subr.bf16.mxu1 %v512_v46  ;;  %v511_v48 = vld [vmem:[%s1548_s9] sm:$0xff]  ;;  %v552_v50 = vld [vmem:[%s1548_s9 + $0x148] sm:$0xff]  ;;  %v514_v53 = vld [vmem:[%s1548_s9 + $0x18] sm:$0xff] }
  0x6b   : > { %v510_v49 = vld [vmem:[%s489_s18] sm:$0x3f]  ;;  %662 = vmatpush1.bf16.msra.mxu1 %v511_v48  ;;  %v513_v54 = vld [vmem:[%s1548_s9 + $0x10] sm:$0xff]  ;;  %v516_v56 = vld [vmem:[%s1548_s9 + $0x28] sm:$0xff] }
  0x6c   : > { %v1562_v45 = vsub.s32 %v611_v41, %v1557_v42  ;;  %v608_v51 = vcombine.high %v510_v49, %v510_v49  ;;  %663 = vmatprep.subr.bf16.mxu1 %v514_v53  ;;  %v551_v58 = vld [vmem:[%s1548_s9 + $0x140] sm:$0xff]  ;;  %v554_v59 = vld [vmem:[%s1548_s9 + $0x158] sm:$0xff]  ;;  %v553_v1 = vld [vmem:[%s1548_s9 + $0x150] sm:$0xff] }
  0x6d   : > { %705 = vmatpush1.bf16.msra.mxu0 %v545_v39  ;;  %v515_v62 = vld [vmem:[%s1548_s9 + $0x20] sm:$0xff]  ;;  %v518_v0 = vld [vmem:[%s1548_s9 + $0x38] sm:$0xff]  ;;  %v556_v2 = vld [vmem:[%s1548_s9 + $0x168] sm:$0xff] }
  0x6e   : > { %706 = vmatprep.subr.bf16.mxu0 %v548_v40  ;;  %v1574_v52 = vrot.slane %v510_v49, %v1562_v45  ;;  %v1582_v57 = vrot.slane %v608_v51, %v1562_v45  ;;  %v517_v3 = vld [vmem:[%s1548_s9 + $0x30] sm:$0xff]  ;;  %v520_v4 = vld [vmem:[%s1548_s9 + $0x48] sm:$0xff]  ;;  %v555_v5 = vld [vmem:[%s1548_s9 + $0x160] sm:$0xff] }
  0x6f   : > { %664 = vmatpush1.bf16.msra.mxu1 %v513_v54  ;;  %v558_v6 = vld [vmem:[%s1548_s9 + $0x178] sm:$0xff]  ;;  %v519_v7 = vld [vmem:[%s1548_s9 + $0x40] sm:$0xff]  ;;  %v557_v9 = vld [vmem:[%s1548_s9 + $0x170] sm:$0xff] }
  0x70   : > { %v623_v55 = vcombine.high %v1574_v52, %v1574_v52  ;;  %v638_v61 = vrot.slane %v1582_v57, %v1562_v45  ;;  %665 = vmatprep.subr.bf16.mxu1 %v516_v56  ;;  %v522_v8 = vld [vmem:[%s1548_s9 + $0x58] sm:$0xff]  ;;  %v560_v10 = vld [vmem:[%s1548_s9 + $0x188] sm:$0xff]  ;;  %v521_v11 = vld [vmem:[%s1548_s9 + $0x50] sm:$0xff]  ;;  %v631_v39 = vrot.slane %v1574_v52, %v1562_v45 }
  0x71   : > { %707 = vmatpush1.bf16.msra.mxu0 %v547_v43  ;;  %v524_v12 = vld [vmem:[%s1548_s9 + $0x68] sm:$0xff]  ;;  %v559_v13 = vld [vmem:[%s1548_s9 + $0x180] sm:$0xff]  ;;  %v562_v14 = vld [vmem:[%s1548_s9 + $0x198] sm:$0xff]  ;;  %v624_v43 = vcombine.high %v1582_v57, %v1582_v57 }
  0x72   : > { %708 = vmatprep.subr.bf16.mxu0 %v550_v44  ;;  %v645_v60 = vrot.slane %v623_v55, %v1562_v45  ;;  %v523_v15 = vld [vmem:[%s1548_s9 + $0x60] sm:$0xff]  ;;  %v526_v16 = vld [vmem:[%s1548_s9 + $0x78] sm:$0xff]  ;;  %v561_v17 = vld [vmem:[%s1548_s9 + $0x190] sm:$0xff] }
  0x73   : > { %666 = vmatpush1.bf16.msra.mxu1 %v515_v62  ;;  %v564_v18 = vld [vmem:[%s1548_s9 + $0x1a8] sm:$0xff]  ;;  %v525_v19 = vld [vmem:[%s1548_s9 + $0x70] sm:$0xff]  ;;  %v563_v21 = vld [vmem:[%s1548_s9 + $0x1a0] sm:$0xff] }
  0x74   : > { %v654_v63 = vcombine.high %v645_v60, %v645_v60  ;;  %693 = vmatprep.mubr.bf16.mxu1 %v645_v60  ;;  %667 = vmatprep.subr.bf16.mxu1 %v518_v0  ;;  %v528_v20 = vld [vmem:[%s1548_s9 + $0x88] sm:$0xff]  ;;  %v566_v22 = vld [vmem:[%s1548_s9 + $0x1b8] sm:$0xff]  ;;  %v527_v23 = vld [vmem:[%s1548_s9 + $0x80] sm:$0xff] }
  0x75   : > { %709 = vmatpush1.bf16.msra.mxu0 %v549_v47  ;;  %v530_v24 = vld [vmem:[%s1548_s9 + $0x98] sm:$0xff]  ;;  %v565_v25 = vld [vmem:[%s1548_s9 + $0x1b0] sm:$0xff]  ;;  %v568_v26 = vld [vmem:[%s1548_s9 + $0x1c8] sm:$0xff]  ;;  %v653_v47 = vcombine.high %v631_v39, %v631_v39 }
  0x76   : > { %710 = vmatprep.subr.bf16.mxu0 %v552_v50  ;;  %734 = vmatprep.mubr.bf16.mxu0 %v654_v63  ;;  %v529_v27 = vld [vmem:[%s1548_s9 + $0x90] sm:$0xff]  ;;  %v532_v28 = vld [vmem:[%s1548_s9 + $0xa8] sm:$0xff]  ;;  %v567_v29 = vld [vmem:[%s1548_s9 + $0x1c0] sm:$0xff]  ;;  %v652_v50 = vrot.slane %v624_v43, %v1562_v45 }
  0x77   : > { %668 = vmatpush1.bf16.msra.mxu1 %v517_v3  ;;  %v570_v30 = vld [vmem:[%s1548_s9 + $0x1d8] sm:$0xff]  ;;  %v531_v31 = vld [vmem:[%s1548_s9 + $0xa0] sm:$0xff]  ;;  %v569_v33 = vld [vmem:[%s1548_s9 + $0x1d0] sm:$0xff] }
  0x78   : > { %669 = vmatprep.subr.bf16.mxu1 %v520_v4  ;;  %v534_v32 = vld [vmem:[%s1548_s9 + $0xb8] sm:$0xff]  ;;  %v572_v34 = vld [vmem:[%s1548_s9 + $0x1e8] sm:$0xff]  ;;  %v533_v35 = vld [vmem:[%s1548_s9 + $0xb0] sm:$0xff] }
  0x79   : > { %711 = vmatpush1.bf16.msra.mxu0 %v551_v58  ;;  %v536_v36 = vld [vmem:[%s1548_s9 + $0xc8] sm:$0xff]  ;;  %v571_v37 = vld [vmem:[%s1548_s9 + $0x1e0] sm:$0xff]  ;;  %v574_v38 = vld [vmem:[%s1548_s9 + $0x1f8] sm:$0xff] }
  0x7a   : > { %712 = vmatprep.subr.bf16.mxu0 %v554_v59  ;;  %v535_v40 = vld [vmem:[%s1548_s9 + $0xc0] sm:$0xff]  ;;  %v538_v41 = vld [vmem:[%s1548_s9 + $0xd8] sm:$0xff]  ;;  %v573_v44 = vld [vmem:[%s1548_s9 + $0x1f0] sm:$0xff] }
  0x7b   : > { %670 = vmatpush1.bf16.msra.mxu1 %v519_v7  ;;  %v576_v46 = vld [vmem:[%s1548_s9 + $0x208] sm:$0xff]  ;;  %v537_v48 = vld [vmem:[%s1548_s9 + $0xd0] sm:$0xff]  ;;  %v575_v51 = vld [vmem:[%s1548_s9 + $0x200] sm:$0xff] }
  0x7c   : > { %671 = vmatprep.subr.bf16.mxu1 %v522_v8  ;;  %v540_v49 = vld [vmem:[%s1548_s9 + $0xe8] sm:$0xff]  ;;  %v578_v52 = vld [vmem:[%s1548_s9 + $0x218] sm:$0xff]  ;;  %v539_v53 = vld [vmem:[%s1548_s9 + $0xe0] sm:$0xff] }
  0x7d   : > { %713 = vmatpush1.bf16.msra.mxu0 %v553_v1  ;;  %v542_v54 = vld [vmem:[%s1548_s9 + $0xf8] sm:$0xff]  ;;  %v577_v55 = vld [vmem:[%s1548_s9 + $0x210] sm:$0xff]  ;;  %v580_v56 = vld [vmem:[%s1548_s9 + $0x228] sm:$0xff] }
  0x7e   : > { %714 = vmatprep.subr.bf16.mxu0 %v556_v2  ;;  %v541_v58 = vld [vmem:[%s1548_s9 + $0xf0] sm:$0xff]  ;;  %v579_v59 = vld [vmem:[%s1548_s9 + $0x220] sm:$0xff]  ;;  %v582_v60 = vld [vmem:[%s1548_s9 + $0x238] sm:$0xff] }
  0x7f   : > { %672 = vmatpush1.bf16.msra.mxu1 %v521_v11  ;;  %v581_v62 = vld [vmem:[%s1548_s9 + $0x230] sm:$0xff]  ;;  %v584_v63 = vld [vmem:[%s1548_s9 + $0x248] sm:$0xff]  ;;  %v583_v0 = vld [vmem:[%s1548_s9 + $0x240] sm:$0xff] }
  0x80   : > { %673 = vmatprep.subr.bf16.mxu1 %v524_v12  ;;  %v586_v1 = vld [vmem:[%s1548_s9 + $0x258] sm:$0xff]  ;;  %v585_v2 = vld [vmem:[%s1548_s9 + $0x250] sm:$0xff]  ;;  %v588_v3 = vld [vmem:[%s1548_s9 + $0x268] sm:$0xff] }
  0x81   : > { %715 = vmatpush1.bf16.msra.mxu0 %v555_v5  ;;  %v587_v4 = vld [vmem:[%s1548_s9 + $0x260] sm:$0xff]  ;;  %v590_v5 = vld [vmem:[%s1548_s9 + $0x278] sm:$0xff]  ;;  %v592_v7 = vld [vmem:[%s1548_s9 + $0x288] sm:$0xff] }
  0x82   : > { %716 = vmatprep.subr.bf16.mxu0 %v558_v6  ;;  %v589_v6 = vld [vmem:[%s1548_s9 + $0x270] sm:$0xff]  ;;  %v591_v8 = vld [vmem:[%s1548_s9 + $0x280] sm:$0xff]  ;;  %v596_v11 = vld [vmem:[%s1548_s9 + $0x2a8] sm:$0xff] }
  0x83   : > { %674 = vmatpush1.bf16.msra.mxu1 %v523_v15  ;;  %v595_v12 = vld [vmem:[%s1548_s9 + $0x2a0] sm:$0xff]  ;;  %v600_v15 = vld [vmem:[%s1548_s9 + $0x2c8] sm:$0xff]  ;;  %v822_v43 = vld [vmem:[%s501_s8] sm:$0x3] (!%p1039_p3) }
  0x84   : > { %675 = vmatprep.subr.bf16.mxu1 %v526_v16  ;;  %v599_v16 = vld [vmem:[%s1548_s9 + $0x2c0] sm:$0xff] }
  0x85   : > { %717 = vmatpush1.bf16.msra.mxu0 %v557_v9  ;;  %v594_v9 = vld [vmem:[%s1548_s9 + $0x298] sm:$0xff] }
  0x86   : > { %718 = vmatprep.subr.bf16.mxu0 %v560_v10  ;;  %v593_v10 = vld [vmem:[%s1548_s9 + $0x290] sm:$0xff] }
  0x87   : > { %676 = vmatpush1.bf16.msra.mxu1 %v525_v19  ;;  %v604_v19 = vld [vmem:[%s1548_s9 + $0x2e8] sm:$0xff] }
  0x88   : > { %677 = vmatprep.subr.bf16.mxu1 %v528_v20  ;;  %v603_v20 = vld [vmem:[%s1548_s9 + $0x2e0] sm:$0xff] }
  0x89   : > { %719 = vmatpush1.bf16.msra.mxu0 %v559_v13  ;;  %v598_v13 = vld [vmem:[%s1548_s9 + $0x2b8] sm:$0xff] }
  0x8a   : > { %720 = vmatprep.subr.bf16.mxu0 %v562_v14  ;;  %v597_v14 = vld [vmem:[%s1548_s9 + $0x2b0] sm:$0xff] }
  0x8b   : > { %678 = vmatpush1.bf16.msra.mxu1 %v527_v23 }
  0x8c   : > { %679 = vmatprep.subr.bf16.mxu1 %v530_v24 }
  0x8d   : > { %721 = vmatpush1.bf16.msra.mxu0 %v561_v17  ;;  %v602_v17 = vld [vmem:[%s1548_s9 + $0x2d8] sm:$0xff] }
  0x8e   : > { %722 = vmatprep.subr.bf16.mxu0 %v564_v18  ;;  %v601_v18 = vld [vmem:[%s1548_s9 + $0x2d0] sm:$0xff] }
  0x8f   : > { %680 = vmatpush1.bf16.msra.mxu1 %v529_v27  ;;  %v1206_v27 = vmov 1983009808  }
  0x90   : > { %681 = vmatprep.subr.bf16.mxu1 %v532_v28  ;;  %v788_v28 = vunpack.c.l.s4 %v1206_v27 }
  0x91   : > { %723 = vmatpush1.bf16.msra.mxu0 %v563_v21  ;;  %v606_v21 = vld [vmem:[%s1548_s9 + $0x2f8] sm:$0xff] }
  0x92   : > { %724 = vmatprep.subr.bf16.mxu0 %v566_v22  ;;  %v605_v22 = vld [vmem:[%s1548_s9 + $0x2f0] sm:$0xff] }
  0x93   : > { %682 = vmatpush1.bf16.msra.mxu1 %v531_v31 }
  0x94   : > { %683 = vmatprep.subr.bf16.mxu1 %v534_v32 }
  0x95   : > { %725 = vmatpush1.bf16.msra.mxu0 %v565_v25 }
  0x96   : > { %726 = vmatprep.subr.bf16.mxu0 %v568_v26 }
  0x97   : > { %684 = vmatpush1.bf16.msra.mxu1 %v533_v35 }
  0x98   : > { %685 = vmatprep.subr.bf16.mxu1 %v536_v36 }
  0x99   : > { %727 = vmatpush1.bf16.msra.mxu0 %v567_v29  ;;  %v789_v29 = vunpack.c.0.s8 %v788_v28 }
  0x9a   : > { %728 = vmatprep.subr.bf16.mxu0 %v570_v30 }
  0x9b   : > { %686 = vmatpush1.bf16.msra.mxu1 %v535_v40  ;;  %v806_v40 = vsub.s32 (!%p1039_p3), 0, %v1557_v42 }
  0x9c   : > { %687 = vmatprep.subr.bf16.mxu1 %v538_v41  ;;  %v810_v41 = vsub.s32 (!%p1039_p3), 1, %v1557_v42 }
  0x9d   : > { %729 = vmatpush1.bf16.msra.mxu0 %v569_v33 }
  0x9e   : > { %730 = vmatprep.subr.bf16.mxu0 %v572_v34  ;;  %v792_v34 = vsub.s32 %v789_v29, %v1557_v42 }
  0x9f   : > { %688 = vmatpush1.bf16.msra.mxu1 %v537_v48  ;;  %v831_v48 = vrot.slane (!%p1039_p3), %v822_v43, %v810_v41 }
  0xa0   : > { %689 = vmatprep.subr.bf16.mxu1 %v540_v49 }
  0xa1   : > { %731 = vmatpush1.bf16.msra.mxu0 %v571_v37 }
  0xa2   : > { %732 = vmatprep.subr.bf16.mxu0 %v574_v38  ;;  %v509_v38 = vld [vmem:[#allocation2] sm:$0xf] }
  0xa3   : > { %690 = vmatpush1.bf16.msra.mxu1 %v539_v53 }
  0xa4   : > { %691 = vmatprep.subr.bf16.mxu1 %v542_v54 }
  0xa5   : > { %733 = vmatpush1.bf16.msra.mxu0 %v573_v44 }
  0xa6   : > { %743 = vmatprep.subr.bf16.mxu0 %v576_v46 }
  0xa7   : > { %692 = vmatpush1.bf16.msra.mxu1 %v541_v58 }
  0xa8   : > { %735 = vmatmul.mubr.bf16.vlgmr.msra.gmra.mrb[0].mxu0 %v653_v47  ;;  %v827_v47 = vrot.slane (!%p1039_p3), %v822_v43, %v806_v40 }
  0xa9   : > { %744 = vmatpush1.bf16.msra.mxu0 %v575_v51  ;;  %775 = vmatprep.mubr.bf16.mxu0 %v652_v50 }
  0xaa   : > { %745 = vmatprep.subr.bf16.mxu0 %v578_v52  ;;  %694 = vmatmul.mubr.bf16.vlgmr.msra.gmra.mrb[0].mxu1 %v631_v39  ;;  %v832_v50 = vcombine.low (!%p1039_p3), %v827_v47, %v831_v48 }
  0xac   : > { %v839_v53 = vrot.slane (!%p1039_p3), %v832_v50, %v792_v34 }
  0xad   : > { %746 = vmatpush1.bf16.msra.mxu0 %v577_v55 }
  0xae   : > { %747 = vmatprep.subr.bf16.mxu0 %v580_v56 }
  0xb1   : > { %748 = vmatpush1.bf16.msra.mxu0 %v579_v59 }
  0xb2   : > { %749 = vmatprep.subr.bf16.mxu0 %v582_v60 }
  0xb5   : > { %750 = vmatpush1.bf16.msra.mxu0 %v581_v62 }
  0xb6   : > { %751 = vmatprep.subr.bf16.mxu0 %v584_v63 }
  0xb9   : > { %752 = vmatpush1.bf16.msra.mxu0 %v583_v0 }
  0xba   : > { %753 = vmatprep.subr.bf16.mxu0 %v586_v1 }
  0xbd   : > { %754 = vmatpush1.bf16.msra.mxu0 %v585_v2 }
  0xbe   : > { %755 = vmatprep.subr.bf16.mxu0 %v588_v3 }
  0xc1   : > { %756 = vmatpush1.bf16.msra.mxu0 %v587_v4 }
  0xc2   : > { %757 = vmatprep.subr.bf16.mxu0 %v590_v5 }
  0xc5   : > { %758 = vmatpush1.bf16.msra.mxu0 %v589_v6 }
  0xc6   : > { %759 = vmatprep.subr.bf16.mxu0 %v592_v7 }
  0xc9   : > { %760 = vmatpush1.bf16.msra.mxu0 %v591_v8 }
  0xca   : > { %761 = vmatprep.subr.bf16.mxu0 %v594_v9 }
  0xcd   : > { %762 = vmatpush1.bf16.msra.mxu0 %v593_v10 }
  0xce   : > { %763 = vmatprep.subr.bf16.mxu0 %v596_v11 }
  0xd1   : > { %764 = vmatpush1.bf16.msra.mxu0 %v595_v12 }
  0xd2   : > { %765 = vmatprep.subr.bf16.mxu0 %v598_v13 }
  0xd5   : > { %766 = vmatpush1.bf16.msra.mxu0 %v597_v14 }
  0xd6   : > { %767 = vmatprep.subr.bf16.mxu0 %v600_v15 }
  0xd9   : > { %768 = vmatpush1.bf16.msra.mxu0 %v599_v16 }
  0xda   : > { %769 = vmatprep.subr.bf16.mxu0 %v602_v17 }
  0xdd   : > { %770 = vmatpush1.bf16.msra.mxu0 %v601_v18 }
  0xde   : > { %771 = vmatprep.subr.bf16.mxu0 %v604_v19 }
  0xe1   : > { %772 = vmatpush1.bf16.msra.mxu0 %v603_v20 }
  0xe2   : > { %773 = vmatprep.subr.bf16.mxu0 %v606_v21 }
  0xe5   : > { %774 = vmatpush1.bf16.msra.mxu0 %v605_v22 }
  0xe8   : > { %776 = vmatmul.mubr.bf16.vlgmr.msra.gmra.mrb[0].mxu0 %v638_v61  ;;  %v802_v61 = vld [vmem:[%s496_s22] sm:$0x3] (!%p1039_p3) }
  0xe9   : > { %v807_v44 = vrot.slane (!%p1039_p3), %v802_v61, %v806_v40  ;;  %v811_v46 = vrot.slane (!%p1039_p3), %v802_v61, %v810_v41 }
  0xeb   : > { %v812_v49 = vcombine.low (!%p1039_p3), %v807_v44, %v811_v46 }
  0xed   : > { %v819_v52 = vrot.slane (!%p1039_p3), %v812_v49, %v792_v34 }
 0x17d   : > { %v695_v23 = vpop.f32.mrb[0].mxu1 }
 0x17e   : > { %v697_v24 = vpop.f32.mrb[1].mxu1 }
 0x17f   : > { %v699_v25 = vpop.f32.mrb[2].mxu1 }
 0x180   : > { %v700_v26 = vpop.f32.mrb[3].mxu1 }
 0x1bb   : > { %v777_v30 = vpop.f32.mrb[0].mxu0 }
 0x1bc   : > { %v1048_v31 = vadd.f32 %v777_v30, %v695_v23  ;;  %v779_v32 = vpop.f32.mrb[1].mxu0 }
 0x1bd   : > { %v1049_v33 = vadd.f32 %v779_v32, %v697_v24  ;;  %v781_v35 = vpop.f32.mrb[2].mxu0 }
 0x1be   : > { %v782_v36 = vpop.f32.mrb[3].mxu0 }
 0x1bf   : > { %v786_v37 = vcombine.low %v1048_v31, %v1049_v33  ;;  %800 = sbr.rel (%p1039_p3) target bundleno = 476 (0x1dc), region = 67 }
 0x1c1   : > { %v793_v39 = vrot.slane %v786_v37, %v792_v34 }
 0x1c3   : > { %v795_v57 = vadd.f32 %v793_v39, %v509_v38 }
 0x1c5   : > { %796 = vst [vmem:[#allocation2] sm:$0xf] %v795_v57 }
 0x1cc   : > { %v801_v51 = vld [vmem:[#allocation2] sm:$0xf] }
 0x1cd   : > { %v821_v54 = vmul.f32 %v819_v52, %v801_v51 }
 0x1cf   : > { %v841_v55 = vadd.f32 %v839_v53, %v821_v54 }
 0x1d1   : > { %v842_v56 = vmax.f32 %v841_v55, 0.0 }
 0x1d3   : > { %v850_v58 = vrot.slane %v842_v56, %v792_v34 }
 0x1d5   : > { %v851_v42 = vcombine.high %v850_v58, %v850_v58 }
 0x1d7   : > { %v1040_v59 = vpack.c.bf16 %v851_v42, %v850_v58 }
 0x1d9   : > { %v865_v60 = vrot.slane %v1040_v59, %v1562_v45 }
 0x1db   : > { %1041 = vst.sshfl [vmem:[%s481_s2] sm:$0x5 pattern:$0x73625140] %v865_v60 }
 0x1dc PF: > { %881 = sbr.rel (!%p1305_p9) target bundleno = 484 (0x1e4), region = 71  ;;  %s962_s7 = scalar_lea.vmem (%p1305_p9), %s1734_s5, %s1528_s16 }
 0x1e2   : > { %v901_v62 = vld [vmem:[%s481_s2] sm:$0x3] (%p1305_p9) }
 0x1e3   : > { %1044 = vst [vmem:[%s962_s7 + $0x10] sm:$0x3] %v901_v62 }
 0x1e4 PF: > { %s16_s25 = sadd.s32 1, %s1202_s25   ;;  %s1739_s18 = smov %s1174_s19 }
 0x1e5   : > { %p13_p4 = scmp.ge.s32.totalorder %s16_s25, 8   ;;  %s1740_s19 = smov %s1310_s11 }
 0x1e6   : > { %s1741_s0 = smov %s1182_s20  ;;  %s1742_s20 = smov %s1313_s12 }
 0x1e7   : > { %s1743_s21 = smov %s1194_s23  ;;  %s1744_s22 = smov %s1198_s24 }
 0x1e8   : > { %s1745_s23 = smov %s1748_s26  ;;  %s1746_s24 = smov %s1752_s27 }
 0x1e9   :  { %15 = sbr.rel (!%p13_p4) target bundleno = 7 (0x7), region = 146 }

// kernel: _lambda_.39
= control target key start
LH: loop header
LB: loop body
LE: loop exit
PB: predicated region body
PF: predicated region fallthrough
CT: control target
= control target key end

     0   :  { %s2188_s18 = smov 0   ;;  %s2190_s19 = smov 0   ;;  %s2647_s0 = inlined_call_operand.vmem [shape: bf16[2,4608], index: 0, kind: input, shape index: {}]   ;;  %s2648_s1 = inlined_call_operand.vmem [shape: bf16[4608,512], index: 1, kind: input, shape index: {}]   ;;  %s2649_s2 = inlined_call_operand.vmem [shape: f32[1,512], index: 2, kind: input, shape index: {}]   ;;  %s2650_s3 = inlined_call_operand.vmem [shape: f32[1,512], index: 3, kind: input, shape index: {}]   ;;  %s2651_s4 = inlined_call_operand.vmem [shape: bf16[2,512], index: 4, kind: input, shape index: {}]   ;;  %s2652_s5 = inlined_call_operand.vmem [shape: bf16[2,512], index: 5, kind: output, shape index: {}]  }
   0x1   :  { %s2192_s20 = smov 0   ;;  %s2194_s21 = smov 0  }
   0x2   :  { %s2196_s22 = smov 0   ;;  %s2198_s23 = smov 0  }
   0x3   :  { %s2200_s24 = smov 0  }
   0x4 LB: > { %s27_s25 = sadd.s32 1, %s2145_s22  ;;  %s30_s26 = sadd.s32 1, %s2149_s23  ;;  %s2153_s24 = sphi %s2200_s24, %s15_s24   ;;  %s2149_s23 = sphi %s2198_s23, %s2658_s23   ;;  %s2145_s22 = sphi %s2196_s22, %s2657_s22   ;;  %s2141_s21 = sphi %s2194_s21, %s2656_s21   ;;  %s2137_s20 = sphi %s2192_s20, %s2655_s20   ;;  %s2133_s19 = sphi %s2190_s19, %s2654_s19   ;;  %s2129_s18 = sphi %s2188_s18, %s2653_s18  }
   0x5   : > { %p28_p0 = scmp.ge.s32.totalorder %s27_s25, 6  ;;  %p78_p1 = scmp.ne.s32.totalorder %s2133_s19, %s2129_s18 }
   0x6   : > { %p79_p2 = scmp.eq.s32.totalorder %s2153_s24, 0  ;;  %s71_s30 = sadd.s32 1, %s2133_s19 }
   0x7   : > { %s2660_s25 = smov (%p28_p0, %s27_s25), 0  ;;  %s2662_s26 = smov (!%p28_p0, %s30_s26), %s2149_s23 }
   0x8   : > { %p80_p3 = por %p79_p2, %p78_p1  ;;  %p32_p4 = scmp.ge.s32.totalorder %s2662_s26, 2 }
   0x9   : > { %s66_s27 = ssub.s32 %s2145_s22, %s2660_s25  ;;  %p1775_p6 = scmp.ge.s32.totalorder %s2153_s24, 12 }
   0xa   : > { %s2664_s26 = smov (%p32_p4, %s2662_s26), 0 }
   0xb   : > { %s67_s28 = ssub.s32 %s2149_s23, %s2664_s26  ;;  %212 = sbr.rel (%p1775_p6) target bundleno = 74 (0x4a), region = 16 }
   0xc   : > { %s68_s29 = sor.u32 %s67_s28, %s66_s27 }
   0xd   : > { %p69_p5 = scmp.eq.s32.totalorder %s68_s29, 0 }
   0xf   : > { %s2239_s6 = scalar_select %p69_p5, %s2133_s19, %s71_s30  }
  0x12   : > { %227 = sbr.rel (!%p80_p3) target bundleno = 74 (0x4a), region = 24  ;;  %s229_s7 = sand.u32 (%p80_p3), 1, %s2133_s19  }
  0x13   : > { %s1893_s8 = smul.u32 (%p80_p3), 768, %s229_s7  ;;  %s1776_s9 = sshll.u32 (%p80_p3), %s2149_s23, 1 }
  0x14   : > { %s1886_s10 = smul.u32 (%p80_p3), 384, %s2145_s22 }
  0x15   : > { %s2253_s16 = scalar_lea.vmem (%p80_p3), [#allocation3], %s1893_s8 }
  0x16   : > { %s235_s11 = sadd.s32 (%p80_p3), %s1886_s10, %s1776_s9 }
  0x17   : > { %s1778_s12 = sshll.u32 (%p80_p3), %s235_s11, 2 }
  0x18   : > { %s2248_s15 = scalar_lea.vmem (%p80_p3), %s2648_s1, %s1778_s12 }
  0x19   : > { %v455_v0 = vld [vmem:[%s2248_s15] sm:$0xff]  ;;  %v457_v1 = vld [vmem:[%s2248_s15 + $0x10] sm:$0xff] }
  0x1a   : > { %v459_v2 = vld [vmem:[%s2248_s15 + $0x20] sm:$0xff]  ;;  %456 = vst [vmem:[%s2253_s16] sm:$0xff] %v455_v0  ;;  %458 = vst [vmem:[%s2253_s16 + $0x8] sm:$0xff] %v457_v1  ;;  %v461_v3 = vld [vmem:[%s2248_s15 + $0x30] sm:$0xff] }
  0x1b   : > { %460 = vst [vmem:[%s2253_s16 + $0x10] sm:$0xff] %v459_v2  ;;  %v463_v4 = vld [vmem:[%s2248_s15 + $0x40] sm:$0xff]  ;;  %v465_v5 = vld [vmem:[%s2248_s15 + $0x50] sm:$0xff]  ;;  %462 = vst [vmem:[%s2253_s16 + $0x18] sm:$0xff] %v461_v3 }
  0x1c   : > { %464 = vst [vmem:[%s2253_s16 + $0x20] sm:$0xff] %v463_v4  ;;  %466 = vst [vmem:[%s2253_s16 + $0x28] sm:$0xff] %v465_v5  ;;  %v467_v6 = vld [vmem:[%s2248_s15 + $0x60] sm:$0xff]  ;;  %v469_v7 = vld [vmem:[%s2248_s15 + $0x70] sm:$0xff] }
  0x1d   : > { %v471_v8 = vld [vmem:[%s2248_s15 + $0x80] sm:$0xff]  ;;  %468 = vst [vmem:[%s2253_s16 + $0x30] sm:$0xff] %v467_v6  ;;  %470 = vst [vmem:[%s2253_s16 + $0x38] sm:$0xff] %v469_v7  ;;  %v473_v9 = vld [vmem:[%s2248_s15 + $0x90] sm:$0xff] }
  0x1e   : > { %472 = vst [vmem:[%s2253_s16 + $0x40] sm:$0xff] %v471_v8  ;;  %v475_v10 = vld [vmem:[%s2248_s15 + $0xa0] sm:$0xff]  ;;  %v477_v11 = vld [vmem:[%s2248_s15 + $0xb0] sm:$0xff]  ;;  %474 = vst [vmem:[%s2253_s16 + $0x48] sm:$0xff] %v473_v9 }
  0x1f   : > { %476 = vst [vmem:[%s2253_s16 + $0x50] sm:$0xff] %v475_v10  ;;  %478 = vst [vmem:[%s2253_s16 + $0x58] sm:$0xff] %v477_v11  ;;  %v479_v12 = vld [vmem:[%s2248_s15 + $0xc0] sm:$0xff]  ;;  %v481_v13 = vld [vmem:[%s2248_s15 + $0xd0] sm:$0xff] }
  0x20   : > { %v483_v14 = vld [vmem:[%s2248_s15 + $0xe0] sm:$0xff]  ;;  %480 = vst [vmem:[%s2253_s16 + $0x60] sm:$0xff] %v479_v12  ;;  %482 = vst [vmem:[%s2253_s16 + $0x68] sm:$0xff] %v481_v13  ;;  %v485_v15 = vld [vmem:[%s2248_s15 + $0xf0] sm:$0xff] }
  0x21   : > { %484 = vst [vmem:[%s2253_s16 + $0x70] sm:$0xff] %v483_v14  ;;  %v487_v16 = vld [vmem:[%s2248_s15 + $0x100] sm:$0xff]  ;;  %v489_v17 = vld [vmem:[%s2248_s15 + $0x110] sm:$0xff]  ;;  %486 = vst [vmem:[%s2253_s16 + $0x78] sm:$0xff] %v485_v15 }
  0x22   : > { %488 = vst [vmem:[%s2253_s16 + $0x80] sm:$0xff] %v487_v16  ;;  %490 = vst [vmem:[%s2253_s16 + $0x88] sm:$0xff] %v489_v17  ;;  %v491_v18 = vld [vmem:[%s2248_s15 + $0x120] sm:$0xff]  ;;  %v493_v19 = vld [vmem:[%s2248_s15 + $0x130] sm:$0xff] }
  0x23   : > { %v495_v20 = vld [vmem:[%s2248_s15 + $0x140] sm:$0xff]  ;;  %492 = vst [vmem:[%s2253_s16 + $0x90] sm:$0xff] %v491_v18  ;;  %494 = vst [vmem:[%s2253_s16 + $0x98] sm:$0xff] %v493_v19  ;;  %v497_v21 = vld [vmem:[%s2248_s15 + $0x150] sm:$0xff] }
  0x24   : > { %496 = vst [vmem:[%s2253_s16 + $0xa0] sm:$0xff] %v495_v20  ;;  %v499_v22 = vld [vmem:[%s2248_s15 + $0x160] sm:$0xff]  ;;  %v501_v23 = vld [vmem:[%s2248_s15 + $0x170] sm:$0xff]  ;;  %498 = vst [vmem:[%s2253_s16 + $0xa8] sm:$0xff] %v497_v21 }
  0x25   : > { %500 = vst [vmem:[%s2253_s16 + $0xb0] sm:$0xff] %v499_v22  ;;  %502 = vst [vmem:[%s2253_s16 + $0xb8] sm:$0xff] %v501_v23  ;;  %v503_v24 = vld [vmem:[%s2248_s15 + $0x180] sm:$0xff]  ;;  %v505_v25 = vld [vmem:[%s2248_s15 + $0x190] sm:$0xff] }
  0x26   : > { %v507_v26 = vld [vmem:[%s2248_s15 + $0x1a0] sm:$0xff]  ;;  %504 = vst [vmem:[%s2253_s16 + $0xc0] sm:$0xff] %v503_v24  ;;  %506 = vst [vmem:[%s2253_s16 + $0xc8] sm:$0xff] %v505_v25  ;;  %v509_v27 = vld [vmem:[%s2248_s15 + $0x1b0] sm:$0xff] }
  0x27   : > { %508 = vst [vmem:[%s2253_s16 + $0xd0] sm:$0xff] %v507_v26  ;;  %v511_v28 = vld [vmem:[%s2248_s15 + $0x1c0] sm:$0xff]  ;;  %v513_v29 = vld [vmem:[%s2248_s15 + $0x1d0] sm:$0xff]  ;;  %510 = vst [vmem:[%s2253_s16 + $0xd8] sm:$0xff] %v509_v27 }
  0x28   : > { %512 = vst [vmem:[%s2253_s16 + $0xe0] sm:$0xff] %v511_v28  ;;  %514 = vst [vmem:[%s2253_s16 + $0xe8] sm:$0xff] %v513_v29  ;;  %v515_v30 = vld [vmem:[%s2248_s15 + $0x1e0] sm:$0xff]  ;;  %v517_v31 = vld [vmem:[%s2248_s15 + $0x1f0] sm:$0xff] }
  0x29   : > { %v519_v32 = vld [vmem:[%s2248_s15 + $0x200] sm:$0xff]  ;;  %516 = vst [vmem:[%s2253_s16 + $0xf0] sm:$0xff] %v515_v30  ;;  %518 = vst [vmem:[%s2253_s16 + $0xf8] sm:$0xff] %v517_v31  ;;  %v521_v33 = vld [vmem:[%s2248_s15 + $0x210] sm:$0xff] }
  0x2a   : > { %520 = vst [vmem:[%s2253_s16 + $0x100] sm:$0xff] %v519_v32  ;;  %v523_v34 = vld [vmem:[%s2248_s15 + $0x220] sm:$0xff]  ;;  %v525_v35 = vld [vmem:[%s2248_s15 + $0x230] sm:$0xff]  ;;  %522 = vst [vmem:[%s2253_s16 + $0x108] sm:$0xff] %v521_v33 }
  0x2b   : > { %524 = vst [vmem:[%s2253_s16 + $0x110] sm:$0xff] %v523_v34  ;;  %526 = vst [vmem:[%s2253_s16 + $0x118] sm:$0xff] %v525_v35  ;;  %v527_v36 = vld [vmem:[%s2248_s15 + $0x240] sm:$0xff]  ;;  %v529_v37 = vld [vmem:[%s2248_s15 + $0x250] sm:$0xff] }
  0x2c   : > { %v531_v38 = vld [vmem:[%s2248_s15 + $0x260] sm:$0xff]  ;;  %528 = vst [vmem:[%s2253_s16 + $0x120] sm:$0xff] %v527_v36  ;;  %530 = vst [vmem:[%s2253_s16 + $0x128] sm:$0xff] %v529_v37  ;;  %v533_v39 = vld [vmem:[%s2248_s15 + $0x270] sm:$0xff] }
  0x2d   : > { %532 = vst [vmem:[%s2253_s16 + $0x130] sm:$0xff] %v531_v38  ;;  %v535_v40 = vld [vmem:[%s2248_s15 + $0x280] sm:$0xff]  ;;  %v537_v41 = vld [vmem:[%s2248_s15 + $0x290] sm:$0xff]  ;;  %534 = vst [vmem:[%s2253_s16 + $0x138] sm:$0xff] %v533_v39 }
  0x2e   : > { %536 = vst [vmem:[%s2253_s16 + $0x140] sm:$0xff] %v535_v40  ;;  %538 = vst [vmem:[%s2253_s16 + $0x148] sm:$0xff] %v537_v41  ;;  %v539_v42 = vld [vmem:[%s2248_s15 + $0x2a0] sm:$0xff]  ;;  %v541_v43 = vld [vmem:[%s2248_s15 + $0x2b0] sm:$0xff] }
  0x2f   : > { %v543_v44 = vld [vmem:[%s2248_s15 + $0x2c0] sm:$0xff]  ;;  %540 = vst [vmem:[%s2253_s16 + $0x150] sm:$0xff] %v539_v42  ;;  %542 = vst [vmem:[%s2253_s16 + $0x158] sm:$0xff] %v541_v43  ;;  %v545_v45 = vld [vmem:[%s2248_s15 + $0x2d0] sm:$0xff] }
  0x30   : > { %544 = vst [vmem:[%s2253_s16 + $0x160] sm:$0xff] %v543_v44  ;;  %v547_v46 = vld [vmem:[%s2248_s15 + $0x2e0] sm:$0xff]  ;;  %v549_v47 = vld [vmem:[%s2248_s15 + $0x2f0] sm:$0xff]  ;;  %546 = vst [vmem:[%s2253_s16 + $0x168] sm:$0xff] %v545_v45 }
  0x31   : > { %548 = vst [vmem:[%s2253_s16 + $0x170] sm:$0xff] %v547_v46  ;;  %550 = vst [vmem:[%s2253_s16 + $0x178] sm:$0xff] %v549_v47  ;;  %v551_v48 = vld [vmem:[%s2248_s15 + $0x300] sm:$0xff]  ;;  %v553_v49 = vld [vmem:[%s2248_s15 + $0x310] sm:$0xff] }
  0x32   : > { %v555_v50 = vld [vmem:[%s2248_s15 + $0x320] sm:$0xff]  ;;  %552 = vst [vmem:[%s2253_s16 + $0x180] sm:$0xff] %v551_v48  ;;  %554 = vst [vmem:[%s2253_s16 + $0x188] sm:$0xff] %v553_v49  ;;  %v557_v51 = vld [vmem:[%s2248_s15 + $0x330] sm:$0xff] }
  0x33   : > { %556 = vst [vmem:[%s2253_s16 + $0x190] sm:$0xff] %v555_v50  ;;  %v559_v52 = vld [vmem:[%s2248_s15 + $0x340] sm:$0xff]  ;;  %v561_v53 = vld [vmem:[%s2248_s15 + $0x350] sm:$0xff]  ;;  %558 = vst [vmem:[%s2253_s16 + $0x198] sm:$0xff] %v557_v51 }
  0x34   : > { %560 = vst [vmem:[%s2253_s16 + $0x1a0] sm:$0xff] %v559_v52  ;;  %562 = vst [vmem:[%s2253_s16 + $0x1a8] sm:$0xff] %v561_v53  ;;  %v563_v54 = vld [vmem:[%s2248_s15 + $0x360] sm:$0xff]  ;;  %v565_v55 = vld [vmem:[%s2248_s15 + $0x370] sm:$0xff] }
  0x35   : > { %v567_v56 = vld [vmem:[%s2248_s15 + $0x380] sm:$0xff]  ;;  %564 = vst [vmem:[%s2253_s16 + $0x1b0] sm:$0xff] %v563_v54  ;;  %566 = vst [vmem:[%s2253_s16 + $0x1b8] sm:$0xff] %v565_v55  ;;  %v569_v57 = vld [vmem:[%s2248_s15 + $0x390] sm:$0xff] }
  0x36   : > { %568 = vst [vmem:[%s2253_s16 + $0x1c0] sm:$0xff] %v567_v56  ;;  %v571_v58 = vld [vmem:[%s2248_s15 + $0x3a0] sm:$0xff]  ;;  %v573_v59 = vld [vmem:[%s2248_s15 + $0x3b0] sm:$0xff]  ;;  %570 = vst [vmem:[%s2253_s16 + $0x1c8] sm:$0xff] %v569_v57 }
  0x37   : > { %572 = vst [vmem:[%s2253_s16 + $0x1d0] sm:$0xff] %v571_v58  ;;  %574 = vst [vmem:[%s2253_s16 + $0x1d8] sm:$0xff] %v573_v59  ;;  %v575_v60 = vld [vmem:[%s2248_s15 + $0x3c0] sm:$0xff]  ;;  %v577_v61 = vld [vmem:[%s2248_s15 + $0x3d0] sm:$0xff] }
  0x38   : > { %v579_v62 = vld [vmem:[%s2248_s15 + $0x3e0] sm:$0xff]  ;;  %576 = vst [vmem:[%s2253_s16 + $0x1e0] sm:$0xff] %v575_v60  ;;  %578 = vst [vmem:[%s2253_s16 + $0x1e8] sm:$0xff] %v577_v61  ;;  %v581_v63 = vld [vmem:[%s2248_s15 + $0x3f0] sm:$0xff] }
  0x39   : > { %580 = vst [vmem:[%s2253_s16 + $0x1f0] sm:$0xff] %v579_v62  ;;  %v583_v0 = vld [vmem:[%s2248_s15 + $0x400] sm:$0xff]  ;;  %v585_v1 = vld [vmem:[%s2248_s15 + $0x410] sm:$0xff]  ;;  %582 = vst [vmem:[%s2253_s16 + $0x1f8] sm:$0xff] %v581_v63 }
  0x3a   : > { %584 = vst [vmem:[%s2253_s16 + $0x200] sm:$0xff] %v583_v0  ;;  %586 = vst [vmem:[%s2253_s16 + $0x208] sm:$0xff] %v585_v1  ;;  %v587_v2 = vld [vmem:[%s2248_s15 + $0x420] sm:$0xff]  ;;  %v589_v3 = vld [vmem:[%s2248_s15 + $0x430] sm:$0xff] }
  0x3b   : > { %v591_v4 = vld [vmem:[%s2248_s15 + $0x440] sm:$0xff]  ;;  %588 = vst [vmem:[%s2253_s16 + $0x210] sm:$0xff] %v587_v2  ;;  %590 = vst [vmem:[%s2253_s16 + $0x218] sm:$0xff] %v589_v3  ;;  %v593_v5 = vld [vmem:[%s2248_s15 + $0x450] sm:$0xff] }
  0x3c   : > { %592 = vst [vmem:[%s2253_s16 + $0x220] sm:$0xff] %v591_v4  ;;  %v595_v6 = vld [vmem:[%s2248_s15 + $0x460] sm:$0xff]  ;;  %v597_v7 = vld [vmem:[%s2248_s15 + $0x470] sm:$0xff]  ;;  %594 = vst [vmem:[%s2253_s16 + $0x228] sm:$0xff] %v593_v5 }
  0x3d   : > { %596 = vst [vmem:[%s2253_s16 + $0x230] sm:$0xff] %v595_v6  ;;  %598 = vst [vmem:[%s2253_s16 + $0x238] sm:$0xff] %v597_v7  ;;  %v599_v8 = vld [vmem:[%s2248_s15 + $0x480] sm:$0xff]  ;;  %v601_v9 = vld [vmem:[%s2248_s15 + $0x490] sm:$0xff] }
  0x3e   : > { %v603_v10 = vld [vmem:[%s2248_s15 + $0x4a0] sm:$0xff]  ;;  %600 = vst [vmem:[%s2253_s16 + $0x240] sm:$0xff] %v599_v8  ;;  %602 = vst [vmem:[%s2253_s16 + $0x248] sm:$0xff] %v601_v9  ;;  %v605_v11 = vld [vmem:[%s2248_s15 + $0x4b0] sm:$0xff] }
  0x3f   : > { %604 = vst [vmem:[%s2253_s16 + $0x250] sm:$0xff] %v603_v10  ;;  %v607_v12 = vld [vmem:[%s2248_s15 + $0x4c0] sm:$0xff]  ;;  %v609_v13 = vld [vmem:[%s2248_s15 + $0x4d0] sm:$0xff]  ;;  %606 = vst [vmem:[%s2253_s16 + $0x258] sm:$0xff] %v605_v11 }
  0x40   : > { %608 = vst [vmem:[%s2253_s16 + $0x260] sm:$0xff] %v607_v12  ;;  %610 = vst [vmem:[%s2253_s16 + $0x268] sm:$0xff] %v609_v13  ;;  %v611_v14 = vld [vmem:[%s2248_s15 + $0x4e0] sm:$0xff]  ;;  %v613_v15 = vld [vmem:[%s2248_s15 + $0x4f0] sm:$0xff] }
  0x41   : > { %v615_v16 = vld [vmem:[%s2248_s15 + $0x500] sm:$0xff]  ;;  %612 = vst [vmem:[%s2253_s16 + $0x270] sm:$0xff] %v611_v14  ;;  %614 = vst [vmem:[%s2253_s16 + $0x278] sm:$0xff] %v613_v15  ;;  %v617_v17 = vld [vmem:[%s2248_s15 + $0x510] sm:$0xff] }
  0x42   : > { %616 = vst [vmem:[%s2253_s16 + $0x280] sm:$0xff] %v615_v16  ;;  %v619_v18 = vld [vmem:[%s2248_s15 + $0x520] sm:$0xff]  ;;  %v621_v19 = vld [vmem:[%s2248_s15 + $0x530] sm:$0xff]  ;;  %618 = vst [vmem:[%s2253_s16 + $0x288] sm:$0xff] %v617_v17 }
  0x43   : > { %620 = vst [vmem:[%s2253_s16 + $0x290] sm:$0xff] %v619_v18  ;;  %622 = vst [vmem:[%s2253_s16 + $0x298] sm:$0xff] %v621_v19  ;;  %v623_v20 = vld [vmem:[%s2248_s15 + $0x540] sm:$0xff]  ;;  %v625_v21 = vld [vmem:[%s2248_s15 + $0x550] sm:$0xff] }
  0x44   : > { %v627_v22 = vld [vmem:[%s2248_s15 + $0x560] sm:$0xff]  ;;  %624 = vst [vmem:[%s2253_s16 + $0x2a0] sm:$0xff] %v623_v20  ;;  %626 = vst [vmem:[%s2253_s16 + $0x2a8] sm:$0xff] %v625_v21  ;;  %v629_v23 = vld [vmem:[%s2248_s15 + $0x570] sm:$0xff] }
  0x45   : > { %628 = vst [vmem:[%s2253_s16 + $0x2b0] sm:$0xff] %v627_v22  ;;  %v631_v24 = vld [vmem:[%s2248_s15 + $0x580] sm:$0xff]  ;;  %v633_v25 = vld [vmem:[%s2248_s15 + $0x590] sm:$0xff]  ;;  %630 = vst [vmem:[%s2253_s16 + $0x2b8] sm:$0xff] %v629_v23 }
  0x46   : > { %632 = vst [vmem:[%s2253_s16 + $0x2c0] sm:$0xff] %v631_v24  ;;  %634 = vst [vmem:[%s2253_s16 + $0x2c8] sm:$0xff] %v633_v25  ;;  %v635_v26 = vld [vmem:[%s2248_s15 + $0x5a0] sm:$0xff]  ;;  %v637_v27 = vld [vmem:[%s2248_s15 + $0x5b0] sm:$0xff] }
  0x47   : > { %v639_v28 = vld [vmem:[%s2248_s15 + $0x5c0] sm:$0xff]  ;;  %636 = vst [vmem:[%s2253_s16 + $0x2d0] sm:$0xff] %v635_v26  ;;  %638 = vst [vmem:[%s2253_s16 + $0x2d8] sm:$0xff] %v637_v27  ;;  %v641_v29 = vld [vmem:[%s2248_s15 + $0x5d0] sm:$0xff] }
  0x48   : > { %640 = vst [vmem:[%s2253_s16 + $0x2e0] sm:$0xff] %v639_v28  ;;  %v643_v30 = vld [vmem:[%s2248_s15 + $0x5e0] sm:$0xff]  ;;  %v645_v31 = vld [vmem:[%s2248_s15 + $0x5f0] sm:$0xff]  ;;  %642 = vst [vmem:[%s2253_s16 + $0x2e8] sm:$0xff] %v641_v29 }
  0x49   : > { %644 = vst [vmem:[%s2253_s16 + $0x2f0] sm:$0xff] %v643_v30  ;;  %646 = vst [vmem:[%s2253_s16 + $0x2f8] sm:$0xff] %v645_v31 }
  0x4a PF: > { %p1779_p7 = scmp.ge.s32.totalorder %s2153_s24, 1  ;;  %p679_p8 = scmp.lt.s32.totalorder %s2153_s24, 13 }
  0x4c   : > { %p680_p9 = pnand %p1779_p7, %p679_p8 }
  0x4d   : > { %s686_s17 = sand.u32 (!%p680_p9), 1, %s2129_s18   ;;  %s740_s27 = smul.u32 (!%p680_p9), 6, %s2137_s20 }
  0x4e   : > { %683 = sbr.rel (%p680_p9) target bundleno = 472 (0x1d8), region = 74  ;;  %s1780_s29 = sshll.u32 (!%p680_p9), %s2141_s21, 1 }
  0x4f   : > { %s1894_s28 = smul.u32 (!%p680_p9), 768, %s686_s17  ;;  %p743_p10 = scmp.lt.s32.totalorder (!%p680_p9), %s740_s27, 35 }
  0x50   : > { %p752_p11 = scmp.lt.s32.totalorder (!%p680_p9), %s1780_s29, 3  ;;  %p1784_p12 = scmp.ne.s32.totalorder (!%p680_p9), %s2137_s20, 0 }
  0x51   : > { %s2473_s7 = scalar_lea.vmem (!%p680_p9), [#allocation3], %s1894_s28 }
  0x55   : > { %s2666_s27 = smov (!%p743_p10, %s740_s27), 35  ;;  %s2668_s29 = smov (!%p752_p11, %s1780_s29), 3 }
  0x56   : > { %s747_s8 = scalar_lea.vmem %s2647_s0, %s2666_s27  ;;  %s754_s10 = scalar_lea.vmem %s2649_s2, %s2668_s29  ;;  %v2155_v32 = vmov (!%p1784_p12), 0.0  }
  0x57   : > { %s759_s12 = scalar_lea.vmem %s2650_s3, %s2668_s29  ;;  %s768_s15 = scalar_lea.vmem %s2651_s4, %s2668_s29  ;;  %783 = vst [vmem:[#allocation2] sm:$0xf] (!%p1784_p12), %v2155_v32 }
  0x58   : > { %s777_s30 = scalar_lea.vmem %s2652_s5, %s2668_s29  ;;  %782 = sbr.rel (%p1784_p12) target bundleno = 95 (0x5f), region = 82 }
  0x5f PF: > { %v1954_v33 = vld [vmem:[%s2473_s7 + $0x104] ss:$8 sps:$4 sm:$0xff]   ;;  %v1956_v34 = vld [vmem:[%s2473_s7 + $0x100] ss:$8 sps:$4 sm:$0xff]   ;;  %v1957_v35 = vld [vmem:[%s2473_s7 + $0x114] ss:$8 sps:$4 sm:$0xff]   ;;  %v887_v43 = vlaneseq }
  0x60   : > { %1457 = vmatprep.subr.bf16.mxu0 %v1954_v33  ;;  %v1959_v36 = vld [vmem:[%s2473_s7 + $0x110] ss:$8 sps:$4 sm:$0xff]   ;;  %v1960_v37 = vld [vmem:[%s2473_s7 + $0x124] ss:$8 sps:$4 sm:$0xff]   ;;  %v1962_v38 = vld [vmem:[%s2473_s7 + $0x120] ss:$8 sps:$4 sm:$0xff]  }
  0x61   : > { %1458 = vmatpush1.bf16.msra.mxu0 %v1956_v34  ;;  %v1963_v39 = vld [vmem:[%s2473_s7 + $0x134] ss:$8 sps:$4 sm:$0xff]   ;;  %v1965_v40 = vld [vmem:[%s2473_s7 + $0x130] ss:$8 sps:$4 sm:$0xff]   ;;  %v2156_v41 = vmov 1966171168  }
  0x62   : > { %1459 = vmatprep.subr.bf16.mxu0 %v1957_v35  ;;  %v885_v42 = vunpack.c.l.s4 %v2156_v41  ;;  %v1966_v44 = vld [vmem:[%s2473_s7 + $0x144] ss:$8 sps:$4 sm:$0xff]   ;;  %v1968_v45 = vld [vmem:[%s2473_s7 + $0x140] ss:$8 sps:$4 sm:$0xff]   ;;  %v2486_v47 = vshrl.u32 %v887_v43, 7  ;;  %p1881_p13 = scmp.ne.s32.totalorder %s2137_s20, 5 }
  0x63   : > { %v1969_v48 = vld [vmem:[%s2473_s7 + $0x154] ss:$8 sps:$4 sm:$0xff]   ;;  %v1971_v49 = vld [vmem:[%s2473_s7 + $0x150] ss:$8 sps:$4 sm:$0xff]   ;;  %v1972_v51 = vld [vmem:[%s2473_s7 + $0x164] ss:$8 sps:$4 sm:$0xff]  }
  0x64   : > { %v886_v46 = vunpack.c.0.s8 %v885_v42  ;;  %v2001_v52 = vld [vmem:[%s2473_s7 + $0x4] ss:$8 sps:$4 sm:$0xff]   ;;  %v2004_v53 = vld [vmem:[%s2473_s7] ss:$8 sps:$4 sm:$0xff]   ;;  %v1975_v58 = vld [vmem:[%s2473_s7 + $0x174] ss:$8 sps:$4 sm:$0xff]  }
  0x65   : > { %1460 = vmatpush1.bf16.msra.mxu0 %v1959_v36  ;;  %v785_v54 = vld [vmem:[%s747_s8] sm:$0x3f]  ;;  %1416 = vmatprep.subr.bf16.mxu1 %v2001_v52  ;;  %v2011_v61 = vld [vmem:[%s2473_s7 + $0x10] ss:$8 sps:$4 sm:$0xff]   ;;  %v1978_v63 = vld [vmem:[%s2473_s7 + $0x184] ss:$8 sps:$4 sm:$0xff]  }
  0x66   : > { %1461 = vmatprep.subr.bf16.mxu0 %v1960_v37  ;;  %v2491_v50 = vsub.s32 %v886_v46, %v2486_v47  ;;  %v1974_v55 = vld [vmem:[%s2473_s7 + $0x160] ss:$8 sps:$4 sm:$0xff]   ;;  %v883_v56 = vcombine.high %v785_v54, %v785_v54  ;;  %1417 = vmatpush1.bf16.msra.mxu1 %v2004_v53  ;;  %v2009_v60 = vld [vmem:[%s2473_s7 + $0x14] ss:$8 sps:$4 sm:$0xff]   ;;  %v1977_v62 = vld [vmem:[%s2473_s7 + $0x170] ss:$8 sps:$4 sm:$0xff]  }
  0x67   : > { %1418 = vmatprep.subr.bf16.mxu1 %v2009_v60  ;;  %v2015_v2 = vld [vmem:[%s2473_s7 + $0x24] ss:$8 sps:$4 sm:$0xff]   ;;  %v2017_v3 = vld [vmem:[%s2473_s7 + $0x20] ss:$8 sps:$4 sm:$0xff]   ;;  %v2021_v7 = vld [vmem:[%s2473_s7 + $0x34] ss:$8 sps:$4 sm:$0xff]  }
  0x68   : > { %v2503_v57 = vrot.slane %v785_v54, %v2491_v50  ;;  %v2513_v0 = vrot.slane %v883_v56, %v2491_v50  ;;  %v1980_v6 = vld [vmem:[%s2473_s7 + $0x180] ss:$8 sps:$4 sm:$0xff]   ;;  %v1981_v8 = vld [vmem:[%s2473_s7 + $0x194] ss:$8 sps:$4 sm:$0xff]   ;;  %v2023_v9 = vld [vmem:[%s2473_s7 + $0x30] ss:$8 sps:$4 sm:$0xff]  }
  0x69   : > { %1462 = vmatpush1.bf16.msra.mxu0 %v1962_v38  ;;  %v2027_v10 = vld [vmem:[%s2473_s7 + $0x44] ss:$8 sps:$4 sm:$0xff]   ;;  %v1983_v11 = vld [vmem:[%s2473_s7 + $0x190] ss:$8 sps:$4 sm:$0xff]   ;;  %v2029_v13 = vld [vmem:[%s2473_s7 + $0x40] ss:$8 sps:$4 sm:$0xff]  }
  0x6a   : > { %1463 = vmatprep.subr.bf16.mxu0 %v1963_v39  ;;  %v898_v59 = vcombine.high %v2503_v57, %v2503_v57  ;;  %1419 = vmatpush1.bf16.msra.mxu1 %v2011_v61  ;;  %v913_v4 = vrot.slane %v2513_v0, %v2491_v50  ;;  %v1984_v12 = vld [vmem:[%s2473_s7 + $0x1a4] ss:$8 sps:$4 sm:$0xff]   ;;  %v2033_v14 = vld [vmem:[%s2473_s7 + $0x54] ss:$8 sps:$4 sm:$0xff]   ;;  %v1986_v15 = vld [vmem:[%s2473_s7 + $0x1a0] ss:$8 sps:$4 sm:$0xff]   ;;  %v906_v36 = vrot.slane %v2503_v57, %v2491_v50 }
  0x6b   : > { %1420 = vmatprep.subr.bf16.mxu1 %v2015_v2  ;;  %v1987_v16 = vld [vmem:[%s2473_s7 + $0x1b4] ss:$8 sps:$4 sm:$0xff]   ;;  %v2035_v17 = vld [vmem:[%s2473_s7 + $0x50] ss:$8 sps:$4 sm:$0xff]   ;;  %v2039_v18 = vld [vmem:[%s2473_s7 + $0x64] ss:$8 sps:$4 sm:$0xff]   ;;  %v899_v38 = vcombine.high %v2513_v0, %v2513_v0 }
  0x6c   : > { %v920_v1 = vrot.slane %v898_v59, %v2491_v50  ;;  %v1989_v19 = vld [vmem:[%s2473_s7 + $0x1b0] ss:$8 sps:$4 sm:$0xff]   ;;  %v1990_v20 = vld [vmem:[%s2473_s7 + $0x1c4] ss:$8 sps:$4 sm:$0xff]   ;;  %v2041_v21 = vld [vmem:[%s2473_s7 + $0x60] ss:$8 sps:$4 sm:$0xff]   ;;  %v928_v41 = vcombine.high %v906_v36, %v906_v36 }
  0x6d   : > { %1464 = vmatpush1.bf16.msra.mxu0 %v1965_v40  ;;  %v2045_v22 = vld [vmem:[%s2473_s7 + $0x74] ss:$8 sps:$4 sm:$0xff]   ;;  %v1992_v23 = vld [vmem:[%s2473_s7 + $0x1c0] ss:$8 sps:$4 sm:$0xff]   ;;  %v2047_v25 = vld [vmem:[%s2473_s7 + $0x70] ss:$8 sps:$4 sm:$0xff]   ;;  %v927_v43 = vrot.slane %v899_v38, %v2491_v50 }
  0x6e   : > { %1465 = vmatprep.subr.bf16.mxu0 %v1966_v44  ;;  %v929_v5 = vcombine.high %v920_v1, %v920_v1  ;;  %1448 = vmatprep.mubr.bf16.mxu1 %v920_v1  ;;  %v1993_v24 = vld [vmem:[%s2473_s7 + $0x1d4] ss:$8 sps:$4 sm:$0xff]   ;;  %v2051_v26 = vld [vmem:[%s2473_s7 + $0x84] ss:$8 sps:$4 sm:$0xff]   ;;  %v1995_v27 = vld [vmem:[%s2473_s7 + $0x1d0] ss:$8 sps:$4 sm:$0xff]  }
  0x6f   : > { %1421 = vmatpush1.bf16.msra.mxu1 %v2017_v3  ;;  %v1996_v28 = vld [vmem:[%s2473_s7 + $0x1e4] ss:$8 sps:$4 sm:$0xff]   ;;  %v2053_v29 = vld [vmem:[%s2473_s7 + $0x80] ss:$8 sps:$4 sm:$0xff]   ;;  %v2057_v30 = vld [vmem:[%s2473_s7 + $0x94] ss:$8 sps:$4 sm:$0xff]  }
  0x70   : > { %1489 = vmatprep.mubr.bf16.mxu0 %v929_v5  ;;  %1422 = vmatprep.subr.bf16.mxu1 %v2021_v7  ;;  %v1998_v31 = vld [vmem:[%s2473_s7 + $0x1e0] ss:$8 sps:$4 sm:$0xff]   ;;  %v1999_v32 = vld [vmem:[%s2473_s7 + $0x1f4] ss:$8 sps:$4 sm:$0xff]   ;;  %v2059_v33 = vld [vmem:[%s2473_s7 + $0x90] ss:$8 sps:$4 sm:$0xff]  }
  0x71   : > { %1466 = vmatpush1.bf16.msra.mxu0 %v1968_v45  ;;  %v2063_v34 = vld [vmem:[%s2473_s7 + $0xa4] ss:$8 sps:$4 sm:$0xff]   ;;  %v2003_v35 = vld [vmem:[%s2473_s7 + $0x1f0] ss:$8 sps:$4 sm:$0xff]   ;;  %v2065_v39 = vld [vmem:[%s2473_s7 + $0xa0] ss:$8 sps:$4 sm:$0xff]  }
  0x72   : > { %1467 = vmatprep.subr.bf16.mxu0 %v1969_v48  ;;  %v2008_v37 = vld [vmem:[%s2473_s7 + $0x204] ss:$8 sps:$4 sm:$0xff]   ;;  %v2069_v40 = vld [vmem:[%s2473_s7 + $0xb4] ss:$8 sps:$4 sm:$0xff]   ;;  %v2006_v42 = vld [vmem:[%s2473_s7 + $0x200] ss:$8 sps:$4 sm:$0xff]  }
  0x73   : > { %1423 = vmatpush1.bf16.msra.mxu1 %v2023_v9  ;;  %v2014_v44 = vld [vmem:[%s2473_s7 + $0x214] ss:$8 sps:$4 sm:$0xff]   ;;  %v2071_v45 = vld [vmem:[%s2473_s7 + $0xb0] ss:$8 sps:$4 sm:$0xff]   ;;  %v2075_v46 = vld [vmem:[%s2473_s7 + $0xc4] ss:$8 sps:$4 sm:$0xff]  }
  0x74   : > { %1424 = vmatprep.subr.bf16.mxu1 %v2027_v10  ;;  %v2012_v48 = vld [vmem:[%s2473_s7 + $0x210] ss:$8 sps:$4 sm:$0xff]   ;;  %v2081_v52 = vld [vmem:[%s2473_s7 + $0xd4] ss:$8 sps:$4 sm:$0xff]   ;;  %v2018_v53 = vld [vmem:[%s2473_s7 + $0x220] ss:$8 sps:$4 sm:$0xff]  }
  0x75   : > { %1468 = vmatpush1.bf16.msra.mxu0 %v1971_v49  ;;  %v2020_v49 = vld [vmem:[%s2473_s7 + $0x224] ss:$8 sps:$4 sm:$0xff]   ;;  %v2026_v54 = vld [vmem:[%s2473_s7 + $0x234] ss:$8 sps:$4 sm:$0xff]   ;;  %v2024_v57 = vld [vmem:[%s2473_s7 + $0x230] ss:$8 sps:$4 sm:$0xff]  }
  0x76   : > { %1469 = vmatprep.subr.bf16.mxu0 %v1972_v51  ;;  %v2077_v51 = vld [vmem:[%s2473_s7 + $0xc0] ss:$8 sps:$4 sm:$0xff]   ;;  %v2087_v56 = vld [vmem:[%s2473_s7 + $0xe4] ss:$8 sps:$4 sm:$0xff]   ;;  %v2093_v60 = vld [vmem:[%s2473_s7 + $0xf4] ss:$8 sps:$4 sm:$0xff]  }
  0x77   : > { %1425 = vmatpush1.bf16.msra.mxu1 %v2029_v13  ;;  %v2089_v59 = vld [vmem:[%s2473_s7 + $0xe0] ss:$8 sps:$4 sm:$0xff]   ;;  %v2036_v1 = vld [vmem:[%s2473_s7 + $0x250] ss:$8 sps:$4 sm:$0xff]   ;;  %v2044_v2 = vld [vmem:[%s2473_s7 + $0x264] ss:$8 sps:$4 sm:$0xff]  }
  0x78   : > { %1426 = vmatprep.subr.bf16.mxu1 %v2033_v14  ;;  %v2030_v61 = vld [vmem:[%s2473_s7 + $0x240] ss:$8 sps:$4 sm:$0xff]   ;;  %v2050_v5 = vld [vmem:[%s2473_s7 + $0x274] ss:$8 sps:$4 sm:$0xff]   ;;  %v2056_v7 = vld [vmem:[%s2473_s7 + $0x284] ss:$8 sps:$4 sm:$0xff]  }
  0x79   : > { %1470 = vmatpush1.bf16.msra.mxu0 %v1974_v55  ;;  %v2083_v55 = vld [vmem:[%s2473_s7 + $0xd0] ss:$8 sps:$4 sm:$0xff]   ;;  %v2042_v3 = vld [vmem:[%s2473_s7 + $0x260] ss:$8 sps:$4 sm:$0xff]   ;;  %v2062_v9 = vld [vmem:[%s2473_s7 + $0x294] ss:$8 sps:$4 sm:$0xff]  }
  0x7a   : > { %1471 = vmatprep.subr.bf16.mxu0 %v1975_v58  ;;  %v2032_v58 = vld [vmem:[%s2473_s7 + $0x244] ss:$8 sps:$4 sm:$0xff]   ;;  %v2060_v10 = vld [vmem:[%s2473_s7 + $0x290] ss:$8 sps:$4 sm:$0xff]   ;;  %v2074_v13 = vld [vmem:[%s2473_s7 + $0x2b4] ss:$8 sps:$4 sm:$0xff]  }
  0x7b   : > { %1427 = vmatpush1.bf16.msra.mxu1 %v2035_v17  ;;  %v2072_v14 = vld [vmem:[%s2473_s7 + $0x2b0] ss:$8 sps:$4 sm:$0xff]   ;;  %v2086_v17 = vld [vmem:[%s2473_s7 + $0x2d4] ss:$8 sps:$4 sm:$0xff]  }
  0x7c   : > { %1428 = vmatprep.subr.bf16.mxu1 %v2039_v18  ;;  %v2084_v18 = vld [vmem:[%s2473_s7 + $0x2d0] ss:$8 sps:$4 sm:$0xff]   ;;  %v784_v38 = vld [vmem:[#allocation2] sm:$0xf] }
  0x7d   : > { %1472 = vmatpush1.bf16.msra.mxu0 %v1977_v62  ;;  %v2038_v62 = vld [vmem:[%s2473_s7 + $0x254] ss:$8 sps:$4 sm:$0xff]  }
  0x7e   : > { %1473 = vmatprep.subr.bf16.mxu0 %v1978_v63  ;;  %v2095_v63 = vld [vmem:[%s2473_s7 + $0xf0] ss:$8 sps:$4 sm:$0xff]  }
  0x7f   : > { %1429 = vmatpush1.bf16.msra.mxu1 %v2041_v21  ;;  %v2098_v21 = vld [vmem:[%s2473_s7 + $0x2f4] ss:$8 sps:$4 sm:$0xff]  }
  0x80   : > { %1430 = vmatprep.subr.bf16.mxu1 %v2045_v22  ;;  %v2096_v22 = vld [vmem:[%s2473_s7 + $0x2f0] ss:$8 sps:$4 sm:$0xff]  }
  0x81   : > { %1474 = vmatpush1.bf16.msra.mxu0 %v1980_v6  ;;  %v2048_v6 = vld [vmem:[%s2473_s7 + $0x270] ss:$8 sps:$4 sm:$0xff]  }
  0x82   : > { %1475 = vmatprep.subr.bf16.mxu0 %v1981_v8  ;;  %v2054_v8 = vld [vmem:[%s2473_s7 + $0x280] ss:$8 sps:$4 sm:$0xff]  }
  0x83   : > { %1431 = vmatpush1.bf16.msra.mxu1 %v2047_v25 }
  0x84   : > { %1432 = vmatprep.subr.bf16.mxu1 %v2051_v26 }
  0x85   : > { %1476 = vmatpush1.bf16.msra.mxu0 %v1983_v11  ;;  %v2068_v11 = vld [vmem:[%s2473_s7 + $0x2a4] ss:$8 sps:$4 sm:$0xff]  }
  0x86   : > { %1477 = vmatprep.subr.bf16.mxu0 %v1984_v12  ;;  %v2066_v12 = vld [vmem:[%s2473_s7 + $0x2a0] ss:$8 sps:$4 sm:$0xff]  }
  0x87   : > { %1433 = vmatpush1.bf16.msra.mxu1 %v2053_v29 }
  0x88   : > { %1434 = vmatprep.subr.bf16.mxu1 %v2057_v30 }
  0x89   : > { %1478 = vmatpush1.bf16.msra.mxu0 %v1986_v15  ;;  %v2080_v15 = vld [vmem:[%s2473_s7 + $0x2c4] ss:$8 sps:$4 sm:$0xff]  }
  0x8a   : > { %1479 = vmatprep.subr.bf16.mxu0 %v1987_v16  ;;  %v2078_v16 = vld [vmem:[%s2473_s7 + $0x2c0] ss:$8 sps:$4 sm:$0xff]  }
  0x8b   : > { %1435 = vmatpush1.bf16.msra.mxu1 %v2059_v33 }
  0x8c   : > { %1436 = vmatprep.subr.bf16.mxu1 %v2063_v34 }
  0x8d   : > { %1480 = vmatpush1.bf16.msra.mxu0 %v1989_v19  ;;  %v2092_v19 = vld [vmem:[%s2473_s7 + $0x2e4] ss:$8 sps:$4 sm:$0xff]  }
  0x8e   : > { %1481 = vmatprep.subr.bf16.mxu0 %v1990_v20  ;;  %v2090_v20 = vld [vmem:[%s2473_s7 + $0x2e0] ss:$8 sps:$4 sm:$0xff]  }
  0x8f   : > { %1437 = vmatpush1.bf16.msra.mxu1 %v2065_v39 }
  0x90   : > { %1438 = vmatprep.subr.bf16.mxu1 %v2069_v40  ;;  %v1561_v40 = vsub.s32 (!%p1881_p13), 0, %v2486_v47 }
  0x91   : > { %1482 = vmatpush1.bf16.msra.mxu0 %v1992_v23 }
  0x92   : > { %1483 = vmatprep.subr.bf16.mxu0 %v1993_v24 }
  0x93   : > { %1439 = vmatpush1.bf16.msra.mxu1 %v2071_v45 }
  0x94   : > { %1440 = vmatprep.subr.bf16.mxu1 %v2075_v46 }
  0x95   : > { %1484 = vmatpush1.bf16.msra.mxu0 %v1995_v27  ;;  %v2157_v27 = vmov 1983009808  }
  0x96   : > { %1485 = vmatprep.subr.bf16.mxu0 %v1996_v28  ;;  %v1543_v28 = vunpack.c.l.s4 %v2157_v27 }
  0x97   : > { %1441 = vmatpush1.bf16.msra.mxu1 %v2077_v51 }
  0x98   : > { %1442 = vmatprep.subr.bf16.mxu1 %v2081_v52  ;;  %v1544_v29 = vunpack.c.0.s8 %v1543_v28 }
  0x99   : > { %1486 = vmatpush1.bf16.msra.mxu0 %v1998_v31 }
  0x9a   : > { %1487 = vmatprep.subr.bf16.mxu0 %v1999_v32  ;;  %v1547_v34 = vsub.s32 %v1544_v29, %v2486_v47 }
  0x9b   : > { %1443 = vmatpush1.bf16.msra.mxu1 %v2083_v55 }
  0x9c   : > { %1444 = vmatprep.subr.bf16.mxu1 %v2087_v56 }
  0x9d   : > { %1488 = vmatpush1.bf16.msra.mxu0 %v2003_v35 }
  0x9e   : > { %1498 = vmatprep.subr.bf16.mxu0 %v2008_v37 }
  0x9f   : > { %1445 = vmatpush1.bf16.msra.mxu1 %v2089_v59 }
  0xa0   : > { %1490 = vmatmul.mubr.bf16.vlgmr.msra.gmra.mrb[0].mxu0 %v928_v41  ;;  %1446 = vmatprep.subr.bf16.mxu1 %v2093_v60  ;;  %v1565_v41 = vsub.s32 (!%p1881_p13), 1, %v2486_v47  ;;  %v1598_v47 = vld [vmem:[%s768_s15] sm:$0x3] (!%p1881_p13) }
  0xa1   : > { %1499 = vmatpush1.bf16.msra.mxu0 %v2006_v42  ;;  %1530 = vmatprep.mubr.bf16.mxu0 %v927_v43  ;;  %v1577_v42 = vld [vmem:[%s759_s12] sm:$0x3] (!%p1881_p13)  ;;  %v1599_v56 = vunpack.c.l.bf16 (!%p1881_p13), %v1598_v47 }
  0xa2   : > { %1500 = vmatprep.subr.bf16.mxu0 %v2014_v44  ;;  %v1582_v45 = vrot.slane (!%p1881_p13), %v1577_v42, %v1561_v40  ;;  %v1586_v46 = vrot.slane (!%p1881_p13), %v1577_v42, %v1565_v41 }
  0xa3   : > { %1447 = vmatpush1.bf16.msra.mxu1 %v2095_v63 }
  0xa5   : > { %1501 = vmatpush1.bf16.msra.mxu0 %v2012_v48 }
  0xa6   : > { %1502 = vmatprep.subr.bf16.mxu0 %v2020_v49  ;;  %1449 = vmatmul.mubr.bf16.vlgmr.msra.gmra.mrb[0].mxu1 %v906_v36  ;;  %v1587_v49 = vcombine.low (!%p1881_p13), %v1582_v45, %v1586_v46 }
  0xa9   : > { %1503 = vmatpush1.bf16.msra.mxu0 %v2018_v53  ;;  %v1594_v53 = vrot.slane (!%p1881_p13), %v1587_v49, %v1547_v34 }
  0xaa   : > { %1504 = vmatprep.subr.bf16.mxu0 %v2026_v54 }
  0xad   : > { %1505 = vmatpush1.bf16.msra.mxu0 %v2024_v57 }
  0xae   : > { %1506 = vmatprep.subr.bf16.mxu0 %v2032_v58 }
  0xb1   : > { %1507 = vmatpush1.bf16.msra.mxu0 %v2030_v61 }
  0xb2   : > { %1508 = vmatprep.subr.bf16.mxu0 %v2038_v62 }
  0xb5   : > { %1509 = vmatpush1.bf16.msra.mxu0 %v2036_v1 }
  0xb6   : > { %1510 = vmatprep.subr.bf16.mxu0 %v2044_v2 }
  0xb9   : > { %1511 = vmatpush1.bf16.msra.mxu0 %v2042_v3 }
  0xba   : > { %1512 = vmatprep.subr.bf16.mxu0 %v2050_v5 }
  0xbd   : > { %1513 = vmatpush1.bf16.msra.mxu0 %v2048_v6 }
  0xbe   : > { %1514 = vmatprep.subr.bf16.mxu0 %v2056_v7 }
  0xc1   : > { %1515 = vmatpush1.bf16.msra.mxu0 %v2054_v8 }
  0xc2   : > { %1516 = vmatprep.subr.bf16.mxu0 %v2062_v9 }
  0xc5   : > { %1517 = vmatpush1.bf16.msra.mxu0 %v2060_v10 }
  0xc6   : > { %1518 = vmatprep.subr.bf16.mxu0 %v2068_v11 }
  0xc9   : > { %1519 = vmatpush1.bf16.msra.mxu0 %v2066_v12 }
  0xca   : > { %1520 = vmatprep.subr.bf16.mxu0 %v2074_v13 }
  0xcd   : > { %1521 = vmatpush1.bf16.msra.mxu0 %v2072_v14 }
  0xce   : > { %1522 = vmatprep.subr.bf16.mxu0 %v2080_v15 }
  0xd1   : > { %1523 = vmatpush1.bf16.msra.mxu0 %v2078_v16 }
  0xd2   : > { %1524 = vmatprep.subr.bf16.mxu0 %v2086_v17 }
  0xd5   : > { %1525 = vmatpush1.bf16.msra.mxu0 %v2084_v18 }
  0xd6   : > { %1526 = vmatprep.subr.bf16.mxu0 %v2092_v19 }
  0xd9   : > { %1527 = vmatpush1.bf16.msra.mxu0 %v2090_v20 }
  0xda   : > { %1528 = vmatprep.subr.bf16.mxu0 %v2098_v21 }
  0xdd   : > { %1529 = vmatpush1.bf16.msra.mxu0 %v2096_v22 }
  0xe0   : > { %1531 = vmatmul.mubr.bf16.vlgmr.msra.gmra.mrb[0].mxu0 %v913_v4  ;;  %v1557_v4 = vld [vmem:[%s754_s10] sm:$0x3] (!%p1881_p13) }
  0xe1   : > { %v1562_v43 = vrot.slane (!%p1881_p13), %v1557_v4, %v1561_v40  ;;  %v1566_v44 = vrot.slane (!%p1881_p13), %v1557_v4, %v1565_v41 }
  0xe3   : > { %v1567_v48 = vcombine.low (!%p1881_p13), %v1562_v43, %v1566_v44 }
  0xe5   : > { %v1574_v52 = vrot.slane (!%p1881_p13), %v1567_v48, %v1547_v34 }
 0x179   : > { %v1450_v23 = vpop.f32.mrb[0].mxu1 }
 0x17a   : > { %v1452_v24 = vpop.f32.mrb[1].mxu1 }
 0x17b   : > { %v1454_v25 = vpop.f32.mrb[2].mxu1 }
 0x17c   : > { %v1455_v26 = vpop.f32.mrb[3].mxu1 }
 0x1b3   : > { %v1532_v30 = vpop.f32.mrb[0].mxu0 }
 0x1b4   : > { %v1887_v31 = vadd.f32 %v1532_v30, %v1450_v23  ;;  %v1534_v32 = vpop.f32.mrb[1].mxu0 }
 0x1b5   : > { %v1888_v33 = vadd.f32 %v1534_v32, %v1452_v24  ;;  %v1536_v35 = vpop.f32.mrb[2].mxu0 }
 0x1b6   : > { %v1537_v36 = vpop.f32.mrb[3].mxu0 }
 0x1b7   : > { %v1541_v37 = vcombine.low %v1887_v31, %v1888_v33  ;;  %1555 = sbr.rel (%p1881_p13) target bundleno = 472 (0x1d8), region = 86 }
 0x1b9   : > { %v1548_v39 = vrot.slane %v1541_v37, %v1547_v34 }
 0x1bb   : > { %v1550_v0 = vadd.f32 %v1548_v39, %v784_v38 }
 0x1bd   : > { %1551 = vst [vmem:[#allocation2] sm:$0xf] %v1550_v0 }
 0x1c4   : > { %v1556_v51 = vld [vmem:[#allocation2] sm:$0xf] }
 0x1c5   : > { %v1576_v54 = vmul.f32 %v1574_v52, %v1556_v51 }
 0x1c7   : > { %v1596_v55 = vadd.f32 %v1594_v53, %v1576_v54 }
 0x1c9   : > { %v1597_v57 = vmax.f32 %v1596_v55, 0.0 }
 0x1cb   : > { %v1600_v58 = vadd.f32 %v1599_v56, %v1597_v57 }
 0x1cd   : > { %v1601_v59 = vmax.f32 %v1600_v58, 0.0 }
 0x1cf   : > { %v1609_v60 = vrot.slane %v1601_v59, %v1547_v34 }
 0x1d1   : > { %v1610_v61 = vcombine.high %v1609_v60, %v1609_v60 }
 0x1d3   : > { %v1882_v62 = vpack.c.bf16 %v1610_v61, %v1609_v60 }
 0x1d5   : > { %v1624_v63 = vrot.slane %v1882_v62, %v2491_v50 }
 0x1d7   : > { %1883 = vst.sshfl [vmem:[%s777_s30] sm:$0x5 pattern:$0x73625140] %v1624_v63 }
 0x1d8 PF: > { %s15_s24 = sadd.s32 1, %s2153_s24   ;;  %s2653_s18 = smov %s2133_s19 }
 0x1d9   : > { %p12_p0 = scmp.ge.s32.totalorder %s15_s24, 14   ;;  %s2654_s19 = smov %s2239_s6 }
 0x1da   : > { %s2655_s20 = smov %s2145_s22  ;;  %s2656_s21 = smov %s2149_s23 }
 0x1db   : > { %s2657_s22 = smov %s2660_s25  ;;  %s2658_s23 = smov %s2664_s26 }
 0x1dc   :  { %14 = sbr.rel (!%p12_p0) target bundleno = 4 (0x4), region = 133 }

// kernel: _lambda_.43
= control target key start
LH: loop header
LB: loop body
LE: loop exit
PB: predicated region body
PF: predicated region fallthrough
CT: control target
= control target key end

     0   :  { %s1729_s0 = inlined_call_operand.vmem [shape: bf16[2,1,1,9,512], index: 0, kind: input, shape index: {}, may-alias: {0,5}]   ;;  %s1730_s1 = inlined_call_operand.vmem [shape: bf16[2,4608], index: 1, kind: input, shape index: {}]   ;;  %s1731_s2 = inlined_call_operand.vmem [shape: bf16[4608,512], index: 2, kind: input, shape index: {}]   ;;  %s1732_s3 = inlined_call_operand.vmem [shape: f32[1,512], index: 3, kind: input, shape index: {}]   ;;  %s1733_s4 = inlined_call_operand.vmem [shape: f32[1,512], index: 4, kind: input, shape index: {}]   ;;  %s1734_s5 = inlined_call_operand.vmem [shape: bf16[2,1,1,9,512], index: 5, kind: output, shape index: {}, may-alias: {0,5}]  }
   0x1   :  { %1735 = sst [smem:[#allocation5_spill]] %s1731_s2 }
   0x2   :  { %s1237_s18 = smov 0   ;;  %s1239_s19 = smov 0  }
   0x3   :  { %s1241_s0 = smov 0   ;;  %s1243_s20 = smov 0  }
   0x4   :  { %s1245_s21 = smov 0   ;;  %s1247_s22 = smov 0  }
   0x5   :  { %s1249_s23 = smov 0   ;;  %s1251_s24 = smov 0  }
   0x6   :  { %s1253_s25 = smov 0  }
   0x7 LB: > { %s28_s26 = sadd.s32 1, %s1194_s23  ;;  %s31_s27 = sadd.s32 1, %s1198_s24  ;;  %s1202_s25 = sphi %s1253_s25, %s16_s25   ;;  %s1198_s24 = sphi %s1251_s24, %s1746_s24   ;;  %s1194_s23 = sphi %s1249_s23, %s1745_s23   ;;  %s1190_s22 = sphi %s1247_s22, %s1744_s22   ;;  %s1186_s21 = sphi %s1245_s21, %s1743_s21   ;;  %s1182_s20 = sphi %s1243_s20, %s1742_s20   ;;  %s1178_s0 = sphi %s1241_s0, %s1741_s0   ;;  %s1174_s19 = sphi %s1239_s19, %s1740_s19   ;;  %s1170_s18 = sphi %s1237_s18, %s1739_s18  }
   0x8   : > { %p29_p0 = scmp.ge.s32.totalorder %s28_s26, 6  ;;  %p79_p1 = scmp.ne.s32.totalorder %s1182_s20, %s1178_s0 }
   0x9   : > { %s1027_s28 = sadd.s32 4294967295, %s1202_s25   ;;  %p80_p2 = scmp.eq.s32.totalorder %s1202_s25, 0 }
   0xa   : > { %s1748_s26 = smov (%p29_p0, %s28_s26), 0  ;;  %s1750_s27 = smov (!%p29_p0, %s31_s27), %s1198_s24 }
   0xb   : > { %p33_p3 = scmp.ge.s32.totalorder %s1750_s27, 2  ;;  %s67_s29 = ssub.s32 %s1194_s23, %s1748_s26 }
   0xc   : > { %p1293_p4 = por %p80_p2, %p79_p1  ;;  %p162_p5 = scmp.ne.s32.totalorder %s1174_s19, %s1170_s18 }
   0xd   : > { %s1752_s27 = smov (%p33_p3, %s1750_s27), 0  ;;  %s72_s6 = sadd.s32 1, %s1182_s20 }
   0xe   : > { %p163_p6 = scmp.eq.s32.totalorder %s1027_s28, 11  ;;  %s68_s7 = ssub.s32 %s1198_s24, %s1752_s27 }
   0xf   : > { %s152_s8 = sadd.s32 1, %s1174_s19  ;;  %s69_s9 = sor.u32 %s68_s7, %s67_s29 }
  0x10   : > { %p150_p7 = scmp.eq.s32.totalorder %s68_s7, 0  ;;  %p70_p8 = scmp.eq.s32.totalorder %s69_s9, 0 }
  0x11   : > { %p1305_p9 = por %p163_p6, %p162_p5  ;;  %p1030_p10 = scmp.ge.s32.totalorder %s1202_s25, 12 }
  0x12   : > { %s1310_s11 = scalar_select %p150_p7, %s1174_s19, %s152_s8  }
  0x13   : > { %s1313_s12 = scalar_select %p70_p8, %s1182_s20, %s72_s6  }
  0x14   : > { %185 = sbr.rel (%p1030_p10) target bundleno = 85 (0x55), region = 16 }
  0x1b   : > { %200 = sbr.rel (!%p1293_p4) target bundleno = 85 (0x55), region = 24  ;;  %s202_s13 = sand.u32 (%p1293_p4), 1, %s1182_s20  }
  0x1c   : > { %s1054_s14 = smul.u32 (%p1293_p4), 768, %s202_s13  ;;  %s1031_s15 = sshll.u32 (%p1293_p4), %s1198_s24, 1 }
  0x1d   : > { %s1047_s16 = smul.u32 (%p1293_p4), 192, %s1194_s23  ;;  %s1738_s2 = sld [smem:[#allocation5_spill]] (%p1293_p4) }
  0x1e   : > { %s1329_s30 = scalar_lea.vmem (%p1293_p4), [#allocation3], %s1054_s14 }
  0x1f   : > { %s208_s17 = sadd.s32 (%p1293_p4), %s1047_s16, %s1031_s15 }
  0x20   : > { %s1033_s28 = sshll.u32 (%p1293_p4), %s208_s17, 3 }
  0x23   : > { %s1324_s6 = scalar_lea.vmem %s1738_s2, %s1033_s28 }
  0x24   : > { %v223_v0 = vld [vmem:[%s1324_s6] sm:$0xff]  ;;  %v225_v1 = vld [vmem:[%s1324_s6 + $0x8] sm:$0xff] }
  0x25   : > { %v227_v2 = vld [vmem:[%s1324_s6 + $0x20] sm:$0xff]  ;;  %224 = vst [vmem:[%s1329_s30] sm:$0xff] %v223_v0  ;;  %226 = vst [vmem:[%s1329_s30 + $0x8] sm:$0xff] %v225_v1  ;;  %v229_v3 = vld [vmem:[%s1324_s6 + $0x28] sm:$0xff] }
  0x26   : > { %228 = vst [vmem:[%s1329_s30 + $0x10] sm:$0xff] %v227_v2  ;;  %v231_v4 = vld [vmem:[%s1324_s6 + $0x40] sm:$0xff]  ;;  %v233_v5 = vld [vmem:[%s1324_s6 + $0x48] sm:$0xff]  ;;  %230 = vst [vmem:[%s1329_s30 + $0x18] sm:$0xff] %v229_v3 }
  0x27   : > { %232 = vst [vmem:[%s1329_s30 + $0x20] sm:$0xff] %v231_v4  ;;  %234 = vst [vmem:[%s1329_s30 + $0x28] sm:$0xff] %v233_v5  ;;  %v235_v6 = vld [vmem:[%s1324_s6 + $0x60] sm:$0xff]  ;;  %v237_v7 = vld [vmem:[%s1324_s6 + $0x68] sm:$0xff] }
  0x28   : > { %v239_v8 = vld [vmem:[%s1324_s6 + $0x80] sm:$0xff]  ;;  %236 = vst [vmem:[%s1329_s30 + $0x30] sm:$0xff] %v235_v6  ;;  %238 = vst [vmem:[%s1329_s30 + $0x38] sm:$0xff] %v237_v7  ;;  %v241_v9 = vld [vmem:[%s1324_s6 + $0x88] sm:$0xff] }
  0x29   : > { %240 = vst [vmem:[%s1329_s30 + $0x40] sm:$0xff] %v239_v8  ;;  %v243_v10 = vld [vmem:[%s1324_s6 + $0xa0] sm:$0xff]  ;;  %v245_v11 = vld [vmem:[%s1324_s6 + $0xa8] sm:$0xff]  ;;  %242 = vst [vmem:[%s1329_s30 + $0x48] sm:$0xff] %v241_v9 }
  0x2a   : > { %244 = vst [vmem:[%s1329_s30 + $0x50] sm:$0xff] %v243_v10  ;;  %246 = vst [vmem:[%s1329_s30 + $0x58] sm:$0xff] %v245_v11  ;;  %v247_v12 = vld [vmem:[%s1324_s6 + $0xc0] sm:$0xff]  ;;  %v249_v13 = vld [vmem:[%s1324_s6 + $0xc8] sm:$0xff] }
  0x2b   : > { %v251_v14 = vld [vmem:[%s1324_s6 + $0xe0] sm:$0xff]  ;;  %248 = vst [vmem:[%s1329_s30 + $0x60] sm:$0xff] %v247_v12  ;;  %250 = vst [vmem:[%s1329_s30 + $0x68] sm:$0xff] %v249_v13  ;;  %v253_v15 = vld [vmem:[%s1324_s6 + $0xe8] sm:$0xff] }
  0x2c   : > { %252 = vst [vmem:[%s1329_s30 + $0x70] sm:$0xff] %v251_v14  ;;  %v255_v16 = vld [vmem:[%s1324_s6 + $0x100] sm:$0xff]  ;;  %v257_v17 = vld [vmem:[%s1324_s6 + $0x108] sm:$0xff]  ;;  %254 = vst [vmem:[%s1329_s30 + $0x78] sm:$0xff] %v253_v15 }
  0x2d   : > { %256 = vst [vmem:[%s1329_s30 + $0x80] sm:$0xff] %v255_v16  ;;  %258 = vst [vmem:[%s1329_s30 + $0x88] sm:$0xff] %v257_v17  ;;  %v259_v18 = vld [vmem:[%s1324_s6 + $0x120] sm:$0xff]  ;;  %v261_v19 = vld [vmem:[%s1324_s6 + $0x128] sm:$0xff] }
  0x2e   : > { %v263_v20 = vld [vmem:[%s1324_s6 + $0x140] sm:$0xff]  ;;  %260 = vst [vmem:[%s1329_s30 + $0x90] sm:$0xff] %v259_v18  ;;  %262 = vst [vmem:[%s1329_s30 + $0x98] sm:$0xff] %v261_v19  ;;  %v265_v21 = vld [vmem:[%s1324_s6 + $0x148] sm:$0xff] }
  0x2f   : > { %264 = vst [vmem:[%s1329_s30 + $0xa0] sm:$0xff] %v263_v20  ;;  %v267_v22 = vld [vmem:[%s1324_s6 + $0x160] sm:$0xff]  ;;  %v269_v23 = vld [vmem:[%s1324_s6 + $0x168] sm:$0xff]  ;;  %266 = vst [vmem:[%s1329_s30 + $0xa8] sm:$0xff] %v265_v21 }
  0x30   : > { %268 = vst [vmem:[%s1329_s30 + $0xb0] sm:$0xff] %v267_v22  ;;  %270 = vst [vmem:[%s1329_s30 + $0xb8] sm:$0xff] %v269_v23  ;;  %v271_v24 = vld [vmem:[%s1324_s6 + $0x180] sm:$0xff]  ;;  %v273_v25 = vld [vmem:[%s1324_s6 + $0x188] sm:$0xff] }
  0x31   : > { %v275_v26 = vld [vmem:[%s1324_s6 + $0x1a0] sm:$0xff]  ;;  %272 = vst [vmem:[%s1329_s30 + $0xc0] sm:$0xff] %v271_v24  ;;  %274 = vst [vmem:[%s1329_s30 + $0xc8] sm:$0xff] %v273_v25  ;;  %v277_v27 = vld [vmem:[%s1324_s6 + $0x1a8] sm:$0xff] }
  0x32   : > { %276 = vst [vmem:[%s1329_s30 + $0xd0] sm:$0xff] %v275_v26  ;;  %v279_v28 = vld [vmem:[%s1324_s6 + $0x1c0] sm:$0xff]  ;;  %v281_v29 = vld [vmem:[%s1324_s6 + $0x1c8] sm:$0xff]  ;;  %278 = vst [vmem:[%s1329_s30 + $0xd8] sm:$0xff] %v277_v27 }
  0x33   : > { %280 = vst [vmem:[%s1329_s30 + $0xe0] sm:$0xff] %v279_v28  ;;  %282 = vst [vmem:[%s1329_s30 + $0xe8] sm:$0xff] %v281_v29  ;;  %v283_v30 = vld [vmem:[%s1324_s6 + $0x1e0] sm:$0xff]  ;;  %v285_v31 = vld [vmem:[%s1324_s6 + $0x1e8] sm:$0xff] }
  0x34   : > { %v287_v32 = vld [vmem:[%s1324_s6 + $0x200] sm:$0xff]  ;;  %284 = vst [vmem:[%s1329_s30 + $0xf0] sm:$0xff] %v283_v30  ;;  %286 = vst [vmem:[%s1329_s30 + $0xf8] sm:$0xff] %v285_v31  ;;  %v289_v33 = vld [vmem:[%s1324_s6 + $0x208] sm:$0xff] }
  0x35   : > { %288 = vst [vmem:[%s1329_s30 + $0x100] sm:$0xff] %v287_v32  ;;  %v291_v34 = vld [vmem:[%s1324_s6 + $0x220] sm:$0xff]  ;;  %v293_v35 = vld [vmem:[%s1324_s6 + $0x228] sm:$0xff]  ;;  %290 = vst [vmem:[%s1329_s30 + $0x108] sm:$0xff] %v289_v33 }
  0x36   : > { %292 = vst [vmem:[%s1329_s30 + $0x110] sm:$0xff] %v291_v34  ;;  %294 = vst [vmem:[%s1329_s30 + $0x118] sm:$0xff] %v293_v35  ;;  %v295_v36 = vld [vmem:[%s1324_s6 + $0x240] sm:$0xff]  ;;  %v297_v37 = vld [vmem:[%s1324_s6 + $0x248] sm:$0xff] }
  0x37   : > { %v299_v38 = vld [vmem:[%s1324_s6 + $0x260] sm:$0xff]  ;;  %296 = vst [vmem:[%s1329_s30 + $0x120] sm:$0xff] %v295_v36  ;;  %298 = vst [vmem:[%s1329_s30 + $0x128] sm:$0xff] %v297_v37  ;;  %v301_v39 = vld [vmem:[%s1324_s6 + $0x268] sm:$0xff] }
  0x38   : > { %300 = vst [vmem:[%s1329_s30 + $0x130] sm:$0xff] %v299_v38  ;;  %v303_v40 = vld [vmem:[%s1324_s6 + $0x280] sm:$0xff]  ;;  %v305_v41 = vld [vmem:[%s1324_s6 + $0x288] sm:$0xff]  ;;  %302 = vst [vmem:[%s1329_s30 + $0x138] sm:$0xff] %v301_v39 }
  0x39   : > { %304 = vst [vmem:[%s1329_s30 + $0x140] sm:$0xff] %v303_v40  ;;  %306 = vst [vmem:[%s1329_s30 + $0x148] sm:$0xff] %v305_v41  ;;  %v307_v42 = vld [vmem:[%s1324_s6 + $0x2a0] sm:$0xff]  ;;  %v309_v43 = vld [vmem:[%s1324_s6 + $0x2a8] sm:$0xff] }
  0x3a   : > { %v311_v44 = vld [vmem:[%s1324_s6 + $0x2c0] sm:$0xff]  ;;  %308 = vst [vmem:[%s1329_s30 + $0x150] sm:$0xff] %v307_v42  ;;  %310 = vst [vmem:[%s1329_s30 + $0x158] sm:$0xff] %v309_v43  ;;  %v313_v45 = vld [vmem:[%s1324_s6 + $0x2c8] sm:$0xff] }
  0x3b   : > { %312 = vst [vmem:[%s1329_s30 + $0x160] sm:$0xff] %v311_v44  ;;  %v315_v46 = vld [vmem:[%s1324_s6 + $0x2e0] sm:$0xff]  ;;  %v317_v47 = vld [vmem:[%s1324_s6 + $0x2e8] sm:$0xff]  ;;  %314 = vst [vmem:[%s1329_s30 + $0x168] sm:$0xff] %v313_v45 }
  0x3c   : > { %316 = vst [vmem:[%s1329_s30 + $0x170] sm:$0xff] %v315_v46  ;;  %318 = vst [vmem:[%s1329_s30 + $0x178] sm:$0xff] %v317_v47  ;;  %v319_v48 = vld [vmem:[%s1324_s6 + $0x300] sm:$0xff]  ;;  %v321_v49 = vld [vmem:[%s1324_s6 + $0x308] sm:$0xff] }
  0x3d   : > { %v323_v50 = vld [vmem:[%s1324_s6 + $0x320] sm:$0xff]  ;;  %320 = vst [vmem:[%s1329_s30 + $0x180] sm:$0xff] %v319_v48  ;;  %322 = vst [vmem:[%s1329_s30 + $0x188] sm:$0xff] %v321_v49  ;;  %v325_v51 = vld [vmem:[%s1324_s6 + $0x328] sm:$0xff] }
  0x3e   : > { %324 = vst [vmem:[%s1329_s30 + $0x190] sm:$0xff] %v323_v50  ;;  %v327_v52 = vld [vmem:[%s1324_s6 + $0x340] sm:$0xff]  ;;  %v329_v53 = vld [vmem:[%s1324_s6 + $0x348] sm:$0xff]  ;;  %326 = vst [vmem:[%s1329_s30 + $0x198] sm:$0xff] %v325_v51 }
  0x3f   : > { %328 = vst [vmem:[%s1329_s30 + $0x1a0] sm:$0xff] %v327_v52  ;;  %330 = vst [vmem:[%s1329_s30 + $0x1a8] sm:$0xff] %v329_v53  ;;  %v331_v54 = vld [vmem:[%s1324_s6 + $0x360] sm:$0xff]  ;;  %v333_v55 = vld [vmem:[%s1324_s6 + $0x368] sm:$0xff] }
  0x40   : > { %v335_v56 = vld [vmem:[%s1324_s6 + $0x380] sm:$0xff]  ;;  %332 = vst [vmem:[%s1329_s30 + $0x1b0] sm:$0xff] %v331_v54  ;;  %334 = vst [vmem:[%s1329_s30 + $0x1b8] sm:$0xff] %v333_v55  ;;  %v337_v57 = vld [vmem:[%s1324_s6 + $0x388] sm:$0xff] }
  0x41   : > { %336 = vst [vmem:[%s1329_s30 + $0x1c0] sm:$0xff] %v335_v56  ;;  %v339_v58 = vld [vmem:[%s1324_s6 + $0x3a0] sm:$0xff]  ;;  %v341_v59 = vld [vmem:[%s1324_s6 + $0x3a8] sm:$0xff]  ;;  %338 = vst [vmem:[%s1329_s30 + $0x1c8] sm:$0xff] %v337_v57 }
  0x42   : > { %340 = vst [vmem:[%s1329_s30 + $0x1d0] sm:$0xff] %v339_v58  ;;  %342 = vst [vmem:[%s1329_s30 + $0x1d8] sm:$0xff] %v341_v59  ;;  %v343_v60 = vld [vmem:[%s1324_s6 + $0x3c0] sm:$0xff]  ;;  %v345_v61 = vld [vmem:[%s1324_s6 + $0x3c8] sm:$0xff] }
  0x43   : > { %v347_v62 = vld [vmem:[%s1324_s6 + $0x3e0] sm:$0xff]  ;;  %344 = vst [vmem:[%s1329_s30 + $0x1e0] sm:$0xff] %v343_v60  ;;  %346 = vst [vmem:[%s1329_s30 + $0x1e8] sm:$0xff] %v345_v61  ;;  %v349_v63 = vld [vmem:[%s1324_s6 + $0x3e8] sm:$0xff] }
  0x44   : > { %348 = vst [vmem:[%s1329_s30 + $0x1f0] sm:$0xff] %v347_v62  ;;  %v351_v0 = vld [vmem:[%s1324_s6 + $0x400] sm:$0xff]  ;;  %v353_v1 = vld [vmem:[%s1324_s6 + $0x408] sm:$0xff]  ;;  %350 = vst [vmem:[%s1329_s30 + $0x1f8] sm:$0xff] %v349_v63 }
  0x45   : > { %352 = vst [vmem:[%s1329_s30 + $0x200] sm:$0xff] %v351_v0  ;;  %354 = vst [vmem:[%s1329_s30 + $0x208] sm:$0xff] %v353_v1  ;;  %v355_v2 = vld [vmem:[%s1324_s6 + $0x420] sm:$0xff]  ;;  %v357_v3 = vld [vmem:[%s1324_s6 + $0x428] sm:$0xff] }
  0x46   : > { %v359_v4 = vld [vmem:[%s1324_s6 + $0x440] sm:$0xff]  ;;  %356 = vst [vmem:[%s1329_s30 + $0x210] sm:$0xff] %v355_v2  ;;  %358 = vst [vmem:[%s1329_s30 + $0x218] sm:$0xff] %v357_v3  ;;  %v361_v5 = vld [vmem:[%s1324_s6 + $0x448] sm:$0xff] }
  0x47   : > { %360 = vst [vmem:[%s1329_s30 + $0x220] sm:$0xff] %v359_v4  ;;  %v363_v6 = vld [vmem:[%s1324_s6 + $0x460] sm:$0xff]  ;;  %v365_v7 = vld [vmem:[%s1324_s6 + $0x468] sm:$0xff]  ;;  %362 = vst [vmem:[%s1329_s30 + $0x228] sm:$0xff] %v361_v5 }
  0x48   : > { %364 = vst [vmem:[%s1329_s30 + $0x230] sm:$0xff] %v363_v6  ;;  %366 = vst [vmem:[%s1329_s30 + $0x238] sm:$0xff] %v365_v7  ;;  %v367_v8 = vld [vmem:[%s1324_s6 + $0x480] sm:$0xff]  ;;  %v369_v9 = vld [vmem:[%s1324_s6 + $0x488] sm:$0xff] }
  0x49   : > { %v371_v10 = vld [vmem:[%s1324_s6 + $0x4a0] sm:$0xff]  ;;  %368 = vst [vmem:[%s1329_s30 + $0x240] sm:$0xff] %v367_v8  ;;  %370 = vst [vmem:[%s1329_s30 + $0x248] sm:$0xff] %v369_v9  ;;  %v373_v11 = vld [vmem:[%s1324_s6 + $0x4a8] sm:$0xff] }
  0x4a   : > { %372 = vst [vmem:[%s1329_s30 + $0x250] sm:$0xff] %v371_v10  ;;  %v375_v12 = vld [vmem:[%s1324_s6 + $0x4c0] sm:$0xff]  ;;  %v377_v13 = vld [vmem:[%s1324_s6 + $0x4c8] sm:$0xff]  ;;  %374 = vst [vmem:[%s1329_s30 + $0x258] sm:$0xff] %v373_v11 }
  0x4b   : > { %376 = vst [vmem:[%s1329_s30 + $0x260] sm:$0xff] %v375_v12  ;;  %378 = vst [vmem:[%s1329_s30 + $0x268] sm:$0xff] %v377_v13  ;;  %v379_v14 = vld [vmem:[%s1324_s6 + $0x4e0] sm:$0xff]  ;;  %v381_v15 = vld [vmem:[%s1324_s6 + $0x4e8] sm:$0xff] }
  0x4c   : > { %v383_v16 = vld [vmem:[%s1324_s6 + $0x500] sm:$0xff]  ;;  %380 = vst [vmem:[%s1329_s30 + $0x270] sm:$0xff] %v379_v14  ;;  %382 = vst [vmem:[%s1329_s30 + $0x278] sm:$0xff] %v381_v15  ;;  %v385_v17 = vld [vmem:[%s1324_s6 + $0x508] sm:$0xff] }
  0x4d   : > { %384 = vst [vmem:[%s1329_s30 + $0x280] sm:$0xff] %v383_v16  ;;  %v387_v18 = vld [vmem:[%s1324_s6 + $0x520] sm:$0xff]  ;;  %v389_v19 = vld [vmem:[%s1324_s6 + $0x528] sm:$0xff]  ;;  %386 = vst [vmem:[%s1329_s30 + $0x288] sm:$0xff] %v385_v17 }
  0x4e   : > { %388 = vst [vmem:[%s1329_s30 + $0x290] sm:$0xff] %v387_v18  ;;  %390 = vst [vmem:[%s1329_s30 + $0x298] sm:$0xff] %v389_v19  ;;  %v391_v20 = vld [vmem:[%s1324_s6 + $0x540] sm:$0xff]  ;;  %v393_v21 = vld [vmem:[%s1324_s6 + $0x548] sm:$0xff] }
  0x4f   : > { %v395_v22 = vld [vmem:[%s1324_s6 + $0x560] sm:$0xff]  ;;  %392 = vst [vmem:[%s1329_s30 + $0x2a0] sm:$0xff] %v391_v20  ;;  %394 = vst [vmem:[%s1329_s30 + $0x2a8] sm:$0xff] %v393_v21  ;;  %v397_v23 = vld [vmem:[%s1324_s6 + $0x568] sm:$0xff] }
  0x50   : > { %396 = vst [vmem:[%s1329_s30 + $0x2b0] sm:$0xff] %v395_v22  ;;  %v399_v24 = vld [vmem:[%s1324_s6 + $0x580] sm:$0xff]  ;;  %v401_v25 = vld [vmem:[%s1324_s6 + $0x588] sm:$0xff]  ;;  %398 = vst [vmem:[%s1329_s30 + $0x2b8] sm:$0xff] %v397_v23 }
  0x51   : > { %400 = vst [vmem:[%s1329_s30 + $0x2c0] sm:$0xff] %v399_v24  ;;  %402 = vst [vmem:[%s1329_s30 + $0x2c8] sm:$0xff] %v401_v25  ;;  %v403_v26 = vld [vmem:[%s1324_s6 + $0x5a0] sm:$0xff]  ;;  %v405_v27 = vld [vmem:[%s1324_s6 + $0x5a8] sm:$0xff] }
  0x52   : > { %v407_v28 = vld [vmem:[%s1324_s6 + $0x5c0] sm:$0xff]  ;;  %404 = vst [vmem:[%s1329_s30 + $0x2d0] sm:$0xff] %v403_v26  ;;  %406 = vst [vmem:[%s1329_s30 + $0x2d8] sm:$0xff] %v405_v27  ;;  %v409_v29 = vld [vmem:[%s1324_s6 + $0x5c8] sm:$0xff] }
  0x53   : > { %408 = vst [vmem:[%s1329_s30 + $0x2e0] sm:$0xff] %v407_v28  ;;  %v411_v30 = vld [vmem:[%s1324_s6 + $0x5e0] sm:$0xff]  ;;  %v413_v31 = vld [vmem:[%s1324_s6 + $0x5e8] sm:$0xff]  ;;  %410 = vst [vmem:[%s1329_s30 + $0x2e8] sm:$0xff] %v409_v29 }
  0x54   : > { %412 = vst [vmem:[%s1329_s30 + $0x2f0] sm:$0xff] %v411_v30  ;;  %414 = vst [vmem:[%s1329_s30 + $0x2f8] sm:$0xff] %v413_v31 }
  0x55 PF: > { %p1034_p11 = scmp.ge.s32.totalorder %s1202_s25, 1  ;;  %p435_p12 = scmp.lt.s32.totalorder %s1202_s25, 13 }
  0x57   : > { %p436_p13 = pnand %p1034_p11, %p435_p12 }
  0x58   : > { %s442_s8 = sand.u32 (!%p436_p13), 1, %s1178_s0   ;;  %s479_s9 = sand.u32 (!%p436_p13), 1, %s1170_s18  }
  0x59   : > { %439 = sbr.rel (%p436_p13) target bundleno = 484 (0x1e4), region = 55  ;;  %s1524_s14 = sshll.u32 (!%p436_p13), %s479_s9, 1 }
  0x5a   : > { %s1055_s13 = smul.u32 (!%p436_p13), 768, %s442_s8  ;;  %s1528_s16 = sshll.u32 (!%p436_p13), %s1190_s22, 1 }
  0x5b   : > { %s482_s15 = smul.u32 (!%p436_p13), 6, %s1186_s21  ;;  %p494_p1 = scmp.lt.s32.totalorder (!%p436_p13), %s1528_s16, 3 }
  0x5c   : > { %s1548_s9 = scalar_lea.vmem (!%p436_p13), [#allocation3], %s1055_s13  ;;  %s481_s2 = scalar_lea.vmem (!%p436_p13), [#allocation4], %s1524_s14 }
  0x5d   : > { %p485_p0 = scmp.lt.s32.totalorder (!%p436_p13), %s482_s15, 35  ;;  %p1038_p2 = scmp.ne.s32.totalorder (!%p436_p13), %s1186_s21, 0 }
  0x60   : > { %s1754_s15 = smov (!%p485_p0, %s482_s15), 35  ;;  %507 = sbr.rel (%p1038_p2) target bundleno = 103 (0x67), region = 63 }
  0x61   : > { %s1534_s17 = scalar_select %p494_p1, %s1528_s16, 3 }
  0x62   : > { %s489_s18 = scalar_lea.vmem %s1730_s1, %s1754_s15  ;;  %v1204_v32 = vmov (!%p1038_p2), 0.0  }
  0x63   : > { %s496_s22 = scalar_lea.vmem %s1732_s3, %s1534_s17  ;;  %s501_s8 = scalar_lea.vmem %s1733_s4, %s1534_s17  ;;  %508 = vst [vmem:[#allocation2] sm:$0xf] (!%p1038_p2), %v1204_v32 }
  0x67 PF: > { %v544_v33 = vld [vmem:[%s1548_s9 + $0x108] sm:$0xff]  ;;  %v543_v34 = vld [vmem:[%s1548_s9 + $0x100] sm:$0xff]  ;;  %v546_v35 = vld [vmem:[%s1548_s9 + $0x118] sm:$0xff]  ;;  %v612_v36 = vlaneseq  ;;  %v1205_v37 = vmov 1966171168   ;;  %p1039_p3 = scmp.ne.s32.totalorder %s1186_s21, 5 }
  0x68   : > { %702 = vmatprep.subr.bf16.mxu0 %v544_v33  ;;  %v610_v38 = vunpack.c.l.s4 %v1205_v37  ;;  %v545_v39 = vld [vmem:[%s1548_s9 + $0x110] sm:$0xff]  ;;  %v548_v40 = vld [vmem:[%s1548_s9 + $0x128] sm:$0xff]  ;;  %v547_v43 = vld [vmem:[%s1548_s9 + $0x120] sm:$0xff] }
  0x69   : > { %703 = vmatpush1.bf16.msra.mxu0 %v543_v34  ;;  %v1557_v42 = vshrl.u32 %v612_v36, 7  ;;  %v550_v44 = vld [vmem:[%s1548_s9 + $0x138] sm:$0xff]  ;;  %v512_v46 = vld [vmem:[%s1548_s9 + $0x8] sm:$0xff]  ;;  %v549_v47 = vld [vmem:[%s1548_s9 + $0x130] sm:$0xff] }
  0x6a   : > { %704 = vmatprep.subr.bf16.mxu0 %v546_v35  ;;  %v611_v41 = vunpack.c.0.s8 %v610_v38  ;;  %661 = vmatprep.subr.bf16.mxu1 %v512_v46  ;;  %v511_v48 = vld [vmem:[%s1548_s9] sm:$0xff]  ;;  %v552_v50 = vld [vmem:[%s1548_s9 + $0x148] sm:$0xff]  ;;  %v514_v53 = vld [vmem:[%s1548_s9 + $0x18] sm:$0xff] }
  0x6b   : > { %v510_v49 = vld [vmem:[%s489_s18] sm:$0x3f]  ;;  %662 = vmatpush1.bf16.msra.mxu1 %v511_v48  ;;  %v513_v54 = vld [vmem:[%s1548_s9 + $0x10] sm:$0xff]  ;;  %v516_v56 = vld [vmem:[%s1548_s9 + $0x28] sm:$0xff] }
  0x6c   : > { %v1562_v45 = vsub.s32 %v611_v41, %v1557_v42  ;;  %v608_v51 = vcombine.high %v510_v49, %v510_v49  ;;  %663 = vmatprep.subr.bf16.mxu1 %v514_v53  ;;  %v551_v58 = vld [vmem:[%s1548_s9 + $0x140] sm:$0xff]  ;;  %v554_v59 = vld [vmem:[%s1548_s9 + $0x158] sm:$0xff]  ;;  %v553_v1 = vld [vmem:[%s1548_s9 + $0x150] sm:$0xff] }
  0x6d   : > { %705 = vmatpush1.bf16.msra.mxu0 %v545_v39  ;;  %v515_v62 = vld [vmem:[%s1548_s9 + $0x20] sm:$0xff]  ;;  %v518_v0 = vld [vmem:[%s1548_s9 + $0x38] sm:$0xff]  ;;  %v556_v2 = vld [vmem:[%s1548_s9 + $0x168] sm:$0xff] }
  0x6e   : > { %706 = vmatprep.subr.bf16.mxu0 %v548_v40  ;;  %v1574_v52 = vrot.slane %v510_v49, %v1562_v45  ;;  %v1582_v57 = vrot.slane %v608_v51, %v1562_v45  ;;  %v517_v3 = vld [vmem:[%s1548_s9 + $0x30] sm:$0xff]  ;;  %v520_v4 = vld [vmem:[%s1548_s9 + $0x48] sm:$0xff]  ;;  %v555_v5 = vld [vmem:[%s1548_s9 + $0x160] sm:$0xff] }
  0x6f   : > { %664 = vmatpush1.bf16.msra.mxu1 %v513_v54  ;;  %v558_v6 = vld [vmem:[%s1548_s9 + $0x178] sm:$0xff]  ;;  %v519_v7 = vld [vmem:[%s1548_s9 + $0x40] sm:$0xff]  ;;  %v557_v9 = vld [vmem:[%s1548_s9 + $0x170] sm:$0xff] }
  0x70   : > { %v623_v55 = vcombine.high %v1574_v52, %v1574_v52  ;;  %v638_v61 = vrot.slane %v1582_v57, %v1562_v45  ;;  %665 = vmatprep.subr.bf16.mxu1 %v516_v56  ;;  %v522_v8 = vld [vmem:[%s1548_s9 + $0x58] sm:$0xff]  ;;  %v560_v10 = vld [vmem:[%s1548_s9 + $0x188] sm:$0xff]  ;;  %v521_v11 = vld [vmem:[%s1548_s9 + $0x50] sm:$0xff]  ;;  %v631_v39 = vrot.slane %v1574_v52, %v1562_v45 }
  0x71   : > { %707 = vmatpush1.bf16.msra.mxu0 %v547_v43  ;;  %v524_v12 = vld [vmem:[%s1548_s9 + $0x68] sm:$0xff]  ;;  %v559_v13 = vld [vmem:[%s1548_s9 + $0x180] sm:$0xff]  ;;  %v562_v14 = vld [vmem:[%s1548_s9 + $0x198] sm:$0xff]  ;;  %v624_v43 = vcombine.high %v1582_v57, %v1582_v57 }
  0x72   : > { %708 = vmatprep.subr.bf16.mxu0 %v550_v44  ;;  %v645_v60 = vrot.slane %v623_v55, %v1562_v45  ;;  %v523_v15 = vld [vmem:[%s1548_s9 + $0x60] sm:$0xff]  ;;  %v526_v16 = vld [vmem:[%s1548_s9 + $0x78] sm:$0xff]  ;;  %v561_v17 = vld [vmem:[%s1548_s9 + $0x190] sm:$0xff] }
  0x73   : > { %666 = vmatpush1.bf16.msra.mxu1 %v515_v62  ;;  %v564_v18 = vld [vmem:[%s1548_s9 + $0x1a8] sm:$0xff]  ;;  %v525_v19 = vld [vmem:[%s1548_s9 + $0x70] sm:$0xff]  ;;  %v563_v21 = vld [vmem:[%s1548_s9 + $0x1a0] sm:$0xff] }
  0x74   : > { %v654_v63 = vcombine.high %v645_v60, %v645_v60  ;;  %693 = vmatprep.mubr.bf16.mxu1 %v645_v60  ;;  %667 = vmatprep.subr.bf16.mxu1 %v518_v0  ;;  %v528_v20 = vld [vmem:[%s1548_s9 + $0x88] sm:$0xff]  ;;  %v566_v22 = vld [vmem:[%s1548_s9 + $0x1b8] sm:$0xff]  ;;  %v527_v23 = vld [vmem:[%s1548_s9 + $0x80] sm:$0xff] }
  0x75   : > { %709 = vmatpush1.bf16.msra.mxu0 %v549_v47  ;;  %v530_v24 = vld [vmem:[%s1548_s9 + $0x98] sm:$0xff]  ;;  %v565_v25 = vld [vmem:[%s1548_s9 + $0x1b0] sm:$0xff]  ;;  %v568_v26 = vld [vmem:[%s1548_s9 + $0x1c8] sm:$0xff]  ;;  %v653_v47 = vcombine.high %v631_v39, %v631_v39 }
  0x76   : > { %710 = vmatprep.subr.bf16.mxu0 %v552_v50  ;;  %734 = vmatprep.mubr.bf16.mxu0 %v654_v63  ;;  %v529_v27 = vld [vmem:[%s1548_s9 + $0x90] sm:$0xff]  ;;  %v532_v28 = vld [vmem:[%s1548_s9 + $0xa8] sm:$0xff]  ;;  %v567_v29 = vld [vmem:[%s1548_s9 + $0x1c0] sm:$0xff]  ;;  %v652_v50 = vrot.slane %v624_v43, %v1562_v45 }
  0x77   : > { %668 = vmatpush1.bf16.msra.mxu1 %v517_v3  ;;  %v570_v30 = vld [vmem:[%s1548_s9 + $0x1d8] sm:$0xff]  ;;  %v531_v31 = vld [vmem:[%s1548_s9 + $0xa0] sm:$0xff]  ;;  %v569_v33 = vld [vmem:[%s1548_s9 + $0x1d0] sm:$0xff] }
  0x78   : > { %669 = vmatprep.subr.bf16.mxu1 %v520_v4  ;;  %v534_v32 = vld [vmem:[%s1548_s9 + $0xb8] sm:$0xff]  ;;  %v572_v34 = vld [vmem:[%s1548_s9 + $0x1e8] sm:$0xff]  ;;  %v533_v35 = vld [vmem:[%s1548_s9 + $0xb0] sm:$0xff] }
  0x79   : > { %711 = vmatpush1.bf16.msra.mxu0 %v551_v58  ;;  %v536_v36 = vld [vmem:[%s1548_s9 + $0xc8] sm:$0xff]  ;;  %v571_v37 = vld [vmem:[%s1548_s9 + $0x1e0] sm:$0xff]  ;;  %v574_v38 = vld [vmem:[%s1548_s9 + $0x1f8] sm:$0xff] }
  0x7a   : > { %712 = vmatprep.subr.bf16.mxu0 %v554_v59  ;;  %v535_v40 = vld [vmem:[%s1548_s9 + $0xc0] sm:$0xff]  ;;  %v538_v41 = vld [vmem:[%s1548_s9 + $0xd8] sm:$0xff]  ;;  %v573_v44 = vld [vmem:[%s1548_s9 + $0x1f0] sm:$0xff] }
  0x7b   : > { %670 = vmatpush1.bf16.msra.mxu1 %v519_v7  ;;  %v576_v46 = vld [vmem:[%s1548_s9 + $0x208] sm:$0xff]  ;;  %v537_v48 = vld [vmem:[%s1548_s9 + $0xd0] sm:$0xff]  ;;  %v575_v51 = vld [vmem:[%s1548_s9 + $0x200] sm:$0xff] }
  0x7c   : > { %671 = vmatprep.subr.bf16.mxu1 %v522_v8  ;;  %v540_v49 = vld [vmem:[%s1548_s9 + $0xe8] sm:$0xff]  ;;  %v578_v52 = vld [vmem:[%s1548_s9 + $0x218] sm:$0xff]  ;;  %v539_v53 = vld [vmem:[%s1548_s9 + $0xe0] sm:$0xff] }
  0x7d   : > { %713 = vmatpush1.bf16.msra.mxu0 %v553_v1  ;;  %v542_v54 = vld [vmem:[%s1548_s9 + $0xf8] sm:$0xff]  ;;  %v577_v55 = vld [vmem:[%s1548_s9 + $0x210] sm:$0xff]  ;;  %v580_v56 = vld [vmem:[%s1548_s9 + $0x228] sm:$0xff] }
  0x7e   : > { %714 = vmatprep.subr.bf16.mxu0 %v556_v2  ;;  %v541_v58 = vld [vmem:[%s1548_s9 + $0xf0] sm:$0xff]  ;;  %v579_v59 = vld [vmem:[%s1548_s9 + $0x220] sm:$0xff]  ;;  %v582_v60 = vld [vmem:[%s1548_s9 + $0x238] sm:$0xff] }
  0x7f   : > { %672 = vmatpush1.bf16.msra.mxu1 %v521_v11  ;;  %v581_v62 = vld [vmem:[%s1548_s9 + $0x230] sm:$0xff]  ;;  %v584_v63 = vld [vmem:[%s1548_s9 + $0x248] sm:$0xff]  ;;  %v583_v0 = vld [vmem:[%s1548_s9 + $0x240] sm:$0xff] }
  0x80   : > { %673 = vmatprep.subr.bf16.mxu1 %v524_v12  ;;  %v586_v1 = vld [vmem:[%s1548_s9 + $0x258] sm:$0xff]  ;;  %v585_v2 = vld [vmem:[%s1548_s9 + $0x250] sm:$0xff]  ;;  %v588_v3 = vld [vmem:[%s1548_s9 + $0x268] sm:$0xff] }
  0x81   : > { %715 = vmatpush1.bf16.msra.mxu0 %v555_v5  ;;  %v587_v4 = vld [vmem:[%s1548_s9 + $0x260] sm:$0xff]  ;;  %v590_v5 = vld [vmem:[%s1548_s9 + $0x278] sm:$0xff]  ;;  %v592_v7 = vld [vmem:[%s1548_s9 + $0x288] sm:$0xff] }
  0x82   : > { %716 = vmatprep.subr.bf16.mxu0 %v558_v6  ;;  %v589_v6 = vld [vmem:[%s1548_s9 + $0x270] sm:$0xff]  ;;  %v591_v8 = vld [vmem:[%s1548_s9 + $0x280] sm:$0xff]  ;;  %v596_v11 = vld [vmem:[%s1548_s9 + $0x2a8] sm:$0xff] }
  0x83   : > { %674 = vmatpush1.bf16.msra.mxu1 %v523_v15  ;;  %v595_v12 = vld [vmem:[%s1548_s9 + $0x2a0] sm:$0xff]  ;;  %v600_v15 = vld [vmem:[%s1548_s9 + $0x2c8] sm:$0xff]  ;;  %v822_v43 = vld [vmem:[%s501_s8] sm:$0x3] (!%p1039_p3) }
  0x84   : > { %675 = vmatprep.subr.bf16.mxu1 %v526_v16  ;;  %v599_v16 = vld [vmem:[%s1548_s9 + $0x2c0] sm:$0xff] }
  0x85   : > { %717 = vmatpush1.bf16.msra.mxu0 %v557_v9  ;;  %v594_v9 = vld [vmem:[%s1548_s9 + $0x298] sm:$0xff] }
  0x86   : > { %718 = vmatprep.subr.bf16.mxu0 %v560_v10  ;;  %v593_v10 = vld [vmem:[%s1548_s9 + $0x290] sm:$0xff] }
  0x87   : > { %676 = vmatpush1.bf16.msra.mxu1 %v525_v19  ;;  %v604_v19 = vld [vmem:[%s1548_s9 + $0x2e8] sm:$0xff] }
  0x88   : > { %677 = vmatprep.subr.bf16.mxu1 %v528_v20  ;;  %v603_v20 = vld [vmem:[%s1548_s9 + $0x2e0] sm:$0xff] }
  0x89   : > { %719 = vmatpush1.bf16.msra.mxu0 %v559_v13  ;;  %v598_v13 = vld [vmem:[%s1548_s9 + $0x2b8] sm:$0xff] }
  0x8a   : > { %720 = vmatprep.subr.bf16.mxu0 %v562_v14  ;;  %v597_v14 = vld [vmem:[%s1548_s9 + $0x2b0] sm:$0xff] }
  0x8b   : > { %678 = vmatpush1.bf16.msra.mxu1 %v527_v23 }
  0x8c   : > { %679 = vmatprep.subr.bf16.mxu1 %v530_v24 }
  0x8d   : > { %721 = vmatpush1.bf16.msra.mxu0 %v561_v17  ;;  %v602_v17 = vld [vmem:[%s1548_s9 + $0x2d8] sm:$0xff] }
  0x8e   : > { %722 = vmatprep.subr.bf16.mxu0 %v564_v18  ;;  %v601_v18 = vld [vmem:[%s1548_s9 + $0x2d0] sm:$0xff] }
  0x8f   : > { %680 = vmatpush1.bf16.msra.mxu1 %v529_v27  ;;  %v1206_v27 = vmov 1983009808  }
  0x90   : > { %681 = vmatprep.subr.bf16.mxu1 %v532_v28  ;;  %v788_v28 = vunpack.c.l.s4 %v1206_v27 }
  0x91   : > { %723 = vmatpush1.bf16.msra.mxu0 %v563_v21  ;;  %v606_v21 = vld [vmem:[%s1548_s9 + $0x2f8] sm:$0xff] }
  0x92   : > { %724 = vmatprep.subr.bf16.mxu0 %v566_v22  ;;  %v605_v22 = vld [vmem:[%s1548_s9 + $0x2f0] sm:$0xff] }
  0x93   : > { %682 = vmatpush1.bf16.msra.mxu1 %v531_v31 }
  0x94   : > { %683 = vmatprep.subr.bf16.mxu1 %v534_v32 }
  0x95   : > { %725 = vmatpush1.bf16.msra.mxu0 %v565_v25 }
  0x96   : > { %726 = vmatprep.subr.bf16.mxu0 %v568_v26 }
  0x97   : > { %684 = vmatpush1.bf16.msra.mxu1 %v533_v35 }
  0x98   : > { %685 = vmatprep.subr.bf16.mxu1 %v536_v36 }
  0x99   : > { %727 = vmatpush1.bf16.msra.mxu0 %v567_v29  ;;  %v789_v29 = vunpack.c.0.s8 %v788_v28 }
  0x9a   : > { %728 = vmatprep.subr.bf16.mxu0 %v570_v30 }
  0x9b   : > { %686 = vmatpush1.bf16.msra.mxu1 %v535_v40  ;;  %v806_v40 = vsub.s32 (!%p1039_p3), 0, %v1557_v42 }
  0x9c   : > { %687 = vmatprep.subr.bf16.mxu1 %v538_v41  ;;  %v810_v41 = vsub.s32 (!%p1039_p3), 1, %v1557_v42 }
  0x9d   : > { %729 = vmatpush1.bf16.msra.mxu0 %v569_v33 }
  0x9e   : > { %730 = vmatprep.subr.bf16.mxu0 %v572_v34  ;;  %v792_v34 = vsub.s32 %v789_v29, %v1557_v42 }
  0x9f   : > { %688 = vmatpush1.bf16.msra.mxu1 %v537_v48  ;;  %v831_v48 = vrot.slane (!%p1039_p3), %v822_v43, %v810_v41 }
  0xa0   : > { %689 = vmatprep.subr.bf16.mxu1 %v540_v49 }
  0xa1   : > { %731 = vmatpush1.bf16.msra.mxu0 %v571_v37 }
  0xa2   : > { %732 = vmatprep.subr.bf16.mxu0 %v574_v38  ;;  %v509_v38 = vld [vmem:[#allocation2] sm:$0xf] }
  0xa3   : > { %690 = vmatpush1.bf16.msra.mxu1 %v539_v53 }
  0xa4   : > { %691 = vmatprep.subr.bf16.mxu1 %v542_v54 }
  0xa5   : > { %733 = vmatpush1.bf16.msra.mxu0 %v573_v44 }
  0xa6   : > { %743 = vmatprep.subr.bf16.mxu0 %v576_v46 }
  0xa7   : > { %692 = vmatpush1.bf16.msra.mxu1 %v541_v58 }
  0xa8   : > { %735 = vmatmul.mubr.bf16.vlgmr.msra.gmra.mrb[0].mxu0 %v653_v47  ;;  %v827_v47 = vrot.slane (!%p1039_p3), %v822_v43, %v806_v40 }
  0xa9   : > { %744 = vmatpush1.bf16.msra.mxu0 %v575_v51  ;;  %775 = vmatprep.mubr.bf16.mxu0 %v652_v50 }
  0xaa   : > { %745 = vmatprep.subr.bf16.mxu0 %v578_v52  ;;  %694 = vmatmul.mubr.bf16.vlgmr.msra.gmra.mrb[0].mxu1 %v631_v39  ;;  %v832_v50 = vcombine.low (!%p1039_p3), %v827_v47, %v831_v48 }
  0xac   : > { %v839_v53 = vrot.slane (!%p1039_p3), %v832_v50, %v792_v34 }
  0xad   : > { %746 = vmatpush1.bf16.msra.mxu0 %v577_v55 }
  0xae   : > { %747 = vmatprep.subr.bf16.mxu0 %v580_v56 }
  0xb1   : > { %748 = vmatpush1.bf16.msra.mxu0 %v579_v59 }
  0xb2   : > { %749 = vmatprep.subr.bf16.mxu0 %v582_v60 }
  0xb5   : > { %750 = vmatpush1.bf16.msra.mxu0 %v581_v62 }
  0xb6   : > { %751 = vmatprep.subr.bf16.mxu0 %v584_v63 }
  0xb9   : > { %752 = vmatpush1.bf16.msra.mxu0 %v583_v0 }
  0xba   : > { %753 = vmatprep.subr.bf16.mxu0 %v586_v1 }
  0xbd   : > { %754 = vmatpush1.bf16.msra.mxu0 %v585_v2 }
  0xbe   : > { %755 = vmatprep.subr.bf16.mxu0 %v588_v3 }
  0xc1   : > { %756 = vmatpush1.bf16.msra.mxu0 %v587_v4 }
  0xc2   : > { %757 = vmatprep.subr.bf16.mxu0 %v590_v5 }
  0xc5   : > { %758 = vmatpush1.bf16.msra.mxu0 %v589_v6 }
  0xc6   : > { %759 = vmatprep.subr.bf16.mxu0 %v592_v7 }
  0xc9   : > { %760 = vmatpush1.bf16.msra.mxu0 %v591_v8 }
  0xca   : > { %761 = vmatprep.subr.bf16.mxu0 %v594_v9 }
  0xcd   : > { %762 = vmatpush1.bf16.msra.mxu0 %v593_v10 }
  0xce   : > { %763 = vmatprep.subr.bf16.mxu0 %v596_v11 }
  0xd1   : > { %764 = vmatpush1.bf16.msra.mxu0 %v595_v12 }
  0xd2   : > { %765 = vmatprep.subr.bf16.mxu0 %v598_v13 }
  0xd5   : > { %766 = vmatpush1.bf16.msra.mxu0 %v597_v14 }
  0xd6   : > { %767 = vmatprep.subr.bf16.mxu0 %v600_v15 }
  0xd9   : > { %768 = vmatpush1.bf16.msra.mxu0 %v599_v16 }
  0xda   : > { %769 = vmatprep.subr.bf16.mxu0 %v602_v17 }
  0xdd   : > { %770 = vmatpush1.bf16.msra.mxu0 %v601_v18 }
  0xde   : > { %771 = vmatprep.subr.bf16.mxu0 %v604_v19 }
  0xe1   : > { %772 = vmatpush1.bf16.msra.mxu0 %v603_v20 }
  0xe2   : > { %773 = vmatprep.subr.bf16.mxu0 %v606_v21 }
  0xe5   : > { %774 = vmatpush1.bf16.msra.mxu0 %v605_v22 }
  0xe8   : > { %776 = vmatmul.mubr.bf16.vlgmr.msra.gmra.mrb[0].mxu0 %v638_v61  ;;  %v802_v61 = vld [vmem:[%s496_s22] sm:$0x3] (!%p1039_p3) }
  0xe9   : > { %v807_v44 = vrot.slane (!%p1039_p3), %v802_v61, %v806_v40  ;;  %v811_v46 = vrot.slane (!%p1039_p3), %v802_v61, %v810_v41 }
  0xeb   : > { %v812_v49 = vcombine.low (!%p1039_p3), %v807_v44, %v811_v46 }
  0xed   : > { %v819_v52 = vrot.slane (!%p1039_p3), %v812_v49, %v792_v34 }
 0x17d   : > { %v695_v23 = vpop.f32.mrb[0].mxu1 }
 0x17e   : > { %v697_v24 = vpop.f32.mrb[1].mxu1 }
 0x17f   : > { %v699_v25 = vpop.f32.mrb[2].mxu1 }
 0x180   : > { %v700_v26 = vpop.f32.mrb[3].mxu1 }
 0x1bb   : > { %v777_v30 = vpop.f32.mrb[0].mxu0 }
 0x1bc   : > { %v1048_v31 = vadd.f32 %v777_v30, %v695_v23  ;;  %v779_v32 = vpop.f32.mrb[1].mxu0 }
 0x1bd   : > { %v1049_v33 = vadd.f32 %v779_v32, %v697_v24  ;;  %v781_v35 = vpop.f32.mrb[2].mxu0 }
 0x1be   : > { %v782_v36 = vpop.f32.mrb[3].mxu0 }
 0x1bf   : > { %v786_v37 = vcombine.low %v1048_v31, %v1049_v33  ;;  %800 = sbr.rel (%p1039_p3) target bundleno = 476 (0x1dc), region = 67 }
 0x1c1   : > { %v793_v39 = vrot.slane %v786_v37, %v792_v34 }
 0x1c3   : > { %v795_v57 = vadd.f32 %v793_v39, %v509_v38 }
 0x1c5   : > { %796 = vst [vmem:[#allocation2] sm:$0xf] %v795_v57 }
 0x1cc   : > { %v801_v51 = vld [vmem:[#allocation2] sm:$0xf] }
 0x1cd   : > { %v821_v54 = vmul.f32 %v819_v52, %v801_v51 }
 0x1cf   : > { %v841_v55 = vadd.f32 %v839_v53, %v821_v54 }
 0x1d1   : > { %v842_v56 = vmax.f32 %v841_v55, 0.0 }
 0x1d3   : > { %v850_v58 = vrot.slane %v842_v56, %v792_v34 }
 0x1d5   : > { %v851_v42 = vcombine.high %v850_v58, %v850_v58 }
 0x1d7   : > { %v1040_v59 = vpack.c.bf16 %v851_v42, %v850_v58 }
 0x1d9   : > { %v865_v60 = vrot.slane %v1040_v59, %v1562_v45 }
 0x1db   : > { %1041 = vst.sshfl [vmem:[%s481_s2] sm:$0x5 pattern:$0x73625140] %v865_v60 }
 0x1dc PF: > { %881 = sbr.rel (!%p1305_p9) target bundleno = 484 (0x1e4), region = 71  ;;  %s962_s7 = scalar_lea.vmem (%p1305_p9), %s1734_s5, %s1528_s16 }
 0x1e2   : > { %v901_v62 = vld [vmem:[%s481_s2] sm:$0x3] (%p1305_p9) }
 0x1e3   : > { %1044 = vst [vmem:[%s962_s7 + $0x10] sm:$0x3] %v901_v62 }
 0x1e4 PF: > { %s16_s25 = sadd.s32 1, %s1202_s25   ;;  %s1739_s18 = smov %s1174_s19 }
 0x1e5   : > { %p13_p4 = scmp.ge.s32.totalorder %s16_s25, 14   ;;  %s1740_s19 = smov %s1310_s11 }
 0x1e6   : > { %s1741_s0 = smov %s1182_s20  ;;  %s1742_s20 = smov %s1313_s12 }
 0x1e7   : > { %s1743_s21 = smov %s1194_s23  ;;  %s1744_s22 = smov %s1198_s24 }
 0x1e8   : > { %s1745_s23 = smov %s1748_s26  ;;  %s1746_s24 = smov %s1752_s27 }
 0x1e9   :  { %15 = sbr.rel (!%p13_p4) target bundleno = 7 (0x7), region = 146 }

// kernel: _lambda_.41
= control target key start
LH: loop header
LB: loop body
LE: loop exit
PB: predicated region body
PF: predicated region fallthrough
CT: control target
= control target key end

     0   :  { %v24_v23 = vlaneseq  ;;  %s740_s0 = inlined_call_operand.vmem [shape: bf16[2,1,512], index: 0, kind: input, shape index: {}]   ;;  %s741_s1 = inlined_call_operand.vmem [shape: bf16[512,128], index: 1, kind: input, shape index: {}]   ;;  %s742_s2 = inlined_call_operand.vmem [shape: f32[1,128], index: 2, kind: input, shape index: {}]   ;;  %s743_s3 = inlined_call_operand.hbm [shape: f32[2,128], index: 3, kind: output, shape index: {}]  }
   0x1   :  { %v545_v0 = vld [vmem:[%s741_s1 + $0x40] sm:$0xff]   ;;  %v549_v4 = vld [vmem:[%s741_s1 + $0x48] sm:$0xff]   ;;  %v553_v8 = vld [vmem:[%s741_s1 + $0x50] sm:$0xff]  }
   0x2   :  { %v546_v1 = vld [vmem:[%s741_s1 + $0xc0] sm:$0xff]   ;;  %500 = vmatprep.subr.bf16.mxu0 %v545_v0  ;;  %v550_v5 = vld [vmem:[%s741_s1 + $0xc8] sm:$0xff]   ;;  %v554_v9 = vld [vmem:[%s741_s1 + $0xd0] sm:$0xff]   ;;  %v25_v28 = vshrl.u32 %v24_v23, 7 }
   0x3   :  { %v547_v2 = vld [vmem:[%s741_s1] sm:$0xff]   ;;  %522 = vmatprep.subr.bf16.mxu1 %v546_v1  ;;  %v551_v6 = vld [vmem:[%s741_s1 + $0x8] sm:$0xff]   ;;  %v555_v10 = vld [vmem:[%s741_s1 + $0x10] sm:$0xff]  }
   0x4   :  { %v548_v3 = vld [vmem:[%s741_s1 + $0x80] sm:$0xff]   ;;  %501 = vmatpush3.bf16.msra.mxu0 %v547_v2  ;;  %v552_v7 = vld [vmem:[%s741_s1 + $0x88] sm:$0xff]   ;;  %v556_v11 = vld [vmem:[%s741_s1 + $0x90] sm:$0xff]   ;;  %v30_v33 = vsub.s32 2, %v25_v28  ;;  %v38_v35 = vsub.s32 6, %v25_v28  ;;  %v26_v37 = vsub.s32 0, %v25_v28 }
   0x5   :  { %523 = vmatpush3.bf16.msra.mxu1 %v548_v3  ;;  %502 = vmatprep.subr.bf16.mxu0 %v549_v4  ;;  %v557_v12 = vld [vmem:[%s741_s1 + $0x58] sm:$0xff]   ;;  %v561_v16 = vld [vmem:[%s741_s1 + $0x60] sm:$0xff]   ;;  %v565_v20 = vld [vmem:[%s741_s1 + $0x68] sm:$0xff]   ;;  %v34_v38 = vsub.s32 4, %v25_v28 }
   0x6   :  { %524 = vmatprep.subr.bf16.mxu1 %v550_v5  ;;  %v558_v13 = vld [vmem:[%s741_s1 + $0xd8] sm:$0xff]   ;;  %v562_v17 = vld [vmem:[%s741_s1 + $0xe0] sm:$0xff]   ;;  %v566_v21 = vld [vmem:[%s741_s1 + $0xe8] sm:$0xff]  }
   0x7   :  { %v559_v14 = vld [vmem:[%s741_s1 + $0x18] sm:$0xff]   ;;  %v563_v18 = vld [vmem:[%s741_s1 + $0x20] sm:$0xff]   ;;  %v567_v22 = vld [vmem:[%s741_s1 + $0x28] sm:$0xff]  }
   0x8   :  { %503 = vmatpush3.bf16.msra.mxu0 %v551_v6  ;;  %v560_v15 = vld [vmem:[%s741_s1 + $0x98] sm:$0xff]   ;;  %v564_v19 = vld [vmem:[%s741_s1 + $0xa0] sm:$0xff]   ;;  %v568_v24 = vld [vmem:[%s741_s1 + $0xa8] sm:$0xff]  }
   0x9   :  { %525 = vmatpush3.bf16.msra.mxu1 %v552_v7  ;;  %504 = vmatprep.subr.bf16.mxu0 %v553_v8  ;;  %v569_v25 = vld [vmem:[%s741_s1 + $0x70] sm:$0xff]   ;;  %v573_v30 = vld [vmem:[%s741_s1 + $0x78] sm:$0xff]   ;;  %v497_v36 = vld [vmem:[%s740_s0] sm:$0xff]  }
   0xa   :  { %526 = vmatprep.subr.bf16.mxu1 %v554_v9  ;;  %v570_v26 = vld [vmem:[%s741_s1 + $0xf0] sm:$0xff]   ;;  %v574_v31 = vld [vmem:[%s741_s1 + $0xf8] sm:$0xff]  }
   0xb   :  { %v571_v27 = vld [vmem:[%s741_s1 + $0x30] sm:$0xff]   ;;  %v575_v32 = vld [vmem:[%s741_s1 + $0x38] sm:$0xff]  }
   0xc   :  { %505 = vmatpush3.bf16.msra.mxu0 %v555_v10  ;;  %v572_v29 = vld [vmem:[%s741_s1 + $0xb0] sm:$0xff]   ;;  %v576_v34 = vld [vmem:[%s741_s1 + $0xb8] sm:$0xff]  }
   0xd   :  { %527 = vmatpush3.bf16.msra.mxu1 %v556_v11  ;;  %506 = vmatprep.subr.bf16.mxu0 %v557_v12 }
   0xe   :  { %528 = vmatprep.subr.bf16.mxu1 %v558_v13 }
  0x10   :  { %507 = vmatpush3.bf16.msra.mxu0 %v559_v14 }
  0x11   :  { %529 = vmatpush3.bf16.msra.mxu1 %v560_v15  ;;  %508 = vmatprep.subr.bf16.mxu0 %v561_v16 }
  0x12   :  { %530 = vmatprep.subr.bf16.mxu1 %v562_v17 }
  0x14   :  { %509 = vmatpush3.bf16.msra.mxu0 %v563_v18 }
  0x15   :  { %531 = vmatpush3.bf16.msra.mxu1 %v564_v19  ;;  %510 = vmatprep.subr.bf16.mxu0 %v565_v20 }
  0x16   :  { %532 = vmatprep.subr.bf16.mxu1 %v566_v21 }
  0x18   :  { %511 = vmatpush3.bf16.msra.mxu0 %v567_v22 }
  0x19   :  { %533 = vmatpush3.bf16.msra.mxu1 %v568_v24  ;;  %512 = vmatprep.subr.bf16.mxu0 %v569_v25 }
  0x1a   :  { %534 = vmatprep.subr.bf16.mxu1 %v570_v26 }
  0x1c   :  { %513 = vmatpush3.bf16.msra.mxu0 %v571_v27 }
  0x1d   :  { %535 = vmatpush3.bf16.msra.mxu1 %v572_v29  ;;  %514 = vmatprep.subr.bf16.mxu0 %v573_v30 }
  0x1e   :  { %536 = vmatprep.subr.bf16.mxu1 %v574_v31 }
  0x20   :  { %515 = vmatpush3.bf16.msra.mxu0 %v575_v32 }
  0x21   :  { %8 = vsyncpa [#allocation3], 0  ;;  %537 = vmatpush3.bf16.msra.mxu1 %v576_v34  ;;  %v498_v39 = vunpack.c.l.bf16 %v497_v36  ;;  %v499_v40 = vunpack.c.h.bf16 %v497_v36  ;;  %vm160_vm0 = vcmask 1041409   ;;  %v463_v15 = vld [vmem:[%s742_s2] ss:$0 sm:$0xff]  ;;  %s601_s24 = smov [#allocation2]  }
  0x22   :  { %s455_s25 = sshll.u32 %s601_s24, 4  ;;  %s456_s25 = int_to_ptr.vmem [resolvable:$true] %s455_s25 }
  0x23   :  { %v31_v41 = vrot.slane %v498_v39, %v30_v33  ;;  %v47_v42 = vrot.slane %v499_v40, %v30_v33  ;;  %v39_v43 = vrot.slane %v498_v39, %v38_v35  ;;  %v55_v44 = vrot.slane %v499_v40, %v38_v35  ;;  %s577_s26 = scalar_lea.vmem %s456_s25, 32  ;;  %p582_p1 = scmp.lt.s32.totalorder %s456_s25, %s456_s25 }
  0x24   :  { %v27_v45 = vrot.slane %v498_v39, %v26_v37  ;;  %v43_v46 = vrot.slane %v499_v40, %v26_v37  ;;  %v35_v47 = vrot.slane %v498_v39, %v34_v38  ;;  %v51_v48 = vrot.slane %v499_v40, %v34_v38  ;;  %p578_p0 = scmp.ne.s32.totalorder %s456_s25, %s577_s26  ;;  %p583_p2 = scmp.lt.s32.totalorder %s577_s26, %s577_s26 }
  0x25   :  { %v65_v49 = vpack.c.bf16 %v31_v41, %v31_v41  ;;  %v69_v50 = vpack.c.bf16 %v47_v42, %v47_v42  ;;  %v67_v51 = vpack.c.bf16 %v39_v43, %v39_v43  ;;  %v71_v52 = vpack.c.bf16 %v55_v44, %v55_v44 }
  0x26   :  { %v64_v53 = vpack.c.bf16 %v27_v45, %v27_v45  ;;  %v68_v54 = vpack.c.bf16 %v43_v46, %v43_v46  ;;  %v66_v55 = vpack.c.bf16 %v35_v47, %v35_v47  ;;  %v70_v56 = vpack.c.bf16 %v51_v48, %v51_v48  ;;  %p584_p3 = por %p583_p2, %p582_p1 }
  0x27   :  { %v152_v57 = vunpack.c.l.b16 %v65_v49  ;;  %v156_v58 = vunpack.c.l.b16 %v69_v50  ;;  %v154_v59 = vunpack.c.l.b16 %v67_v51  ;;  %v158_v60 = vunpack.c.l.b16 %v71_v52 }
  0x28   :  { %v151_v61 = vunpack.c.l.b16 %v64_v53  ;;  %v155_v62 = vunpack.c.l.b16 %v68_v54  ;;  %v153_v63 = vunpack.c.l.b16 %v66_v55  ;;  %v157_v0 = vunpack.c.l.b16 %v70_v56  ;;  %p585_p4 = pnand %p584_p3, %p578_p0 }
  0x29   :  { %v162_v1 = vrot.slane %v156_v58, 7  ;;  %v166_v2 = vrot.slane %v158_v60, 7 }
  0x2a   :  { %v159_v3 = vrot.slane %v155_v62, 7  ;;  %v164_v4 = vrot.slane %v157_v0, 7 }
  0x2b   :  { %v163_v5 = vsel %vm160_vm0, %v162_v1, %v152_v57  ;;  %v167_v6 = vsel %vm160_vm0, %v166_v2, %v154_v59 }
  0x2c   :  { %v169_v7 = vpack.c.b16 %v163_v5, %v163_v5  ;;  %v171_v8 = vpack.c.b16 %v167_v6, %v167_v6  ;;  %v161_v9 = vsel %vm160_vm0, %v159_v3, %v151_v61  ;;  %v165_v10 = vsel %vm160_vm0, %v164_v4, %v153_v63 }
  0x2d   :  { %v168_v11 = vpack.c.b16 %v161_v9, %v161_v9  ;;  %v170_v12 = vpack.c.b16 %v165_v10, %v165_v10 }
  0x2e   :  { %400 = vmatprep.mubr.bf16.mxu0 %v169_v7  ;;  %440 = vmatprep.mubr.bf16.mxu1 %v171_v8 }
  0x2f   :  { %401 = vmatmul.mubr.bf16.vlgmr.msra.gmra.mrb[0].mxu0 %v168_v11  ;;  %441 = vmatmul.mubr.bf16.vlgmr.msra.gmra.mrb[0].mxu1 %v170_v12 }
 0x102   :  { %v516_v13 = vpop.f32.mrb[0].mxu0  ;;  %v538_v14 = vpop.f32.mrb[0].mxu1 }
 0x103   :  { %v517_v16 = vpop.f32.mrb[1].mxu0  ;;  %v539_v17 = vpop.f32.mrb[1].mxu1 }
 0x104   :  { %v518_v18 = vadd.f32 %v517_v16, %v516_v13  ;;  %v540_v19 = vadd.f32 %v539_v17, %v538_v14  ;;  %v519_v20 = vpop.f32.mrb[2].mxu0  ;;  %v541_v21 = vpop.f32.mrb[2].mxu1 }
 0x105   :  { %v520_v22 = vpop.f32.mrb[3].mxu0  ;;  %v542_v23 = vpop.f32.mrb[3].mxu1 }
 0x106   :  { %v403_v24 = vadd.f32 %v518_v18, %v463_v15 }
 0x108   :  { %v443_v25 = vadd.f32 %v540_v19, %v403_v24 }
 0x10a   :  { %448 = vst [vmem:[#allocation2] sm:$0x3] %v443_v25 }
 0x10b   :  { %588 = shalt.err (!%p585_p4)
}
 0x10c   :  { %s589_s28 = scalar_lea.hbm %s743_s3, 32 }
 0x10d   :  { %p590_p5 = scmp.ne.s32.totalorder %s743_s3, %s589_s28  ;;  %p593_p6 = scmp.lt.u32.totalorder %s589_s28, %s743_s3 }
 0x10f   :  { %p595_p7 = pnand %p593_p6, %p590_p5 }
 0x111   :  { %598 = shalt.err (!%p595_p7)
}
 0x112   :  { %458 = dma.vmem_to_hbm [thread:$0]  %s456_s25, 32, %s743_s3, [#allocation3]  }
 0x113   :  { %599 = dma.done.wait [#allocation3], 32  }
 0x114   :  { %600 = vsyncadd [#allocation3], 4294967264 }
 0x115   :  { %462 = vsyncpa [#allocation3], 1 }

</bundles_post_ra>
